<compile_context>
chip_gen: v6e
topology: v6e:2x2x1
jax: 0.10.0
libtpu: 0.0.40
codegen_flags: <defaults>
</compile_context>

<pallas_src>
import functools

import jax
import jax.numpy as jnp
from jax import lax
from jax.experimental import pallas as pl
from jax.experimental.pallas import tpu as pltpu


_VMEM = functools.partial(pl.BlockSpec, memory_space=pltpu.MemorySpace.VMEM)
_SUBLANE = 8  # f32 sublane tile


# ---------------------------------------------------------------------------
# Pallas kernels
# ---------------------------------------------------------------------------

def _gru_cell(gx_t, gh_t, bhh_n, h, hidden):
    """One GRU cell update.  Gate order [r | z | n] (torch.nn.GRU).

    gx_t : (Bp, 3H)  x_t @ W_ih + (b_ih, with b_hh[r|z] pre-folded)
    gh_t : (Bp, 3H)  h   @ W_hh  (no bias)
    bhh_n: (1, H)    hidden bias of the n gate (stays inside the r multiply)
    """
    grz = jax.nn.sigmoid(gx_t[:, :2 * hidden] + gh_t[:, :2 * hidden])  # fused r|z
    r = grz[:, :hidden]
    z = grz[:, hidden:]
    n = jnp.tanh(gx_t[:, 2 * hidden:] + r * (gh_t[:, 2 * hidden:] + bhh_n))
    return (1.0 - z) * n + z * h


def _gru_scan(z_full, wih, whh, bg, bhn, *, seq_len, batch_pad):
    """GRU recurrence over a time-major-flat (L*Bp, Din) value.

    The input projection is hoisted into one big matmul; only the tiny h @ W_hh
    stays on the serial chain and h / gx never round-trip through VMEM.  Returns
    the list of per-step hidden states [(Bp, H)] * L (all live in vregs).
    """
    H = whh.shape[0]
    Bp = batch_pad
    gx = jnp.dot(z_full, wih, preferred_element_type=jnp.float32) + bg
    h = jnp.zeros((Bp, H), jnp.float32)
    hs = []
    for t in range(seq_len):                      # fully unrolled, L is static
        lo = t * Bp                               # sublane-tile aligned slice
        gh = jnp.dot(h, whh, preferred_element_type=jnp.float32)
        h = _gru_cell(gx[lo:lo + Bp, :], gh, bhn, h, H)
        hs.append(h)
    return hs


def gru_kernel(x_ref, wih_ref, whh_ref, bg_ref, bhn_ref, out_ref,
               *, seq_len, batch_pad):
    """GRU_x over the full sequence.  x_ref: (L*Bp, Din) -> out_ref: (L*Bp, H)."""
    hs = _gru_scan(x_ref[...], wih_ref[...], whh_ref[...], bg_ref[...],
                   bhn_ref[...], seq_len=seq_len, batch_pad=batch_pad)
    out_ref[...] = jnp.concatenate(hs, axis=0).astype(out_ref.dtype)  # one store


def func_combine_kernel(alpha_ref, fhist_ref, z0_ref, wih_ref, whh_ref, bg_ref,
                        bhn_ref, mask_ref, xk_ref, out_ref, sqd_ref, sqf_ref,
                        *, seq_len, batch_pad, m):
    """One Anderson step, fully fused:

        xk  = sum_n alpha[b, n] * F_hist[n]          (combine, beta == 1.0)
        f   = tanh(GRU_z(xk) + z0)                   (Func)
        sqd = sum_real_rows (f - xk)^2               ('abs' residual numerator)
        sqf = sum_real_rows  f^2                     ('rel' residual denominator)
    """
    Bp = batch_pad
    alpha = alpha_ref[...]                                     # (Bp, m)
    a_rows = jnp.concatenate([alpha] * seq_len, axis=0)        # (L*Bp, m)
    xk = a_rows[:, 0:1] * fhist_ref[0]
    for n in range(1, m):
        xk = xk + a_rows[:, n:n + 1] * fhist_ref[n]
    xk_ref[...] = xk.astype(xk_ref.dtype)

    hs = _gru_scan(xk, wih_ref[...], whh_ref[...], bg_ref[...], bhn_ref[...],
                   seq_len=seq_len, batch_pad=batch_pad)

    z0 = z0_ref[...]
    mask = mask_ref[...]                                       # (Bp, 1) real rows
    outs = []
    sq_d = jnp.zeros((Bp, 1), jnp.float32)
    sq_f = jnp.zeros((Bp, 1), jnp.float32)
    for t in range(seq_len):
        lo = t * Bp
        o = jnp.tanh(hs[t] + z0[lo:lo + Bp, :])
        outs.append(o)
        d = o - xk[lo:lo + Bp, :]
        sq_d = sq_d + jnp.sum(d * d, axis=1, keepdims=True)
        sq_f = sq_f + jnp.sum(o * o, axis=1, keepdims=True)
    out_ref[...] = jnp.concatenate(outs, axis=0).astype(out_ref.dtype)
    sqd_ref[...] = jnp.sum(sq_d * mask, axis=0, keepdims=True)   # padding masked out
    sqf_ref[...] = jnp.sum(sq_f * mask, axis=0, keepdims=True)


def gru_tanh_linear_kernel(z_ref, z0_ref, wih_ref, whh_ref, bg_ref, bhn_ref,
                           wout_ref, bout_ref, out_ref, *, seq_len, batch_pad):
    """Final DEQ step fused with the output head:
       out = Flatten(tanh(GRU_z(z*) + z0)) @ W_out + b_out   -> (Bp, O)."""
    Bp = batch_pad
    hs = _gru_scan(z_ref[...], wih_ref[...], whh_ref[...], bg_ref[...],
                   bhn_ref[...], seq_len=seq_len, batch_pad=batch_pad)
    z0 = z0_ref[...]
    outs = [jnp.tanh(hs[t] + z0[t * Bp:(t + 1) * Bp, :]) for t in range(seq_len)]
    # torch Flatten of (B, L, H): per-sample features in timestep-major order,
    # so concatenating o_t along lanes matches W_out's row order exactly.
    o_all = jnp.concatenate(outs, axis=1)                       # (Bp, L*H)
    acc = jnp.dot(o_all, wout_ref[...], preferred_element_type=jnp.float32)
    out_ref[...] = (acc + bout_ref[...]).astype(out_ref.dtype)


# ---------------------------------------------------------------------------
# Kernel wrappers
# ---------------------------------------------------------------------------

def gru_forward(x_flat, p, *, seq_len, batch_pad):
    LB = x_flat.shape[0]
    H = p['whh'].shape[0]
    return pl.pallas_call(
        functools.partial(gru_kernel, seq_len=seq_len, batch_pad=batch_pad),
        out_shape=jax.ShapeDtypeStruct((LB, H), x_flat.dtype),
        in_specs=[_VMEM()] * 5,
        out_specs=_VMEM(),
    )(x_flat, p['wih'], p['whh'], p['bg'], p['bhn'])


def make_func_fused(z0_flat, p, mask, *, seq_len, batch_pad, m):
    """Returns call(alpha, F_hist) -> (xk, f(xk), sum((f-xk)^2), sum(f^2))."""
    LB, H = z0_flat.shape
    kern = functools.partial(func_combine_kernel, seq_len=seq_len,
                             batch_pad=batch_pad, m=m)

    def call(alpha, f_hist):
        return pl.pallas_call(
            kern,
            out_shape=(jax.ShapeDtypeStruct((LB, H), z0_flat.dtype),
                       jax.ShapeDtypeStruct((LB, H), z0_flat.dtype),
                       jax.ShapeDtypeStruct((1, 1), jnp.float32),
                       jax.ShapeDtypeStruct((1, 1), jnp.float32)),
            in_specs=[_VMEM()] * 8,
            out_specs=(_VMEM(),) * 4,
        )(alpha, f_hist, z0_flat, p['wih'], p['whh'], p['bg'], p['bhn'], mask)

    return call


def func_linear_forward(z_flat, z0_flat, p, w_out, b_out, *, seq_len, batch_pad):
    O = w_out.shape[1]
    return pl.pallas_call(
        functools.partial(gru_tanh_linear_kernel, seq_len=seq_len,
                          batch_pad=batch_pad),
        out_shape=jax.ShapeDtypeStruct((batch_pad, O), z_flat.dtype),
        in_specs=[_VMEM()] * 8,
        out_specs=_VMEM(),
    )(z_flat, z0_flat, p['wih'], p['whh'], p['bg'], p['bhn'], w_out, b_out)


# ---------------------------------------------------------------------------
# Anderson acceleration (thin JAX glue around the fused Pallas step)
# ---------------------------------------------------------------------------

def anderson_jax(func_fused, z0, *, m=6, lam=1e-4, threshold=50, eps=1e-3,
                 batch_pad=8):
    """Anderson acceleration (stop_mode='abs', beta=1.0, as the module uses it).

    Iterates stay in the padded time-major-flat (L*Bp, H) layout.  The combine
    step and residual norms live inside the Pallas kernel; the per-iteration JAX
    glue is only the bordered (m+1)x(m+1) per-sample solve and the history
    writes.  A single lax.while_loop with a masked history size n = min(k, m)
    covers both the growing phase and early stopping, so only one traced copy of
    f + solve exists and no post-convergence work is executed.
    """
    LB, H = z0.shape
    Bp = batch_pad
    dtype = z0.dtype

    slot_ids = jnp.arange(m)
    y_vec = jnp.zeros((Bp, m + 1, 1), dtype).at[:, 0, 0].set(1.0)

    # --- init: X[0]=z0, F[0]=f(z0); X[1]=F[0], F[1]=f(F[0]) ------------------
    e0 = jnp.zeros((Bp, m), dtype).at[:, 0].set(1.0)
    X = jnp.zeros((m, LB, H), dtype)
    F = jnp.zeros((m, LB, H), dtype).at[0].set(z0)
    x0_, f0, _, _ = func_fused(e0, F)          # combine(e0, F) == z0 exactly
    X = X.at[0].set(x0_)
    F = F.at[0].set(f0)
    x1_, f1, _, _ = func_fused(e0, F)          # == f(f(z0))
    X = X.at[1].set(x1_)
    F = F.at[1].set(f1)

    def cond(carry):
        k, _, _, _, _, done = carry
        return jnp.logical_and(k < threshold, jnp.logical_not(done))

    def body(carry):
        k, Xc, Fc, low, low_xest, _ = carry
        n = jnp.minimum(k, m)
        valid = slot_ids < n                               # mask unfilled slots
        G = (Fc - Xc).reshape(m, -1, Bp, H)
        gram = jnp.einsum('nlbh,mlbh->bnm', G, G)          # per-sample Gram
        A = gram + jnp.diag(jnp.where(valid, lam, 1.0).astype(dtype))
        border = valid.astype(dtype)
        Hs = jnp.zeros((Bp, m + 1, m + 1), dtype)
        Hs = Hs.at[:, 0, 1:].set(border).at[:, 1:, 0].set(border)
        Hs = Hs.at[:, 1:, 1:].set(A)
        # TODO(synk): tiny batched (m+1)x(m+1) dense solve kept in plain JAX
        # (no clean Pallas equivalent for linalg.solve at this size).
        alpha = jnp.linalg.solve(Hs, y_vec)[:, 1:, 0]      # (Bp, m); 0 on masked slots
        xk, fk, sq_d, _ = func_fused(alpha, Fc)            # combine + f + residual
        diff = jnp.sqrt(sq_d[0, 0])                        # 'abs' residual (real rows)
        idx = k % m
        Xc = Xc.at[idx].set(xk)
        Fc = Fc.at[idx].set(fk)
        improve = diff < low
        low_xest = jnp.where(improve, xk, low_xest)
        low = jnp.where(improve, diff, low)
        return (k + 1, Xc, Fc, low, low_xest, diff < eps)

    carry = (jnp.asarray(2, jnp.int32), X, F, jnp.asarray(1e8, dtype), z0,
             jnp.asarray(False))
    _, _, _, _, lowest_xest, _ = lax.while_loop(cond, body, carry)
    return lowest_xest


# ---------------------------------------------------------------------------
# Full NeuralNetwork forward
# ---------------------------------------------------------------------------

def _fuse_gru_params(p):
    """Fold b_hh[r|z] into the hoisted input-projection bias; keep b_hh[n]
    separate (it must stay inside the r-gate multiply, per torch.nn.GRU)."""
    H = p['whh'].shape[0]
    bg = p['bih'].at[:, :2 * H].add(p['bhh'][:, :2 * H])
    return dict(wih=p['wih'], whh=p['whh'], bg=bg, bhn=p['bhh'][:, 2 * H:])


def neural_network_forward(params, x, *, m=6, threshold=50, eps=1e-3):
    # x: (B, L, data_size)
    B, L, D = x.shape
    Bp = ((B + _SUBLANE - 1) // _SUBLANE) * _SUBLANE   # pad batch to sublane tile
    px = _fuse_gru_params(params['rnnx'])
    pz = _fuse_gru_params(params['rnnz'])

    # Single layout change of the whole forward: batch-first -> padded
    # time-major-flat.  Padding rows ride along (rows >= B) and are masked out
    # of the residual norms inside the kernel; real rows are unaffected.
    x_p = jnp.zeros((Bp, L, D), x.dtype).at[:B].set(x)
    x_tm = jnp.transpose(x_p, (1, 0, 2)).reshape(L * Bp, D)
    mask = (jnp.arange(Bp) < B).astype(jnp.float32).reshape(Bp, 1)

    z0 = gru_forward(x_tm, px, seq_len=L, batch_pad=Bp)            # (L*Bp, H)
    func_fused = make_func_fused(z0, pz, mask, seq_len=L, batch_pad=Bp, m=m)
    z_star = anderson_jax(func_fused, z0, m=m, threshold=threshold, eps=eps,
                          batch_pad=Bp)                            # DEQ fixed point
    # Re-apply f (as in DEQFixedPoint) fused with Flatten + Linear head.
    out_p = func_linear_forward(z_star, z0, pz, params['w_out'], params['b_out'],
                                seq_len=L, batch_pad=Bp)           # (Bp, O)
    return out_p[:B]


def init_params(key, data_size, hidden_size, seq_len, output_size):
    ks = jax.random.split(key, 10)
    s = 1.0 / float(hidden_size) ** 0.5

    def u(k, shape, scale):
        return jax.random.uniform(k, shape, jnp.float32, -scale, scale)

    rnnx = dict(wih=u(ks[0], (data_size, 3 * hidden_size), s),
                whh=u(ks[1], (hidden_size, 3 * hidden_size), s),
                bih=u(ks[2], (1, 3 * hidden_size), s),
                bhh=u(ks[3], (1, 3 * hidden_size), s))
    rnnz = dict(wih=u(ks[4], (hidden_size, 3 * hidden_size), s),
                whh=u(ks[5], (hidden_size, 3 * hidden_size), s),
                bih=u(ks[6], (1, 3 * hidden_size), s),
                bhh=u(ks[7], (1, 3 * hidden_size), s))
    s_lin = 1.0 / float(hidden_size * seq_len) ** 0.5
    w_out = u(ks[8], (hidden_size * seq_len, output_size), s_lin)
    b_out = u(ks[9], (1, output_size), s_lin)
    return dict(rnnx=rnnx, rnnz=rnnz, w_out=w_out, b_out=b_out)


if __name__ == "__main__":
    # Small shapes consistent with the module's forward:
    # batch=2, seq_len=8, data_size=8, hidden_size=32, output_size=1.
    B, L, D, H, O = 2, 8, 8, 32, 1

    key = jax.random.PRNGKey(0)
    pkey, xkey = jax.random.split(key)
    params = init_params(pkey, D, H, L, O)
    x = jax.random.normal(xkey, (B, L, D), jnp.float32)

    fwd = jax.jit(functools.partial(neural_network_forward,
                                    m=6, threshold=50, eps=1e-3))
    out = fwd(params, x)
    jax.block_until_ready(out)
    assert out.shape == (B, O), out.shape
    assert out.dtype == jnp.float32
    print("KERNEL_OK")
</pallas_src>

<mosaic_0001>
module attributes {stable_mosaic.version = 11 : i64} {
  func.func @gru_kernel(%arg0: memref<64x8xf32, #tpu.memory_space<vmem>>, %arg1: memref<8x96xf32, #tpu.memory_space<vmem>>, %arg2: memref<32x96xf32, #tpu.memory_space<vmem>>, %arg3: memref<1x96xf32, #tpu.memory_space<vmem>>, %arg4: memref<1x32xf32, #tpu.memory_space<vmem>>, %arg5: memref<64x32xf32, #tpu.memory_space<vmem>>) attributes {dimension_semantics = [], scalar_prefetch = 0 : i64, scratch_operands = 0 : i64, tpu.core_type = #tpu.core_type<tc>} {
    %c0 = arith.constant 0 : index
    %c0_0 = arith.constant 0 : index
    %0 = vector.load %arg0[%c0, %c0_0] : memref<64x8xf32, #tpu.memory_space<vmem>>, vector<64x8xf32>
    %c0_1 = arith.constant 0 : index
    %c0_2 = arith.constant 0 : index
    %1 = vector.load %arg1[%c0_1, %c0_2] : memref<8x96xf32, #tpu.memory_space<vmem>>, vector<8x96xf32>
    %c0_3 = arith.constant 0 : index
    %c0_4 = arith.constant 0 : index
    %2 = vector.load %arg2[%c0_3, %c0_4] : memref<32x96xf32, #tpu.memory_space<vmem>>, vector<32x96xf32>
    %c0_5 = arith.constant 0 : index
    %c0_6 = arith.constant 0 : index
    %3 = vector.load %arg3[%c0_5, %c0_6] : memref<1x96xf32, #tpu.memory_space<vmem>>, vector<1x96xf32>
    %c0_7 = arith.constant 0 : index
    %c0_8 = arith.constant 0 : index
    %4 = vector.load %arg4[%c0_7, %c0_8] : memref<1x32xf32, #tpu.memory_space<vmem>>, vector<1x32xf32>
    %cst = arith.constant dense<0.000000e+00> : vector<64x96xf32>
    %5 = tpu.matmul %0, %1, %cst {dimension_numbers = #tpu.dot_dimension_numbers<[1], [0], [0], [1], [0, 0, 1, 1], [], []>} : vector<64x8xf32>, vector<8x96xf32>, vector<64x96xf32> -> vector<64x96xf32>
    %6 = vector.broadcast %3 : vector<1x96xf32> to vector<64x96xf32>
    %7 = arith.addf %5, %6 : vector<64x96xf32>
    %cst_9 = arith.constant 0.000000e+00 : f32
    %8 = vector.broadcast %cst_9 : f32 to vector<8x32xf32>
    %cst_10 = arith.constant dense<0.000000e+00> : vector<8x96xf32>
    %9 = tpu.matmul %8, %2, %cst_10 {dimension_numbers = #tpu.dot_dimension_numbers<[1], [0], [0], [1], [0, 0, 1, 1], [], []>} : vector<8x32xf32>, vector<32x96xf32>, vector<8x96xf32> -> vector<8x96xf32>
    %10 = vector.extract_strided_slice %7 {offsets = [0, 0], sizes = [8, 96], strides = [1, 1]} : vector<64x96xf32> to vector<8x96xf32>
    %11 = vector.extract_strided_slice %10 {offsets = [0, 0], sizes = [8, 64], strides = [1, 1]} : vector<8x96xf32> to vector<8x64xf32>
    %12 = vector.extract_strided_slice %9 {offsets = [0, 0], sizes = [8, 64], strides = [1, 1]} : vector<8x96xf32> to vector<8x64xf32>
    %13 = arith.addf %11, %12 : vector<8x64xf32>
    %14 = arith.negf %13 : vector<8x64xf32>
    %15 = math.exp %14 : vector<8x64xf32>
    %cst_11 = arith.constant 1.000000e+00 : f32
    %16 = vector.broadcast %cst_11 : f32 to vector<8x64xf32>
    %17 = arith.addf %16, %15 : vector<8x64xf32>
    %18 = arith.divf %16, %17 : vector<8x64xf32>
    %19 = vector.extract_strided_slice %18 {offsets = [0, 0], sizes = [8, 32], strides = [1, 1]} : vector<8x64xf32> to vector<8x32xf32>
    %20 = vector.extract_strided_slice %18 {offsets = [0, 32], sizes = [8, 32], strides = [1, 1]} : vector<8x64xf32> to vector<8x32xf32>
    %21 = vector.extract_strided_slice %10 {offsets = [0, 64], sizes = [8, 32], strides = [1, 1]} : vector<8x96xf32> to vector<8x32xf32>
    %22 = vector.extract_strided_slice %9 {offsets = [0, 64], sizes = [8, 32], strides = [1, 1]} : vector<8x96xf32> to vector<8x32xf32>
    %23 = vector.broadcast %4 : vector<1x32xf32> to vector<8x32xf32>
    %24 = arith.addf %22, %23 : vector<8x32xf32>
    %25 = arith.mulf %19, %24 : vector<8x32xf32>
    %26 = arith.addf %21, %25 : vector<8x32xf32>
    %27 = math.tanh %26 : vector<8x32xf32>
    %cst_12 = arith.constant 1.000000e+00 : f32
    %28 = vector.broadcast %cst_12 : f32 to vector<8x32xf32>
    %29 = arith.subf %28, %20 : vector<8x32xf32>
    %30 = arith.mulf %29, %27 : vector<8x32xf32>
    %31 = arith.mulf %20, %8 : vector<8x32xf32>
    %32 = arith.addf %30, %31 : vector<8x32xf32>
    %cst_13 = arith.constant dense<0.000000e+00> : vector<8x96xf32>
    %33 = tpu.matmul %32, %2, %cst_13 {dimension_numbers = #tpu.dot_dimension_numbers<[1], [0], [0], [1], [0, 0, 1, 1], [], []>} : vector<8x32xf32>, vector<32x96xf32>, vector<8x96xf32> -> vector<8x96xf32>
    %34 = vector.extract_strided_slice %7 {offsets = [8, 0], sizes = [8, 96], strides = [1, 1]} : vector<64x96xf32> to vector<8x96xf32>
    %35 = vector.extract_strided_slice %34 {offsets = [0, 0], sizes = [8, 64], strides = [1, 1]} : vector<8x96xf32> to vector<8x64xf32>
    %36 = vector.extract_strided_slice %33 {offsets = [0, 0], sizes = [8, 64], strides = [1, 1]} : vector<8x96xf32> to vector<8x64xf32>
    %37 = arith.addf %35, %36 : vector<8x64xf32>
    %38 = arith.negf %37 : vector<8x64xf32>
    %39 = math.exp %38 : vector<8x64xf32>
    %cst_14 = arith.constant 1.000000e+00 : f32
    %40 = vector.broadcast %cst_14 : f32 to vector<8x64xf32>
    %41 = arith.addf %40, %39 : vector<8x64xf32>
    %42 = arith.divf %40, %41 : vector<8x64xf32>
    %43 = vector.extract_strided_slice %42 {offsets = [0, 0], sizes = [8, 32], strides = [1, 1]} : vector<8x64xf32> to vector<8x32xf32>
    %44 = vector.extract_strided_slice %42 {offsets = [0, 32], sizes = [8, 32], strides = [1, 1]} : vector<8x64xf32> to vector<8x32xf32>
    %45 = vector.extract_strided_slice %34 {offsets = [0, 64], sizes = [8, 32], strides = [1, 1]} : vector<8x96xf32> to vector<8x32xf32>
    %46 = vector.extract_strided_slice %33 {offsets = [0, 64], sizes = [8, 32], strides = [1, 1]} : vector<8x96xf32> to vector<8x32xf32>
    %47 = vector.broadcast %4 : vector<1x32xf32> to vector<8x32xf32>
    %48 = arith.addf %46, %47 : vector<8x32xf32>
    %49 = arith.mulf %43, %48 : vector<8x32xf32>
    %50 = arith.addf %45, %49 : vector<8x32xf32>
    %51 = math.tanh %50 : vector<8x32xf32>
    %cst_15 = arith.constant 1.000000e+00 : f32
    %52 = vector.broadcast %cst_15 : f32 to vector<8x32xf32>
    %53 = arith.subf %52, %44 : vector<8x32xf32>
    %54 = arith.mulf %53, %51 : vector<8x32xf32>
    %55 = arith.mulf %44, %32 : vector<8x32xf32>
    %56 = arith.addf %54, %55 : vector<8x32xf32>
    %cst_16 = arith.constant dense<0.000000e+00> : vector<8x96xf32>
    %57 = tpu.matmul %56, %2, %cst_16 {dimension_numbers = #tpu.dot_dimension_numbers<[1], [0], [0], [1], [0, 0, 1, 1], [], []>} : vector<8x32xf32>, vector<32x96xf32>, vector<8x96xf32> -> vector<8x96xf32>
    %58 = vector.extract_strided_slice %7 {offsets = [16, 0], sizes = [8, 96], strides = [1, 1]} : vector<64x96xf32> to vector<8x96xf32>
    %59 = vector.extract_strided_slice %58 {offsets = [0, 0], sizes = [8, 64], strides = [1, 1]} : vector<8x96xf32> to vector<8x64xf32>
    %60 = vector.extract_strided_slice %57 {offsets = [0, 0], sizes = [8, 64], strides = [1, 1]} : vector<8x96xf32> to vector<8x64xf32>
    %61 = arith.addf %59, %60 : vector<8x64xf32>
    %62 = arith.negf %61 : vector<8x64xf32>
    %63 = math.exp %62 : vector<8x64xf32>
    %cst_17 = arith.constant 1.000000e+00 : f32
    %64 = vector.broadcast %cst_17 : f32 to vector<8x64xf32>
    %65 = arith.addf %64, %63 : vector<8x64xf32>
    %66 = arith.divf %64, %65 : vector<8x64xf32>
    %67 = vector.extract_strided_slice %66 {offsets = [0, 0], sizes = [8, 32], strides = [1, 1]} : vector<8x64xf32> to vector<8x32xf32>
    %68 = vector.extract_strided_slice %66 {offsets = [0, 32], sizes = [8, 32], strides = [1, 1]} : vector<8x64xf32> to vector<8x32xf32>
    %69 = vector.extract_strided_slice %58 {offsets = [0, 64], sizes = [8, 32], strides = [1, 1]} : vector<8x96xf32> to vector<8x32xf32>
    %70 = vector.extract_strided_slice %57 {offsets = [0, 64], sizes = [8, 32], strides = [1, 1]} : vector<8x96xf32> to vector<8x32xf32>
    %71 = vector.broadcast %4 : vector<1x32xf32> to vector<8x32xf32>
    %72 = arith.addf %70, %71 : vector<8x32xf32>
    %73 = arith.mulf %67, %72 : vector<8x32xf32>
    %74 = arith.addf %69, %73 : vector<8x32xf32>
    %75 = math.tanh %74 : vector<8x32xf32>
    %cst_18 = arith.constant 1.000000e+00 : f32
    %76 = vector.broadcast %cst_18 : f32 to vector<8x32xf32>
    %77 = arith.subf %76, %68 : vector<8x32xf32>
    %78 = arith.mulf %77, %75 : vector<8x32xf32>
    %79 = arith.mulf %68, %56 : vector<8x32xf32>
    %80 = arith.addf %78, %79 : vector<8x32xf32>
    %cst_19 = arith.constant dense<0.000000e+00> : vector<8x96xf32>
    %81 = tpu.matmul %80, %2, %cst_19 {dimension_numbers = #tpu.dot_dimension_numbers<[1], [0], [0], [1], [0, 0, 1, 1], [], []>} : vector<8x32xf32>, vector<32x96xf32>, vector<8x96xf32> -> vector<8x96xf32>
    %82 = vector.extract_strided_slice %7 {offsets = [24, 0], sizes = [8, 96], strides = [1, 1]} : vector<64x96xf32> to vector<8x96xf32>
    %83 = vector.extract_strided_slice %82 {offsets = [0, 0], sizes = [8, 64], strides = [1, 1]} : vector<8x96xf32> to vector<8x64xf32>
    %84 = vector.extract_strided_slice %81 {offsets = [0, 0], sizes = [8, 64], strides = [1, 1]} : vector<8x96xf32> to vector<8x64xf32>
    %85 = arith.addf %83, %84 : vector<8x64xf32>
    %86 = arith.negf %85 : vector<8x64xf32>
    %87 = math.exp %86 : vector<8x64xf32>
    %cst_20 = arith.constant 1.000000e+00 : f32
    %88 = vector.broadcast %cst_20 : f32 to vector<8x64xf32>
    %89 = arith.addf %88, %87 : vector<8x64xf32>
    %90 = arith.divf %88, %89 : vector<8x64xf32>
    %91 = vector.extract_strided_slice %90 {offsets = [0, 0], sizes = [8, 32], strides = [1, 1]} : vector<8x64xf32> to vector<8x32xf32>
    %92 = vector.extract_strided_slice %90 {offsets = [0, 32], sizes = [8, 32], strides = [1, 1]} : vector<8x64xf32> to vector<8x32xf32>
    %93 = vector.extract_strided_slice %82 {offsets = [0, 64], sizes = [8, 32], strides = [1, 1]} : vector<8x96xf32> to vector<8x32xf32>
    %94 = vector.extract_strided_slice %81 {offsets = [0, 64], sizes = [8, 32], strides = [1, 1]} : vector<8x96xf32> to vector<8x32xf32>
    %95 = vector.broadcast %4 : vector<1x32xf32> to vector<8x32xf32>
    %96 = arith.addf %94, %95 : vector<8x32xf32>
    %97 = arith.mulf %91, %96 : vector<8x32xf32>
    %98 = arith.addf %93, %97 : vector<8x32xf32>
    %99 = math.tanh %98 : vector<8x32xf32>
    %cst_21 = arith.constant 1.000000e+00 : f32
    %100 = vector.broadcast %cst_21 : f32 to vector<8x32xf32>
    %101 = arith.subf %100, %92 : vector<8x32xf32>
    %102 = arith.mulf %101, %99 : vector<8x32xf32>
    %103 = arith.mulf %92, %80 : vector<8x32xf32>
    %104 = arith.addf %102, %103 : vector<8x32xf32>
    %cst_22 = arith.constant dense<0.000000e+00> : vector<8x96xf32>
    %105 = tpu.matmul %104, %2, %cst_22 {dimension_numbers = #tpu.dot_dimension_numbers<[1], [0], [0], [1], [0, 0, 1, 1], [], []>} : vector<8x32xf32>, vector<32x96xf32>, vector<8x96xf32> -> vector<8x96xf32>
    %106 = vector.extract_strided_slice %7 {offsets = [32, 0], sizes = [8, 96], strides = [1, 1]} : vector<64x96xf32> to vector<8x96xf32>
    %107 = vector.extract_strided_slice %106 {offsets = [0, 0], sizes = [8, 64], strides = [1, 1]} : vector<8x96xf32> to vector<8x64xf32>
    %108 = vector.extract_strided_slice %105 {offsets = [0, 0], sizes = [8, 64], strides = [1, 1]} : vector<8x96xf32> to vector<8x64xf32>
    %109 = arith.addf %107, %108 : vector<8x64xf32>
    %110 = arith.negf %109 : vector<8x64xf32>
    %111 = math.exp %110 : vector<8x64xf32>
    %cst_23 = arith.constant 1.000000e+00 : f32
    %112 = vector.broadcast %cst_23 : f32 to vector<8x64xf32>
    %113 = arith.addf %112, %111 : vector<8x64xf32>
    %114 = arith.divf %112, %113 : vector<8x64xf32>
    %115 = vector.extract_strided_slice %114 {offsets = [0, 0], sizes = [8, 32], strides = [1, 1]} : vector<8x64xf32> to vector<8x32xf32>
    %116 = vector.extract_strided_slice %114 {offsets = [0, 32], sizes = [8, 32], strides = [1, 1]} : vector<8x64xf32> to vector<8x32xf32>
    %117 = vector.extract_strided_slice %106 {offsets = [0, 64], sizes = [8, 32], strides = [1, 1]} : vector<8x96xf32> to vector<8x32xf32>
    %118 = vector.extract_strided_slice %105 {offsets = [0, 64], sizes = [8, 32], strides = [1, 1]} : vector<8x96xf32> to vector<8x32xf32>
    %119 = vector.broadcast %4 : vector<1x32xf32> to vector<8x32xf32>
    %120 = arith.addf %118, %119 : vector<8x32xf32>
    %121 = arith.mulf %115, %120 : vector<8x32xf32>
    %122 = arith.addf %117, %121 : vector<8x32xf32>
    %123 = math.tanh %122 : vector<8x32xf32>
    %cst_24 = arith.constant 1.000000e+00 : f32
    %124 = vector.broadcast %cst_24 : f32 to vector<8x32xf32>
    %125 = arith.subf %124, %116 : vector<8x32xf32>
    %126 = arith.mulf %125, %123 : vector<8x32xf32>
    %127 = arith.mulf %116, %104 : vector<8x32xf32>
    %128 = arith.addf %126, %127 : vector<8x32xf32>
    %cst_25 = arith.constant dense<0.000000e+00> : vector<8x96xf32>
    %129 = tpu.matmul %128, %2, %cst_25 {dimension_numbers = #tpu.dot_dimension_numbers<[1], [0], [0], [1], [0, 0, 1, 1], [], []>} : vector<8x32xf32>, vector<32x96xf32>, vector<8x96xf32> -> vector<8x96xf32>
    %130 = vector.extract_strided_slice %7 {offsets = [40, 0], sizes = [8, 96], strides = [1, 1]} : vector<64x96xf32> to vector<8x96xf32>
    %131 = vector.extract_strided_slice %130 {offsets = [0, 0], sizes = [8, 64], strides = [1, 1]} : vector<8x96xf32> to vector<8x64xf32>
    %132 = vector.extract_strided_slice %129 {offsets = [0, 0], sizes = [8, 64], strides = [1, 1]} : vector<8x96xf32> to vector<8x64xf32>
    %133 = arith.addf %131, %132 : vector<8x64xf32>
    %134 = arith.negf %133 : vector<8x64xf32>
    %135 = math.exp %134 : vector<8x64xf32>
    %cst_26 = arith.constant 1.000000e+00 : f32
    %136 = vector.broadcast %cst_26 : f32 to vector<8x64xf32>
    %137 = arith.addf %136, %135 : vector<8x64xf32>
    %138 = arith.divf %136, %137 : vector<8x64xf32>
    %139 = vector.extract_strided_slice %138 {offsets = [0, 0], sizes = [8, 32], strides = [1, 1]} : vector<8x64xf32> to vector<8x32xf32>
    %140 = vector.extract_strided_slice %138 {offsets = [0, 32], sizes = [8, 32], strides = [1, 1]} : vector<8x64xf32> to vector<8x32xf32>
    %141 = vector.extract_strided_slice %130 {offsets = [0, 64], sizes = [8, 32], strides = [1, 1]} : vector<8x96xf32> to vector<8x32xf32>
    %142 = vector.extract_strided_slice %129 {offsets = [0, 64], sizes = [8, 32], strides = [1, 1]} : vector<8x96xf32> to vector<8x32xf32>
    %143 = vector.broadcast %4 : vector<1x32xf32> to vector<8x32xf32>
    %144 = arith.addf %142, %143 : vector<8x32xf32>
    %145 = arith.mulf %139, %144 : vector<8x32xf32>
    %146 = arith.addf %141, %145 : vector<8x32xf32>
    %147 = math.tanh %146 : vector<8x32xf32>
    %cst_27 = arith.constant 1.000000e+00 : f32
    %148 = vector.broadcast %cst_27 : f32 to vector<8x32xf32>
    %149 = arith.subf %148, %140 : vector<8x32xf32>
    %150 = arith.mulf %149, %147 : vector<8x32xf32>
    %151 = arith.mulf %140, %128 : vector<8x32xf32>
    %152 = arith.addf %150, %151 : vector<8x32xf32>
    %cst_28 = arith.constant dense<0.000000e+00> : vector<8x96xf32>
    %153 = tpu.matmul %152, %2, %cst_28 {dimension_numbers = #tpu.dot_dimension_numbers<[1], [0], [0], [1], [0, 0, 1, 1], [], []>} : vector<8x32xf32>, vector<32x96xf32>, vector<8x96xf32> -> vector<8x96xf32>
    %154 = vector.extract_strided_slice %7 {offsets = [48, 0], sizes = [8, 96], strides = [1, 1]} : vector<64x96xf32> to vector<8x96xf32>
    %155 = vector.extract_strided_slice %154 {offsets = [0, 0], sizes = [8, 64], strides = [1, 1]} : vector<8x96xf32> to vector<8x64xf32>
    %156 = vector.extract_strided_slice %153 {offsets = [0, 0], sizes = [8, 64], strides = [1, 1]} : vector<8x96xf32> to vector<8x64xf32>
    %157 = arith.addf %155, %156 : vector<8x64xf32>
    %158 = arith.negf %157 : vector<8x64xf32>
    %159 = math.exp %158 : vector<8x64xf32>
    %cst_29 = arith.constant 1.000000e+00 : f32
    %160 = vector.broadcast %cst_29 : f32 to vector<8x64xf32>
    %161 = arith.addf %160, %159 : vector<8x64xf32>
    %162 = arith.divf %160, %161 : vector<8x64xf32>
    %163 = vector.extract_strided_slice %162 {offsets = [0, 0], sizes = [8, 32], strides = [1, 1]} : vector<8x64xf32> to vector<8x32xf32>
    %164 = vector.extract_strided_slice %162 {offsets = [0, 32], sizes = [8, 32], strides = [1, 1]} : vector<8x64xf32> to vector<8x32xf32>
    %165 = vector.extract_strided_slice %154 {offsets = [0, 64], sizes = [8, 32], strides = [1, 1]} : vector<8x96xf32> to vector<8x32xf32>
    %166 = vector.extract_strided_slice %153 {offsets = [0, 64], sizes = [8, 32], strides = [1, 1]} : vector<8x96xf32> to vector<8x32xf32>
    %167 = vector.broadcast %4 : vector<1x32xf32> to vector<8x32xf32>
    %168 = arith.addf %166, %167 : vector<8x32xf32>
    %169 = arith.mulf %163, %168 : vector<8x32xf32>
    %170 = arith.addf %165, %169 : vector<8x32xf32>
    %171 = math.tanh %170 : vector<8x32xf32>
    %cst_30 = arith.constant 1.000000e+00 : f32
    %172 = vector.broadcast %cst_30 : f32 to vector<8x32xf32>
    %173 = arith.subf %172, %164 : vector<8x32xf32>
    %174 = arith.mulf %173, %171 : vector<8x32xf32>
    %175 = arith.mulf %164, %152 : vector<8x32xf32>
    %176 = arith.addf %174, %175 : vector<8x32xf32>
    %cst_31 = arith.constant dense<0.000000e+00> : vector<8x96xf32>
    %177 = tpu.matmul %176, %2, %cst_31 {dimension_numbers = #tpu.dot_dimension_numbers<[1], [0], [0], [1], [0, 0, 1, 1], [], []>} : vector<8x32xf32>, vector<32x96xf32>, vector<8x96xf32> -> vector<8x96xf32>
    %178 = vector.extract_strided_slice %7 {offsets = [56, 0], sizes = [8, 96], strides = [1, 1]} : vector<64x96xf32> to vector<8x96xf32>
    %179 = vector.extract_strided_slice %178 {offsets = [0, 0], sizes = [8, 64], strides = [1, 1]} : vector<8x96xf32> to vector<8x64xf32>
    %180 = vector.extract_strided_slice %177 {offsets = [0, 0], sizes = [8, 64], strides = [1, 1]} : vector<8x96xf32> to vector<8x64xf32>
    %181 = arith.addf %179, %180 : vector<8x64xf32>
    %182 = arith.negf %181 : vector<8x64xf32>
    %183 = math.exp %182 : vector<8x64xf32>
    %cst_32 = arith.constant 1.000000e+00 : f32
    %184 = vector.broadcast %cst_32 : f32 to vector<8x64xf32>
    %185 = arith.addf %184, %183 : vector<8x64xf32>
    %186 = arith.divf %184, %185 : vector<8x64xf32>
    %187 = vector.extract_strided_slice %186 {offsets = [0, 0], sizes = [8, 32], strides = [1, 1]} : vector<8x64xf32> to vector<8x32xf32>
    %188 = vector.extract_strided_slice %186 {offsets = [0, 32], sizes = [8, 32], strides = [1, 1]} : vector<8x64xf32> to vector<8x32xf32>
    %189 = vector.extract_strided_slice %178 {offsets = [0, 64], sizes = [8, 32], strides = [1, 1]} : vector<8x96xf32> to vector<8x32xf32>
    %190 = vector.extract_strided_slice %177 {offsets = [0, 64], sizes = [8, 32], strides = [1, 1]} : vector<8x96xf32> to vector<8x32xf32>
    %191 = vector.broadcast %4 : vector<1x32xf32> to vector<8x32xf32>
    %192 = arith.addf %190, %191 : vector<8x32xf32>
    %193 = arith.mulf %187, %192 : vector<8x32xf32>
    %194 = arith.addf %189, %193 : vector<8x32xf32>
    %195 = math.tanh %194 : vector<8x32xf32>
    %cst_33 = arith.constant 1.000000e+00 : f32
    %196 = vector.broadcast %cst_33 : f32 to vector<8x32xf32>
    %197 = arith.subf %196, %188 : vector<8x32xf32>
    %198 = arith.mulf %197, %195 : vector<8x32xf32>
    %199 = arith.mulf %188, %176 : vector<8x32xf32>
    %200 = arith.addf %198, %199 : vector<8x32xf32>
    %201 = tpu.concatenate %32, %56, %80, %104, %128, %152, %176, %200 in 0 : vector<8x32xf32>, vector<8x32xf32>, vector<8x32xf32>, vector<8x32xf32>, vector<8x32xf32>, vector<8x32xf32>, vector<8x32xf32>, vector<8x32xf32> -> vector<64x32xf32>
    %c0_34 = arith.constant 0 : index
    %c0_35 = arith.constant 0 : index
    %202 = vector.load %arg5[%c0_34, %c0_35] : memref<64x32xf32, #tpu.memory_space<vmem>>, vector<64x32xf32>
    tpu.vector_store %arg5[%c0_34, %c0_35], %201 {strides = array<i32>} : memref<64x32xf32, #tpu.memory_space<vmem>>, vector<64x32xf32>,
    return
  }
}

module attributes {stable_mosaic.version = 11 : i64} {
  func.func @func_combine_kernel(%arg0: memref<8x6xf32, #tpu.memory_space<vmem>>, %arg1: memref<6x64x32xf32, #tpu.memory_space<vmem>>, %arg2: memref<64x32xf32, #tpu.memory_space<vmem>>, %arg3: memref<32x96xf32, #tpu.memory_space<vmem>>, %arg4: memref<32x96xf32, #tpu.memory_space<vmem>>, %arg5: memref<1x96xf32, #tpu.memory_space<vmem>>, %arg6: memref<1x32xf32, #tpu.memory_space<vmem>>, %arg7: memref<8x1xf32, #tpu.memory_space<vmem>>, %arg8: memref<64x32xf32, #tpu.memory_space<vmem>>, %arg9: memref<64x32xf32, #tpu.memory_space<vmem>>, %arg10: memref<1x1xf32, #tpu.memory_space<vmem>>, %arg11: memref<1x1xf32, #tpu.memory_space<vmem>>) attributes {dimension_semantics = [], scalar_prefetch = 0 : i64, scratch_operands = 0 : i64, tpu.core_type = #tpu.core_type<tc>} {
    %c0 = arith.constant 0 : index
    %c0_0 = arith.constant 0 : index
    %0 = vector.load %arg0[%c0, %c0_0] : memref<8x6xf32, #tpu.memory_space<vmem>>, vector<8x6xf32>
    %1 = tpu.concatenate %0, %0, %0, %0, %0, %0, %0, %0 in 0 : vector<8x6xf32>, vector<8x6xf32>, vector<8x6xf32>, vector<8x6xf32>, vector<8x6xf32>, vector<8x6xf32>, vector<8x6xf32>, vector<8x6xf32> -> vector<64x6xf32>
    %2 = vector.extract_strided_slice %1 {offsets = [0, 0], sizes = [64, 1], strides = [1, 1]} : vector<64x6xf32> to vector<64x1xf32>
    %c0_1 = arith.constant 0 : index
    %c0_2 = arith.constant 0 : index
    %c0_3 = arith.constant 0 : index
    %3 = vector.load %arg1[%c0_1, %c0_2, %c0_3] : memref<6x64x32xf32, #tpu.memory_space<vmem>>, vector<1x64x32xf32>
    %4 = vector.shape_cast %3 : vector<1x64x32xf32> to vector<64x32xf32>
    %5 = vector.broadcast %2 : vector<64x1xf32> to vector<64x32xf32>
    %6 = arith.mulf %5, %4 : vector<64x32xf32>
    %7 = vector.extract_strided_slice %1 {offsets = [0, 1], sizes = [64, 1], strides = [1, 1]} : vector<64x6xf32> to vector<64x1xf32>
    %c1 = arith.constant 1 : index
    %c0_4 = arith.constant 0 : index
    %c0_5 = arith.constant 0 : index
    %8 = vector.load %arg1[%c1, %c0_4, %c0_5] : memref<6x64x32xf32, #tpu.memory_space<vmem>>, vector<1x64x32xf32>
    %9 = vector.shape_cast %8 : vector<1x64x32xf32> to vector<64x32xf32>
    %10 = vector.broadcast %7 : vector<64x1xf32> to vector<64x32xf32>
    %11 = arith.mulf %10, %9 : vector<64x32xf32>
    %12 = arith.addf %6, %11 : vector<64x32xf32>
    %13 = vector.extract_strided_slice %1 {offsets = [0, 2], sizes = [64, 1], strides = [1, 1]} : vector<64x6xf32> to vector<64x1xf32>
    %c2 = arith.constant 2 : index
    %c0_6 = arith.constant 0 : index
    %c0_7 = arith.constant 0 : index
    %14 = vector.load %arg1[%c2, %c0_6, %c0_7] : memref<6x64x32xf32, #tpu.memory_space<vmem>>, vector<1x64x32xf32>
    %15 = vector.shape_cast %14 : vector<1x64x32xf32> to vector<64x32xf32>
    %16 = vector.broadcast %13 : vector<64x1xf32> to vector<64x32xf32>
    %17 = arith.mulf %16, %15 : vector<64x32xf32>
    %18 = arith.addf %12, %17 : vector<64x32xf32>
    %19 = vector.extract_strided_slice %1 {offsets = [0, 3], sizes = [64, 1], strides = [1, 1]} : vector<64x6xf32> to vector<64x1xf32>
    %c3 = arith.constant 3 : index
    %c0_8 = arith.constant 0 : index
    %c0_9 = arith.constant 0 : index
    %20 = vector.load %arg1[%c3, %c0_8, %c0_9] : memref<6x64x32xf32, #tpu.memory_space<vmem>>, vector<1x64x32xf32>
    %21 = vector.shape_cast %20 : vector<1x64x32xf32> to vector<64x32xf32>
    %22 = vector.broadcast %19 : vector<64x1xf32> to vector<64x32xf32>
    %23 = arith.mulf %22, %21 : vector<64x32xf32>
    %24 = arith.addf %18, %23 : vector<64x32xf32>
    %25 = vector.extract_strided_slice %1 {offsets = [0, 4], sizes = [64, 1], strides = [1, 1]} : vector<64x6xf32> to vector<64x1xf32>
    %c4 = arith.constant 4 : index
    %c0_10 = arith.constant 0 : index
    %c0_11 = arith.constant 0 : index
    %26 = vector.load %arg1[%c4, %c0_10, %c0_11] : memref<6x64x32xf32, #tpu.memory_space<vmem>>, vector<1x64x32xf32>
    %27 = vector.shape_cast %26 : vector<1x64x32xf32> to vector<64x32xf32>
    %28 = vector.broadcast %25 : vector<64x1xf32> to vector<64x32xf32>
    %29 = arith.mulf %28, %27 : vector<64x32xf32>
    %30 = arith.addf %24, %29 : vector<64x32xf32>
    %31 = vector.extract_strided_slice %1 {offsets = [0, 5], sizes = [64, 1], strides = [1, 1]} : vector<64x6xf32> to vector<64x1xf32>
    %c5 = arith.constant 5 : index
    %c0_12 = arith.constant 0 : index
    %c0_13 = arith.constant 0 : index
    %32 = vector.load %arg1[%c5, %c0_12, %c0_13] : memref<6x64x32xf32, #tpu.memory_space<vmem>>, vector<1x64x32xf32>
    %33 = vector.shape_cast %32 : vector<1x64x32xf32> to vector<64x32xf32>
    %34 = vector.broadcast %31 : vector<64x1xf32> to vector<64x32xf32>
    %35 = arith.mulf %34, %33 : vector<64x32xf32>
    %36 = arith.addf %30, %35 : vector<64x32xf32>
    %c0_14 = arith.constant 0 : index
    %c0_15 = arith.constant 0 : index
    %37 = vector.load %arg8[%c0_14, %c0_15] : memref<64x32xf32, #tpu.memory_space<vmem>>, vector<64x32xf32>
    tpu.vector_store %arg8[%c0_14, %c0_15], %36 {strides = array<i32>} : memref<64x32xf32, #tpu.memory_space<vmem>>, vector<64x32xf32>,
    %c0_16 = arith.constant 0 : index
    %c0_17 = arith.constant 0 : index
    %38 = vector.load %arg3[%c0_16, %c0_17] : memref<32x96xf32, #tpu.memory_space<vmem>>, vector<32x96xf32>
    %c0_18 = arith.constant 0 : index
    %c0_19 = arith.constant 0 : index
    %39 = vector.load %arg4[%c0_18, %c0_19] : memref<32x96xf32, #tpu.memory_space<vmem>>, vector<32x96xf32>
    %c0_20 = arith.constant 0 : index
    %c0_21 = arith.constant 0 : index
    %40 = vector.load %arg5[%c0_20, %c0_21] : memref<1x96xf32, #tpu.memory_space<vmem>>, vector<1x96xf32>
    %c0_22 = arith.constant 0 : index
    %c0_23 = arith.constant 0 : index
    %41 = vector.load %arg6[%c0_22, %c0_23] : memref<1x32xf32, #tpu.memory_space<vmem>>, vector<1x32xf32>
    %cst = arith.constant dense<0.000000e+00> : vector<64x96xf32>
    %42 = tpu.matmul %36, %38, %cst {dimension_numbers = #tpu.dot_dimension_numbers<[1], [0], [0], [1], [0, 0, 1, 1], [], []>} : vector<64x32xf32>, vector<32x96xf32>, vector<64x96xf32> -> vector<64x96xf32>
    %43 = vector.broadcast %40 : vector<1x96xf32> to vector<64x96xf32>
    %44 = arith.addf %42, %43 : vector<64x96xf32>
    %cst_24 = arith.constant 0.000000e+00 : f32
    %45 = vector.broadcast %cst_24 : f32 to vector<8x32xf32>
    %cst_25 = arith.constant dense<0.000000e+00> : vector<8x96xf32>
    %46 = tpu.matmul %45, %39, %cst_25 {dimension_numbers = #tpu.dot_dimension_numbers<[1], [0], [0], [1], [0, 0, 1, 1], [], []>} : vector<8x32xf32>, vector<32x96xf32>, vector<8x96xf32> -> vector<8x96xf32>
    %47 = vector.extract_strided_slice %44 {offsets = [0, 0], sizes = [8, 96], strides = [1, 1]} : vector<64x96xf32> to vector<8x96xf32>
    %48 = vector.extract_strided_slice %47 {offsets = [0, 0], sizes = [8, 64], strides = [1, 1]} : vector<8x96xf32> to vector<8x64xf32>
    %49 = vector.extract_strided_slice %46 {offsets = [0, 0], sizes = [8, 64], strides = [1, 1]} : vector<8x96xf32> to vector<8x64xf32>
    %50 = arith.addf %48, %49 : vector<8x64xf32>
    %51 = arith.negf %50 : vector<8x64xf32>
    %52 = math.exp %51 : vector<8x64xf32>
    %cst_26 = arith.constant 1.000000e+00 : f32
    %53 = vector.broadcast %cst_26 : f32 to vector<8x64xf32>
    %54 = arith.addf %53, %52 : vector<8x64xf32>
    %55 = arith.divf %53, %54 : vector<8x64xf32>
    %56 = vector.extract_strided_slice %55 {offsets = [0, 0], sizes = [8, 32], strides = [1, 1]} : vector<8x64xf32> to vector<8x32xf32>
    %57 = vector.extract_strided_slice %55 {offsets = [0, 32], sizes = [8, 32], strides = [1, 1]} : vector<8x64xf32> to vector<8x32xf32>
    %58 = vector.extract_strided_slice %47 {offsets = [0, 64], sizes = [8, 32], strides = [1, 1]} : vector<8x96xf32> to vector<8x32xf32>
    %59 = vector.extract_strided_slice %46 {offsets = [0, 64], sizes = [8, 32], strides = [1, 1]} : vector<8x96xf32> to vector<8x32xf32>
    %60 = vector.broadcast %41 : vector<1x32xf32> to vector<8x32xf32>
    %61 = arith.addf %59, %60 : vector<8x32xf32>
    %62 = arith.mulf %56, %61 : vector<8x32xf32>
    %63 = arith.addf %58, %62 : vector<8x32xf32>
    %64 = math.tanh %63 : vector<8x32xf32>
    %cst_27 = arith.constant 1.000000e+00 : f32
    %65 = vector.broadcast %cst_27 : f32 to vector<8x32xf32>
    %66 = arith.subf %65, %57 : vector<8x32xf32>
    %67 = arith.mulf %66, %64 : vector<8x32xf32>
    %68 = arith.mulf %57, %45 : vector<8x32xf32>
    %69 = arith.addf %67, %68 : vector<8x32xf32>
    %cst_28 = arith.constant dense<0.000000e+00> : vector<8x96xf32>
    %70 = tpu.matmul %69, %39, %cst_28 {dimension_numbers = #tpu.dot_dimension_numbers<[1], [0], [0], [1], [0, 0, 1, 1], [], []>} : vector<8x32xf32>, vector<32x96xf32>, vector<8x96xf32> -> vector<8x96xf32>
    %71 = vector.extract_strided_slice %44 {offsets = [8, 0], sizes = [8, 96], strides = [1, 1]} : vector<64x96xf32> to vector<8x96xf32>
    %72 = vector.extract_strided_slice %71 {offsets = [0, 0], sizes = [8, 64], strides = [1, 1]} : vector<8x96xf32> to vector<8x64xf32>
    %73 = vector.extract_strided_slice %70 {offsets = [0, 0], sizes = [8, 64], strides = [1, 1]} : vector<8x96xf32> to vector<8x64xf32>
    %74 = arith.addf %72, %73 : vector<8x64xf32>
    %75 = arith.negf %74 : vector<8x64xf32>
    %76 = math.exp %75 : vector<8x64xf32>
    %cst_29 = arith.constant 1.000000e+00 : f32
    %77 = vector.broadcast %cst_29 : f32 to vector<8x64xf32>
    %78 = arith.addf %77, %76 : vector<8x64xf32>
    %79 = arith.divf %77, %78 : vector<8x64xf32>
    %80 = vector.extract_strided_slice %79 {offsets = [0, 0], sizes = [8, 32], strides = [1, 1]} : vector<8x64xf32> to vector<8x32xf32>
    %81 = vector.extract_strided_slice %79 {offsets = [0, 32], sizes = [8, 32], strides = [1, 1]} : vector<8x64xf32> to vector<8x32xf32>
    %82 = vector.extract_strided_slice %71 {offsets = [0, 64], sizes = [8, 32], strides = [1, 1]} : vector<8x96xf32> to vector<8x32xf32>
    %83 = vector.extract_strided_slice %70 {offsets = [0, 64], sizes = [8, 32], strides = [1, 1]} : vector<8x96xf32> to vector<8x32xf32>
    %84 = vector.broadcast %41 : vector<1x32xf32> to vector<8x32xf32>
    %85 = arith.addf %83, %84 : vector<8x32xf32>
    %86 = arith.mulf %80, %85 : vector<8x32xf32>
    %87 = arith.addf %82, %86 : vector<8x32xf32>
    %88 = math.tanh %87 : vector<8x32xf32>
    %cst_30 = arith.constant 1.000000e+00 : f32
    %89 = vector.broadcast %cst_30 : f32 to vector<8x32xf32>
    %90 = arith.subf %89, %81 : vector<8x32xf32>
    %91 = arith.mulf %90, %88 : vector<8x32xf32>
    %92 = arith.mulf %81, %69 : vector<8x32xf32>
    %93 = arith.addf %91, %92 : vector<8x32xf32>
    %cst_31 = arith.constant dense<0.000000e+00> : vector<8x96xf32>
    %94 = tpu.matmul %93, %39, %cst_31 {dimension_numbers = #tpu.dot_dimension_numbers<[1], [0], [0], [1], [0, 0, 1, 1], [], []>} : vector<8x32xf32>, vector<32x96xf32>, vector<8x96xf32> -> vector<8x96xf32>
    %95 = vector.extract_strided_slice %44 {offsets = [16, 0], sizes = [8, 96], strides = [1, 1]} : vector<64x96xf32> to vector<8x96xf32>
    %96 = vector.extract_strided_slice %95 {offsets = [0, 0], sizes = [8, 64], strides = [1, 1]} : vector<8x96xf32> to vector<8x64xf32>
    %97 = vector.extract_strided_slice %94 {offsets = [0, 0], sizes = [8, 64], strides = [1, 1]} : vector<8x96xf32> to vector<8x64xf32>
    %98 = arith.addf %96, %97 : vector<8x64xf32>
    %99 = arith.negf %98 : vector<8x64xf32>
    %100 = math.exp %99 : vector<8x64xf32>
    %cst_32 = arith.constant 1.000000e+00 : f32
    %101 = vector.broadcast %cst_32 : f32 to vector<8x64xf32>
    %102 = arith.addf %101, %100 : vector<8x64xf32>
    %103 = arith.divf %101, %102 : vector<8x64xf32>
    %104 = vector.extract_strided_slice %103 {offsets = [0, 0], sizes = [8, 32], strides = [1, 1]} : vector<8x64xf32> to vector<8x32xf32>
    %105 = vector.extract_strided_slice %103 {offsets = [0, 32], sizes = [8, 32], strides = [1, 1]} : vector<8x64xf32> to vector<8x32xf32>
    %106 = vector.extract_strided_slice %95 {offsets = [0, 64], sizes = [8, 32], strides = [1, 1]} : vector<8x96xf32> to vector<8x32xf32>
    %107 = vector.extract_strided_slice %94 {offsets = [0, 64], sizes = [8, 32], strides = [1, 1]} : vector<8x96xf32> to vector<8x32xf32>
    %108 = vector.broadcast %41 : vector<1x32xf32> to vector<8x32xf32>
    %109 = arith.addf %107, %108 : vector<8x32xf32>
    %110 = arith.mulf %104, %109 : vector<8x32xf32>
    %111 = arith.addf %106, %110 : vector<8x32xf32>
    %112 = math.tanh %111 : vector<8x32xf32>
    %cst_33 = arith.constant 1.000000e+00 : f32
    %113 = vector.broadcast %cst_33 : f32 to vector<8x32xf32>
    %114 = arith.subf %113, %105 : vector<8x32xf32>
    %115 = arith.mulf %114, %112 : vector<8x32xf32>
    %116 = arith.mulf %105, %93 : vector<8x32xf32>
    %117 = arith.addf %115, %116 : vector<8x32xf32>
    %cst_34 = arith.constant dense<0.000000e+00> : vector<8x96xf32>
    %118 = tpu.matmul %117, %39, %cst_34 {dimension_numbers = #tpu.dot_dimension_numbers<[1], [0], [0], [1], [0, 0, 1, 1], [], []>} : vector<8x32xf32>, vector<32x96xf32>, vector<8x96xf32> -> vector<8x96xf32>
    %119 = vector.extract_strided_slice %44 {offsets = [24, 0], sizes = [8, 96], strides = [1, 1]} : vector<64x96xf32> to vector<8x96xf32>
    %120 = vector.extract_strided_slice %119 {offsets = [0, 0], sizes = [8, 64], strides = [1, 1]} : vector<8x96xf32> to vector<8x64xf32>
    %121 = vector.extract_strided_slice %118 {offsets = [0, 0], sizes = [8, 64], strides = [1, 1]} : vector<8x96xf32> to vector<8x64xf32>
    %122 = arith.addf %120, %121 : vector<8x64xf32>
    %123 = arith.negf %122 : vector<8x64xf32>
    %124 = math.exp %123 : vector<8x64xf32>
    %cst_35 = arith.constant 1.000000e+00 : f32
    %125 = vector.broadcast %cst_35 : f32 to vector<8x64xf32>
    %126 = arith.addf %125, %124 : vector<8x64xf32>
    %127 = arith.divf %125, %126 : vector<8x64xf32>
    %128 = vector.extract_strided_slice %127 {offsets = [0, 0], sizes = [8, 32], strides = [1, 1]} : vector<8x64xf32> to vector<8x32xf32>
    %129 = vector.extract_strided_slice %127 {offsets = [0, 32], sizes = [8, 32], strides = [1, 1]} : vector<8x64xf32> to vector<8x32xf32>
    %130 = vector.extract_strided_slice %119 {offsets = [0, 64], sizes = [8, 32], strides = [1, 1]} : vector<8x96xf32> to vector<8x32xf32>
    %131 = vector.extract_strided_slice %118 {offsets = [0, 64], sizes = [8, 32], strides = [1, 1]} : vector<8x96xf32> to vector<8x32xf32>
    %132 = vector.broadcast %41 : vector<1x32xf32> to vector<8x32xf32>
    %133 = arith.addf %131, %132 : vector<8x32xf32>
    %134 = arith.mulf %128, %133 : vector<8x32xf32>
    %135 = arith.addf %130, %134 : vector<8x32xf32>
    %136 = math.tanh %135 : vector<8x32xf32>
    %cst_36 = arith.constant 1.000000e+00 : f32
    %137 = vector.broadcast %cst_36 : f32 to vector<8x32xf32>
    %138 = arith.subf %137, %129 : vector<8x32xf32>
    %139 = arith.mulf %138, %136 : vector<8x32xf32>
    %140 = arith.mulf %129, %117 : vector<8x32xf32>
    %141 = arith.addf %139, %140 : vector<8x32xf32>
    %cst_37 = arith.constant dense<0.000000e+00> : vector<8x96xf32>
    %142 = tpu.matmul %141, %39, %cst_37 {dimension_numbers = #tpu.dot_dimension_numbers<[1], [0], [0], [1], [0, 0, 1, 1], [], []>} : vector<8x32xf32>, vector<32x96xf32>, vector<8x96xf32> -> vector<8x96xf32>
    %143 = vector.extract_strided_slice %44 {offsets = [32, 0], sizes = [8, 96], strides = [1, 1]} : vector<64x96xf32> to vector<8x96xf32>
    %144 = vector.extract_strided_slice %143 {offsets = [0, 0], sizes = [8, 64], strides = [1, 1]} : vector<8x96xf32> to vector<8x64xf32>
    %145 = vector.extract_strided_slice %142 {offsets = [0, 0], sizes = [8, 64], strides = [1, 1]} : vector<8x96xf32> to vector<8x64xf32>
    %146 = arith.addf %144, %145 : vector<8x64xf32>
    %147 = arith.negf %146 : vector<8x64xf32>
    %148 = math.exp %147 : vector<8x64xf32>
    %cst_38 = arith.constant 1.000000e+00 : f32
    %149 = vector.broadcast %cst_38 : f32 to vector<8x64xf32>
    %150 = arith.addf %149, %148 : vector<8x64xf32>
    %151 = arith.divf %149, %150 : vector<8x64xf32>
    %152 = vector.extract_strided_slice %151 {offsets = [0, 0], sizes = [8, 32], strides = [1, 1]} : vector<8x64xf32> to vector<8x32xf32>
    %153 = vector.extract_strided_slice %151 {offsets = [0, 32], sizes = [8, 32], strides = [1, 1]} : vector<8x64xf32> to vector<8x32xf32>
    %154 = vector.extract_strided_slice %143 {offsets = [0, 64], sizes = [8, 32], strides = [1, 1]} : vector<8x96xf32> to vector<8x32xf32>
    %155 = vector.extract_strided_slice %142 {offsets = [0, 64], sizes = [8, 32], strides = [1, 1]} : vector<8x96xf32> to vector<8x32xf32>
    %156 = vector.broadcast %41 : vector<1x32xf32> to vector<8x32xf32>
    %157 = arith.addf %155, %156 : vector<8x32xf32>
    %158 = arith.mulf %152, %157 : vector<8x32xf32>
    %159 = arith.addf %154, %158 : vector<8x32xf32>
    %160 = math.tanh %159 : vector<8x32xf32>
    %cst_39 = arith.constant 1.000000e+00 : f32
    %161 = vector.broadcast %cst_39 : f32 to vector<8x32xf32>
    %162 = arith.subf %161, %153 : vector<8x32xf32>
    %163 = arith.mulf %162, %160 : vector<8x32xf32>
    %164 = arith.mulf %153, %141 : vector<8x32xf32>
    %165 = arith.addf %163, %164 : vector<8x32xf32>
    %cst_40 = arith.constant dense<0.000000e+00> : vector<8x96xf32>
    %166 = tpu.matmul %165, %39, %cst_40 {dimension_numbers = #tpu.dot_dimension_numbers<[1], [0], [0], [1], [0, 0, 1, 1], [], []>} : vector<8x32xf32>, vector<32x96xf32>, vector<8x96xf32> -> vector<8x96xf32>
    %167 = vector.extract_strided_slice %44 {offsets = [40, 0], sizes = [8, 96], strides = [1, 1]} : vector<64x96xf32> to vector<8x96xf32>
    %168 = vector.extract_strided_slice %167 {offsets = [0, 0], sizes = [8, 64], strides = [1, 1]} : vector<8x96xf32> to vector<8x64xf32>
    %169 = vector.extract_strided_slice %166 {offsets = [0, 0], sizes = [8, 64], strides = [1, 1]} : vector<8x96xf32> to vector<8x64xf32>
    %170 = arith.addf %168, %169 : vector<8x64xf32>
    %171 = arith.negf %170 : vector<8x64xf32>
    %172 = math.exp %171 : vector<8x64xf32>
    %cst_41 = arith.constant 1.000000e+00 : f32
    %173 = vector.broadcast %cst_41 : f32 to vector<8x64xf32>
    %174 = arith.addf %173, %172 : vector<8x64xf32>
    %175 = arith.divf %173, %174 : vector<8x64xf32>
    %176 = vector.extract_strided_slice %175 {offsets = [0, 0], sizes = [8, 32], strides = [1, 1]} : vector<8x64xf32> to vector<8x32xf32>
    %177 = vector.extract_strided_slice %175 {offsets = [0, 32], sizes = [8, 32], strides = [1, 1]} : vector<8x64xf32> to vector<8x32xf32>
    %178 = vector.extract_strided_slice %167 {offsets = [0, 64], sizes = [8, 32], strides = [1, 1]} : vector<8x96xf32> to vector<8x32xf32>
    %179 = vector.extract_strided_slice %166 {offsets = [0, 64], sizes = [8, 32], strides = [1, 1]} : vector<8x96xf32> to vector<8x32xf32>
    %180 = vector.broadcast %41 : vector<1x32xf32> to vector<8x32xf32>
    %181 = arith.addf %179, %180 : vector<8x32xf32>
    %182 = arith.mulf %176, %181 : vector<8x32xf32>
    %183 = arith.addf %178, %182 : vector<8x32xf32>
    %184 = math.tanh %183 : vector<8x32xf32>
    %cst_42 = arith.constant 1.000000e+00 : f32
    %185 = vector.broadcast %cst_42 : f32 to vector<8x32xf32>
    %186 = arith.subf %185, %177 : vector<8x32xf32>
    %187 = arith.mulf %186, %184 : vector<8x32xf32>
    %188 = arith.mulf %177, %165 : vector<8x32xf32>
    %189 = arith.addf %187, %188 : vector<8x32xf32>
    %cst_43 = arith.constant dense<0.000000e+00> : vector<8x96xf32>
    %190 = tpu.matmul %189, %39, %cst_43 {dimension_numbers = #tpu.dot_dimension_numbers<[1], [0], [0], [1], [0, 0, 1, 1], [], []>} : vector<8x32xf32>, vector<32x96xf32>, vector<8x96xf32> -> vector<8x96xf32>
    %191 = vector.extract_strided_slice %44 {offsets = [48, 0], sizes = [8, 96], strides = [1, 1]} : vector<64x96xf32> to vector<8x96xf32>
    %192 = vector.extract_strided_slice %191 {offsets = [0, 0], sizes = [8, 64], strides = [1, 1]} : vector<8x96xf32> to vector<8x64xf32>
    %193 = vector.extract_strided_slice %190 {offsets = [0, 0], sizes = [8, 64], strides = [1, 1]} : vector<8x96xf32> to vector<8x64xf32>
    %194 = arith.addf %192, %193 : vector<8x64xf32>
    %195 = arith.negf %194 : vector<8x64xf32>
    %196 = math.exp %195 : vector<8x64xf32>
    %cst_44 = arith.constant 1.000000e+00 : f32
    %197 = vector.broadcast %cst_44 : f32 to vector<8x64xf32>
    %198 = arith.addf %197, %196 : vector<8x64xf32>
    %199 = arith.divf %197, %198 : vector<8x64xf32>
    %200 = vector.extract_strided_slice %199 {offsets = [0, 0], sizes = [8, 32], strides = [1, 1]} : vector<8x64xf32> to vector<8x32xf32>
    %201 = vector.extract_strided_slice %199 {offsets = [0, 32], sizes = [8, 32], strides = [1, 1]} : vector<8x64xf32> to vector<8x32xf32>
    %202 = vector.extract_strided_slice %191 {offsets = [0, 64], sizes = [8, 32], strides = [1, 1]} : vector<8x96xf32> to vector<8x32xf32>
    %203 = vector.extract_strided_slice %190 {offsets = [0, 64], sizes = [8, 32], strides = [1, 1]} : vector<8x96xf32> to vector<8x32xf32>
    %204 = vector.broadcast %41 : vector<1x32xf32> to vector<8x32xf32>
    %205 = arith.addf %203, %204 : vector<8x32xf32>
    %206 = arith.mulf %200, %205 : vector<8x32xf32>
    %207 = arith.addf %202, %206 : vector<8x32xf32>
    %208 = math.tanh %207 : vector<8x32xf32>
    %cst_45 = arith.constant 1.000000e+00 : f32
    %209 = vector.broadcast %cst_45 : f32 to vector<8x32xf32>
    %210 = arith.subf %209, %201 : vector<8x32xf32>
    %211 = arith.mulf %210, %208 : vector<8x32xf32>
    %212 = arith.mulf %201, %189 : vector<8x32xf32>
    %213 = arith.addf %211, %212 : vector<8x32xf32>
    %cst_46 = arith.constant dense<0.000000e+00> : vector<8x96xf32>
    %214 = tpu.matmul %213, %39, %cst_46 {dimension_numbers = #tpu.dot_dimension_numbers<[1], [0], [0], [1], [0, 0, 1, 1], [], []>} : vector<8x32xf32>, vector<32x96xf32>, vector<8x96xf32> -> vector<8x96xf32>
    %215 = vector.extract_strided_slice %44 {offsets = [56, 0], sizes = [8, 96], strides = [1, 1]} : vector<64x96xf32> to vector<8x96xf32>
    %216 = vector.extract_strided_slice %215 {offsets = [0, 0], sizes = [8, 64], strides = [1, 1]} : vector<8x96xf32> to vector<8x64xf32>
    %217 = vector.extract_strided_slice %214 {offsets = [0, 0], sizes = [8, 64], strides = [1, 1]} : vector<8x96xf32> to vector<8x64xf32>
    %218 = arith.addf %216, %217 : vector<8x64xf32>
    %219 = arith.negf %218 : vector<8x64xf32>
    %220 = math.exp %219 : vector<8x64xf32>
    %cst_47 = arith.constant 1.000000e+00 : f32
    %221 = vector.broadcast %cst_47 : f32 to vector<8x64xf32>
    %222 = arith.addf %221, %220 : vector<8x64xf32>
    %223 = arith.divf %221, %222 : vector<8x64xf32>
    %224 = vector.extract_strided_slice %223 {offsets = [0, 0], sizes = [8, 32], strides = [1, 1]} : vector<8x64xf32> to vector<8x32xf32>
    %225 = vector.extract_strided_slice %223 {offsets = [0, 32], sizes = [8, 32], strides = [1, 1]} : vector<8x64xf32> to vector<8x32xf32>
    %226 = vector.extract_strided_slice %215 {offsets = [0, 64], sizes = [8, 32], strides = [1, 1]} : vector<8x96xf32> to vector<8x32xf32>
    %227 = vector.extract_strided_slice %214 {offsets = [0, 64], sizes = [8, 32], strides = [1, 1]} : vector<8x96xf32> to vector<8x32xf32>
    %228 = vector.broadcast %41 : vector<1x32xf32> to vector<8x32xf32>
    %229 = arith.addf %227, %228 : vector<8x32xf32>
    %230 = arith.mulf %224, %229 : vector<8x32xf32>
    %231 = arith.addf %226, %230 : vector<8x32xf32>
    %232 = math.tanh %231 : vector<8x32xf32>
    %cst_48 = arith.constant 1.000000e+00 : f32
    %233 = vector.broadcast %cst_48 : f32 to vector<8x32xf32>
    %234 = arith.subf %233, %225 : vector<8x32xf32>
    %235 = arith.mulf %234, %232 : vector<8x32xf32>
    %236 = arith.mulf %225, %213 : vector<8x32xf32>
    %237 = arith.addf %235, %236 : vector<8x32xf32>
    %c0_49 = arith.constant 0 : index
    %c0_50 = arith.constant 0 : index
    %238 = vector.load %arg2[%c0_49, %c0_50] : memref<64x32xf32, #tpu.memory_space<vmem>>, vector<64x32xf32>
    %c0_51 = arith.constant 0 : index
    %c0_52 = arith.constant 0 : index
    %239 = vector.load %arg7[%c0_51, %c0_52] : memref<8x1xf32, #tpu.memory_space<vmem>>, vector<8x1xf32>
    %cst_53 = arith.constant 0.000000e+00 : f32
    %240 = vector.broadcast %cst_53 : f32 to vector<8x1xf32>
    %cst_54 = arith.constant 0.000000e+00 : f32
    %241 = vector.broadcast %cst_54 : f32 to vector<8x1xf32>
    %242 = vector.extract_strided_slice %238 {offsets = [0, 0], sizes = [8, 32], strides = [1, 1]} : vector<64x32xf32> to vector<8x32xf32>
    %243 = arith.addf %69, %242 : vector<8x32xf32>
    %244 = math.tanh %243 : vector<8x32xf32>
    %245 = vector.extract_strided_slice %36 {offsets = [0, 0], sizes = [8, 32], strides = [1, 1]} : vector<64x32xf32> to vector<8x32xf32>
    %246 = arith.subf %244, %245 : vector<8x32xf32>
    %247 = arith.mulf %246, %246 : vector<8x32xf32>
    %cst_55 = arith.constant dense<0.000000e+00> : vector<8xf32>
    %248 = vector.multi_reduction <add>, %247, %cst_55 [1] : vector<8x32xf32> to vector<8xf32>
    %249 = vector.shape_cast %248 : vector<8xf32> to vector<8x1xf32>
    %250 = arith.addf %240, %249 : vector<8x1xf32>
    %251 = arith.mulf %244, %244 : vector<8x32xf32>
    %cst_56 = arith.constant dense<0.000000e+00> : vector<8xf32>
    %252 = vector.multi_reduction <add>, %251, %cst_56 [1] : vector<8x32xf32> to vector<8xf32>
    %253 = vector.shape_cast %252 : vector<8xf32> to vector<8x1xf32>
    %254 = arith.addf %241, %253 : vector<8x1xf32>
    %255 = vector.extract_strided_slice %238 {offsets = [8, 0], sizes = [8, 32], strides = [1, 1]} : vector<64x32xf32> to vector<8x32xf32>
    %256 = arith.addf %93, %255 : vector<8x32xf32>
    %257 = math.tanh %256 : vector<8x32xf32>
    %258 = vector.extract_strided_slice %36 {offsets = [8, 0], sizes = [8, 32], strides = [1, 1]} : vector<64x32xf32> to vector<8x32xf32>
    %259 = arith.subf %257, %258 : vector<8x32xf32>
    %260 = arith.mulf %259, %259 : vector<8x32xf32>
    %cst_57 = arith.constant dense<0.000000e+00> : vector<8xf32>
    %261 = vector.multi_reduction <add>, %260, %cst_57 [1] : vector<8x32xf32> to vector<8xf32>
    %262 = vector.shape_cast %261 : vector<8xf32> to vector<8x1xf32>
    %263 = arith.addf %250, %262 : vector<8x1xf32>
    %264 = arith.mulf %257, %257 : vector<8x32xf32>
    %cst_58 = arith.constant dense<0.000000e+00> : vector<8xf32>
    %265 = vector.multi_reduction <add>, %264, %cst_58 [1] : vector<8x32xf32> to vector<8xf32>
    %266 = vector.shape_cast %265 : vector<8xf32> to vector<8x1xf32>
    %267 = arith.addf %254, %266 : vector<8x1xf32>
    %268 = vector.extract_strided_slice %238 {offsets = [16, 0], sizes = [8, 32], strides = [1, 1]} : vector<64x32xf32> to vector<8x32xf32>
    %269 = arith.addf %117, %268 : vector<8x32xf32>
    %270 = math.tanh %269 : vector<8x32xf32>
    %271 = vector.extract_strided_slice %36 {offsets = [16, 0], sizes = [8, 32], strides = [1, 1]} : vector<64x32xf32> to vector<8x32xf32>
    %272 = arith.subf %270, %271 : vector<8x32xf32>
    %273 = arith.mulf %272, %272 : vector<8x32xf32>
    %cst_59 = arith.constant dense<0.000000e+00> : vector<8xf32>
    %274 = vector.multi_reduction <add>, %273, %cst_59 [1] : vector<8x32xf32> to vector<8xf32>
    %275 = vector.shape_cast %274 : vector<8xf32> to vector<8x1xf32>
    %276 = arith.addf %263, %275 : vector<8x1xf32>
    %277 = arith.mulf %270, %270 : vector<8x32xf32>
    %cst_60 = arith.constant dense<0.000000e+00> : vector<8xf32>
    %278 = vector.multi_reduction <add>, %277, %cst_60 [1] : vector<8x32xf32> to vector<8xf32>
    %279 = vector.shape_cast %278 : vector<8xf32> to vector<8x1xf32>
    %280 = arith.addf %267, %279 : vector<8x1xf32>
    %281 = vector.extract_strided_slice %238 {offsets = [24, 0], sizes = [8, 32], strides = [1, 1]} : vector<64x32xf32> to vector<8x32xf32>
    %282 = arith.addf %141, %281 : vector<8x32xf32>
    %283 = math.tanh %282 : vector<8x32xf32>
    %284 = vector.extract_strided_slice %36 {offsets = [24, 0], sizes = [8, 32], strides = [1, 1]} : vector<64x32xf32> to vector<8x32xf32>
    %285 = arith.subf %283, %284 : vector<8x32xf32>
    %286 = arith.mulf %285, %285 : vector<8x32xf32>
    %cst_61 = arith.constant dense<0.000000e+00> : vector<8xf32>
    %287 = vector.multi_reduction <add>, %286, %cst_61 [1] : vector<8x32xf32> to vector<8xf32>
    %288 = vector.shape_cast %287 : vector<8xf32> to vector<8x1xf32>
    %289 = arith.addf %276, %288 : vector<8x1xf32>
    %290 = arith.mulf %283, %283 : vector<8x32xf32>
    %cst_62 = arith.constant dense<0.000000e+00> : vector<8xf32>
    %291 = vector.multi_reduction <add>, %290, %cst_62 [1] : vector<8x32xf32> to vector<8xf32>
    %292 = vector.shape_cast %291 : vector<8xf32> to vector<8x1xf32>
    %293 = arith.addf %280, %292 : vector<8x1xf32>
    %294 = vector.extract_strided_slice %238 {offsets = [32, 0], sizes = [8, 32], strides = [1, 1]} : vector<64x32xf32> to vector<8x32xf32>
    %295 = arith.addf %165, %294 : vector<8x32xf32>
    %296 = math.tanh %295 : vector<8x32xf32>
    %297 = vector.extract_strided_slice %36 {offsets = [32, 0], sizes = [8, 32], strides = [1, 1]} : vector<64x32xf32> to vector<8x32xf32>
    %298 = arith.subf %296, %297 : vector<8x32xf32>
    %299 = arith.mulf %298, %298 : vector<8x32xf32>
    %cst_63 = arith.constant dense<0.000000e+00> : vector<8xf32>
    %300 = vector.multi_reduction <add>, %299, %cst_63 [1] : vector<8x32xf32> to vector<8xf32>
    %301 = vector.shape_cast %300 : vector<8xf32> to vector<8x1xf32>
    %302 = arith.addf %289, %301 : vector<8x1xf32>
    %303 = arith.mulf %296, %296 : vector<8x32xf32>
    %cst_64 = arith.constant dense<0.000000e+00> : vector<8xf32>
    %304 = vector.multi_reduction <add>, %303, %cst_64 [1] : vector<8x32xf32> to vector<8xf32>
    %305 = vector.shape_cast %304 : vector<8xf32> to vector<8x1xf32>
    %306 = arith.addf %293, %305 : vector<8x1xf32>
    %307 = vector.extract_strided_slice %238 {offsets = [40, 0], sizes = [8, 32], strides = [1, 1]} : vector<64x32xf32> to vector<8x32xf32>
    %308 = arith.addf %189, %307 : vector<8x32xf32>
    %309 = math.tanh %308 : vector<8x32xf32>
    %310 = vector.extract_strided_slice %36 {offsets = [40, 0], sizes = [8, 32], strides = [1, 1]} : vector<64x32xf32> to vector<8x32xf32>
    %311 = arith.subf %309, %310 : vector<8x32xf32>
    %312 = arith.mulf %311, %311 : vector<8x32xf32>
    %cst_65 = arith.constant dense<0.000000e+00> : vector<8xf32>
    %313 = vector.multi_reduction <add>, %312, %cst_65 [1] : vector<8x32xf32> to vector<8xf32>
    %314 = vector.shape_cast %313 : vector<8xf32> to vector<8x1xf32>
    %315 = arith.addf %302, %314 : vector<8x1xf32>
    %316 = arith.mulf %309, %309 : vector<8x32xf32>
    %cst_66 = arith.constant dense<0.000000e+00> : vector<8xf32>
    %317 = vector.multi_reduction <add>, %316, %cst_66 [1] : vector<8x32xf32> to vector<8xf32>
    %318 = vector.shape_cast %317 : vector<8xf32> to vector<8x1xf32>
    %319 = arith.addf %306, %318 : vector<8x1xf32>
    %320 = vector.extract_strided_slice %238 {offsets = [48, 0], sizes = [8, 32], strides = [1, 1]} : vector<64x32xf32> to vector<8x32xf32>
    %321 = arith.addf %213, %320 : vector<8x32xf32>
    %322 = math.tanh %321 : vector<8x32xf32>
    %323 = vector.extract_strided_slice %36 {offsets = [48, 0], sizes = [8, 32], strides = [1, 1]} : vector<64x32xf32> to vector<8x32xf32>
    %324 = arith.subf %322, %323 : vector<8x32xf32>
    %325 = arith.mulf %324, %324 : vector<8x32xf32>
    %cst_67 = arith.constant dense<0.000000e+00> : vector<8xf32>
    %326 = vector.multi_reduction <add>, %325, %cst_67 [1] : vector<8x32xf32> to vector<8xf32>
    %327 = vector.shape_cast %326 : vector<8xf32> to vector<8x1xf32>
    %328 = arith.addf %315, %327 : vector<8x1xf32>
    %329 = arith.mulf %322, %322 : vector<8x32xf32>
    %cst_68 = arith.constant dense<0.000000e+00> : vector<8xf32>
    %330 = vector.multi_reduction <add>, %329, %cst_68 [1] : vector<8x32xf32> to vector<8xf32>
    %331 = vector.shape_cast %330 : vector<8xf32> to vector<8x1xf32>
    %332 = arith.addf %319, %331 : vector<8x1xf32>
    %333 = vector.extract_strided_slice %238 {offsets = [56, 0], sizes = [8, 32], strides = [1, 1]} : vector<64x32xf32> to vector<8x32xf32>
    %334 = arith.addf %237, %333 : vector<8x32xf32>
    %335 = math.tanh %334 : vector<8x32xf32>
    %336 = vector.extract_strided_slice %36 {offsets = [56, 0], sizes = [8, 32], strides = [1, 1]} : vector<64x32xf32> to vector<8x32xf32>
    %337 = arith.subf %335, %336 : vector<8x32xf32>
    %338 = arith.mulf %337, %337 : vector<8x32xf32>
    %cst_69 = arith.constant dense<0.000000e+00> : vector<8xf32>
    %339 = vector.multi_reduction <add>, %338, %cst_69 [1] : vector<8x32xf32> to vector<8xf32>
    %340 = vector.shape_cast %339 : vector<8xf32> to vector<8x1xf32>
    %341 = arith.addf %328, %340 : vector<8x1xf32>
    %342 = arith.mulf %335, %335 : vector<8x32xf32>
    %cst_70 = arith.constant dense<0.000000e+00> : vector<8xf32>
    %343 = vector.multi_reduction <add>, %342, %cst_70 [1] : vector<8x32xf32> to vector<8xf32>
    %344 = vector.shape_cast %343 : vector<8xf32> to vector<8x1xf32>
    %345 = arith.addf %332, %344 : vector<8x1xf32>
    %346 = tpu.concatenate %244, %257, %270, %283, %296, %309, %322, %335 in 0 : vector<8x32xf32>, vector<8x32xf32>, vector<8x32xf32>, vector<8x32xf32>, vector<8x32xf32>, vector<8x32xf32>, vector<8x32xf32>, vector<8x32xf32> -> vector<64x32xf32>
    %c0_71 = arith.constant 0 : index
    %c0_72 = arith.constant 0 : index
    %347 = vector.load %arg9[%c0_71, %c0_72] : memref<64x32xf32, #tpu.memory_space<vmem>>, vector<64x32xf32>
    tpu.vector_store %arg9[%c0_71, %c0_72], %346 {strides = array<i32>} : memref<64x32xf32, #tpu.memory_space<vmem>>, vector<64x32xf32>,
    %348 = arith.mulf %341, %239 : vector<8x1xf32>
    %cst_73 = arith.constant dense<0.000000e+00> : vector<1xf32>
    %349 = vector.multi_reduction <add>, %348, %cst_73 [0] : vector<8x1xf32> to vector<1xf32>
    %350 = vector.shape_cast %349 : vector<1xf32> to vector<1x1xf32>
    %c0_74 = arith.constant 0 : index
    %c0_75 = arith.constant 0 : index
    %351 = vector.load %arg10[%c0_74, %c0_75] : memref<1x1xf32, #tpu.memory_space<vmem>>, vector<1x1xf32>
    tpu.vector_store %arg10[%c0_74, %c0_75], %350 {strides = array<i32>} : memref<1x1xf32, #tpu.memory_space<vmem>>, vector<1x1xf32>,
    %352 = arith.mulf %345, %239 : vector<8x1xf32>
    %cst_76 = arith.constant dense<0.000000e+00> : vector<1xf32>
    %353 = vector.multi_reduction <add>, %352, %cst_76 [0] : vector<8x1xf32> to vector<1xf32>
    %354 = vector.shape_cast %353 : vector<1xf32> to vector<1x1xf32>
    %c0_77 = arith.constant 0 : index
    %c0_78 = arith.constant 0 : index
    %355 = vector.load %arg11[%c0_77, %c0_78] : memref<1x1xf32, #tpu.memory_space<vmem>>, vector<1x1xf32>
    tpu.vector_store %arg11[%c0_77, %c0_78], %354 {strides = array<i32>} : memref<1x1xf32, #tpu.memory_space<vmem>>, vector<1x1xf32>,
    return
  }
}

module attributes {stable_mosaic.version = 11 : i64} {
  func.func @func_combine_kernel(%arg0: memref<8x6xf32, #tpu.memory_space<vmem>>, %arg1: memref<6x64x32xf32, #tpu.memory_space<vmem>>, %arg2: memref<64x32xf32, #tpu.memory_space<vmem>>, %arg3: memref<32x96xf32, #tpu.memory_space<vmem>>, %arg4: memref<32x96xf32, #tpu.memory_space<vmem>>, %arg5: memref<1x96xf32, #tpu.memory_space<vmem>>, %arg6: memref<1x32xf32, #tpu.memory_space<vmem>>, %arg7: memref<8x1xf32, #tpu.memory_space<vmem>>, %arg8: memref<64x32xf32, #tpu.memory_space<vmem>>, %arg9: memref<64x32xf32, #tpu.memory_space<vmem>>, %arg10: memref<1x1xf32, #tpu.memory_space<vmem>>, %arg11: memref<1x1xf32, #tpu.memory_space<vmem>>) attributes {dimension_semantics = [], scalar_prefetch = 0 : i64, scratch_operands = 0 : i64, tpu.core_type = #tpu.core_type<tc>} {
    %c0 = arith.constant 0 : index
    %c0_0 = arith.constant 0 : index
    %0 = vector.load %arg0[%c0, %c0_0] : memref<8x6xf32, #tpu.memory_space<vmem>>, vector<8x6xf32>
    %1 = tpu.concatenate %0, %0, %0, %0, %0, %0, %0, %0 in 0 : vector<8x6xf32>, vector<8x6xf32>, vector<8x6xf32>, vector<8x6xf32>, vector<8x6xf32>, vector<8x6xf32>, vector<8x6xf32>, vector<8x6xf32> -> vector<64x6xf32>
    %2 = vector.extract_strided_slice %1 {offsets = [0, 0], sizes = [64, 1], strides = [1, 1]} : vector<64x6xf32> to vector<64x1xf32>
    %c0_1 = arith.constant 0 : index
    %c0_2 = arith.constant 0 : index
    %c0_3 = arith.constant 0 : index
    %3 = vector.load %arg1[%c0_1, %c0_2, %c0_3] : memref<6x64x32xf32, #tpu.memory_space<vmem>>, vector<1x64x32xf32>
    %4 = vector.shape_cast %3 : vector<1x64x32xf32> to vector<64x32xf32>
    %5 = vector.broadcast %2 : vector<64x1xf32> to vector<64x32xf32>
    %6 = arith.mulf %5, %4 : vector<64x32xf32>
    %7 = vector.extract_strided_slice %1 {offsets = [0, 1], sizes = [64, 1], strides = [1, 1]} : vector<64x6xf32> to vector<64x1xf32>
    %c1 = arith.constant 1 : index
    %c0_4 = arith.constant 0 : index
    %c0_5 = arith.constant 0 : index
    %8 = vector.load %arg1[%c1, %c0_4, %c0_5] : memref<6x64x32xf32, #tpu.memory_space<vmem>>, vector<1x64x32xf32>
    %9 = vector.shape_cast %8 : vector<1x64x32xf32> to vector<64x32xf32>
    %10 = vector.broadcast %7 : vector<64x1xf32> to vector<64x32xf32>
    %11 = arith.mulf %10, %9 : vector<64x32xf32>
    %12 = arith.addf %6, %11 : vector<64x32xf32>
    %13 = vector.extract_strided_slice %1 {offsets = [0, 2], sizes = [64, 1], strides = [1, 1]} : vector<64x6xf32> to vector<64x1xf32>
    %c2 = arith.constant 2 : index
    %c0_6 = arith.constant 0 : index
    %c0_7 = arith.constant 0 : index
    %14 = vector.load %arg1[%c2, %c0_6, %c0_7] : memref<6x64x32xf32, #tpu.memory_space<vmem>>, vector<1x64x32xf32>
    %15 = vector.shape_cast %14 : vector<1x64x32xf32> to vector<64x32xf32>
    %16 = vector.broadcast %13 : vector<64x1xf32> to vector<64x32xf32>
    %17 = arith.mulf %16, %15 : vector<64x32xf32>
    %18 = arith.addf %12, %17 : vector<64x32xf32>
    %19 = vector.extract_strided_slice %1 {offsets = [0, 3], sizes = [64, 1], strides = [1, 1]} : vector<64x6xf32> to vector<64x1xf32>
    %c3 = arith.constant 3 : index
    %c0_8 = arith.constant 0 : index
    %c0_9 = arith.constant 0 : index
    %20 = vector.load %arg1[%c3, %c0_8, %c0_9] : memref<6x64x32xf32, #tpu.memory_space<vmem>>, vector<1x64x32xf32>
    %21 = vector.shape_cast %20 : vector<1x64x32xf32> to vector<64x32xf32>
    %22 = vector.broadcast %19 : vector<64x1xf32> to vector<64x32xf32>
    %23 = arith.mulf %22, %21 : vector<64x32xf32>
    %24 = arith.addf %18, %23 : vector<64x32xf32>
    %25 = vector.extract_strided_slice %1 {offsets = [0, 4], sizes = [64, 1], strides = [1, 1]} : vector<64x6xf32> to vector<64x1xf32>
    %c4 = arith.constant 4 : index
    %c0_10 = arith.constant 0 : index
    %c0_11 = arith.constant 0 : index
    %26 = vector.load %arg1[%c4, %c0_10, %c0_11] : memref<6x64x32xf32, #tpu.memory_space<vmem>>, vector<1x64x32xf32>
    %27 = vector.shape_cast %26 : vector<1x64x32xf32> to vector<64x32xf32>
    %28 = vector.broadcast %25 : vector<64x1xf32> to vector<64x32xf32>
    %29 = arith.mulf %28, %27 : vector<64x32xf32>
    %30 = arith.addf %24, %29 : vector<64x32xf32>
    %31 = vector.extract_strided_slice %1 {offsets = [0, 5], sizes = [64, 1], strides = [1, 1]} : vector<64x6xf32> to vector<64x1xf32>
    %c5 = arith.constant 5 : index
    %c0_12 = arith.constant 0 : index
    %c0_13 = arith.constant 0 : index
    %32 = vector.load %arg1[%c5, %c0_12, %c0_13] : memref<6x64x32xf32, #tpu.memory_space<vmem>>, vector<1x64x32xf32>
    %33 = vector.shape_cast %32 : vector<1x64x32xf32> to vector<64x32xf32>
    %34 = vector.broadcast %31 : vector<64x1xf32> to vector<64x32xf32>
    %35 = arith.mulf %34, %33 : vector<64x32xf32>
    %36 = arith.addf %30, %35 : vector<64x32xf32>
    %c0_14 = arith.constant 0 : index
    %c0_15 = arith.constant 0 : index
    %37 = vector.load %arg8[%c0_14, %c0_15] : memref<64x32xf32, #tpu.memory_space<vmem>>, vector<64x32xf32>
    tpu.vector_store %arg8[%c0_14, %c0_15], %36 {strides = array<i32>} : memref<64x32xf32, #tpu.memory_space<vmem>>, vector<64x32xf32>,
    %c0_16 = arith.constant 0 : index
    %c0_17 = arith.constant 0 : index
    %38 = vector.load %arg3[%c0_16, %c0_17] : memref<32x96xf32, #tpu.memory_space<vmem>>, vector<32x96xf32>
    %c0_18 = arith.constant 0 : index
    %c0_19 = arith.constant 0 : index
    %39 = vector.load %arg4[%c0_18, %c0_19] : memref<32x96xf32, #tpu.memory_space<vmem>>, vector<32x96xf32>
    %c0_20 = arith.constant 0 : index
    %c0_21 = arith.constant 0 : index
    %40 = vector.load %arg5[%c0_20, %c0_21] : memref<1x96xf32, #tpu.memory_space<vmem>>, vector<1x96xf32>
    %c0_22 = arith.constant 0 : index
    %c0_23 = arith.constant 0 : index
    %41 = vector.load %arg6[%c0_22, %c0_23] : memref<1x32xf32, #tpu.memory_space<vmem>>, vector<1x32xf32>
    %cst = arith.constant dense<0.000000e+00> : vector<64x96xf32>
    %42 = tpu.matmul %36, %38, %cst {dimension_numbers = #tpu.dot_dimension_numbers<[1], [0], [0], [1], [0, 0, 1, 1], [], []>} : vector<64x32xf32>, vector<32x96xf32>, vector<64x96xf32> -> vector<64x96xf32>
    %43 = vector.broadcast %40 : vector<1x96xf32> to vector<64x96xf32>
    %44 = arith.addf %42, %43 : vector<64x96xf32>
    %cst_24 = arith.constant 0.000000e+00 : f32
    %45 = vector.broadcast %cst_24 : f32 to vector<8x32xf32>
    %cst_25 = arith.constant dense<0.000000e+00> : vector<8x96xf32>
    %46 = tpu.matmul %45, %39, %cst_25 {dimension_numbers = #tpu.dot_dimension_numbers<[1], [0], [0], [1], [0, 0, 1, 1], [], []>} : vector<8x32xf32>, vector<32x96xf32>, vector<8x96xf32> -> vector<8x96xf32>
    %47 = vector.extract_strided_slice %44 {offsets = [0, 0], sizes = [8, 96], strides = [1, 1]} : vector<64x96xf32> to vector<8x96xf32>
    %48 = vector.extract_strided_slice %47 {offsets = [0, 0], sizes = [8, 64], strides = [1, 1]} : vector<8x96xf32> to vector<8x64xf32>
    %49 = vector.extract_strided_slice %46 {offsets = [0, 0], sizes = [8, 64], strides = [1, 1]} : vector<8x96xf32> to vector<8x64xf32>
    %50 = arith.addf %48, %49 : vector<8x64xf32>
    %51 = arith.negf %50 : vector<8x64xf32>
    %52 = math.exp %51 : vector<8x64xf32>
    %cst_26 = arith.constant 1.000000e+00 : f32
    %53 = vector.broadcast %cst_26 : f32 to vector<8x64xf32>
    %54 = arith.addf %53, %52 : vector<8x64xf32>
    %55 = arith.divf %53, %54 : vector<8x64xf32>
    %56 = vector.extract_strided_slice %55 {offsets = [0, 0], sizes = [8, 32], strides = [1, 1]} : vector<8x64xf32> to vector<8x32xf32>
    %57 = vector.extract_strided_slice %55 {offsets = [0, 32], sizes = [8, 32], strides = [1, 1]} : vector<8x64xf32> to vector<8x32xf32>
    %58 = vector.extract_strided_slice %47 {offsets = [0, 64], sizes = [8, 32], strides = [1, 1]} : vector<8x96xf32> to vector<8x32xf32>
    %59 = vector.extract_strided_slice %46 {offsets = [0, 64], sizes = [8, 32], strides = [1, 1]} : vector<8x96xf32> to vector<8x32xf32>
    %60 = vector.broadcast %41 : vector<1x32xf32> to vector<8x32xf32>
    %61 = arith.addf %59, %60 : vector<8x32xf32>
    %62 = arith.mulf %56, %61 : vector<8x32xf32>
    %63 = arith.addf %58, %62 : vector<8x32xf32>
    %64 = math.tanh %63 : vector<8x32xf32>
    %cst_27 = arith.constant 1.000000e+00 : f32
    %65 = vector.broadcast %cst_27 : f32 to vector<8x32xf32>
    %66 = arith.subf %65, %57 : vector<8x32xf32>
    %67 = arith.mulf %66, %64 : vector<8x32xf32>
    %68 = arith.mulf %57, %45 : vector<8x32xf32>
    %69 = arith.addf %67, %68 : vector<8x32xf32>
    %cst_28 = arith.constant dense<0.000000e+00> : vector<8x96xf32>
    %70 = tpu.matmul %69, %39, %cst_28 {dimension_numbers = #tpu.dot_dimension_numbers<[1], [0], [0], [1], [0, 0, 1, 1], [], []>} : vector<8x32xf32>, vector<32x96xf32>, vector<8x96xf32> -> vector<8x96xf32>
    %71 = vector.extract_strided_slice %44 {offsets = [8, 0], sizes = [8, 96], strides = [1, 1]} : vector<64x96xf32> to vector<8x96xf32>
    %72 = vector.extract_strided_slice %71 {offsets = [0, 0], sizes = [8, 64], strides = [1, 1]} : vector<8x96xf32> to vector<8x64xf32>
    %73 = vector.extract_strided_slice %70 {offsets = [0, 0], sizes = [8, 64], strides = [1, 1]} : vector<8x96xf32> to vector<8x64xf32>
    %74 = arith.addf %72, %73 : vector<8x64xf32>
    %75 = arith.negf %74 : vector<8x64xf32>
    %76 = math.exp %75 : vector<8x64xf32>
    %cst_29 = arith.constant 1.000000e+00 : f32
    %77 = vector.broadcast %cst_29 : f32 to vector<8x64xf32>
    %78 = arith.addf %77, %76 : vector<8x64xf32>
    %79 = arith.divf %77, %78 : vector<8x64xf32>
    %80 = vector.extract_strided_slice %79 {offsets = [0, 0], sizes = [8, 32], strides = [1, 1]} : vector<8x64xf32> to vector<8x32xf32>
    %81 = vector.extract_strided_slice %79 {offsets = [0, 32], sizes = [8, 32], strides = [1, 1]} : vector<8x64xf32> to vector<8x32xf32>
    %82 = vector.extract_strided_slice %71 {offsets = [0, 64], sizes = [8, 32], strides = [1, 1]} : vector<8x96xf32> to vector<8x32xf32>
    %83 = vector.extract_strided_slice %70 {offsets = [0, 64], sizes = [8, 32], strides = [1, 1]} : vector<8x96xf32> to vector<8x32xf32>
    %84 = vector.broadcast %41 : vector<1x32xf32> to vector<8x32xf32>
    %85 = arith.addf %83, %84 : vector<8x32xf32>
    %86 = arith.mulf %80, %85 : vector<8x32xf32>
    %87 = arith.addf %82, %86 : vector<8x32xf32>
    %88 = math.tanh %87 : vector<8x32xf32>
    %cst_30 = arith.constant 1.000000e+00 : f32
    %89 = vector.broadcast %cst_30 : f32 to vector<8x32xf32>
    %90 = arith.subf %89, %81 : vector<8x32xf32>
    %91 = arith.mulf %90, %88 : vector<8x32xf32>
    %92 = arith.mulf %81, %69 : vector<8x32xf32>
    %93 = arith.addf %91, %92 : vector<8x32xf32>
    %cst_31 = arith.constant dense<0.000000e+00> : vector<8x96xf32>
    %94 = tpu.matmul %93, %39, %cst_31 {dimension_numbers = #tpu.dot_dimension_numbers<[1], [0], [0], [1], [0, 0, 1, 1], [], []>} : vector<8x32xf32>, vector<32x96xf32>, vector<8x96xf32> -> vector<8x96xf32>
    %95 = vector.extract_strided_slice %44 {offsets = [16, 0], sizes = [8, 96], strides = [1, 1]} : vector<64x96xf32> to vector<8x96xf32>
    %96 = vector.extract_strided_slice %95 {offsets = [0, 0], sizes = [8, 64], strides = [1, 1]} : vector<8x96xf32> to vector<8x64xf32>
    %97 = vector.extract_strided_slice %94 {offsets = [0, 0], sizes = [8, 64], strides = [1, 1]} : vector<8x96xf32> to vector<8x64xf32>
    %98 = arith.addf %96, %97 : vector<8x64xf32>
    %99 = arith.negf %98 : vector<8x64xf32>
    %100 = math.exp %99 : vector<8x64xf32>
    %cst_32 = arith.constant 1.000000e+00 : f32
    %101 = vector.broadcast %cst_32 : f32 to vector<8x64xf32>
    %102 = arith.addf %101, %100 : vector<8x64xf32>
    %103 = arith.divf %101, %102 : vector<8x64xf32>
    %104 = vector.extract_strided_slice %103 {offsets = [0, 0], sizes = [8, 32], strides = [1, 1]} : vector<8x64xf32> to vector<8x32xf32>
    %105 = vector.extract_strided_slice %103 {offsets = [0, 32], sizes = [8, 32], strides = [1, 1]} : vector<8x64xf32> to vector<8x32xf32>
    %106 = vector.extract_strided_slice %95 {offsets = [0, 64], sizes = [8, 32], strides = [1, 1]} : vector<8x96xf32> to vector<8x32xf32>
    %107 = vector.extract_strided_slice %94 {offsets = [0, 64], sizes = [8, 32], strides = [1, 1]} : vector<8x96xf32> to vector<8x32xf32>
    %108 = vector.broadcast %41 : vector<1x32xf32> to vector<8x32xf32>
    %109 = arith.addf %107, %108 : vector<8x32xf32>
    %110 = arith.mulf %104, %109 : vector<8x32xf32>
    %111 = arith.addf %106, %110 : vector<8x32xf32>
    %112 = math.tanh %111 : vector<8x32xf32>
    %cst_33 = arith.constant 1.000000e+00 : f32
    %113 = vector.broadcast %cst_33 : f32 to vector<8x32xf32>
    %114 = arith.subf %113, %105 : vector<8x32xf32>
    %115 = arith.mulf %114, %112 : vector<8x32xf32>
    %116 = arith.mulf %105, %93 : vector<8x32xf32>
    %117 = arith.addf %115, %116 : vector<8x32xf32>
    %cst_34 = arith.constant dense<0.000000e+00> : vector<8x96xf32>
    %118 = tpu.matmul %117, %39, %cst_34 {dimension_numbers = #tpu.dot_dimension_numbers<[1], [0], [0], [1], [0, 0, 1, 1], [], []>} : vector<8x32xf32>, vector<32x96xf32>, vector<8x96xf32> -> vector<8x96xf32>
    %119 = vector.extract_strided_slice %44 {offsets = [24, 0], sizes = [8, 96], strides = [1, 1]} : vector<64x96xf32> to vector<8x96xf32>
    %120 = vector.extract_strided_slice %119 {offsets = [0, 0], sizes = [8, 64], strides = [1, 1]} : vector<8x96xf32> to vector<8x64xf32>
    %121 = vector.extract_strided_slice %118 {offsets = [0, 0], sizes = [8, 64], strides = [1, 1]} : vector<8x96xf32> to vector<8x64xf32>
    %122 = arith.addf %120, %121 : vector<8x64xf32>
    %123 = arith.negf %122 : vector<8x64xf32>
    %124 = math.exp %123 : vector<8x64xf32>
    %cst_35 = arith.constant 1.000000e+00 : f32
    %125 = vector.broadcast %cst_35 : f32 to vector<8x64xf32>
    %126 = arith.addf %125, %124 : vector<8x64xf32>
    %127 = arith.divf %125, %126 : vector<8x64xf32>
    %128 = vector.extract_strided_slice %127 {offsets = [0, 0], sizes = [8, 32], strides = [1, 1]} : vector<8x64xf32> to vector<8x32xf32>
    %129 = vector.extract_strided_slice %127 {offsets = [0, 32], sizes = [8, 32], strides = [1, 1]} : vector<8x64xf32> to vector<8x32xf32>
    %130 = vector.extract_strided_slice %119 {offsets = [0, 64], sizes = [8, 32], strides = [1, 1]} : vector<8x96xf32> to vector<8x32xf32>
    %131 = vector.extract_strided_slice %118 {offsets = [0, 64], sizes = [8, 32], strides = [1, 1]} : vector<8x96xf32> to vector<8x32xf32>
    %132 = vector.broadcast %41 : vector<1x32xf32> to vector<8x32xf32>
    %133 = arith.addf %131, %132 : vector<8x32xf32>
    %134 = arith.mulf %128, %133 : vector<8x32xf32>
    %135 = arith.addf %130, %134 : vector<8x32xf32>
    %136 = math.tanh %135 : vector<8x32xf32>
    %cst_36 = arith.constant 1.000000e+00 : f32
    %137 = vector.broadcast %cst_36 : f32 to vector<8x32xf32>
    %138 = arith.subf %137, %129 : vector<8x32xf32>
    %139 = arith.mulf %138, %136 : vector<8x32xf32>
    %140 = arith.mulf %129, %117 : vector<8x32xf32>
    %141 = arith.addf %139, %140 : vector<8x32xf32>
    %cst_37 = arith.constant dense<0.000000e+00> : vector<8x96xf32>
    %142 = tpu.matmul %141, %39, %cst_37 {dimension_numbers = #tpu.dot_dimension_numbers<[1], [0], [0], [1], [0, 0, 1, 1], [], []>} : vector<8x32xf32>, vector<32x96xf32>, vector<8x96xf32> -> vector<8x96xf32>
    %143 = vector.extract_strided_slice %44 {offsets = [32, 0], sizes = [8, 96], strides = [1, 1]} : vector<64x96xf32> to vector<8x96xf32>
    %144 = vector.extract_strided_slice %143 {offsets = [0, 0], sizes = [8, 64], strides = [1, 1]} : vector<8x96xf32> to vector<8x64xf32>
    %145 = vector.extract_strided_slice %142 {offsets = [0, 0], sizes = [8, 64], strides = [1, 1]} : vector<8x96xf32> to vector<8x64xf32>
    %146 = arith.addf %144, %145 : vector<8x64xf32>
    %147 = arith.negf %146 : vector<8x64xf32>
    %148 = math.exp %147 : vector<8x64xf32>
    %cst_38 = arith.constant 1.000000e+00 : f32
    %149 = vector.broadcast %cst_38 : f32 to vector<8x64xf32>
    %150 = arith.addf %149, %148 : vector<8x64xf32>
    %151 = arith.divf %149, %150 : vector<8x64xf32>
    %152 = vector.extract_strided_slice %151 {offsets = [0, 0], sizes = [8, 32], strides = [1, 1]} : vector<8x64xf32> to vector<8x32xf32>
    %153 = vector.extract_strided_slice %151 {offsets = [0, 32], sizes = [8, 32], strides = [1, 1]} : vector<8x64xf32> to vector<8x32xf32>
    %154 = vector.extract_strided_slice %143 {offsets = [0, 64], sizes = [8, 32], strides = [1, 1]} : vector<8x96xf32> to vector<8x32xf32>
    %155 = vector.extract_strided_slice %142 {offsets = [0, 64], sizes = [8, 32], strides = [1, 1]} : vector<8x96xf32> to vector<8x32xf32>
    %156 = vector.broadcast %41 : vector<1x32xf32> to vector<8x32xf32>
    %157 = arith.addf %155, %156 : vector<8x32xf32>
    %158 = arith.mulf %152, %157 : vector<8x32xf32>
    %159 = arith.addf %154, %158 : vector<8x32xf32>
    %160 = math.tanh %159 : vector<8x32xf32>
    %cst_39 = arith.constant 1.000000e+00 : f32
    %161 = vector.broadcast %cst_39 : f32 to vector<8x32xf32>
    %162 = arith.subf %161, %153 : vector<8x32xf32>
    %163 = arith.mulf %162, %160 : vector<8x32xf32>
    %164 = arith.mulf %153, %141 : vector<8x32xf32>
    %165 = arith.addf %163, %164 : vector<8x32xf32>
    %cst_40 = arith.constant dense<0.000000e+00> : vector<8x96xf32>
    %166 = tpu.matmul %165, %39, %cst_40 {dimension_numbers = #tpu.dot_dimension_numbers<[1], [0], [0], [1], [0, 0, 1, 1], [], []>} : vector<8x32xf32>, vector<32x96xf32>, vector<8x96xf32> -> vector<8x96xf32>
    %167 = vector.extract_strided_slice %44 {offsets = [40, 0], sizes = [8, 96], strides = [1, 1]} : vector<64x96xf32> to vector<8x96xf32>
    %168 = vector.extract_strided_slice %167 {offsets = [0, 0], sizes = [8, 64], strides = [1, 1]} : vector<8x96xf32> to vector<8x64xf32>
    %169 = vector.extract_strided_slice %166 {offsets = [0, 0], sizes = [8, 64], strides = [1, 1]} : vector<8x96xf32> to vector<8x64xf32>
    %170 = arith.addf %168, %169 : vector<8x64xf32>
    %171 = arith.negf %170 : vector<8x64xf32>
    %172 = math.exp %171 : vector<8x64xf32>
    %cst_41 = arith.constant 1.000000e+00 : f32
    %173 = vector.broadcast %cst_41 : f32 to vector<8x64xf32>
    %174 = arith.addf %173, %172 : vector<8x64xf32>
    %175 = arith.divf %173, %174 : vector<8x64xf32>
    %176 = vector.extract_strided_slice %175 {offsets = [0, 0], sizes = [8, 32], strides = [1, 1]} : vector<8x64xf32> to vector<8x32xf32>
    %177 = vector.extract_strided_slice %175 {offsets = [0, 32], sizes = [8, 32], strides = [1, 1]} : vector<8x64xf32> to vector<8x32xf32>
    %178 = vector.extract_strided_slice %167 {offsets = [0, 64], sizes = [8, 32], strides = [1, 1]} : vector<8x96xf32> to vector<8x32xf32>
    %179 = vector.extract_strided_slice %166 {offsets = [0, 64], sizes = [8, 32], strides = [1, 1]} : vector<8x96xf32> to vector<8x32xf32>
    %180 = vector.broadcast %41 : vector<1x32xf32> to vector<8x32xf32>
    %181 = arith.addf %179, %180 : vector<8x32xf32>
    %182 = arith.mulf %176, %181 : vector<8x32xf32>
    %183 = arith.addf %178, %182 : vector<8x32xf32>
    %184 = math.tanh %183 : vector<8x32xf32>
    %cst_42 = arith.constant 1.000000e+00 : f32
    %185 = vector.broadcast %cst_42 : f32 to vector<8x32xf32>
    %186 = arith.subf %185, %177 : vector<8x32xf32>
    %187 = arith.mulf %186, %184 : vector<8x32xf32>
    %188 = arith.mulf %177, %165 : vector<8x32xf32>
    %189 = arith.addf %187, %188 : vector<8x32xf32>
    %cst_43 = arith.constant dense<0.000000e+00> : vector<8x96xf32>
    %190 = tpu.matmul %189, %39, %cst_43 {dimension_numbers = #tpu.dot_dimension_numbers<[1], [0], [0], [1], [0, 0, 1, 1], [], []>} : vector<8x32xf32>, vector<32x96xf32>, vector<8x96xf32> -> vector<8x96xf32>
    %191 = vector.extract_strided_slice %44 {offsets = [48, 0], sizes = [8, 96], strides = [1, 1]} : vector<64x96xf32> to vector<8x96xf32>
    %192 = vector.extract_strided_slice %191 {offsets = [0, 0], sizes = [8, 64], strides = [1, 1]} : vector<8x96xf32> to vector<8x64xf32>
    %193 = vector.extract_strided_slice %190 {offsets = [0, 0], sizes = [8, 64], strides = [1, 1]} : vector<8x96xf32> to vector<8x64xf32>
    %194 = arith.addf %192, %193 : vector<8x64xf32>
    %195 = arith.negf %194 : vector<8x64xf32>
    %196 = math.exp %195 : vector<8x64xf32>
    %cst_44 = arith.constant 1.000000e+00 : f32
    %197 = vector.broadcast %cst_44 : f32 to vector<8x64xf32>
    %198 = arith.addf %197, %196 : vector<8x64xf32>
    %199 = arith.divf %197, %198 : vector<8x64xf32>
    %200 = vector.extract_strided_slice %199 {offsets = [0, 0], sizes = [8, 32], strides = [1, 1]} : vector<8x64xf32> to vector<8x32xf32>
    %201 = vector.extract_strided_slice %199 {offsets = [0, 32], sizes = [8, 32], strides = [1, 1]} : vector<8x64xf32> to vector<8x32xf32>
    %202 = vector.extract_strided_slice %191 {offsets = [0, 64], sizes = [8, 32], strides = [1, 1]} : vector<8x96xf32> to vector<8x32xf32>
    %203 = vector.extract_strided_slice %190 {offsets = [0, 64], sizes = [8, 32], strides = [1, 1]} : vector<8x96xf32> to vector<8x32xf32>
    %204 = vector.broadcast %41 : vector<1x32xf32> to vector<8x32xf32>
    %205 = arith.addf %203, %204 : vector<8x32xf32>
    %206 = arith.mulf %200, %205 : vector<8x32xf32>
    %207 = arith.addf %202, %206 : vector<8x32xf32>
    %208 = math.tanh %207 : vector<8x32xf32>
    %cst_45 = arith.constant 1.000000e+00 : f32
    %209 = vector.broadcast %cst_45 : f32 to vector<8x32xf32>
    %210 = arith.subf %209, %201 : vector<8x32xf32>
    %211 = arith.mulf %210, %208 : vector<8x32xf32>
    %212 = arith.mulf %201, %189 : vector<8x32xf32>
    %213 = arith.addf %211, %212 : vector<8x32xf32>
    %cst_46 = arith.constant dense<0.000000e+00> : vector<8x96xf32>
    %214 = tpu.matmul %213, %39, %cst_46 {dimension_numbers = #tpu.dot_dimension_numbers<[1], [0], [0], [1], [0, 0, 1, 1], [], []>} : vector<8x32xf32>, vector<32x96xf32>, vector<8x96xf32> -> vector<8x96xf32>
    %215 = vector.extract_strided_slice %44 {offsets = [56, 0], sizes = [8, 96], strides = [1, 1]} : vector<64x96xf32> to vector<8x96xf32>
    %216 = vector.extract_strided_slice %215 {offsets = [0, 0], sizes = [8, 64], strides = [1, 1]} : vector<8x96xf32> to vector<8x64xf32>
    %217 = vector.extract_strided_slice %214 {offsets = [0, 0], sizes = [8, 64], strides = [1, 1]} : vector<8x96xf32> to vector<8x64xf32>
    %218 = arith.addf %216, %217 : vector<8x64xf32>
    %219 = arith.negf %218 : vector<8x64xf32>
    %220 = math.exp %219 : vector<8x64xf32>
    %cst_47 = arith.constant 1.000000e+00 : f32
    %221 = vector.broadcast %cst_47 : f32 to vector<8x64xf32>
    %222 = arith.addf %221, %220 : vector<8x64xf32>
    %223 = arith.divf %221, %222 : vector<8x64xf32>
    %224 = vector.extract_strided_slice %223 {offsets = [0, 0], sizes = [8, 32], strides = [1, 1]} : vector<8x64xf32> to vector<8x32xf32>
    %225 = vector.extract_strided_slice %223 {offsets = [0, 32], sizes = [8, 32], strides = [1, 1]} : vector<8x64xf32> to vector<8x32xf32>
    %226 = vector.extract_strided_slice %215 {offsets = [0, 64], sizes = [8, 32], strides = [1, 1]} : vector<8x96xf32> to vector<8x32xf32>
    %227 = vector.extract_strided_slice %214 {offsets = [0, 64], sizes = [8, 32], strides = [1, 1]} : vector<8x96xf32> to vector<8x32xf32>
    %228 = vector.broadcast %41 : vector<1x32xf32> to vector<8x32xf32>
    %229 = arith.addf %227, %228 : vector<8x32xf32>
    %230 = arith.mulf %224, %229 : vector<8x32xf32>
    %231 = arith.addf %226, %230 : vector<8x32xf32>
    %232 = math.tanh %231 : vector<8x32xf32>
    %cst_48 = arith.constant 1.000000e+00 : f32
    %233 = vector.broadcast %cst_48 : f32 to vector<8x32xf32>
    %234 = arith.subf %233, %225 : vector<8x32xf32>
    %235 = arith.mulf %234, %232 : vector<8x32xf32>
    %236 = arith.mulf %225, %213 : vector<8x32xf32>
    %237 = arith.addf %235, %236 : vector<8x32xf32>
    %c0_49 = arith.constant 0 : index
    %c0_50 = arith.constant 0 : index
    %238 = vector.load %arg2[%c0_49, %c0_50] : memref<64x32xf32, #tpu.memory_space<vmem>>, vector<64x32xf32>
    %c0_51 = arith.constant 0 : index
    %c0_52 = arith.constant 0 : index
    %239 = vector.load %arg7[%c0_51, %c0_52] : memref<8x1xf32, #tpu.memory_space<vmem>>, vector<8x1xf32>
    %cst_53 = arith.constant 0.000000e+00 : f32
    %240 = vector.broadcast %cst_53 : f32 to vector<8x1xf32>
    %cst_54 = arith.constant 0.000000e+00 : f32
    %241 = vector.broadcast %cst_54 : f32 to vector<8x1xf32>
    %242 = vector.extract_strided_slice %238 {offsets = [0, 0], sizes = [8, 32], strides = [1, 1]} : vector<64x32xf32> to vector<8x32xf32>
    %243 = arith.addf %69, %242 : vector<8x32xf32>
    %244 = math.tanh %243 : vector<8x32xf32>
    %245 = vector.extract_strided_slice %36 {offsets = [0, 0], sizes = [8, 32], strides = [1, 1]} : vector<64x32xf32> to vector<8x32xf32>
    %246 = arith.subf %244, %245 : vector<8x32xf32>
    %247 = arith.mulf %246, %246 : vector<8x32xf32>
    %cst_55 = arith.constant dense<0.000000e+00> : vector<8xf32>
    %248 = vector.multi_reduction <add>, %247, %cst_55 [1] : vector<8x32xf32> to vector<8xf32>
    %249 = vector.shape_cast %248 : vector<8xf32> to vector<8x1xf32>
    %250 = arith.addf %240, %249 : vector<8x1xf32>
    %251 = arith.mulf %244, %244 : vector<8x32xf32>
    %cst_56 = arith.constant dense<0.000000e+00> : vector<8xf32>
    %252 = vector.multi_reduction <add>, %251, %cst_56 [1] : vector<8x32xf32> to vector<8xf32>
    %253 = vector.shape_cast %252 : vector<8xf32> to vector<8x1xf32>
    %254 = arith.addf %241, %253 : vector<8x1xf32>
    %255 = vector.extract_strided_slice %238 {offsets = [8, 0], sizes = [8, 32], strides = [1, 1]} : vector<64x32xf32> to vector<8x32xf32>
    %256 = arith.addf %93, %255 : vector<8x32xf32>
    %257 = math.tanh %256 : vector<8x32xf32>
    %258 = vector.extract_strided_slice %36 {offsets = [8, 0], sizes = [8, 32], strides = [1, 1]} : vector<64x32xf32> to vector<8x32xf32>
    %259 = arith.subf %257, %258 : vector<8x32xf32>
    %260 = arith.mulf %259, %259 : vector<8x32xf32>
    %cst_57 = arith.constant dense<0.000000e+00> : vector<8xf32>
    %261 = vector.multi_reduction <add>, %260, %cst_57 [1] : vector<8x32xf32> to vector<8xf32>
    %262 = vector.shape_cast %261 : vector<8xf32> to vector<8x1xf32>
    %263 = arith.addf %250, %262 : vector<8x1xf32>
    %264 = arith.mulf %257, %257 : vector<8x32xf32>
    %cst_58 = arith.constant dense<0.000000e+00> : vector<8xf32>
    %265 = vector.multi_reduction <add>, %264, %cst_58 [1] : vector<8x32xf32> to vector<8xf32>
    %266 = vector.shape_cast %265 : vector<8xf32> to vector<8x1xf32>
    %267 = arith.addf %254, %266 : vector<8x1xf32>
    %268 = vector.extract_strided_slice %238 {offsets = [16, 0], sizes = [8, 32], strides = [1, 1]} : vector<64x32xf32> to vector<8x32xf32>
    %269 = arith.addf %117, %268 : vector<8x32xf32>
    %270 = math.tanh %269 : vector<8x32xf32>
    %271 = vector.extract_strided_slice %36 {offsets = [16, 0], sizes = [8, 32], strides = [1, 1]} : vector<64x32xf32> to vector<8x32xf32>
    %272 = arith.subf %270, %271 : vector<8x32xf32>
    %273 = arith.mulf %272, %272 : vector<8x32xf32>
    %cst_59 = arith.constant dense<0.000000e+00> : vector<8xf32>
    %274 = vector.multi_reduction <add>, %273, %cst_59 [1] : vector<8x32xf32> to vector<8xf32>
    %275 = vector.shape_cast %274 : vector<8xf32> to vector<8x1xf32>
    %276 = arith.addf %263, %275 : vector<8x1xf32>
    %277 = arith.mulf %270, %270 : vector<8x32xf32>
    %cst_60 = arith.constant dense<0.000000e+00> : vector<8xf32>
    %278 = vector.multi_reduction <add>, %277, %cst_60 [1] : vector<8x32xf32> to vector<8xf32>
    %279 = vector.shape_cast %278 : vector<8xf32> to vector<8x1xf32>
    %280 = arith.addf %267, %279 : vector<8x1xf32>
    %281 = vector.extract_strided_slice %238 {offsets = [24, 0], sizes = [8, 32], strides = [1, 1]} : vector<64x32xf32> to vector<8x32xf32>
    %282 = arith.addf %141, %281 : vector<8x32xf32>
    %283 = math.tanh %282 : vector<8x32xf32>
    %284 = vector.extract_strided_slice %36 {offsets = [24, 0], sizes = [8, 32], strides = [1, 1]} : vector<64x32xf32> to vector<8x32xf32>
    %285 = arith.subf %283, %284 : vector<8x32xf32>
    %286 = arith.mulf %285, %285 : vector<8x32xf32>
    %cst_61 = arith.constant dense<0.000000e+00> : vector<8xf32>
    %287 = vector.multi_reduction <add>, %286, %cst_61 [1] : vector<8x32xf32> to vector<8xf32>
    %288 = vector.shape_cast %287 : vector<8xf32> to vector<8x1xf32>
    %289 = arith.addf %276, %288 : vector<8x1xf32>
    %290 = arith.mulf %283, %283 : vector<8x32xf32>
    %cst_62 = arith.constant dense<0.000000e+00> : vector<8xf32>
    %291 = vector.multi_reduction <add>, %290, %cst_62 [1] : vector<8x32xf32> to vector<8xf32>
    %292 = vector.shape_cast %291 : vector<8xf32> to vector<8x1xf32>
    %293 = arith.addf %280, %292 : vector<8x1xf32>
    %294 = vector.extract_strided_slice %238 {offsets = [32, 0], sizes = [8, 32], strides = [1, 1]} : vector<64x32xf32> to vector<8x32xf32>
    %295 = arith.addf %165, %294 : vector<8x32xf32>
    %296 = math.tanh %295 : vector<8x32xf32>
    %297 = vector.extract_strided_slice %36 {offsets = [32, 0], sizes = [8, 32], strides = [1, 1]} : vector<64x32xf32> to vector<8x32xf32>
    %298 = arith.subf %296, %297 : vector<8x32xf32>
    %299 = arith.mulf %298, %298 : vector<8x32xf32>
    %cst_63 = arith.constant dense<0.000000e+00> : vector<8xf32>
    %300 = vector.multi_reduction <add>, %299, %cst_63 [1] : vector<8x32xf32> to vector<8xf32>
    %301 = vector.shape_cast %300 : vector<8xf32> to vector<8x1xf32>
    %302 = arith.addf %289, %301 : vector<8x1xf32>
    %303 = arith.mulf %296, %296 : vector<8x32xf32>
    %cst_64 = arith.constant dense<0.000000e+00> : vector<8xf32>
    %304 = vector.multi_reduction <add>, %303, %cst_64 [1] : vector<8x32xf32> to vector<8xf32>
    %305 = vector.shape_cast %304 : vector<8xf32> to vector<8x1xf32>
    %306 = arith.addf %293, %305 : vector<8x1xf32>
    %307 = vector.extract_strided_slice %238 {offsets = [40, 0], sizes = [8, 32], strides = [1, 1]} : vector<64x32xf32> to vector<8x32xf32>
    %308 = arith.addf %189, %307 : vector<8x32xf32>
    %309 = math.tanh %308 : vector<8x32xf32>
    %310 = vector.extract_strided_slice %36 {offsets = [40, 0], sizes = [8, 32], strides = [1, 1]} : vector<64x32xf32> to vector<8x32xf32>
    %311 = arith.subf %309, %310 : vector<8x32xf32>
    %312 = arith.mulf %311, %311 : vector<8x32xf32>
    %cst_65 = arith.constant dense<0.000000e+00> : vector<8xf32>
    %313 = vector.multi_reduction <add>, %312, %cst_65 [1] : vector<8x32xf32> to vector<8xf32>
    %314 = vector.shape_cast %313 : vector<8xf32> to vector<8x1xf32>
    %315 = arith.addf %302, %314 : vector<8x1xf32>
    %316 = arith.mulf %309, %309 : vector<8x32xf32>
    %cst_66 = arith.constant dense<0.000000e+00> : vector<8xf32>
    %317 = vector.multi_reduction <add>, %316, %cst_66 [1] : vector<8x32xf32> to vector<8xf32>
    %318 = vector.shape_cast %317 : vector<8xf32> to vector<8x1xf32>
    %319 = arith.addf %306, %318 : vector<8x1xf32>
    %320 = vector.extract_strided_slice %238 {offsets = [48, 0], sizes = [8, 32], strides = [1, 1]} : vector<64x32xf32> to vector<8x32xf32>
    %321 = arith.addf %213, %320 : vector<8x32xf32>
    %322 = math.tanh %321 : vector<8x32xf32>
    %323 = vector.extract_strided_slice %36 {offsets = [48, 0], sizes = [8, 32], strides = [1, 1]} : vector<64x32xf32> to vector<8x32xf32>
    %324 = arith.subf %322, %323 : vector<8x32xf32>
    %325 = arith.mulf %324, %324 : vector<8x32xf32>
    %cst_67 = arith.constant dense<0.000000e+00> : vector<8xf32>
    %326 = vector.multi_reduction <add>, %325, %cst_67 [1] : vector<8x32xf32> to vector<8xf32>
    %327 = vector.shape_cast %326 : vector<8xf32> to vector<8x1xf32>
    %328 = arith.addf %315, %327 : vector<8x1xf32>
    %329 = arith.mulf %322, %322 : vector<8x32xf32>
    %cst_68 = arith.constant dense<0.000000e+00> : vector<8xf32>
    %330 = vector.multi_reduction <add>, %329, %cst_68 [1] : vector<8x32xf32> to vector<8xf32>
    %331 = vector.shape_cast %330 : vector<8xf32> to vector<8x1xf32>
    %332 = arith.addf %319, %331 : vector<8x1xf32>
    %333 = vector.extract_strided_slice %238 {offsets = [56, 0], sizes = [8, 32], strides = [1, 1]} : vector<64x32xf32> to vector<8x32xf32>
    %334 = arith.addf %237, %333 : vector<8x32xf32>
    %335 = math.tanh %334 : vector<8x32xf32>
    %336 = vector.extract_strided_slice %36 {offsets = [56, 0], sizes = [8, 32], strides = [1, 1]} : vector<64x32xf32> to vector<8x32xf32>
    %337 = arith.subf %335, %336 : vector<8x32xf32>
    %338 = arith.mulf %337, %337 : vector<8x32xf32>
    %cst_69 = arith.constant dense<0.000000e+00> : vector<8xf32>
    %339 = vector.multi_reduction <add>, %338, %cst_69 [1] : vector<8x32xf32> to vector<8xf32>
    %340 = vector.shape_cast %339 : vector<8xf32> to vector<8x1xf32>
    %341 = arith.addf %328, %340 : vector<8x1xf32>
    %342 = arith.mulf %335, %335 : vector<8x32xf32>
    %cst_70 = arith.constant dense<0.000000e+00> : vector<8xf32>
    %343 = vector.multi_reduction <add>, %342, %cst_70 [1] : vector<8x32xf32> to vector<8xf32>
    %344 = vector.shape_cast %343 : vector<8xf32> to vector<8x1xf32>
    %345 = arith.addf %332, %344 : vector<8x1xf32>
    %346 = tpu.concatenate %244, %257, %270, %283, %296, %309, %322, %335 in 0 : vector<8x32xf32>, vector<8x32xf32>, vector<8x32xf32>, vector<8x32xf32>, vector<8x32xf32>, vector<8x32xf32>, vector<8x32xf32>, vector<8x32xf32> -> vector<64x32xf32>
    %c0_71 = arith.constant 0 : index
    %c0_72 = arith.constant 0 : index
    %347 = vector.load %arg9[%c0_71, %c0_72] : memref<64x32xf32, #tpu.memory_space<vmem>>, vector<64x32xf32>
    tpu.vector_store %arg9[%c0_71, %c0_72], %346 {strides = array<i32>} : memref<64x32xf32, #tpu.memory_space<vmem>>, vector<64x32xf32>,
    %348 = arith.mulf %341, %239 : vector<8x1xf32>
    %cst_73 = arith.constant dense<0.000000e+00> : vector<1xf32>
    %349 = vector.multi_reduction <add>, %348, %cst_73 [0] : vector<8x1xf32> to vector<1xf32>
    %350 = vector.shape_cast %349 : vector<1xf32> to vector<1x1xf32>
    %c0_74 = arith.constant 0 : index
    %c0_75 = arith.constant 0 : index
    %351 = vector.load %arg10[%c0_74, %c0_75] : memref<1x1xf32, #tpu.memory_space<vmem>>, vector<1x1xf32>
    tpu.vector_store %arg10[%c0_74, %c0_75], %350 {strides = array<i32>} : memref<1x1xf32, #tpu.memory_space<vmem>>, vector<1x1xf32>,
    %352 = arith.mulf %345, %239 : vector<8x1xf32>
    %cst_76 = arith.constant dense<0.000000e+00> : vector<1xf32>
    %353 = vector.multi_reduction <add>, %352, %cst_76 [0] : vector<8x1xf32> to vector<1xf32>
    %354 = vector.shape_cast %353 : vector<1xf32> to vector<1x1xf32>
    %c0_77 = arith.constant 0 : index
    %c0_78 = arith.constant 0 : index
    %355 = vector.load %arg11[%c0_77, %c0_78] : memref<1x1xf32, #tpu.memory_space<vmem>>, vector<1x1xf32>
    tpu.vector_store %arg11[%c0_77, %c0_78], %354 {strides = array<i32>} : memref<1x1xf32, #tpu.memory_space<vmem>>, vector<1x1xf32>,
    return
  }
}

module attributes {stable_mosaic.version = 11 : i64} {
  func.func @func_combine_kernel(%arg0: memref<8x6xf32, #tpu.memory_space<vmem>>, %arg1: memref<6x64x32xf32, #tpu.memory_space<vmem>>, %arg2: memref<64x32xf32, #tpu.memory_space<vmem>>, %arg3: memref<32x96xf32, #tpu.memory_space<vmem>>, %arg4: memref<32x96xf32, #tpu.memory_space<vmem>>, %arg5: memref<1x96xf32, #tpu.memory_space<vmem>>, %arg6: memref<1x32xf32, #tpu.memory_space<vmem>>, %arg7: memref<8x1xf32, #tpu.memory_space<vmem>>, %arg8: memref<64x32xf32, #tpu.memory_space<vmem>>, %arg9: memref<64x32xf32, #tpu.memory_space<vmem>>, %arg10: memref<1x1xf32, #tpu.memory_space<vmem>>, %arg11: memref<1x1xf32, #tpu.memory_space<vmem>>) attributes {dimension_semantics = [], scalar_prefetch = 0 : i64, scratch_operands = 0 : i64, tpu.core_type = #tpu.core_type<tc>} {
    %c0 = arith.constant 0 : index
    %c0_0 = arith.constant 0 : index
    %0 = vector.load %arg0[%c0, %c0_0] : memref<8x6xf32, #tpu.memory_space<vmem>>, vector<8x6xf32>
    %1 = tpu.concatenate %0, %0, %0, %0, %0, %0, %0, %0 in 0 : vector<8x6xf32>, vector<8x6xf32>, vector<8x6xf32>, vector<8x6xf32>, vector<8x6xf32>, vector<8x6xf32>, vector<8x6xf32>, vector<8x6xf32> -> vector<64x6xf32>
    %2 = vector.extract_strided_slice %1 {offsets = [0, 0], sizes = [64, 1], strides = [1, 1]} : vector<64x6xf32> to vector<64x1xf32>
    %c0_1 = arith.constant 0 : index
    %c0_2 = arith.constant 0 : index
    %c0_3 = arith.constant 0 : index
    %3 = vector.load %arg1[%c0_1, %c0_2, %c0_3] : memref<6x64x32xf32, #tpu.memory_space<vmem>>, vector<1x64x32xf32>
    %4 = vector.shape_cast %3 : vector<1x64x32xf32> to vector<64x32xf32>
    %5 = vector.broadcast %2 : vector<64x1xf32> to vector<64x32xf32>
    %6 = arith.mulf %5, %4 : vector<64x32xf32>
    %7 = vector.extract_strided_slice %1 {offsets = [0, 1], sizes = [64, 1], strides = [1, 1]} : vector<64x6xf32> to vector<64x1xf32>
    %c1 = arith.constant 1 : index
    %c0_4 = arith.constant 0 : index
    %c0_5 = arith.constant 0 : index
    %8 = vector.load %arg1[%c1, %c0_4, %c0_5] : memref<6x64x32xf32, #tpu.memory_space<vmem>>, vector<1x64x32xf32>
    %9 = vector.shape_cast %8 : vector<1x64x32xf32> to vector<64x32xf32>
    %10 = vector.broadcast %7 : vector<64x1xf32> to vector<64x32xf32>
    %11 = arith.mulf %10, %9 : vector<64x32xf32>
    %12 = arith.addf %6, %11 : vector<64x32xf32>
    %13 = vector.extract_strided_slice %1 {offsets = [0, 2], sizes = [64, 1], strides = [1, 1]} : vector<64x6xf32> to vector<64x1xf32>
    %c2 = arith.constant 2 : index
    %c0_6 = arith.constant 0 : index
    %c0_7 = arith.constant 0 : index
    %14 = vector.load %arg1[%c2, %c0_6, %c0_7] : memref<6x64x32xf32, #tpu.memory_space<vmem>>, vector<1x64x32xf32>
    %15 = vector.shape_cast %14 : vector<1x64x32xf32> to vector<64x32xf32>
    %16 = vector.broadcast %13 : vector<64x1xf32> to vector<64x32xf32>
    %17 = arith.mulf %16, %15 : vector<64x32xf32>
    %18 = arith.addf %12, %17 : vector<64x32xf32>
    %19 = vector.extract_strided_slice %1 {offsets = [0, 3], sizes = [64, 1], strides = [1, 1]} : vector<64x6xf32> to vector<64x1xf32>
    %c3 = arith.constant 3 : index
    %c0_8 = arith.constant 0 : index
    %c0_9 = arith.constant 0 : index
    %20 = vector.load %arg1[%c3, %c0_8, %c0_9] : memref<6x64x32xf32, #tpu.memory_space<vmem>>, vector<1x64x32xf32>
    %21 = vector.shape_cast %20 : vector<1x64x32xf32> to vector<64x32xf32>
    %22 = vector.broadcast %19 : vector<64x1xf32> to vector<64x32xf32>
    %23 = arith.mulf %22, %21 : vector<64x32xf32>
    %24 = arith.addf %18, %23 : vector<64x32xf32>
    %25 = vector.extract_strided_slice %1 {offsets = [0, 4], sizes = [64, 1], strides = [1, 1]} : vector<64x6xf32> to vector<64x1xf32>
    %c4 = arith.constant 4 : index
    %c0_10 = arith.constant 0 : index
    %c0_11 = arith.constant 0 : index
    %26 = vector.load %arg1[%c4, %c0_10, %c0_11] : memref<6x64x32xf32, #tpu.memory_space<vmem>>, vector<1x64x32xf32>
    %27 = vector.shape_cast %26 : vector<1x64x32xf32> to vector<64x32xf32>
    %28 = vector.broadcast %25 : vector<64x1xf32> to vector<64x32xf32>
    %29 = arith.mulf %28, %27 : vector<64x32xf32>
    %30 = arith.addf %24, %29 : vector<64x32xf32>
    %31 = vector.extract_strided_slice %1 {offsets = [0, 5], sizes = [64, 1], strides = [1, 1]} : vector<64x6xf32> to vector<64x1xf32>
    %c5 = arith.constant 5 : index
    %c0_12 = arith.constant 0 : index
    %c0_13 = arith.constant 0 : index
    %32 = vector.load %arg1[%c5, %c0_12, %c0_13] : memref<6x64x32xf32, #tpu.memory_space<vmem>>, vector<1x64x32xf32>
    %33 = vector.shape_cast %32 : vector<1x64x32xf32> to vector<64x32xf32>
    %34 = vector.broadcast %31 : vector<64x1xf32> to vector<64x32xf32>
    %35 = arith.mulf %34, %33 : vector<64x32xf32>
    %36 = arith.addf %30, %35 : vector<64x32xf32>
    %c0_14 = arith.constant 0 : index
    %c0_15 = arith.constant 0 : index
    %37 = vector.load %arg8[%c0_14, %c0_15] : memref<64x32xf32, #tpu.memory_space<vmem>>, vector<64x32xf32>
    tpu.vector_store %arg8[%c0_14, %c0_15], %36 {strides = array<i32>} : memref<64x32xf32, #tpu.memory_space<vmem>>, vector<64x32xf32>,
    %c0_16 = arith.constant 0 : index
    %c0_17 = arith.constant 0 : index
    %38 = vector.load %arg3[%c0_16, %c0_17] : memref<32x96xf32, #tpu.memory_space<vmem>>, vector<32x96xf32>
    %c0_18 = arith.constant 0 : index
    %c0_19 = arith.constant 0 : index
    %39 = vector.load %arg4[%c0_18, %c0_19] : memref<32x96xf32, #tpu.memory_space<vmem>>, vector<32x96xf32>
    %c0_20 = arith.constant 0 : index
    %c0_21 = arith.constant 0 : index
    %40 = vector.load %arg5[%c0_20, %c0_21] : memref<1x96xf32, #tpu.memory_space<vmem>>, vector<1x96xf32>
    %c0_22 = arith.constant 0 : index
    %c0_23 = arith.constant 0 : index
    %41 = vector.load %arg6[%c0_22, %c0_23] : memref<1x32xf32, #tpu.memory_space<vmem>>, vector<1x32xf32>
    %cst = arith.constant dense<0.000000e+00> : vector<64x96xf32>
    %42 = tpu.matmul %36, %38, %cst {dimension_numbers = #tpu.dot_dimension_numbers<[1], [0], [0], [1], [0, 0, 1, 1], [], []>} : vector<64x32xf32>, vector<32x96xf32>, vector<64x96xf32> -> vector<64x96xf32>
    %43 = vector.broadcast %40 : vector<1x96xf32> to vector<64x96xf32>
    %44 = arith.addf %42, %43 : vector<64x96xf32>
    %cst_24 = arith.constant 0.000000e+00 : f32
    %45 = vector.broadcast %cst_24 : f32 to vector<8x32xf32>
    %cst_25 = arith.constant dense<0.000000e+00> : vector<8x96xf32>
    %46 = tpu.matmul %45, %39, %cst_25 {dimension_numbers = #tpu.dot_dimension_numbers<[1], [0], [0], [1], [0, 0, 1, 1], [], []>} : vector<8x32xf32>, vector<32x96xf32>, vector<8x96xf32> -> vector<8x96xf32>
    %47 = vector.extract_strided_slice %44 {offsets = [0, 0], sizes = [8, 96], strides = [1, 1]} : vector<64x96xf32> to vector<8x96xf32>
    %48 = vector.extract_strided_slice %47 {offsets = [0, 0], sizes = [8, 64], strides = [1, 1]} : vector<8x96xf32> to vector<8x64xf32>
    %49 = vector.extract_strided_slice %46 {offsets = [0, 0], sizes = [8, 64], strides = [1, 1]} : vector<8x96xf32> to vector<8x64xf32>
    %50 = arith.addf %48, %49 : vector<8x64xf32>
    %51 = arith.negf %50 : vector<8x64xf32>
    %52 = math.exp %51 : vector<8x64xf32>
    %cst_26 = arith.constant 1.000000e+00 : f32
    %53 = vector.broadcast %cst_26 : f32 to vector<8x64xf32>
    %54 = arith.addf %53, %52 : vector<8x64xf32>
    %55 = arith.divf %53, %54 : vector<8x64xf32>
    %56 = vector.extract_strided_slice %55 {offsets = [0, 0], sizes = [8, 32], strides = [1, 1]} : vector<8x64xf32> to vector<8x32xf32>
    %57 = vector.extract_strided_slice %55 {offsets = [0, 32], sizes = [8, 32], strides = [1, 1]} : vector<8x64xf32> to vector<8x32xf32>
    %58 = vector.extract_strided_slice %47 {offsets = [0, 64], sizes = [8, 32], strides = [1, 1]} : vector<8x96xf32> to vector<8x32xf32>
    %59 = vector.extract_strided_slice %46 {offsets = [0, 64], sizes = [8, 32], strides = [1, 1]} : vector<8x96xf32> to vector<8x32xf32>
    %60 = vector.broadcast %41 : vector<1x32xf32> to vector<8x32xf32>
    %61 = arith.addf %59, %60 : vector<8x32xf32>
    %62 = arith.mulf %56, %61 : vector<8x32xf32>
    %63 = arith.addf %58, %62 : vector<8x32xf32>
    %64 = math.tanh %63 : vector<8x32xf32>
    %cst_27 = arith.constant 1.000000e+00 : f32
    %65 = vector.broadcast %cst_27 : f32 to vector<8x32xf32>
    %66 = arith.subf %65, %57 : vector<8x32xf32>
    %67 = arith.mulf %66, %64 : vector<8x32xf32>
    %68 = arith.mulf %57, %45 : vector<8x32xf32>
    %69 = arith.addf %67, %68 : vector<8x32xf32>
    %cst_28 = arith.constant dense<0.000000e+00> : vector<8x96xf32>
    %70 = tpu.matmul %69, %39, %cst_28 {dimension_numbers = #tpu.dot_dimension_numbers<[1], [0], [0], [1], [0, 0, 1, 1], [], []>} : vector<8x32xf32>, vector<32x96xf32>, vector<8x96xf32> -> vector<8x96xf32>
    %71 = vector.extract_strided_slice %44 {offsets = [8, 0], sizes = [8, 96], strides = [1, 1]} : vector<64x96xf32> to vector<8x96xf32>
    %72 = vector.extract_strided_slice %71 {offsets = [0, 0], sizes = [8, 64], strides = [1, 1]} : vector<8x96xf32> to vector<8x64xf32>
    %73 = vector.extract_strided_slice %70 {offsets = [0, 0], sizes = [8, 64], strides = [1, 1]} : vector<8x96xf32> to vector<8x64xf32>
    %74 = arith.addf %72, %73 : vector<8x64xf32>
    %75 = arith.negf %74 : vector<8x64xf32>
    %76 = math.exp %75 : vector<8x64xf32>
    %cst_29 = arith.constant 1.000000e+00 : f32
    %77 = vector.broadcast %cst_29 : f32 to vector<8x64xf32>
    %78 = arith.addf %77, %76 : vector<8x64xf32>
    %79 = arith.divf %77, %78 : vector<8x64xf32>
    %80 = vector.extract_strided_slice %79 {offsets = [0, 0], sizes = [8, 32], strides = [1, 1]} : vector<8x64xf32> to vector<8x32xf32>
    %81 = vector.extract_strided_slice %79 {offsets = [0, 32], sizes = [8, 32], strides = [1, 1]} : vector<8x64xf32> to vector<8x32xf32>
    %82 = vector.extract_strided_slice %71 {offsets = [0, 64], sizes = [8, 32], strides = [1, 1]} : vector<8x96xf32> to vector<8x32xf32>
    %83 = vector.extract_strided_slice %70 {offsets = [0, 64], sizes = [8, 32], strides = [1, 1]} : vector<8x96xf32> to vector<8x32xf32>
    %84 = vector.broadcast %41 : vector<1x32xf32> to vector<8x32xf32>
    %85 = arith.addf %83, %84 : vector<8x32xf32>
    %86 = arith.mulf %80, %85 : vector<8x32xf32>
    %87 = arith.addf %82, %86 : vector<8x32xf32>
    %88 = math.tanh %87 : vector<8x32xf32>
    %cst_30 = arith.constant 1.000000e+00 : f32
    %89 = vector.broadcast %cst_30 : f32 to vector<8x32xf32>
    %90 = arith.subf %89, %81 : vector<8x32xf32>
    %91 = arith.mulf %90, %88 : vector<8x32xf32>
    %92 = arith.mulf %81, %69 : vector<8x32xf32>
    %93 = arith.addf %91, %92 : vector<8x32xf32>
    %cst_31 = arith.constant dense<0.000000e+00> : vector<8x96xf32>
    %94 = tpu.matmul %93, %39, %cst_31 {dimension_numbers = #tpu.dot_dimension_numbers<[1], [0], [0], [1], [0, 0, 1, 1], [], []>} : vector<8x32xf32>, vector<32x96xf32>, vector<8x96xf32> -> vector<8x96xf32>
    %95 = vector.extract_strided_slice %44 {offsets = [16, 0], sizes = [8, 96], strides = [1, 1]} : vector<64x96xf32> to vector<8x96xf32>
    %96 = vector.extract_strided_slice %95 {offsets = [0, 0], sizes = [8, 64], strides = [1, 1]} : vector<8x96xf32> to vector<8x64xf32>
    %97 = vector.extract_strided_slice %94 {offsets = [0, 0], sizes = [8, 64], strides = [1, 1]} : vector<8x96xf32> to vector<8x64xf32>
    %98 = arith.addf %96, %97 : vector<8x64xf32>
    %99 = arith.negf %98 : vector<8x64xf32>
    %100 = math.exp %99 : vector<8x64xf32>
    %cst_32 = arith.constant 1.000000e+00 : f32
    %101 = vector.broadcast %cst_32 : f32 to vector<8x64xf32>
    %102 = arith.addf %101, %100 : vector<8x64xf32>
    %103 = arith.divf %101, %102 : vector<8x64xf32>
    %104 = vector.extract_strided_slice %103 {offsets = [0, 0], sizes = [8, 32], strides = [1, 1]} : vector<8x64xf32> to vector<8x32xf32>
    %105 = vector.extract_strided_slice %103 {offsets = [0, 32], sizes = [8, 32], strides = [1, 1]} : vector<8x64xf32> to vector<8x32xf32>
    %106 = vector.extract_strided_slice %95 {offsets = [0, 64], sizes = [8, 32], strides = [1, 1]} : vector<8x96xf32> to vector<8x32xf32>
    %107 = vector.extract_strided_slice %94 {offsets = [0, 64], sizes = [8, 32], strides = [1, 1]} : vector<8x96xf32> to vector<8x32xf32>
    %108 = vector.broadcast %41 : vector<1x32xf32> to vector<8x32xf32>
    %109 = arith.addf %107, %108 : vector<8x32xf32>
    %110 = arith.mulf %104, %109 : vector<8x32xf32>
    %111 = arith.addf %106, %110 : vector<8x32xf32>
    %112 = math.tanh %111 : vector<8x32xf32>
    %cst_33 = arith.constant 1.000000e+00 : f32
    %113 = vector.broadcast %cst_33 : f32 to vector<8x32xf32>
    %114 = arith.subf %113, %105 : vector<8x32xf32>
    %115 = arith.mulf %114, %112 : vector<8x32xf32>
    %116 = arith.mulf %105, %93 : vector<8x32xf32>
    %117 = arith.addf %115, %116 : vector<8x32xf32>
    %cst_34 = arith.constant dense<0.000000e+00> : vector<8x96xf32>
    %118 = tpu.matmul %117, %39, %cst_34 {dimension_numbers = #tpu.dot_dimension_numbers<[1], [0], [0], [1], [0, 0, 1, 1], [], []>} : vector<8x32xf32>, vector<32x96xf32>, vector<8x96xf32> -> vector<8x96xf32>
    %119 = vector.extract_strided_slice %44 {offsets = [24, 0], sizes = [8, 96], strides = [1, 1]} : vector<64x96xf32> to vector<8x96xf32>
    %120 = vector.extract_strided_slice %119 {offsets = [0, 0], sizes = [8, 64], strides = [1, 1]} : vector<8x96xf32> to vector<8x64xf32>
    %121 = vector.extract_strided_slice %118 {offsets = [0, 0], sizes = [8, 64], strides = [1, 1]} : vector<8x96xf32> to vector<8x64xf32>
    %122 = arith.addf %120, %121 : vector<8x64xf32>
    %123 = arith.negf %122 : vector<8x64xf32>
    %124 = math.exp %123 : vector<8x64xf32>
    %cst_35 = arith.constant 1.000000e+00 : f32
    %125 = vector.broadcast %cst_35 : f32 to vector<8x64xf32>
    %126 = arith.addf %125, %124 : vector<8x64xf32>
    %127 = arith.divf %125, %126 : vector<8x64xf32>
    %128 = vector.extract_strided_slice %127 {offsets = [0, 0], sizes = [8, 32], strides = [1, 1]} : vector<8x64xf32> to vector<8x32xf32>
    %129 = vector.extract_strided_slice %127 {offsets = [0, 32], sizes = [8, 32], strides = [1, 1]} : vector<8x64xf32> to vector<8x32xf32>
    %130 = vector.extract_strided_slice %119 {offsets = [0, 64], sizes = [8, 32], strides = [1, 1]} : vector<8x96xf32> to vector<8x32xf32>
    %131 = vector.extract_strided_slice %118 {offsets = [0, 64], sizes = [8, 32], strides = [1, 1]} : vector<8x96xf32> to vector<8x32xf32>
    %132 = vector.broadcast %41 : vector<1x32xf32> to vector<8x32xf32>
    %133 = arith.addf %131, %132 : vector<8x32xf32>
    %134 = arith.mulf %128, %133 : vector<8x32xf32>
    %135 = arith.addf %130, %134 : vector<8x32xf32>
    %136 = math.tanh %135 : vector<8x32xf32>
    %cst_36 = arith.constant 1.000000e+00 : f32
    %137 = vector.broadcast %cst_36 : f32 to vector<8x32xf32>
    %138 = arith.subf %137, %129 : vector<8x32xf32>
    %139 = arith.mulf %138, %136 : vector<8x32xf32>
    %140 = arith.mulf %129, %117 : vector<8x32xf32>
    %141 = arith.addf %139, %140 : vector<8x32xf32>
    %cst_37 = arith.constant dense<0.000000e+00> : vector<8x96xf32>
    %142 = tpu.matmul %141, %39, %cst_37 {dimension_numbers = #tpu.dot_dimension_numbers<[1], [0], [0], [1], [0, 0, 1, 1], [], []>} : vector<8x32xf32>, vector<32x96xf32>, vector<8x96xf32> -> vector<8x96xf32>
    %143 = vector.extract_strided_slice %44 {offsets = [32, 0], sizes = [8, 96], strides = [1, 1]} : vector<64x96xf32> to vector<8x96xf32>
    %144 = vector.extract_strided_slice %143 {offsets = [0, 0], sizes = [8, 64], strides = [1, 1]} : vector<8x96xf32> to vector<8x64xf32>
    %145 = vector.extract_strided_slice %142 {offsets = [0, 0], sizes = [8, 64], strides = [1, 1]} : vector<8x96xf32> to vector<8x64xf32>
    %146 = arith.addf %144, %145 : vector<8x64xf32>
    %147 = arith.negf %146 : vector<8x64xf32>
    %148 = math.exp %147 : vector<8x64xf32>
    %cst_38 = arith.constant 1.000000e+00 : f32
    %149 = vector.broadcast %cst_38 : f32 to vector<8x64xf32>
    %150 = arith.addf %149, %148 : vector<8x64xf32>
    %151 = arith.divf %149, %150 : vector<8x64xf32>
    %152 = vector.extract_strided_slice %151 {offsets = [0, 0], sizes = [8, 32], strides = [1, 1]} : vector<8x64xf32> to vector<8x32xf32>
    %153 = vector.extract_strided_slice %151 {offsets = [0, 32], sizes = [8, 32], strides = [1, 1]} : vector<8x64xf32> to vector<8x32xf32>
    %154 = vector.extract_strided_slice %143 {offsets = [0, 64], sizes = [8, 32], strides = [1, 1]} : vector<8x96xf32> to vector<8x32xf32>
    %155 = vector.extract_strided_slice %142 {offsets = [0, 64], sizes = [8, 32], strides = [1, 1]} : vector<8x96xf32> to vector<8x32xf32>
    %156 = vector.broadcast %41 : vector<1x32xf32> to vector<8x32xf32>
    %157 = arith.addf %155, %156 : vector<8x32xf32>
    %158 = arith.mulf %152, %157 : vector<8x32xf32>
    %159 = arith.addf %154, %158 : vector<8x32xf32>
    %160 = math.tanh %159 : vector<8x32xf32>
    %cst_39 = arith.constant 1.000000e+00 : f32
    %161 = vector.broadcast %cst_39 : f32 to vector<8x32xf32>
    %162 = arith.subf %161, %153 : vector<8x32xf32>
    %163 = arith.mulf %162, %160 : vector<8x32xf32>
    %164 = arith.mulf %153, %141 : vector<8x32xf32>
    %165 = arith.addf %163, %164 : vector<8x32xf32>
    %cst_40 = arith.constant dense<0.000000e+00> : vector<8x96xf32>
    %166 = tpu.matmul %165, %39, %cst_40 {dimension_numbers = #tpu.dot_dimension_numbers<[1], [0], [0], [1], [0, 0, 1, 1], [], []>} : vector<8x32xf32>, vector<32x96xf32>, vector<8x96xf32> -> vector<8x96xf32>
    %167 = vector.extract_strided_slice %44 {offsets = [40, 0], sizes = [8, 96], strides = [1, 1]} : vector<64x96xf32> to vector<8x96xf32>
    %168 = vector.extract_strided_slice %167 {offsets = [0, 0], sizes = [8, 64], strides = [1, 1]} : vector<8x96xf32> to vector<8x64xf32>
    %169 = vector.extract_strided_slice %166 {offsets = [0, 0], sizes = [8, 64], strides = [1, 1]} : vector<8x96xf32> to vector<8x64xf32>
    %170 = arith.addf %168, %169 : vector<8x64xf32>
    %171 = arith.negf %170 : vector<8x64xf32>
    %172 = math.exp %171 : vector<8x64xf32>
    %cst_41 = arith.constant 1.000000e+00 : f32
    %173 = vector.broadcast %cst_41 : f32 to vector<8x64xf32>
    %174 = arith.addf %173, %172 : vector<8x64xf32>
    %175 = arith.divf %173, %174 : vector<8x64xf32>
    %176 = vector.extract_strided_slice %175 {offsets = [0, 0], sizes = [8, 32], strides = [1, 1]} : vector<8x64xf32> to vector<8x32xf32>
    %177 = vector.extract_strided_slice %175 {offsets = [0, 32], sizes = [8, 32], strides = [1, 1]} : vector<8x64xf32> to vector<8x32xf32>
    %178 = vector.extract_strided_slice %167 {offsets = [0, 64], sizes = [8, 32], strides = [1, 1]} : vector<8x96xf32> to vector<8x32xf32>
    %179 = vector.extract_strided_slice %166 {offsets = [0, 64], sizes = [8, 32], strides = [1, 1]} : vector<8x96xf32> to vector<8x32xf32>
    %180 = vector.broadcast %41 : vector<1x32xf32> to vector<8x32xf32>
    %181 = arith.addf %179, %180 : vector<8x32xf32>
    %182 = arith.mulf %176, %181 : vector<8x32xf32>
    %183 = arith.addf %178, %182 : vector<8x32xf32>
    %184 = math.tanh %183 : vector<8x32xf32>
    %cst_42 = arith.constant 1.000000e+00 : f32
    %185 = vector.broadcast %cst_42 : f32 to vector<8x32xf32>
    %186 = arith.subf %185, %177 : vector<8x32xf32>
    %187 = arith.mulf %186, %184 : vector<8x32xf32>
    %188 = arith.mulf %177, %165 : vector<8x32xf32>
    %189 = arith.addf %187, %188 : vector<8x32xf32>
    %cst_43 = arith.constant dense<0.000000e+00> : vector<8x96xf32>
    %190 = tpu.matmul %189, %39, %cst_43 {dimension_numbers = #tpu.dot_dimension_numbers<[1], [0], [0], [1], [0, 0, 1, 1], [], []>} : vector<8x32xf32>, vector<32x96xf32>, vector<8x96xf32> -> vector<8x96xf32>
    %191 = vector.extract_strided_slice %44 {offsets = [48, 0], sizes = [8, 96], strides = [1, 1]} : vector<64x96xf32> to vector<8x96xf32>
    %192 = vector.extract_strided_slice %191 {offsets = [0, 0], sizes = [8, 64], strides = [1, 1]} : vector<8x96xf32> to vector<8x64xf32>
    %193 = vector.extract_strided_slice %190 {offsets = [0, 0], sizes = [8, 64], strides = [1, 1]} : vector<8x96xf32> to vector<8x64xf32>
    %194 = arith.addf %192, %193 : vector<8x64xf32>
    %195 = arith.negf %194 : vector<8x64xf32>
    %196 = math.exp %195 : vector<8x64xf32>
    %cst_44 = arith.constant 1.000000e+00 : f32
    %197 = vector.broadcast %cst_44 : f32 to vector<8x64xf32>
    %198 = arith.addf %197, %196 : vector<8x64xf32>
    %199 = arith.divf %197, %198 : vector<8x64xf32>
    %200 = vector.extract_strided_slice %199 {offsets = [0, 0], sizes = [8, 32], strides = [1, 1]} : vector<8x64xf32> to vector<8x32xf32>
    %201 = vector.extract_strided_slice %199 {offsets = [0, 32], sizes = [8, 32], strides = [1, 1]} : vector<8x64xf32> to vector<8x32xf32>
    %202 = vector.extract_strided_slice %191 {offsets = [0, 64], sizes = [8, 32], strides = [1, 1]} : vector<8x96xf32> to vector<8x32xf32>
    %203 = vector.extract_strided_slice %190 {offsets = [0, 64], sizes = [8, 32], strides = [1, 1]} : vector<8x96xf32> to vector<8x32xf32>
    %204 = vector.broadcast %41 : vector<1x32xf32> to vector<8x32xf32>
    %205 = arith.addf %203, %204 : vector<8x32xf32>
    %206 = arith.mulf %200, %205 : vector<8x32xf32>
    %207 = arith.addf %202, %206 : vector<8x32xf32>
    %208 = math.tanh %207 : vector<8x32xf32>
    %cst_45 = arith.constant 1.000000e+00 : f32
    %209 = vector.broadcast %cst_45 : f32 to vector<8x32xf32>
    %210 = arith.subf %209, %201 : vector<8x32xf32>
    %211 = arith.mulf %210, %208 : vector<8x32xf32>
    %212 = arith.mulf %201, %189 : vector<8x32xf32>
    %213 = arith.addf %211, %212 : vector<8x32xf32>
    %cst_46 = arith.constant dense<0.000000e+00> : vector<8x96xf32>
    %214 = tpu.matmul %213, %39, %cst_46 {dimension_numbers = #tpu.dot_dimension_numbers<[1], [0], [0], [1], [0, 0, 1, 1], [], []>} : vector<8x32xf32>, vector<32x96xf32>, vector<8x96xf32> -> vector<8x96xf32>
    %215 = vector.extract_strided_slice %44 {offsets = [56, 0], sizes = [8, 96], strides = [1, 1]} : vector<64x96xf32> to vector<8x96xf32>
    %216 = vector.extract_strided_slice %215 {offsets = [0, 0], sizes = [8, 64], strides = [1, 1]} : vector<8x96xf32> to vector<8x64xf32>
    %217 = vector.extract_strided_slice %214 {offsets = [0, 0], sizes = [8, 64], strides = [1, 1]} : vector<8x96xf32> to vector<8x64xf32>
    %218 = arith.addf %216, %217 : vector<8x64xf32>
    %219 = arith.negf %218 : vector<8x64xf32>
    %220 = math.exp %219 : vector<8x64xf32>
    %cst_47 = arith.constant 1.000000e+00 : f32
    %221 = vector.broadcast %cst_47 : f32 to vector<8x64xf32>
    %222 = arith.addf %221, %220 : vector<8x64xf32>
    %223 = arith.divf %221, %222 : vector<8x64xf32>
    %224 = vector.extract_strided_slice %223 {offsets = [0, 0], sizes = [8, 32], strides = [1, 1]} : vector<8x64xf32> to vector<8x32xf32>
    %225 = vector.extract_strided_slice %223 {offsets = [0, 32], sizes = [8, 32], strides = [1, 1]} : vector<8x64xf32> to vector<8x32xf32>
    %226 = vector.extract_strided_slice %215 {offsets = [0, 64], sizes = [8, 32], strides = [1, 1]} : vector<8x96xf32> to vector<8x32xf32>
    %227 = vector.extract_strided_slice %214 {offsets = [0, 64], sizes = [8, 32], strides = [1, 1]} : vector<8x96xf32> to vector<8x32xf32>
    %228 = vector.broadcast %41 : vector<1x32xf32> to vector<8x32xf32>
    %229 = arith.addf %227, %228 : vector<8x32xf32>
    %230 = arith.mulf %224, %229 : vector<8x32xf32>
    %231 = arith.addf %226, %230 : vector<8x32xf32>
    %232 = math.tanh %231 : vector<8x32xf32>
    %cst_48 = arith.constant 1.000000e+00 : f32
    %233 = vector.broadcast %cst_48 : f32 to vector<8x32xf32>
    %234 = arith.subf %233, %225 : vector<8x32xf32>
    %235 = arith.mulf %234, %232 : vector<8x32xf32>
    %236 = arith.mulf %225, %213 : vector<8x32xf32>
    %237 = arith.addf %235, %236 : vector<8x32xf32>
    %c0_49 = arith.constant 0 : index
    %c0_50 = arith.constant 0 : index
    %238 = vector.load %arg2[%c0_49, %c0_50] : memref<64x32xf32, #tpu.memory_space<vmem>>, vector<64x32xf32>
    %c0_51 = arith.constant 0 : index
    %c0_52 = arith.constant 0 : index
    %239 = vector.load %arg7[%c0_51, %c0_52] : memref<8x1xf32, #tpu.memory_space<vmem>>, vector<8x1xf32>
    %cst_53 = arith.constant 0.000000e+00 : f32
    %240 = vector.broadcast %cst_53 : f32 to vector<8x1xf32>
    %cst_54 = arith.constant 0.000000e+00 : f32
    %241 = vector.broadcast %cst_54 : f32 to vector<8x1xf32>
    %242 = vector.extract_strided_slice %238 {offsets = [0, 0], sizes = [8, 32], strides = [1, 1]} : vector<64x32xf32> to vector<8x32xf32>
    %243 = arith.addf %69, %242 : vector<8x32xf32>
    %244 = math.tanh %243 : vector<8x32xf32>
    %245 = vector.extract_strided_slice %36 {offsets = [0, 0], sizes = [8, 32], strides = [1, 1]} : vector<64x32xf32> to vector<8x32xf32>
    %246 = arith.subf %244, %245 : vector<8x32xf32>
    %247 = arith.mulf %246, %246 : vector<8x32xf32>
    %cst_55 = arith.constant dense<0.000000e+00> : vector<8xf32>
    %248 = vector.multi_reduction <add>, %247, %cst_55 [1] : vector<8x32xf32> to vector<8xf32>
    %249 = vector.shape_cast %248 : vector<8xf32> to vector<8x1xf32>
    %250 = arith.addf %240, %249 : vector<8x1xf32>
    %251 = arith.mulf %244, %244 : vector<8x32xf32>
    %cst_56 = arith.constant dense<0.000000e+00> : vector<8xf32>
    %252 = vector.multi_reduction <add>, %251, %cst_56 [1] : vector<8x32xf32> to vector<8xf32>
    %253 = vector.shape_cast %252 : vector<8xf32> to vector<8x1xf32>
    %254 = arith.addf %241, %253 : vector<8x1xf32>
    %255 = vector.extract_strided_slice %238 {offsets = [8, 0], sizes = [8, 32], strides = [1, 1]} : vector<64x32xf32> to vector<8x32xf32>
    %256 = arith.addf %93, %255 : vector<8x32xf32>
    %257 = math.tanh %256 : vector<8x32xf32>
    %258 = vector.extract_strided_slice %36 {offsets = [8, 0], sizes = [8, 32], strides = [1, 1]} : vector<64x32xf32> to vector<8x32xf32>
    %259 = arith.subf %257, %258 : vector<8x32xf32>
    %260 = arith.mulf %259, %259 : vector<8x32xf32>
    %cst_57 = arith.constant dense<0.000000e+00> : vector<8xf32>
    %261 = vector.multi_reduction <add>, %260, %cst_57 [1] : vector<8x32xf32> to vector<8xf32>
    %262 = vector.shape_cast %261 : vector<8xf32> to vector<8x1xf32>
    %263 = arith.addf %250, %262 : vector<8x1xf32>
    %264 = arith.mulf %257, %257 : vector<8x32xf32>
    %cst_58 = arith.constant dense<0.000000e+00> : vector<8xf32>
    %265 = vector.multi_reduction <add>, %264, %cst_58 [1] : vector<8x32xf32> to vector<8xf32>
    %266 = vector.shape_cast %265 : vector<8xf32> to vector<8x1xf32>
    %267 = arith.addf %254, %266 : vector<8x1xf32>
    %268 = vector.extract_strided_slice %238 {offsets = [16, 0], sizes = [8, 32], strides = [1, 1]} : vector<64x32xf32> to vector<8x32xf32>
    %269 = arith.addf %117, %268 : vector<8x32xf32>
    %270 = math.tanh %269 : vector<8x32xf32>
    %271 = vector.extract_strided_slice %36 {offsets = [16, 0], sizes = [8, 32], strides = [1, 1]} : vector<64x32xf32> to vector<8x32xf32>
    %272 = arith.subf %270, %271 : vector<8x32xf32>
    %273 = arith.mulf %272, %272 : vector<8x32xf32>
    %cst_59 = arith.constant dense<0.000000e+00> : vector<8xf32>
    %274 = vector.multi_reduction <add>, %273, %cst_59 [1] : vector<8x32xf32> to vector<8xf32>
    %275 = vector.shape_cast %274 : vector<8xf32> to vector<8x1xf32>
    %276 = arith.addf %263, %275 : vector<8x1xf32>
    %277 = arith.mulf %270, %270 : vector<8x32xf32>
    %cst_60 = arith.constant dense<0.000000e+00> : vector<8xf32>
    %278 = vector.multi_reduction <add>, %277, %cst_60 [1] : vector<8x32xf32> to vector<8xf32>
    %279 = vector.shape_cast %278 : vector<8xf32> to vector<8x1xf32>
    %280 = arith.addf %267, %279 : vector<8x1xf32>
    %281 = vector.extract_strided_slice %238 {offsets = [24, 0], sizes = [8, 32], strides = [1, 1]} : vector<64x32xf32> to vector<8x32xf32>
    %282 = arith.addf %141, %281 : vector<8x32xf32>
    %283 = math.tanh %282 : vector<8x32xf32>
    %284 = vector.extract_strided_slice %36 {offsets = [24, 0], sizes = [8, 32], strides = [1, 1]} : vector<64x32xf32> to vector<8x32xf32>
    %285 = arith.subf %283, %284 : vector<8x32xf32>
    %286 = arith.mulf %285, %285 : vector<8x32xf32>
    %cst_61 = arith.constant dense<0.000000e+00> : vector<8xf32>
    %287 = vector.multi_reduction <add>, %286, %cst_61 [1] : vector<8x32xf32> to vector<8xf32>
    %288 = vector.shape_cast %287 : vector<8xf32> to vector<8x1xf32>
    %289 = arith.addf %276, %288 : vector<8x1xf32>
    %290 = arith.mulf %283, %283 : vector<8x32xf32>
    %cst_62 = arith.constant dense<0.000000e+00> : vector<8xf32>
    %291 = vector.multi_reduction <add>, %290, %cst_62 [1] : vector<8x32xf32> to vector<8xf32>
    %292 = vector.shape_cast %291 : vector<8xf32> to vector<8x1xf32>
    %293 = arith.addf %280, %292 : vector<8x1xf32>
    %294 = vector.extract_strided_slice %238 {offsets = [32, 0], sizes = [8, 32], strides = [1, 1]} : vector<64x32xf32> to vector<8x32xf32>
    %295 = arith.addf %165, %294 : vector<8x32xf32>
    %296 = math.tanh %295 : vector<8x32xf32>
    %297 = vector.extract_strided_slice %36 {offsets = [32, 0], sizes = [8, 32], strides = [1, 1]} : vector<64x32xf32> to vector<8x32xf32>
    %298 = arith.subf %296, %297 : vector<8x32xf32>
    %299 = arith.mulf %298, %298 : vector<8x32xf32>
    %cst_63 = arith.constant dense<0.000000e+00> : vector<8xf32>
    %300 = vector.multi_reduction <add>, %299, %cst_63 [1] : vector<8x32xf32> to vector<8xf32>
    %301 = vector.shape_cast %300 : vector<8xf32> to vector<8x1xf32>
    %302 = arith.addf %289, %301 : vector<8x1xf32>
    %303 = arith.mulf %296, %296 : vector<8x32xf32>
    %cst_64 = arith.constant dense<0.000000e+00> : vector<8xf32>
    %304 = vector.multi_reduction <add>, %303, %cst_64 [1] : vector<8x32xf32> to vector<8xf32>
    %305 = vector.shape_cast %304 : vector<8xf32> to vector<8x1xf32>
    %306 = arith.addf %293, %305 : vector<8x1xf32>
    %307 = vector.extract_strided_slice %238 {offsets = [40, 0], sizes = [8, 32], strides = [1, 1]} : vector<64x32xf32> to vector<8x32xf32>
    %308 = arith.addf %189, %307 : vector<8x32xf32>
    %309 = math.tanh %308 : vector<8x32xf32>
    %310 = vector.extract_strided_slice %36 {offsets = [40, 0], sizes = [8, 32], strides = [1, 1]} : vector<64x32xf32> to vector<8x32xf32>
    %311 = arith.subf %309, %310 : vector<8x32xf32>
    %312 = arith.mulf %311, %311 : vector<8x32xf32>
    %cst_65 = arith.constant dense<0.000000e+00> : vector<8xf32>
    %313 = vector.multi_reduction <add>, %312, %cst_65 [1] : vector<8x32xf32> to vector<8xf32>
    %314 = vector.shape_cast %313 : vector<8xf32> to vector<8x1xf32>
    %315 = arith.addf %302, %314 : vector<8x1xf32>
    %316 = arith.mulf %309, %309 : vector<8x32xf32>
    %cst_66 = arith.constant dense<0.000000e+00> : vector<8xf32>
    %317 = vector.multi_reduction <add>, %316, %cst_66 [1] : vector<8x32xf32> to vector<8xf32>
    %318 = vector.shape_cast %317 : vector<8xf32> to vector<8x1xf32>
    %319 = arith.addf %306, %318 : vector<8x1xf32>
    %320 = vector.extract_strided_slice %238 {offsets = [48, 0], sizes = [8, 32], strides = [1, 1]} : vector<64x32xf32> to vector<8x32xf32>
    %321 = arith.addf %213, %320 : vector<8x32xf32>
    %322 = math.tanh %321 : vector<8x32xf32>
    %323 = vector.extract_strided_slice %36 {offsets = [48, 0], sizes = [8, 32], strides = [1, 1]} : vector<64x32xf32> to vector<8x32xf32>
    %324 = arith.subf %322, %323 : vector<8x32xf32>
    %325 = arith.mulf %324, %324 : vector<8x32xf32>
    %cst_67 = arith.constant dense<0.000000e+00> : vector<8xf32>
    %326 = vector.multi_reduction <add>, %325, %cst_67 [1] : vector<8x32xf32> to vector<8xf32>
    %327 = vector.shape_cast %326 : vector<8xf32> to vector<8x1xf32>
    %328 = arith.addf %315, %327 : vector<8x1xf32>
    %329 = arith.mulf %322, %322 : vector<8x32xf32>
    %cst_68 = arith.constant dense<0.000000e+00> : vector<8xf32>
    %330 = vector.multi_reduction <add>, %329, %cst_68 [1] : vector<8x32xf32> to vector<8xf32>
    %331 = vector.shape_cast %330 : vector<8xf32> to vector<8x1xf32>
    %332 = arith.addf %319, %331 : vector<8x1xf32>
    %333 = vector.extract_strided_slice %238 {offsets = [56, 0], sizes = [8, 32], strides = [1, 1]} : vector<64x32xf32> to vector<8x32xf32>
    %334 = arith.addf %237, %333 : vector<8x32xf32>
    %335 = math.tanh %334 : vector<8x32xf32>
    %336 = vector.extract_strided_slice %36 {offsets = [56, 0], sizes = [8, 32], strides = [1, 1]} : vector<64x32xf32> to vector<8x32xf32>
    %337 = arith.subf %335, %336 : vector<8x32xf32>
    %338 = arith.mulf %337, %337 : vector<8x32xf32>
    %cst_69 = arith.constant dense<0.000000e+00> : vector<8xf32>
    %339 = vector.multi_reduction <add>, %338, %cst_69 [1] : vector<8x32xf32> to vector<8xf32>
    %340 = vector.shape_cast %339 : vector<8xf32> to vector<8x1xf32>
    %341 = arith.addf %328, %340 : vector<8x1xf32>
    %342 = arith.mulf %335, %335 : vector<8x32xf32>
    %cst_70 = arith.constant dense<0.000000e+00> : vector<8xf32>
    %343 = vector.multi_reduction <add>, %342, %cst_70 [1] : vector<8x32xf32> to vector<8xf32>
    %344 = vector.shape_cast %343 : vector<8xf32> to vector<8x1xf32>
    %345 = arith.addf %332, %344 : vector<8x1xf32>
    %346 = tpu.concatenate %244, %257, %270, %283, %296, %309, %322, %335 in 0 : vector<8x32xf32>, vector<8x32xf32>, vector<8x32xf32>, vector<8x32xf32>, vector<8x32xf32>, vector<8x32xf32>, vector<8x32xf32>, vector<8x32xf32> -> vector<64x32xf32>
    %c0_71 = arith.constant 0 : index
    %c0_72 = arith.constant 0 : index
    %347 = vector.load %arg9[%c0_71, %c0_72] : memref<64x32xf32, #tpu.memory_space<vmem>>, vector<64x32xf32>
    tpu.vector_store %arg9[%c0_71, %c0_72], %346 {strides = array<i32>} : memref<64x32xf32, #tpu.memory_space<vmem>>, vector<64x32xf32>,
    %348 = arith.mulf %341, %239 : vector<8x1xf32>
    %cst_73 = arith.constant dense<0.000000e+00> : vector<1xf32>
    %349 = vector.multi_reduction <add>, %348, %cst_73 [0] : vector<8x1xf32> to vector<1xf32>
    %350 = vector.shape_cast %349 : vector<1xf32> to vector<1x1xf32>
    %c0_74 = arith.constant 0 : index
    %c0_75 = arith.constant 0 : index
    %351 = vector.load %arg10[%c0_74, %c0_75] : memref<1x1xf32, #tpu.memory_space<vmem>>, vector<1x1xf32>
    tpu.vector_store %arg10[%c0_74, %c0_75], %350 {strides = array<i32>} : memref<1x1xf32, #tpu.memory_space<vmem>>, vector<1x1xf32>,
    %352 = arith.mulf %345, %239 : vector<8x1xf32>
    %cst_76 = arith.constant dense<0.000000e+00> : vector<1xf32>
    %353 = vector.multi_reduction <add>, %352, %cst_76 [0] : vector<8x1xf32> to vector<1xf32>
    %354 = vector.shape_cast %353 : vector<1xf32> to vector<1x1xf32>
    %c0_77 = arith.constant 0 : index
    %c0_78 = arith.constant 0 : index
    %355 = vector.load %arg11[%c0_77, %c0_78] : memref<1x1xf32, #tpu.memory_space<vmem>>, vector<1x1xf32>
    tpu.vector_store %arg11[%c0_77, %c0_78], %354 {strides = array<i32>} : memref<1x1xf32, #tpu.memory_space<vmem>>, vector<1x1xf32>,
    return
  }
}

module attributes {stable_mosaic.version = 11 : i64} {
  func.func @gru_tanh_linear_kernel(%arg0: memref<64x32xf32, #tpu.memory_space<vmem>>, %arg1: memref<64x32xf32, #tpu.memory_space<vmem>>, %arg2: memref<32x96xf32, #tpu.memory_space<vmem>>, %arg3: memref<32x96xf32, #tpu.memory_space<vmem>>, %arg4: memref<1x96xf32, #tpu.memory_space<vmem>>, %arg5: memref<1x32xf32, #tpu.memory_space<vmem>>, %arg6: memref<256x1xf32, #tpu.memory_space<vmem>>, %arg7: memref<1x1xf32, #tpu.memory_space<vmem>>, %arg8: memref<8x1xf32, #tpu.memory_space<vmem>>) attributes {dimension_semantics = [], scalar_prefetch = 0 : i64, scratch_operands = 0 : i64, tpu.core_type = #tpu.core_type<tc>} {
    %c0 = arith.constant 0 : index
    %c0_0 = arith.constant 0 : index
    %0 = vector.load %arg0[%c0, %c0_0] : memref<64x32xf32, #tpu.memory_space<vmem>>, vector<64x32xf32>
    %c0_1 = arith.constant 0 : index
    %c0_2 = arith.constant 0 : index
    %1 = vector.load %arg2[%c0_1, %c0_2] : memref<32x96xf32, #tpu.memory_space<vmem>>, vector<32x96xf32>
    %c0_3 = arith.constant 0 : index
    %c0_4 = arith.constant 0 : index
    %2 = vector.load %arg3[%c0_3, %c0_4] : memref<32x96xf32, #tpu.memory_space<vmem>>, vector<32x96xf32>
    %c0_5 = arith.constant 0 : index
    %c0_6 = arith.constant 0 : index
    %3 = vector.load %arg4[%c0_5, %c0_6] : memref<1x96xf32, #tpu.memory_space<vmem>>, vector<1x96xf32>
    %c0_7 = arith.constant 0 : index
    %c0_8 = arith.constant 0 : index
    %4 = vector.load %arg5[%c0_7, %c0_8] : memref<1x32xf32, #tpu.memory_space<vmem>>, vector<1x32xf32>
    %cst = arith.constant dense<0.000000e+00> : vector<64x96xf32>
    %5 = tpu.matmul %0, %1, %cst {dimension_numbers = #tpu.dot_dimension_numbers<[1], [0], [0], [1], [0, 0, 1, 1], [], []>} : vector<64x32xf32>, vector<32x96xf32>, vector<64x96xf32> -> vector<64x96xf32>
    %6 = vector.broadcast %3 : vector<1x96xf32> to vector<64x96xf32>
    %7 = arith.addf %5, %6 : vector<64x96xf32>
    %cst_9 = arith.constant 0.000000e+00 : f32
    %8 = vector.broadcast %cst_9 : f32 to vector<8x32xf32>
    %cst_10 = arith.constant dense<0.000000e+00> : vector<8x96xf32>
    %9 = tpu.matmul %8, %2, %cst_10 {dimension_numbers = #tpu.dot_dimension_numbers<[1], [0], [0], [1], [0, 0, 1, 1], [], []>} : vector<8x32xf32>, vector<32x96xf32>, vector<8x96xf32> -> vector<8x96xf32>
    %10 = vector.extract_strided_slice %7 {offsets = [0, 0], sizes = [8, 96], strides = [1, 1]} : vector<64x96xf32> to vector<8x96xf32>
    %11 = vector.extract_strided_slice %10 {offsets = [0, 0], sizes = [8, 64], strides = [1, 1]} : vector<8x96xf32> to vector<8x64xf32>
    %12 = vector.extract_strided_slice %9 {offsets = [0, 0], sizes = [8, 64], strides = [1, 1]} : vector<8x96xf32> to vector<8x64xf32>
    %13 = arith.addf %11, %12 : vector<8x64xf32>
    %14 = arith.negf %13 : vector<8x64xf32>
    %15 = math.exp %14 : vector<8x64xf32>
    %cst_11 = arith.constant 1.000000e+00 : f32
    %16 = vector.broadcast %cst_11 : f32 to vector<8x64xf32>
    %17 = arith.addf %16, %15 : vector<8x64xf32>
    %18 = arith.divf %16, %17 : vector<8x64xf32>
    %19 = vector.extract_strided_slice %18 {offsets = [0, 0], sizes = [8, 32], strides = [1, 1]} : vector<8x64xf32> to vector<8x32xf32>
    %20 = vector.extract_strided_slice %18 {offsets = [0, 32], sizes = [8, 32], strides = [1, 1]} : vector<8x64xf32> to vector<8x32xf32>
    %21 = vector.extract_strided_slice %10 {offsets = [0, 64], sizes = [8, 32], strides = [1, 1]} : vector<8x96xf32> to vector<8x32xf32>
    %22 = vector.extract_strided_slice %9 {offsets = [0, 64], sizes = [8, 32], strides = [1, 1]} : vector<8x96xf32> to vector<8x32xf32>
    %23 = vector.broadcast %4 : vector<1x32xf32> to vector<8x32xf32>
    %24 = arith.addf %22, %23 : vector<8x32xf32>
    %25 = arith.mulf %19, %24 : vector<8x32xf32>
    %26 = arith.addf %21, %25 : vector<8x32xf32>
    %27 = math.tanh %26 : vector<8x32xf32>
    %cst_12 = arith.constant 1.000000e+00 : f32
    %28 = vector.broadcast %cst_12 : f32 to vector<8x32xf32>
    %29 = arith.subf %28, %20 : vector<8x32xf32>
    %30 = arith.mulf %29, %27 : vector<8x32xf32>
    %31 = arith.mulf %20, %8 : vector<8x32xf32>
    %32 = arith.addf %30, %31 : vector<8x32xf32>
    %cst_13 = arith.constant dense<0.000000e+00> : vector<8x96xf32>
    %33 = tpu.matmul %32, %2, %cst_13 {dimension_numbers = #tpu.dot_dimension_numbers<[1], [0], [0], [1], [0, 0, 1, 1], [], []>} : vector<8x32xf32>, vector<32x96xf32>, vector<8x96xf32> -> vector<8x96xf32>
    %34 = vector.extract_strided_slice %7 {offsets = [8, 0], sizes = [8, 96], strides = [1, 1]} : vector<64x96xf32> to vector<8x96xf32>
    %35 = vector.extract_strided_slice %34 {offsets = [0, 0], sizes = [8, 64], strides = [1, 1]} : vector<8x96xf32> to vector<8x64xf32>
    %36 = vector.extract_strided_slice %33 {offsets = [0, 0], sizes = [8, 64], strides = [1, 1]} : vector<8x96xf32> to vector<8x64xf32>
    %37 = arith.addf %35, %36 : vector<8x64xf32>
    %38 = arith.negf %37 : vector<8x64xf32>
    %39 = math.exp %38 : vector<8x64xf32>
    %cst_14 = arith.constant 1.000000e+00 : f32
    %40 = vector.broadcast %cst_14 : f32 to vector<8x64xf32>
    %41 = arith.addf %40, %39 : vector<8x64xf32>
    %42 = arith.divf %40, %41 : vector<8x64xf32>
    %43 = vector.extract_strided_slice %42 {offsets = [0, 0], sizes = [8, 32], strides = [1, 1]} : vector<8x64xf32> to vector<8x32xf32>
    %44 = vector.extract_strided_slice %42 {offsets = [0, 32], sizes = [8, 32], strides = [1, 1]} : vector<8x64xf32> to vector<8x32xf32>
    %45 = vector.extract_strided_slice %34 {offsets = [0, 64], sizes = [8, 32], strides = [1, 1]} : vector<8x96xf32> to vector<8x32xf32>
    %46 = vector.extract_strided_slice %33 {offsets = [0, 64], sizes = [8, 32], strides = [1, 1]} : vector<8x96xf32> to vector<8x32xf32>
    %47 = vector.broadcast %4 : vector<1x32xf32> to vector<8x32xf32>
    %48 = arith.addf %46, %47 : vector<8x32xf32>
    %49 = arith.mulf %43, %48 : vector<8x32xf32>
    %50 = arith.addf %45, %49 : vector<8x32xf32>
    %51 = math.tanh %50 : vector<8x32xf32>
    %cst_15 = arith.constant 1.000000e+00 : f32
    %52 = vector.broadcast %cst_15 : f32 to vector<8x32xf32>
    %53 = arith.subf %52, %44 : vector<8x32xf32>
    %54 = arith.mulf %53, %51 : vector<8x32xf32>
    %55 = arith.mulf %44, %32 : vector<8x32xf32>
    %56 = arith.addf %54, %55 : vector<8x32xf32>
    %cst_16 = arith.constant dense<0.000000e+00> : vector<8x96xf32>
    %57 = tpu.matmul %56, %2, %cst_16 {dimension_numbers = #tpu.dot_dimension_numbers<[1], [0], [0], [1], [0, 0, 1, 1], [], []>} : vector<8x32xf32>, vector<32x96xf32>, vector<8x96xf32> -> vector<8x96xf32>
    %58 = vector.extract_strided_slice %7 {offsets = [16, 0], sizes = [8, 96], strides = [1, 1]} : vector<64x96xf32> to vector<8x96xf32>
    %59 = vector.extract_strided_slice %58 {offsets = [0, 0], sizes = [8, 64], strides = [1, 1]} : vector<8x96xf32> to vector<8x64xf32>
    %60 = vector.extract_strided_slice %57 {offsets = [0, 0], sizes = [8, 64], strides = [1, 1]} : vector<8x96xf32> to vector<8x64xf32>
    %61 = arith.addf %59, %60 : vector<8x64xf32>
    %62 = arith.negf %61 : vector<8x64xf32>
    %63 = math.exp %62 : vector<8x64xf32>
    %cst_17 = arith.constant 1.000000e+00 : f32
    %64 = vector.broadcast %cst_17 : f32 to vector<8x64xf32>
    %65 = arith.addf %64, %63 : vector<8x64xf32>
    %66 = arith.divf %64, %65 : vector<8x64xf32>
    %67 = vector.extract_strided_slice %66 {offsets = [0, 0], sizes = [8, 32], strides = [1, 1]} : vector<8x64xf32> to vector<8x32xf32>
    %68 = vector.extract_strided_slice %66 {offsets = [0, 32], sizes = [8, 32], strides = [1, 1]} : vector<8x64xf32> to vector<8x32xf32>
    %69 = vector.extract_strided_slice %58 {offsets = [0, 64], sizes = [8, 32], strides = [1, 1]} : vector<8x96xf32> to vector<8x32xf32>
    %70 = vector.extract_strided_slice %57 {offsets = [0, 64], sizes = [8, 32], strides = [1, 1]} : vector<8x96xf32> to vector<8x32xf32>
    %71 = vector.broadcast %4 : vector<1x32xf32> to vector<8x32xf32>
    %72 = arith.addf %70, %71 : vector<8x32xf32>
    %73 = arith.mulf %67, %72 : vector<8x32xf32>
    %74 = arith.addf %69, %73 : vector<8x32xf32>
    %75 = math.tanh %74 : vector<8x32xf32>
    %cst_18 = arith.constant 1.000000e+00 : f32
    %76 = vector.broadcast %cst_18 : f32 to vector<8x32xf32>
    %77 = arith.subf %76, %68 : vector<8x32xf32>
    %78 = arith.mulf %77, %75 : vector<8x32xf32>
    %79 = arith.mulf %68, %56 : vector<8x32xf32>
    %80 = arith.addf %78, %79 : vector<8x32xf32>
    %cst_19 = arith.constant dense<0.000000e+00> : vector<8x96xf32>
    %81 = tpu.matmul %80, %2, %cst_19 {dimension_numbers = #tpu.dot_dimension_numbers<[1], [0], [0], [1], [0, 0, 1, 1], [], []>} : vector<8x32xf32>, vector<32x96xf32>, vector<8x96xf32> -> vector<8x96xf32>
    %82 = vector.extract_strided_slice %7 {offsets = [24, 0], sizes = [8, 96], strides = [1, 1]} : vector<64x96xf32> to vector<8x96xf32>
    %83 = vector.extract_strided_slice %82 {offsets = [0, 0], sizes = [8, 64], strides = [1, 1]} : vector<8x96xf32> to vector<8x64xf32>
    %84 = vector.extract_strided_slice %81 {offsets = [0, 0], sizes = [8, 64], strides = [1, 1]} : vector<8x96xf32> to vector<8x64xf32>
    %85 = arith.addf %83, %84 : vector<8x64xf32>
    %86 = arith.negf %85 : vector<8x64xf32>
    %87 = math.exp %86 : vector<8x64xf32>
    %cst_20 = arith.constant 1.000000e+00 : f32
    %88 = vector.broadcast %cst_20 : f32 to vector<8x64xf32>
    %89 = arith.addf %88, %87 : vector<8x64xf32>
    %90 = arith.divf %88, %89 : vector<8x64xf32>
    %91 = vector.extract_strided_slice %90 {offsets = [0, 0], sizes = [8, 32], strides = [1, 1]} : vector<8x64xf32> to vector<8x32xf32>
    %92 = vector.extract_strided_slice %90 {offsets = [0, 32], sizes = [8, 32], strides = [1, 1]} : vector<8x64xf32> to vector<8x32xf32>
    %93 = vector.extract_strided_slice %82 {offsets = [0, 64], sizes = [8, 32], strides = [1, 1]} : vector<8x96xf32> to vector<8x32xf32>
    %94 = vector.extract_strided_slice %81 {offsets = [0, 64], sizes = [8, 32], strides = [1, 1]} : vector<8x96xf32> to vector<8x32xf32>
    %95 = vector.broadcast %4 : vector<1x32xf32> to vector<8x32xf32>
    %96 = arith.addf %94, %95 : vector<8x32xf32>
    %97 = arith.mulf %91, %96 : vector<8x32xf32>
    %98 = arith.addf %93, %97 : vector<8x32xf32>
    %99 = math.tanh %98 : vector<8x32xf32>
    %cst_21 = arith.constant 1.000000e+00 : f32
    %100 = vector.broadcast %cst_21 : f32 to vector<8x32xf32>
    %101 = arith.subf %100, %92 : vector<8x32xf32>
    %102 = arith.mulf %101, %99 : vector<8x32xf32>
    %103 = arith.mulf %92, %80 : vector<8x32xf32>
    %104 = arith.addf %102, %103 : vector<8x32xf32>
    %cst_22 = arith.constant dense<0.000000e+00> : vector<8x96xf32>
    %105 = tpu.matmul %104, %2, %cst_22 {dimension_numbers = #tpu.dot_dimension_numbers<[1], [0], [0], [1], [0, 0, 1, 1], [], []>} : vector<8x32xf32>, vector<32x96xf32>, vector<8x96xf32> -> vector<8x96xf32>
    %106 = vector.extract_strided_slice %7 {offsets = [32, 0], sizes = [8, 96], strides = [1, 1]} : vector<64x96xf32> to vector<8x96xf32>
    %107 = vector.extract_strided_slice %106 {offsets = [0, 0], sizes = [8, 64], strides = [1, 1]} : vector<8x96xf32> to vector<8x64xf32>
    %108 = vector.extract_strided_slice %105 {offsets = [0, 0], sizes = [8, 64], strides = [1, 1]} : vector<8x96xf32> to vector<8x64xf32>
    %109 = arith.addf %107, %108 : vector<8x64xf32>
    %110 = arith.negf %109 : vector<8x64xf32>
    %111 = math.exp %110 : vector<8x64xf32>
    %cst_23 = arith.constant 1.000000e+00 : f32
    %112 = vector.broadcast %cst_23 : f32 to vector<8x64xf32>
    %113 = arith.addf %112, %111 : vector<8x64xf32>
    %114 = arith.divf %112, %113 : vector<8x64xf32>
    %115 = vector.extract_strided_slice %114 {offsets = [0, 0], sizes = [8, 32], strides = [1, 1]} : vector<8x64xf32> to vector<8x32xf32>
    %116 = vector.extract_strided_slice %114 {offsets = [0, 32], sizes = [8, 32], strides = [1, 1]} : vector<8x64xf32> to vector<8x32xf32>
    %117 = vector.extract_strided_slice %106 {offsets = [0, 64], sizes = [8, 32], strides = [1, 1]} : vector<8x96xf32> to vector<8x32xf32>
    %118 = vector.extract_strided_slice %105 {offsets = [0, 64], sizes = [8, 32], strides = [1, 1]} : vector<8x96xf32> to vector<8x32xf32>
    %119 = vector.broadcast %4 : vector<1x32xf32> to vector<8x32xf32>
    %120 = arith.addf %118, %119 : vector<8x32xf32>
    %121 = arith.mulf %115, %120 : vector<8x32xf32>
    %122 = arith.addf %117, %121 : vector<8x32xf32>
    %123 = math.tanh %122 : vector<8x32xf32>
    %cst_24 = arith.constant 1.000000e+00 : f32
    %124 = vector.broadcast %cst_24 : f32 to vector<8x32xf32>
    %125 = arith.subf %124, %116 : vector<8x32xf32>
    %126 = arith.mulf %125, %123 : vector<8x32xf32>
    %127 = arith.mulf %116, %104 : vector<8x32xf32>
    %128 = arith.addf %126, %127 : vector<8x32xf32>
    %cst_25 = arith.constant dense<0.000000e+00> : vector<8x96xf32>
    %129 = tpu.matmul %128, %2, %cst_25 {dimension_numbers = #tpu.dot_dimension_numbers<[1], [0], [0], [1], [0, 0, 1, 1], [], []>} : vector<8x32xf32>, vector<32x96xf32>, vector<8x96xf32> -> vector<8x96xf32>
    %130 = vector.extract_strided_slice %7 {offsets = [40, 0], sizes = [8, 96], strides = [1, 1]} : vector<64x96xf32> to vector<8x96xf32>
    %131 = vector.extract_strided_slice %130 {offsets = [0, 0], sizes = [8, 64], strides = [1, 1]} : vector<8x96xf32> to vector<8x64xf32>
    %132 = vector.extract_strided_slice %129 {offsets = [0, 0], sizes = [8, 64], strides = [1, 1]} : vector<8x96xf32> to vector<8x64xf32>
    %133 = arith.addf %131, %132 : vector<8x64xf32>
    %134 = arith.negf %133 : vector<8x64xf32>
    %135 = math.exp %134 : vector<8x64xf32>
    %cst_26 = arith.constant 1.000000e+00 : f32
    %136 = vector.broadcast %cst_26 : f32 to vector<8x64xf32>
    %137 = arith.addf %136, %135 : vector<8x64xf32>
    %138 = arith.divf %136, %137 : vector<8x64xf32>
    %139 = vector.extract_strided_slice %138 {offsets = [0, 0], sizes = [8, 32], strides = [1, 1]} : vector<8x64xf32> to vector<8x32xf32>
    %140 = vector.extract_strided_slice %138 {offsets = [0, 32], sizes = [8, 32], strides = [1, 1]} : vector<8x64xf32> to vector<8x32xf32>
    %141 = vector.extract_strided_slice %130 {offsets = [0, 64], sizes = [8, 32], strides = [1, 1]} : vector<8x96xf32> to vector<8x32xf32>
    %142 = vector.extract_strided_slice %129 {offsets = [0, 64], sizes = [8, 32], strides = [1, 1]} : vector<8x96xf32> to vector<8x32xf32>
    %143 = vector.broadcast %4 : vector<1x32xf32> to vector<8x32xf32>
    %144 = arith.addf %142, %143 : vector<8x32xf32>
    %145 = arith.mulf %139, %144 : vector<8x32xf32>
    %146 = arith.addf %141, %145 : vector<8x32xf32>
    %147 = math.tanh %146 : vector<8x32xf32>
    %cst_27 = arith.constant 1.000000e+00 : f32
    %148 = vector.broadcast %cst_27 : f32 to vector<8x32xf32>
    %149 = arith.subf %148, %140 : vector<8x32xf32>
    %150 = arith.mulf %149, %147 : vector<8x32xf32>
    %151 = arith.mulf %140, %128 : vector<8x32xf32>
    %152 = arith.addf %150, %151 : vector<8x32xf32>
    %cst_28 = arith.constant dense<0.000000e+00> : vector<8x96xf32>
    %153 = tpu.matmul %152, %2, %cst_28 {dimension_numbers = #tpu.dot_dimension_numbers<[1], [0], [0], [1], [0, 0, 1, 1], [], []>} : vector<8x32xf32>, vector<32x96xf32>, vector<8x96xf32> -> vector<8x96xf32>
    %154 = vector.extract_strided_slice %7 {offsets = [48, 0], sizes = [8, 96], strides = [1, 1]} : vector<64x96xf32> to vector<8x96xf32>
    %155 = vector.extract_strided_slice %154 {offsets = [0, 0], sizes = [8, 64], strides = [1, 1]} : vector<8x96xf32> to vector<8x64xf32>
    %156 = vector.extract_strided_slice %153 {offsets = [0, 0], sizes = [8, 64], strides = [1, 1]} : vector<8x96xf32> to vector<8x64xf32>
    %157 = arith.addf %155, %156 : vector<8x64xf32>
    %158 = arith.negf %157 : vector<8x64xf32>
    %159 = math.exp %158 : vector<8x64xf32>
    %cst_29 = arith.constant 1.000000e+00 : f32
    %160 = vector.broadcast %cst_29 : f32 to vector<8x64xf32>
    %161 = arith.addf %160, %159 : vector<8x64xf32>
    %162 = arith.divf %160, %161 : vector<8x64xf32>
    %163 = vector.extract_strided_slice %162 {offsets = [0, 0], sizes = [8, 32], strides = [1, 1]} : vector<8x64xf32> to vector<8x32xf32>
    %164 = vector.extract_strided_slice %162 {offsets = [0, 32], sizes = [8, 32], strides = [1, 1]} : vector<8x64xf32> to vector<8x32xf32>
    %165 = vector.extract_strided_slice %154 {offsets = [0, 64], sizes = [8, 32], strides = [1, 1]} : vector<8x96xf32> to vector<8x32xf32>
    %166 = vector.extract_strided_slice %153 {offsets = [0, 64], sizes = [8, 32], strides = [1, 1]} : vector<8x96xf32> to vector<8x32xf32>
    %167 = vector.broadcast %4 : vector<1x32xf32> to vector<8x32xf32>
    %168 = arith.addf %166, %167 : vector<8x32xf32>
    %169 = arith.mulf %163, %168 : vector<8x32xf32>
    %170 = arith.addf %165, %169 : vector<8x32xf32>
    %171 = math.tanh %170 : vector<8x32xf32>
    %cst_30 = arith.constant 1.000000e+00 : f32
    %172 = vector.broadcast %cst_30 : f32 to vector<8x32xf32>
    %173 = arith.subf %172, %164 : vector<8x32xf32>
    %174 = arith.mulf %173, %171 : vector<8x32xf32>
    %175 = arith.mulf %164, %152 : vector<8x32xf32>
    %176 = arith.addf %174, %175 : vector<8x32xf32>
    %cst_31 = arith.constant dense<0.000000e+00> : vector<8x96xf32>
    %177 = tpu.matmul %176, %2, %cst_31 {dimension_numbers = #tpu.dot_dimension_numbers<[1], [0], [0], [1], [0, 0, 1, 1], [], []>} : vector<8x32xf32>, vector<32x96xf32>, vector<8x96xf32> -> vector<8x96xf32>
    %178 = vector.extract_strided_slice %7 {offsets = [56, 0], sizes = [8, 96], strides = [1, 1]} : vector<64x96xf32> to vector<8x96xf32>
    %179 = vector.extract_strided_slice %178 {offsets = [0, 0], sizes = [8, 64], strides = [1, 1]} : vector<8x96xf32> to vector<8x64xf32>
    %180 = vector.extract_strided_slice %177 {offsets = [0, 0], sizes = [8, 64], strides = [1, 1]} : vector<8x96xf32> to vector<8x64xf32>
    %181 = arith.addf %179, %180 : vector<8x64xf32>
    %182 = arith.negf %181 : vector<8x64xf32>
    %183 = math.exp %182 : vector<8x64xf32>
    %cst_32 = arith.constant 1.000000e+00 : f32
    %184 = vector.broadcast %cst_32 : f32 to vector<8x64xf32>
    %185 = arith.addf %184, %183 : vector<8x64xf32>
    %186 = arith.divf %184, %185 : vector<8x64xf32>
    %187 = vector.extract_strided_slice %186 {offsets = [0, 0], sizes = [8, 32], strides = [1, 1]} : vector<8x64xf32> to vector<8x32xf32>
    %188 = vector.extract_strided_slice %186 {offsets = [0, 32], sizes = [8, 32], strides = [1, 1]} : vector<8x64xf32> to vector<8x32xf32>
    %189 = vector.extract_strided_slice %178 {offsets = [0, 64], sizes = [8, 32], strides = [1, 1]} : vector<8x96xf32> to vector<8x32xf32>
    %190 = vector.extract_strided_slice %177 {offsets = [0, 64], sizes = [8, 32], strides = [1, 1]} : vector<8x96xf32> to vector<8x32xf32>
    %191 = vector.broadcast %4 : vector<1x32xf32> to vector<8x32xf32>
    %192 = arith.addf %190, %191 : vector<8x32xf32>
    %193 = arith.mulf %187, %192 : vector<8x32xf32>
    %194 = arith.addf %189, %193 : vector<8x32xf32>
    %195 = math.tanh %194 : vector<8x32xf32>
    %cst_33 = arith.constant 1.000000e+00 : f32
    %196 = vector.broadcast %cst_33 : f32 to vector<8x32xf32>
    %197 = arith.subf %196, %188 : vector<8x32xf32>
    %198 = arith.mulf %197, %195 : vector<8x32xf32>
    %199 = arith.mulf %188, %176 : vector<8x32xf32>
    %200 = arith.addf %198, %199 : vector<8x32xf32>
    %c0_34 = arith.constant 0 : index
    %c0_35 = arith.constant 0 : index
    %201 = vector.load %arg1[%c0_34, %c0_35] : memref<64x32xf32, #tpu.memory_space<vmem>>, vector<64x32xf32>
    %202 = vector.extract_strided_slice %201 {offsets = [0, 0], sizes = [8, 32], strides = [1, 1]} : vector<64x32xf32> to vector<8x32xf32>
    %203 = arith.addf %32, %202 : vector<8x32xf32>
    %204 = math.tanh %203 : vector<8x32xf32>
    %205 = vector.extract_strided_slice %201 {offsets = [8, 0], sizes = [8, 32], strides = [1, 1]} : vector<64x32xf32> to vector<8x32xf32>
    %206 = arith.addf %56, %205 : vector<8x32xf32>
    %207 = math.tanh %206 : vector<8x32xf32>
    %208 = vector.extract_strided_slice %201 {offsets = [16, 0], sizes = [8, 32], strides = [1, 1]} : vector<64x32xf32> to vector<8x32xf32>
    %209 = arith.addf %80, %208 : vector<8x32xf32>
    %210 = math.tanh %209 : vector<8x32xf32>
    %211 = vector.extract_strided_slice %201 {offsets = [24, 0], sizes = [8, 32], strides = [1, 1]} : vector<64x32xf32> to vector<8x32xf32>
    %212 = arith.addf %104, %211 : vector<8x32xf32>
    %213 = math.tanh %212 : vector<8x32xf32>
    %214 = vector.extract_strided_slice %201 {offsets = [32, 0], sizes = [8, 32], strides = [1, 1]} : vector<64x32xf32> to vector<8x32xf32>
    %215 = arith.addf %128, %214 : vector<8x32xf32>
    %216 = math.tanh %215 : vector<8x32xf32>
    %217 = vector.extract_strided_slice %201 {offsets = [40, 0], sizes = [8, 32], strides = [1, 1]} : vector<64x32xf32> to vector<8x32xf32>
    %218 = arith.addf %152, %217 : vector<8x32xf32>
    %219 = math.tanh %218 : vector<8x32xf32>
    %220 = vector.extract_strided_slice %201 {offsets = [48, 0], sizes = [8, 32], strides = [1, 1]} : vector<64x32xf32> to vector<8x32xf32>
    %221 = arith.addf %176, %220 : vector<8x32xf32>
    %222 = math.tanh %221 : vector<8x32xf32>
    %223 = vector.extract_strided_slice %201 {offsets = [56, 0], sizes = [8, 32], strides = [1, 1]} : vector<64x32xf32> to vector<8x32xf32>
    %224 = arith.addf %200, %223 : vector<8x32xf32>
    %225 = math.tanh %224 : vector<8x32xf32>
    %226 = tpu.concatenate %204, %207, %210, %213, %216, %219, %222, %225 in 1 : vector<8x32xf32>, vector<8x32xf32>, vector<8x32xf32>, vector<8x32xf32>, vector<8x32xf32>, vector<8x32xf32>, vector<8x32xf32>, vector<8x32xf32> -> vector<8x256xf32>
    %c0_36 = arith.constant 0 : index
    %c0_37 = arith.constant 0 : index
    %227 = vector.load %arg6[%c0_36, %c0_37] : memref<256x1xf32, #tpu.memory_space<vmem>>, vector<256x1xf32>
    %cst_38 = arith.constant dense<0.000000e+00> : vector<8x1xf32>
    %228 = tpu.matmul %226, %227, %cst_38 {dimension_numbers = #tpu.dot_dimension_numbers<[1], [0], [0], [1], [0, 0, 1, 1], [], []>} : vector<8x256xf32>, vector<256x1xf32>, vector<8x1xf32> -> vector<8x1xf32>
    %c0_39 = arith.constant 0 : index
    %c0_40 = arith.constant 0 : index
    %229 = vector.load %arg7[%c0_39, %c0_40] : memref<1x1xf32, #tpu.memory_space<vmem>>, vector<1x1xf32>
    %230 = vector.broadcast %229 : vector<1x1xf32> to vector<8x1xf32>
    %231 = arith.addf %228, %230 : vector<8x1xf32>
    %c0_41 = arith.constant 0 : index
    %c0_42 = arith.constant 0 : index
    %232 = vector.load %arg8[%c0_41, %c0_42] : memref<8x1xf32, #tpu.memory_space<vmem>>, vector<8x1xf32>
    tpu.vector_store %arg8[%c0_41, %c0_42], %231 {strides = array<i32>} : memref<8x1xf32, #tpu.memory_space<vmem>>, vector<8x1xf32>,
    return
  }
}

</mosaic_0001>

<bundles_post_ra>
// kernel: neural_network_forward.8
= control target key start
LH: loop header
LB: loop body
LE: loop exit
PB: predicated region body
PF: predicated region fallthrough
CT: control target
= control target key end

     0   :  { %18 = vsyncpa [#allocation4], 0  ;;  %v1933_v1 = vmov 0   ;;  %v1934_v2 = vmov 2   ;;  %v1935_v5 = vmov 0.0   ;;  %vm1936_vm0 = vmmov 0   ;;  %s2693_s0 = inlined_call_operand.vmem [shape: f32[6,64,32], index: 0, kind: input, shape index: {}, may-alias: {0,8}]   ;;  %s2694_s1 = inlined_call_operand.vmem [shape: f32[8,6], index: 1, kind: input, shape index: {}]   ;;  %s2695_s2 = inlined_call_operand.vmem [shape: f32[64,32], index: 2, kind: input, shape index: {}]   ;;  %s2696_s3 = inlined_call_operand.vmem [shape: f32[32,96], index: 3, kind: input, shape index: {}]   ;;  %s2697_s4 = inlined_call_operand.vmem [shape: f32[32,96], index: 4, kind: input, shape index: {}]   ;;  %s2698_s5 = inlined_call_operand.vmem [shape: f32[1,96], index: 5, kind: input, shape index: {}]   ;;  %s2699_s6 = inlined_call_operand.vmem [shape: f32[1,32], index: 6, kind: input, shape index: {}]   ;;  %s2700_s7 = inlined_call_operand.vmem [shape: f32[8,1], index: 7, kind: input, shape index: {}]   ;;  %s2701_s8 = inlined_call_operand.vmem [shape: f32[6,64,32], index: 8, kind: output, shape index: {0}, may-alias: {0,8}]   ;;  %s2702_s9 = inlined_call_operand.vmem [shape: f32[64,32], index: 9, kind: output, shape index: {1}]   ;;  %s2703_s10 = inlined_call_operand.hbm [shape: f32[1,1], index: 10, kind: output, shape index: {2}]   ;;  %s2704_s11 = inlined_call_operand.hbm [shape: f32[1,1], index: 11, kind: output, shape index: {3}]  }
   0x1   :  { %v36_v0 = vld [vmem:[%s2694_s1] sm:$0xff]  ;;  %1819 = vset.pattern.permute.xlu0 %v1933_v1  ;;  %1821 = vset.pattern.permute.xlu1 %v1934_v2  ;;  %v2012_v3 = vld [vmem:[%s2697_s4 + $0x18] sm:$0xff]  ;;  %v2025_v6 = vld [vmem:[%s2697_s4 + $0x10] sm:$0xff]  ;;  %v1937_v7 = vmov 1   ;;  %v1938_v8 = vmov 3   ;;  %v1939_v12 = vmov 4  }
   0x2   :  { %47 = vperm.xlu0 %1819, %v36_v0   ;;  %97 = vperm.xlu1 %1821, %v36_v0   ;;  %v215_v4 = vld [vmem:[%s2696_s3 + $0x18] sm:$0xff]  ;;  %v2030_v9 = vld [vmem:[%s2697_s4 + $0x8] sm:$0xff]  ;;  %v214_v10 = vld [vmem:[%s2696_s3 + $0x10] sm:$0xff]  ;;  %v1940_v13 = vmov 5  }
   0x3   :  { %1718 = vmatprep.subr.mxu1 %v1935_v5  ;;  %1726 = vmatprep.mubr.msk.f32.mxu1 %vm1936_vm0, %v1935_v5  ;;  %v213_v11 = vld [vmem:[%s2696_s3 + $0x8] sm:$0xff]  ;;  %v2044_v14 = vld [vmem:[%s2697_s4] sm:$0xff]  ;;  %s1941_s4 = smov 64  }
   0x4   :  { %1719 = vmatpush3.msra.mxu1 %v2012_v3  ;;  %1698 = vmatprep.subr.mxu0 %v215_v4  ;;  %v212_v15 = vld [vmem:[%s2696_s3] sm:$0xff] }
   0x5   :  { %1720 = vmatprep.subr.mxu1 %v1935_v5  ;;  %1699 = vmatpush3.msra.mxu0 %v215_v4  ;;  %v1623_v16 = vld [vmem:[%s2699_s6] ss:$0 sm:$0xff] }
   0x6   :  { %1820 = vset.pattern.permute.xlu0 %v1937_v7  ;;  %1822 = vset.pattern.permute.xlu1 %v1938_v8 }
   0x7   :  { %68 = vperm.xlu0 %1820, %v36_v0   ;;  %126 = vperm.xlu1 %1822, %v36_v0  }
   0x8   :  { %1721 = vmatpush3.msra.mxu1 %v2025_v6  ;;  %1700 = vmatprep.subr.mxu0 %v214_v10 }
   0x9   :  { %1722 = vmatprep.subr.mxu1 %v1935_v5  ;;  %1701 = vmatpush3.msra.mxu0 %v214_v10 }
   0xa   :  { %1723 = vmatpush3.msra.mxu1 %v2030_v9  ;;  %1702 = vmatprep.subr.mxu0 %v213_v11 }
   0xb   :  { %1823 = vset.pattern.permute.xlu1 %v1939_v12  ;;  %1824 = vset.pattern.permute.xlu0 %v1940_v13 }
   0xc   :  { %155 = vperm.xlu1 %1823, %v36_v0   ;;  %184 = vperm.xlu0 %1824, %v36_v0  }
   0xd   :  { %1724 = vmatprep.subr.mxu1 %v1935_v5  ;;  %1703 = vmatpush3.msra.mxu0 %v213_v11 }
   0xe   :  { %1725 = vmatpush3.msra.mxu1 %v2044_v14  ;;  %1704 = vmatprep.subr.mxu0 %v212_v15 }
   0xf   :  { %1727 = vmatmul.mubr.f32.vlgmr.msra.gmra.mxu1 %v1935_v5  ;;  %1705 = vmatpush3.msra.mxu0 %v212_v15 }
  0x10   :  { %442 = vrot.lane.b32.xlu1 %v1623_v16, %s1941_s4  ;;  %1729 = vmatprep.subr.mxu1 %v1935_v5 }
  0x11   :  { %1730 = vmatpush3.msra.mxu1 %v2012_v3  ;;  %1737 = vmatprep.mubr.msk.f32.mxu1 %vm1936_vm0, %v1935_v5 }
  0x12   :  { %1731 = vmatprep.subr.mxu1 %v1935_v5  ;;  %1740 = vmatprep.subr.mxu0 %v1935_v5 }
  0x13   :  { %19 = vsyncpa [#allocation6], 0  ;;  %1732 = vmatpush3.msra.mxu1 %v2025_v6  ;;  %v37_v17 = vld [vmem:[%s2693_s0] sm:$0xff]  ;;  %v38_v19 = vld [vmem:[%s2693_s0 + $0x8] sm:$0xff]  ;;  %vm203_vm1 = vcmask 261120   ;;  %vm1453_vm2 = vcmask 7168  }
  0x14   :  { %1733 = vmatprep.subr.mxu1 %v1935_v5  ;;  %v1581_v18 = vld [vmem:[%s2693_s0 + $0x80] sm:$0xff]  ;;  %v1582_v20 = vld [vmem:[%s2693_s0 + $0x88] sm:$0xff]  ;;  %v39_v23 = vld [vmem:[%s2693_s0 + $0x10] sm:$0xff]  ;;  %s1944_s22 = smov [#allocation5]   ;;  %vm1461_vm3 = vcmask 0  }
  0x15   :  { %1734 = vmatpush3.msra.mxu1 %v2030_v9  ;;  %v1583_v24 = vld [vmem:[%s2693_s0 + $0x90] sm:$0xff]  ;;  %v40_v25 = vld [vmem:[%s2693_s0 + $0x18] sm:$0xff]  ;;  %v1573_v26 = vld [vmem:[%s2693_s0 + $0x40] sm:$0xff]  ;;  %s1553_s1 = sshll.u32 %s1944_s22, 4  ;;  %s1554_s1 = int_to_ptr.vmem [resolvable:$true] %s1553_s1 }
  0x16   :  { %1735 = vmatprep.subr.mxu1 %v1935_v5  ;;  %v1589_v27 = vld [vmem:[%s2693_s0 + $0xc0] sm:$0xff]  ;;  %v1584_v28 = vld [vmem:[%s2693_s0 + $0x98] sm:$0xff]  ;;  %v42_v32 = vld [vmem:[%s2693_s0 + $0x28] sm:$0xff]  ;;  %s1889_s23 = scalar_lea.vmem %s1554_s1, 16  ;;  %s1893_s24 = scalar_lea.vmem %s1554_s1, 32 }
  0x17   :  { %1736 = vmatpush3.msra.mxu1 %v2044_v14  ;;  %v41_v29 = vld [vmem:[%s2693_s0 + $0x20] sm:$0xff]  ;;  %v1586_v33 = vld [vmem:[%s2693_s0 + $0xa8] sm:$0xff]  ;;  %v43_v34 = vld [vmem:[%s2693_s0 + $0x30] sm:$0xff]  ;;  %p1890_p0 = scmp.ne.s32.totalorder %s1554_s1, %s1889_s23  ;;  %p1894_p1 = scmp.lt.s32.totalorder %s1554_s1, %s1554_s1 }
  0x18   :  { %1751 = vmatprep.subr.mxu1 %v1935_v5  ;;  %v1585_v30 = vld [vmem:[%s2693_s0 + $0xa0] sm:$0xff]  ;;  %v1574_v37 = vld [vmem:[%s2693_s0 + $0x48] sm:$0xff]  ;;  %v1587_v41 = vld [vmem:[%s2693_s0 + $0xb0] sm:$0xff]  ;;  %p1895_p2 = scmp.lt.s32.totalorder %s1893_s24, %s1889_s23 }
  0x19   :  { %v1590_v39 = vld [vmem:[%s2693_s0 + $0xc8] sm:$0xff]  ;;  %v1575_v42 = vld [vmem:[%s2693_s0 + $0x50] sm:$0xff]  ;;  %v1576_v46 = vld [vmem:[%s2693_s0 + $0x58] sm:$0xff] }
  0x1a   :  { %v1591_v44 = vld [vmem:[%s2693_s0 + $0xd0] sm:$0xff]  ;;  %v1592_v51 = vld [vmem:[%s2693_s0 + $0xd8] sm:$0xff]  ;;  %v1577_v52 = vld [vmem:[%s2693_s0 + $0x60] sm:$0xff]  ;;  %p1896_p3 = por %p1895_p2, %p1894_p1 }
  0x1b   :  { %v1593_v60 = vld [vmem:[%s2693_s0 + $0xe0] sm:$0xff]  ;;  %v1578_v61 = vld [vmem:[%s2693_s0 + $0x68] sm:$0xff]  ;;  %v1579_v7 = vld [vmem:[%s2693_s0 + $0x70] sm:$0xff] }
  0x1c   :  { %v1597_v63 = vld [vmem:[%s2693_s0 + $0x100] sm:$0xff]  ;;  %v1598_v12 = vld [vmem:[%s2693_s0 + $0x108] sm:$0xff]  ;;  %p1897_p4 = pnand %p1896_p3, %p1890_p0 }
  0x1d   :  { %v1605_v10 = vld [vmem:[%s2693_s0 + $0x140] sm:$0xff]  ;;  %v1606_v13 = vld [vmem:[%s2693_s0 + $0x148] sm:$0xff] }
  0x7d   :  { %v2080_v21 = vpop.permute.xlu0 %47  ;;  %v2082_v22 = vpop.permute.xlu1 %97 }
  0x7e   :  { %v50_v31 = vmul.f32 %v2080_v21, %v37_v17  ;;  %v100_v35 = vmul.f32 %v1581_v18, %v2082_v22  ;;  %v51_v36 = vmul.f32 %v2080_v21, %v38_v19  ;;  %v101_v38 = vmul.f32 %v1582_v20, %v2082_v22  ;;  %v1599_v18 = vld [vmem:[%s2693_s0 + $0x110] sm:$0xff] }
  0x7f   :  { %v52_v40 = vmul.f32 %v2080_v21, %v39_v23  ;;  %v102_v43 = vmul.f32 %v1583_v24, %v2082_v22  ;;  %v53_v45 = vmul.f32 %v2080_v21, %v40_v25  ;;  %v103_v47 = vmul.f32 %v1584_v28, %v2082_v22  ;;  %v1607_v28 = vld [vmem:[%s2693_s0 + $0x150] sm:$0xff] }
  0x80   :  { %v54_v48 = vmul.f32 %v2080_v21, %v41_v29  ;;  %v104_v53 = vmul.f32 %v1585_v30, %v2082_v22  ;;  %v55_v54 = vmul.f32 %v2080_v21, %v42_v32  ;;  %v2157_v55 = vmul.f32 %v1586_v33, %v2082_v22  ;;  %v1600_v29 = vld [vmem:[%s2693_s0 + $0x118] sm:$0xff] }
  0x81   :  { %v2160_v56 = vmul.f32 %v2080_v21, %v43_v34  ;;  %v2172_v62 = vmul.f32 %v1587_v41, %v2082_v22  ;;  %v1608_v30 = vld [vmem:[%s2693_s0 + $0x158] sm:$0xff]  ;;  %v1601_v41 = vld [vmem:[%s2693_s0 + $0x120] sm:$0xff] }
  0x82   :  { %v2144_v49 = vpop.permute.xlu0 %68  ;;  %v2146_v50 = vpop.permute.xlu1 %126 }
  0x83   :  { %v71_v57 = vmul.f32 %v1573_v26, %v2144_v49  ;;  %v129_v58 = vmul.f32 %v1589_v27, %v2146_v50  ;;  %v72_v59 = vmul.f32 %v1574_v37, %v2144_v49  ;;  %v130_v0 = vmul.f32 %v1590_v39, %v2146_v50 }
  0x84   :  { %v73_v1 = vmul.f32 %v1575_v42, %v2144_v49  ;;  %v131_v2 = vmul.f32 %v1591_v44, %v2146_v50  ;;  %v74_v4 = vmul.f32 %v1576_v46, %v2144_v49  ;;  %v132_v15 = vmul.f32 %v1592_v51, %v2146_v50  ;;  %v1609_v42 = vld [vmem:[%s2693_s0 + $0x160] sm:$0xff] }
  0x85   :  { %v79_v8 = vadd.f32 %v71_v57, %v50_v31  ;;  %v80_v11 = vadd.f32 %v72_v59, %v51_v36  ;;  %v75_v16 = vmul.f32 %v1577_v52, %v2144_v49  ;;  %v133_v20 = vmul.f32 %v1593_v60, %v2146_v50  ;;  %v1602_v59 = vld [vmem:[%s2693_s0 + $0x128] sm:$0xff] }
  0x86   :  { %v81_v17 = vadd.f32 %v73_v1, %v52_v40  ;;  %v82_v19 = vadd.f32 %v74_v4, %v53_v45  ;;  %v76_v23 = vmul.f32 %v1578_v61, %v2144_v49  ;;  %v77_v32 = vmul.f32 %v1579_v7, %v2144_v49  ;;  %v1610_v7 = vld [vmem:[%s2693_s0 + $0x168] sm:$0xff] }
  0x87   :  { %v2200_v24 = vpop.permute.xlu1 %155  ;;  %v2202_v25 = vpop.permute.xlu0 %184  ;;  %v108_v26 = vadd.f32 %v100_v35, %v79_v8  ;;  %v109_v27 = vadd.f32 %v101_v38, %v80_v11  ;;  %v83_v31 = vadd.f32 %v75_v16, %v54_v48  ;;  %v1595_v8 = vld [vmem:[%s2693_s0 + $0xf0] sm:$0xff] }
  0x88   :  { %v158_v33 = vmul.f32 %v1597_v63, %v2200_v24  ;;  %v187_v34 = vmul.f32 %v1605_v10, %v2202_v25  ;;  %v159_v35 = vmul.f32 %v1598_v12, %v2200_v24  ;;  %v188_v36 = vmul.f32 %v1606_v13, %v2202_v25  ;;  %v1603_v13 = vld [vmem:[%s2693_s0 + $0x130] sm:$0xff] }
  0x89   :  { %v137_v37 = vadd.f32 %v129_v58, %v108_v26  ;;  %v138_v38 = vadd.f32 %v130_v0, %v109_v27  ;;  %v110_v39 = vadd.f32 %v102_v43, %v81_v17  ;;  %v160_v40 = vmul.f32 %v1599_v18, %v2200_v24  ;;  %v1594_v58 = vld [vmem:[%s2693_s0 + $0xe8] sm:$0xff]  ;;  %v44_v0 = vld [vmem:[%s2693_s0 + $0x38] sm:$0xff]  ;;  %v1611_v27 = vld [vmem:[%s2693_s0 + $0x170] sm:$0xff] }
  0x8a   :  { %v189_v44 = vmul.f32 %v1607_v28, %v2202_v25  ;;  %v111_v45 = vadd.f32 %v103_v47, %v82_v19  ;;  %v161_v46 = vmul.f32 %v1600_v29, %v2200_v24  ;;  %v190_v48 = vmul.f32 %v1608_v30, %v2202_v25 }
  0x8b   :  { %v166_v51 = vadd.f32 %v158_v33, %v137_v37  ;;  %v167_v52 = vadd.f32 %v159_v35, %v138_v38  ;;  %v139_v43 = vadd.f32 %v131_v2, %v110_v39  ;;  %v112_v57 = vadd.f32 %v104_v53, %v83_v31  ;;  %v1596_v31 = vld [vmem:[%s2693_s0 + $0xf8] sm:$0xff] }
  0x8c   :  { %v140_v60 = vadd.f32 %v132_v15, %v111_v45  ;;  %v162_v61 = vmul.f32 %v1601_v41, %v2200_v24  ;;  %v191_v47 = vmul.f32 %v1609_v42, %v2202_v25  ;;  %v84_v63 = vadd.f32 %v76_v23, %v55_v54  ;;  %v1580_v15 = vld [vmem:[%s2693_s0 + $0x78] sm:$0xff] }
  0x8d   :  { %v2239_v1 = vadd.f32 %v187_v34, %v166_v51  ;;  %v2241_v53 = vadd.f32 %v188_v36, %v167_v52  ;;  %v168_v2 = vadd.f32 %v160_v40, %v139_v43  ;;  %v141_v4 = vadd.f32 %v133_v20, %v112_v57  ;;  %v1604_v33 = vld [vmem:[%s2693_s0 + $0x138] sm:$0xff]  ;;  %v2370_v51 = vld [vmem:[%s2698_s5] ss:$0 sm:$0xff]  ;;  %s1942_s5 = smov 96  }
  0x8e   :  { %v169_v10 = vadd.f32 %v161_v46, %v140_v60  ;;  %v113_v54 = vadd.f32 %v2157_v55, %v84_v63  ;;  %v134_v11 = vmul.f32 %v1594_v58, %v2146_v50  ;;  %v163_v12 = vmul.f32 %v1602_v59, %v2200_v24  ;;  %v1612_v38 = vld [vmem:[%s2693_s0 + $0x178] sm:$0xff] }
  0x8f   :  { %204 = vst.msk [vmem:[%s2702_s9] sm:$0xff] %vm203_vm1, %v2239_v1  ;;  %1706 = vmatprep.mubr.msk.f32.mxu0 %vm203_vm1, %v2239_v1  ;;  %205 = vst.msk [vmem:[%s2702_s9 + $0x8] sm:$0xff] %vm203_vm1, %v2241_v53  ;;  %v2270_v55 = vadd.f32 %v189_v44, %v168_v2  ;;  %v170_v16 = vadd.f32 %v162_v61, %v141_v4  ;;  %v85_v17 = vadd.f32 %v77_v32, %v2160_v56  ;;  %v1588_v56 = vld [vmem:[%s2693_s0 + $0xb8] sm:$0xff]  ;;  %v2363_v44 = vpop.permute.xlu1 %442 }
  0x90   :  { %v57_v18 = vmul.f32 %v2080_v21, %v44_v0  ;;  %1707 = vmatmul.mubr.msk.f32.vlgmr.msra.gmra.mxu0 %vm203_vm1, %v2241_v53  ;;  %v2276_v19 = vadd.f32 %v190_v48, %v169_v10  ;;  %v142_v20 = vadd.f32 %v134_v11, %v113_v54  ;;  %v192_v23 = vmul.f32 %v1610_v7, %v2202_v25 }
  0x91   :  { %v135_v26 = vmul.f32 %v1595_v8, %v2146_v50  ;;  %206 = vst.msk [vmem:[%s2702_s9 + $0x10] sm:$0xff] %vm203_vm1, %v2270_v55  ;;  %1709 = vmatprep.mubr.msk.f32.mxu0 %vm203_vm1, %v2270_v55  ;;  %v2293_v21 = vadd.f32 %v191_v47, %v170_v16  ;;  %v114_v28 = vadd.f32 %v2172_v62, %v85_v17 }
  0x92   :  { %v164_v29 = vmul.f32 %v1603_v13, %v2200_v24  ;;  %v78_v30 = vmul.f32 %v1580_v15, %v2144_v49  ;;  %207 = vst.msk [vmem:[%s2702_s9 + $0x18] sm:$0xff] %vm203_vm1, %v2276_v19  ;;  %v171_v32 = vadd.f32 %v163_v12, %v142_v20  ;;  %1741 = vmatpush3.msra.mxu0 %v2012_v3 }
  0x93   :  { %208 = vst.msk [vmem:[%s2702_s9 + $0x20] sm:$0xff] %vm203_vm1, %v2293_v21  ;;  %v143_v49 = vadd.f32 %v135_v26, %v114_v28  ;;  %v193_v62 = vmul.f32 %v1611_v27, %v2202_v25  ;;  %v107_v35 = vmul.f32 %v1588_v56, %v2082_v22  ;;  %1742 = vmatprep.subr.mxu0 %v1935_v5 }
  0x94   :  { %v86_v34 = vadd.f32 %v78_v30, %v57_v18  ;;  %1710 = vmatmul.mubr.msk.f32.gmra.mxu0 %vm203_vm1, %v2276_v19  ;;  %v2320_v36 = vadd.f32 %v192_v23, %v171_v32  ;;  %v136_v37 = vmul.f32 %v1596_v31, %v2146_v50  ;;  %v165_v22 = vmul.f32 %v1604_v33, %v2200_v24 }
  0x95   :  { %1712 = vmatprep.mubr.msk.f32.mxu0 %vm203_vm1, %v2293_v21  ;;  %v172_v39 = vadd.f32 %v164_v29, %v143_v49  ;;  %1743 = vmatpush3.msra.mxu0 %v2025_v6  ;;  %v194_v42 = vmul.f32 %v1612_v38, %v2202_v25 }
  0x96   :  { %v115_v40 = vadd.f32 %v107_v35, %v86_v34  ;;  %209 = vst.msk [vmem:[%s2702_s9 + $0x28] sm:$0xff] %vm203_vm1, %v2320_v36  ;;  %1744 = vmatprep.subr.mxu0 %v1935_v5 }
  0x97   :  { %v2336_v50 = vadd.f32 %v193_v62, %v172_v39  ;;  %1745 = vmatpush3.msra.mxu0 %v2030_v9 }
  0x98   :  { %v144_v41 = vadd.f32 %v136_v37, %v115_v40  ;;  %1713 = vmatmul.mubr.msk.f32.gmra.mxu0 %vm203_vm1, %v2320_v36  ;;  %1746 = vmatprep.subr.mxu0 %v1935_v5 }
  0x99   :  { %210 = vst.msk [vmem:[%s2702_s9 + $0x30] sm:$0xff] %vm203_vm1, %v2336_v50  ;;  %1715 = vmatprep.mubr.msk.f32.mxu0 %vm203_vm1, %v2336_v50  ;;  %1747 = vmatpush3.msra.mxu0 %v2044_v14 }
  0x9a   :  { %v173_v24 = vadd.f32 %v165_v22, %v144_v41  ;;  %1762 = vmatprep.subr.mxu0 %v1935_v5 }
  0x9c   :  { %v2352_v25 = vadd.f32 %v194_v42, %v173_v24 }
  0x9e   :  { %211 = vst.msk [vmem:[%s2702_s9 + $0x38] sm:$0xff] %vm203_vm1, %v2352_v25  ;;  %1716 = vmatmul.mubr.msk.f32.gmra.mxu0 %vm203_vm1, %v2352_v25  ;;  %s1943_s9 = smov 32  }
  0x9f   :  { %1748 = vmatprep.mubr.msk.f32.mxu0 %vm1936_vm0, %v1935_v5 }
  0xcf   :  { %v426_v45 = vpop.f32.mrf.mxu1 }
  0xd0   :  { %v445_v46 = vadd.f32 %v2363_v44, %v426_v45 }
  0xd1   :  { %v1728_v48 = vpop.f32.mrf.mxu1 }
  0xd2   :  { %447 = vrot.lane.b32.xlu1 %v445_v46, %s1941_s4 }
 0x144   :  { %v448_v13 = vpop.permute.xlu1 %447 }
 0x150   :  { %v1708_v52 = vpop.f32.mrf.mxu0 }
 0x151   :  { %v324_v43 = vadd.f32 %v1708_v52, %v2370_v51 }
 0x152   :  { %v318_v57 = vpop.f32.mrf.mxu0 }
 0x153   :  { %v319_v58 = vadd.f32 %v2370_v51, %v318_v57 }
 0x154   :  { %v1711_v59 = vpop.f32.mrf.mxu0 }
 0x155   :  { %v430_v60 = vadd.f32 %v426_v45, %v319_v58  ;;  %v2375_v61 = vadd.f32 %v1711_v59, %v2370_v51 }
 0x156   :  { %v328_v47 = vpop.f32.mrf.mxu0 }
 0x157   :  { %v1622_v63 = vmul.f32 -1.442695, %v430_v60  ;;  %v2378_v0 = vadd.f32 %v2370_v51, %v328_v47 }
 0x158   :  { %v1714_v2 = vpop.f32.mrf.mxu0 }
 0x159   :  { %1825 = vpow2.f32 %v1622_v63  ;;  %v2381_v4 = vadd.f32 %v1714_v2, %v2370_v51 }
 0x15a   :  { %v338_v7 = vpop.f32.mrf.mxu0 }
 0x15b   :  { %v2384_v8 = vadd.f32 %v2370_v51, %v338_v7 }
 0x15e   :  { %v1717_v10 = vpop.f32.mrf.mxu0 }
 0x15f   :  { %v2387_v54 = vadd.f32 %v1717_v10, %v2370_v51 }
 0x160   :  { %v2426_v52 = vpop.f32.mrf.mxu0 }
 0x166   :  { %v1826_v11 = vpop.eup %1825 }
 0x167   :  { %v434_v12 = vadd.f32 1.0, %v1826_v11 }
 0x169   :  { %1827 = vrcp.f32 %v434_v12 }
 0x176   :  { %v1828_v15 = vpop.eup %1827 }
 0x177   :  { %v450_v16 = vmul.f32 %v1828_v15, %v448_v13  ;;  %v457_v23 = vsub.f32 1.0, %v1828_v15  ;;  %v463_v27 = vmul.f32 0.0, %v1828_v15 }
 0x179   :  { %452 = vrot.lane.b32.xlu0 %v450_v16, %s1941_s4 }
 0x1eb   :  { %v453_v17 = vpop.permute.xlu0 %452 }
 0x1ec   :  { %v455_v18 = vadd.f32 %v453_v17, %v319_v58 }
 0x1ee   :  { %1829 = vtanh.f32 %v455_v18 }
 0x1fb   :  { %v1830_v20 = vpop.eup %1829 }
 0x1fc   :  { %459 = vrot.lane.b32.xlu1 %v1830_v20, %s1942_s5 }
 0x26e   :  { %v460_v26 = vpop.permute.xlu1 %459 }
 0x26f   :  { %v462_v56 = vmul.f32 %v460_v26, %v457_v23 }
 0x271   :  { %v2391_v28 = vadd.f32 %v463_v27, %v462_v56 }
 0x273   :  { %466 = vrot.lane.b32.xlu0 %v2391_v28, %s1942_s5 }
 0x2e5   :  { %v467_v29 = vpop.permute.xlu0 %466 }
 0x2e6   :  { %1738 = vmatmul.mubr.msk.f32.vlgmr.msra.gmra.mxu1 %vm203_vm1, %v467_v29 }
 0x2e7   :  { %1752 = vmatpush3.msra.mxu1 %v2012_v3  ;;  %1759 = vmatprep.mubr.msk.f32.mxu1 %vm1936_vm0, %v1935_v5 }
 0x2e8   :  { %1753 = vmatprep.subr.mxu1 %v1935_v5 }
 0x2e9   :  { %1754 = vmatpush3.msra.mxu1 %v2025_v6 }
 0x2ea   :  { %1755 = vmatprep.subr.mxu1 %v1935_v5 }
 0x2eb   :  { %1756 = vmatpush3.msra.mxu1 %v2030_v9 }
 0x2ec   :  { %1757 = vmatprep.subr.mxu1 %v1935_v5 }
 0x2ed   :  { %1758 = vmatpush3.msra.mxu1 %v2044_v14 }
 0x2ee   :  { %1773 = vmatprep.subr.mxu1 %v1935_v5 }
 0x3a6   :  { %v536_v30 = vpop.f32.mrf.mxu1 }
 0x3a7   :  { %v547_v31 = vadd.f32 %v536_v30, %v2363_v44  ;;  %v540_v33 = vadd.f32 %v536_v30, %v324_v43 }
 0x3a8   :  { %v1739_v32 = vpop.f32.mrf.mxu1 }
 0x3a9   :  { %549 = vrot.lane.b32.xlu1 %v547_v31, %s1941_s4  ;;  %v1625_v49 = vmul.f32 -1.442695, %v540_v33 }
 0x3ab   :  { %1831 = vpow2.f32 %v1625_v49 }
 0x3b8   :  { %v1832_v62 = vpop.eup %1831 }
 0x3b9   :  { %v544_v34 = vadd.f32 1.0, %v1832_v62 }
 0x3bb   :  { %1833 = vrcp.f32 %v544_v34 }
 0x3c8   :  { %v1834_v35 = vpop.eup %1833 }
 0x3c9   :  { %v559_v41 = vsub.f32 1.0, %v1834_v35  ;;  %v565_v24 = vmul.f32 %v1834_v35, %v2391_v28 }
 0x41b   :  { %v550_v37 = vpop.permute.xlu1 %549 }
 0x41c   :  { %v552_v38 = vmul.f32 %v1834_v35, %v550_v37 }
 0x41e   :  { %554 = vrot.lane.b32.xlu0 %v552_v38, %s1941_s4 }
 0x490   :  { %v555_v39 = vpop.permute.xlu0 %554 }
 0x491   :  { %v557_v40 = vadd.f32 %v555_v39, %v324_v43 }
 0x493   :  { %1835 = vtanh.f32 %v557_v40 }
 0x4a0   :  { %v1836_v22 = vpop.eup %1835 }
 0x4a1   :  { %561 = vrot.lane.b32.xlu1 %v1836_v22, %s1942_s5 }
 0x513   :  { %v562_v42 = vpop.permute.xlu1 %561 }
 0x514   :  { %v564_v45 = vmul.f32 %v562_v42, %v559_v41 }
 0x516   :  { %v2411_v46 = vadd.f32 %v565_v24, %v564_v45 }
 0x518   :  { %568 = vrot.lane.b32.xlu0 %v2411_v46, %s1942_s5 }
 0x58a   :  { %v569_v48 = vpop.permute.xlu0 %568 }
 0x58b   :  { %1749 = vmatmul.mubr.msk.f32.vlgmr.msra.gmra.mxu0 %vm203_vm1, %v569_v48 }
 0x58c   :  { %1763 = vmatpush3.msra.mxu0 %v2012_v3  ;;  %1770 = vmatprep.mubr.msk.f32.mxu0 %vm1936_vm0, %v1935_v5 }
 0x58d   :  { %1764 = vmatprep.subr.mxu0 %v1935_v5 }
 0x58e   :  { %1765 = vmatpush3.msra.mxu0 %v2025_v6 }
 0x58f   :  { %1766 = vmatprep.subr.mxu0 %v1935_v5 }
 0x590   :  { %1767 = vmatpush3.msra.mxu0 %v2030_v9 }
 0x591   :  { %1768 = vmatprep.subr.mxu0 %v1935_v5 }
 0x592   :  { %1769 = vmatpush3.msra.mxu0 %v2044_v14 }
 0x593   :  { %1784 = vmatprep.subr.mxu0 %v1935_v5 }
 0x64b   :  { %v638_v43 = vpop.f32.mrf.mxu0 }
 0x64c   :  { %v649_v57 = vadd.f32 %v638_v43, %v2363_v44  ;;  %v642_v59 = vadd.f32 %v638_v43, %v2378_v0 }
 0x64d   :  { %v1750_v58 = vpop.f32.mrf.mxu0 }
 0x64e   :  { %651 = vrot.lane.b32.xlu1 %v649_v57, %s1941_s4  ;;  %v1627_v60 = vmul.f32 -1.442695, %v642_v59 }
 0x650   :  { %1837 = vpow2.f32 %v1627_v60 }
 0x65d   :  { %v1838_v47 = vpop.eup %1837 }
 0x65e   :  { %v646_v63 = vadd.f32 1.0, %v1838_v47 }
 0x660   :  { %1839 = vrcp.f32 %v646_v63 }
 0x66d   :  { %v1840_v2 = vpop.eup %1839 }
 0x66e   :  { %v661_v15 = vsub.f32 1.0, %v1840_v2  ;;  %v667_v17 = vmul.f32 %v1840_v2, %v2411_v46 }
 0x6c0   :  { %v652_v7 = vpop.permute.xlu1 %651 }
 0x6c1   :  { %v654_v10 = vmul.f32 %v1840_v2, %v652_v7 }
 0x6c3   :  { %656 = vrot.lane.b32.xlu0 %v654_v10, %s1941_s4 }
 0x735   :  { %v657_v11 = vpop.permute.xlu0 %656 }
 0x736   :  { %v659_v12 = vadd.f32 %v657_v11, %v2378_v0 }
 0x738   :  { %1841 = vtanh.f32 %v659_v12 }
 0x745   :  { %v1842_v13 = vpop.eup %1841 }
 0x746   :  { %663 = vrot.lane.b32.xlu1 %v1842_v13, %s1942_s5 }
 0x7b8   :  { %v664_v16 = vpop.permute.xlu1 %663 }
 0x7b9   :  { %v666_v18 = vmul.f32 %v664_v16, %v661_v15 }
 0x7bb   :  { %v2435_v20 = vadd.f32 %v667_v17, %v666_v18 }
 0x7bd   :  { %670 = vrot.lane.b32.xlu0 %v2435_v20, %s1942_s5 }
 0x82f   :  { %v671_v23 = vpop.permute.xlu0 %670 }
 0x830   :  { %1760 = vmatmul.mubr.msk.f32.vlgmr.msra.gmra.mxu1 %vm203_vm1, %v671_v23 }
 0x831   :  { %1774 = vmatpush3.msra.mxu1 %v2012_v3  ;;  %1781 = vmatprep.mubr.msk.f32.mxu1 %vm1936_vm0, %v1935_v5 }
 0x832   :  { %1775 = vmatprep.subr.mxu1 %v1935_v5 }
 0x833   :  { %1776 = vmatpush3.msra.mxu1 %v2025_v6 }
 0x834   :  { %1777 = vmatprep.subr.mxu1 %v1935_v5 }
 0x835   :  { %1778 = vmatpush3.msra.mxu1 %v2030_v9 }
 0x836   :  { %1779 = vmatprep.subr.mxu1 %v1935_v5 }
 0x837   :  { %1780 = vmatpush3.msra.mxu1 %v2044_v14 }
 0x838   :  { %1795 = vmatprep.subr.mxu1 %v1935_v5 }
 0x8f0   :  { %v740_v0 = vpop.f32.mrf.mxu1 }
 0x8f1   :  { %v751_v26 = vadd.f32 %v740_v0, %v2363_v44  ;;  %v744_v56 = vadd.f32 %v740_v0, %v2375_v61 }
 0x8f2   :  { %v1761_v27 = vpop.f32.mrf.mxu1 }
 0x8f3   :  { %753 = vrot.lane.b32.xlu1 %v751_v26, %s1941_s4  ;;  %v1629_v29 = vmul.f32 -1.442695, %v744_v56 }
 0x8f5   :  { %1843 = vpow2.f32 %v1629_v29 }
 0x902   :  { %v1844_v30 = vpop.eup %1843 }
 0x903   :  { %v748_v31 = vadd.f32 1.0, %v1844_v30 }
 0x905   :  { %1845 = vrcp.f32 %v748_v31 }
 0x912   :  { %v1846_v32 = vpop.eup %1845 }
 0x913   :  { %v763_v37 = vsub.f32 1.0, %v1846_v32  ;;  %v769_v39 = vmul.f32 %v1846_v32, %v2435_v20 }
 0x965   :  { %v754_v33 = vpop.permute.xlu1 %753 }
 0x966   :  { %v756_v49 = vmul.f32 %v1846_v32, %v754_v33 }
 0x968   :  { %758 = vrot.lane.b32.xlu0 %v756_v49, %s1941_s4 }
 0x9da   :  { %v759_v62 = vpop.permute.xlu0 %758 }
 0x9db   :  { %v761_v34 = vadd.f32 %v759_v62, %v2375_v61 }
 0x9dd   :  { %1847 = vtanh.f32 %v761_v34  ;;  %v349_v34 = vadd.f32 %v2370_v51, %v2426_v52 }
 0x9ea   :  { %v1848_v35 = vpop.eup %1847 }
 0x9eb   :  { %765 = vrot.lane.b32.xlu1 %v1848_v35, %s1942_s5 }
 0xa5d   :  { %v766_v38 = vpop.permute.xlu1 %765 }
 0xa5e   :  { %v768_v40 = vmul.f32 %v766_v38, %v763_v37 }
 0xa60   :  { %v2457_v22 = vadd.f32 %v769_v39, %v768_v40 }
 0xa62   :  { %772 = vrot.lane.b32.xlu0 %v2457_v22, %s1942_s5 }
 0xad4   :  { %v773_v41 = vpop.permute.xlu0 %772 }
 0xad5   :  { %1771 = vmatmul.mubr.msk.f32.vlgmr.msra.gmra.mxu0 %vm203_vm1, %v773_v41 }
 0xad6   :  { %1785 = vmatpush3.msra.mxu0 %v2012_v3  ;;  %1792 = vmatprep.mubr.msk.f32.mxu0 %vm1936_vm0, %v1935_v5 }
 0xad7   :  { %1786 = vmatprep.subr.mxu0 %v1935_v5 }
 0xad8   :  { %1787 = vmatpush3.msra.mxu0 %v2025_v6 }
 0xad9   :  { %1788 = vmatprep.subr.mxu0 %v1935_v5 }
 0xada   :  { %1789 = vmatpush3.msra.mxu0 %v2030_v9 }
 0xadb   :  { %1790 = vmatprep.subr.mxu0 %v1935_v5 }
 0xadc   :  { %1791 = vmatpush3.msra.mxu0 %v2044_v14 }
 0xb95   :  { %v842_v61 = vpop.f32.mrf.mxu0 }
 0xb96   :  { %v853_v42 = vadd.f32 %v842_v61, %v2363_v44  ;;  %v846_v45 = vadd.f32 %v842_v61, %v2384_v8 }
 0xb97   :  { %v1772_v24 = vpop.f32.mrf.mxu0 }
 0xb98   :  { %855 = vrot.lane.b32.xlu1 %v853_v42, %s1941_s4  ;;  %v1631_v48 = vmul.f32 -1.442695, %v846_v45 }
 0xb9a   :  { %1849 = vpow2.f32 %v1631_v48 }
 0xba7   :  { %v1850_v43 = vpop.eup %1849 }
 0xba8   :  { %v850_v57 = vadd.f32 1.0, %v1850_v43 }
 0xbaa   :  { %1851 = vrcp.f32 %v850_v57 }
 0xbb7   :  { %v1852_v58 = vpop.eup %1851 }
 0xbb8   :  { %v865_v7 = vsub.f32 1.0, %v1852_v58  ;;  %v871_v11 = vmul.f32 %v1852_v58, %v2457_v22 }
 0xc0a   :  { %v856_v59 = vpop.permute.xlu1 %855 }
 0xc0b   :  { %v858_v60 = vmul.f32 %v1852_v58, %v856_v59  ;;  %v1179_v58 = vld [vmem:[%s2695_s2] sm:$0xff] }
 0xc0d   :  { %860 = vrot.lane.b32.xlu0 %v858_v60, %s1941_s4 }
 0xc7f   :  { %v861_v47 = vpop.permute.xlu0 %860 }
 0xc80   :  { %v863_v63 = vadd.f32 %v861_v47, %v2384_v8 }
 0xc82   :  { %1853 = vtanh.f32 %v863_v63 }
 0xc8f   :  { %v1854_v2 = vpop.eup %1853 }
 0xc90   :  { %867 = vrot.lane.b32.xlu1 %v1854_v2, %s1942_s5 }
 0xd02   :  { %v868_v10 = vpop.permute.xlu1 %867 }
 0xd03   :  { %v870_v12 = vmul.f32 %v868_v10, %v865_v7 }
 0xd05   :  { %v2478_v13 = vadd.f32 %v871_v11, %v870_v12 }
 0xd07   :  { %874 = vrot.lane.b32.xlu0 %v2478_v13, %s1942_s5 }
 0xd79   :  { %v875_v15 = vpop.permute.xlu0 %874 }
 0xd7a   :  { %1782 = vmatmul.mubr.msk.f32.vlgmr.msra.gmra.mxu1 %vm203_vm1, %v875_v15 }
 0xd7b   :  { %1796 = vmatpush3.msra.mxu1 %v2012_v3  ;;  %1803 = vmatprep.mubr.msk.f32.mxu1 %vm1936_vm0, %v1935_v5 }
 0xd7c   :  { %1797 = vmatprep.subr.mxu1 %v1935_v5 }
 0xd7d   :  { %1798 = vmatpush3.msra.mxu1 %v2025_v6 }
 0xd7e   :  { %1799 = vmatprep.subr.mxu1 %v1935_v5 }
 0xd7f   :  { %1800 = vmatpush3.msra.mxu1 %v2030_v9 }
 0xd80   :  { %1801 = vmatprep.subr.mxu1 %v1935_v5 }
 0xd81   :  { %1802 = vmatpush3.msra.mxu1 %v2044_v14 }
 0xe3a   :  { %v944_v8 = vpop.f32.mrf.mxu1 }
 0xe3b   :  { %v955_v16 = vadd.f32 %v944_v8, %v2363_v44  ;;  %v948_v3 = vadd.f32 %v944_v8, %v2381_v4  ;;  %v1180_v8 = vld [vmem:[%s2695_s2 + $0x8] sm:$0xff] }
 0xe3c   :  { %v1783_v17 = vpop.f32.mrf.mxu1 }
 0xe3d   :  { %957 = vrot.lane.b32.xlu1 %v955_v16, %s1941_s4  ;;  %v1633_v18 = vmul.f32 -1.442695, %v948_v3 }
 0xe3f   :  { %1855 = vpow2.f32 %v1633_v18 }
 0xe4c   :  { %v1856_v23 = vpop.eup %1855 }
 0xe4d   :  { %v952_v6 = vadd.f32 1.0, %v1856_v23 }
 0xe4f   :  { %1857 = vrcp.f32 %v952_v6 }
 0xe5c   :  { %v1858_v0 = vpop.eup %1857 }
 0xe5d   :  { %v967_v56 = vsub.f32 1.0, %v1858_v0  ;;  %v973_v30 = vmul.f32 %v1858_v0, %v2478_v13 }
 0xeaf   :  { %v958_v26 = vpop.permute.xlu1 %957 }
 0xeb0   :  { %v960_v9 = vmul.f32 %v1858_v0, %v958_v26 }
 0xeb2   :  { %962 = vrot.lane.b32.xlu0 %v960_v9, %s1941_s4 }
 0xf24   :  { %v963_v5 = vpop.permute.xlu0 %962 }
 0xf25   :  { %v965_v14 = vadd.f32 %v963_v5, %v2381_v4 }
 0xf27   :  { %1859 = vtanh.f32 %v965_v14 }
 0xf34   :  { %v1860_v27 = vpop.eup %1859 }
 0xf35   :  { %969 = vrot.lane.b32.xlu1 %v1860_v27, %s1942_s5 }
 0xfa7   :  { %v970_v29 = vpop.permute.xlu1 %969 }
 0xfa8   :  { %v972_v31 = vmul.f32 %v970_v29, %v967_v56  ;;  %v1181_v29 = vld [vmem:[%s2695_s2 + $0x10] sm:$0xff] }
 0xfaa   :  { %v2499_v32 = vadd.f32 %v973_v30, %v972_v31 }
 0xfac   :  { %976 = vrot.lane.b32.xlu0 %v2499_v32, %s1942_s5 }
0x101e   :  { %v977_v33 = vpop.permute.xlu0 %976 }
0x101f   :  { %1793 = vmatmul.mubr.msk.f32.vlgmr.msra.gmra.mxu0 %vm203_vm1, %v977_v33 }
0x10df   :  { %v1046_v49 = vpop.f32.mrf.mxu0 }
0x10e0   :  { %v1057_v4 = vadd.f32 %v1046_v49, %v2363_v44  ;;  %v1050_v35 = vadd.f32 %v1046_v49, %v349_v34 }
0x10e1   :  { %v1794_v62 = vpop.f32.mrf.mxu0 }
0x10e2   :  { %1059 = vrot.lane.b32.xlu1 %v1057_v4, %s1941_s4  ;;  %v1635_v37 = vmul.f32 -1.442695, %v1050_v35 }
0x10e4   :  { %1861 = vpow2.f32 %v1635_v37 }
0x10f1   :  { %v1862_v38 = vpop.eup %1861 }
0x10f2   :  { %v1054_v39 = vadd.f32 1.0, %v1862_v38 }
0x10f4   :  { %1863 = vrcp.f32 %v1054_v39 }
0x1101   :  { %v1864_v40 = vpop.eup %1863 }
0x1102   :  { %v1069_v51 = vsub.f32 1.0, %v1864_v40  ;;  %v1075_v48 = vmul.f32 %v1864_v40, %v2499_v32 }
0x1154   :  { %v1060_v41 = vpop.permute.xlu1 %1059 }
0x1155   :  { %v1062_v61 = vmul.f32 %v1864_v40, %v1060_v41  ;;  %v1182_v41 = vld [vmem:[%s2695_s2 + $0x18] sm:$0xff] }
0x1157   :  { %1064 = vrot.lane.b32.xlu0 %v1062_v61, %s1941_s4 }
0x11c9   :  { %v1065_v42 = vpop.permute.xlu0 %1064 }
0x11ca   :  { %v1067_v24 = vadd.f32 %v1065_v42, %v349_v34 }
0x11cc   :  { %1865 = vtanh.f32 %v1067_v24 }
0x11d9   :  { %v1866_v45 = vpop.eup %1865 }
0x11da   :  { %1071 = vrot.lane.b32.xlu1 %v1866_v45, %s1942_s5 }
0x11de   :  { %1194 = vrot.lane.b32.xlu1 %v2239_v1, %s1943_s9 }
0x124c   :  { %v1072_v52 = vpop.permute.xlu1 %1071 }
0x124d   :  { %v1074_v43 = vmul.f32 %v1072_v52, %v1069_v51 }
0x124f   :  { %v2513_v57 = vadd.f32 %v1075_v48, %v1074_v43 }
0x1250   :  { %v1195_v63 = vpop.permute.xlu1 %1194 }
0x1251   :  { %1078 = vrot.lane.b32.xlu0 %v2513_v57, %s1942_s5 }
0x1255   :  { %1189 = vrot.lane.b32.xlu0 %v1179_v58, %s1943_s9 }
0x12c3   :  { %v1079_v59 = vpop.permute.xlu0 %1078 }
0x12c4   :  { %1804 = vmatmul.mubr.msk.f32.vlgmr.msra.gmra.mxu1 %vm203_vm1, %v1079_v59 }
0x12c7   :  { %v1190_v1 = vpop.permute.xlu0 %1189 }
0x12c8   :  { %v1192_v60 = vadd.f32 %v1190_v1, %v2391_v28 }
0x12ca   :  { %1867 = vtanh.f32 %v1192_v60 }
0x12d7   :  { %v2523_v47 = vpop.eup %1867 }
0x12d8   :  { %v1197_v2 = vsub.f32 %v2523_v47, %v1195_v63  ;;  %v1207_v10 = vmul.f32 %v2523_v47, %v2523_v47 }
0x12da   :  { %v1198_v7 = vmul.f32 %v1197_v2, %v1197_v2 }
0x12dc   :  { %1200 = vrot.lane.b32.xlu0 %v1198_v7, %s1942_s5 }
0x12e0   :  { %1209 = vrot.lane.b32.xlu0 %v1207_v10, %s1942_s5 }
0x134e   :  { %v1201_v11 = vpop.permute.xlu0 %1200 }
0x134f   :  { %v1203_v12 = vsel %vm203_vm1, %v1201_v11, 0.0 }
0x1350   :  { %1204 = vadd.xlane.f32.xlu1 %v1203_v12 }
0x1352   :  { %v1210_v15 = vpop.permute.xlu0 %1209 }
0x1353   :  { %v1212_v28 = vsel %vm203_vm1, %v1210_v15, 0.0 }
0x1354   :  { %1213 = vadd.xlane.f32.xlu0 %v1212_v28 }
0x1361   :  { %1217 = vrot.lane.b32.xlu1 %v1180_v8, %s1943_s9 }
0x136a   :  { %1222 = vrot.lane.b32.xlu0 %v2241_v53, %s1943_s9 }
0x1384   :  { %v1148_v16 = vpop.f32.mrf.mxu1 }
0x1386   :  { %v1805_v17 = vpop.f32.mrf.mxu1 }
0x1387   :  { %v1184_v17 = vld [vmem:[%s2695_s2 + $0x28] sm:$0xff] }
0x13d9   :  { %v1205_v3 = vpop.xlane.xlu1 %1204 }
0x13dd   :  { %v1218_v18 = vpop.permute.xlu1 %1217  ;;  %v1214_v6 = vpop.xlane.xlu0 %1213 }
0x13de   :  { %v1220_v23 = vadd.f32 %v1218_v18, %v2411_v46  ;;  %v1186_v18 = vld [vmem:[%s2695_s2 + $0x38] sm:$0xff] }
0x13e0   :  { %1869 = vtanh.f32 %v1220_v23 }
0x13e1   :  { %v1223_v26 = vpop.permute.xlu0 %1222 }
0x13ed   :  { %v2539_v0 = vpop.eup %1869 }
0x13ee   :  { %v1225_v9 = vsub.f32 %v2539_v0, %v1223_v26  ;;  %v1235_v5 = vmul.f32 %v2539_v0, %v2539_v0 }
0x13f0   :  { %v1226_v14 = vmul.f32 %v1225_v9, %v1225_v9  ;;  %1237 = vrot.lane.b32.xlu0 %v1235_v5, %s1942_s5 }
0x13f2   :  { %1228 = vrot.lane.b32.xlu1 %v1226_v14, %s1942_s5 }
0x1462   :  { %v1238_v53 = vpop.permute.xlu0 %1237 }
0x1463   :  { %v1240_v27 = vsel %vm203_vm1, %v1238_v53, 0.0 }
0x1464   :  { %v1229_v56 = vpop.permute.xlu1 %1228  ;;  %1241 = vadd.xlane.f32.xlu0 %v1240_v27 }
0x1465   :  { %v1231_v46 = vsel %vm203_vm1, %v1229_v56, 0.0 }
0x1466   :  { %1232 = vadd.xlane.f32.xlu1 %v1231_v46 }
0x1477   :  { %1245 = vrot.lane.b32.xlu1 %v1181_v29, %s1943_s9 }
0x147a   :  { %1250 = vrot.lane.b32.xlu0 %v2270_v55, %s1943_s9  ;;  %v1159_v55 = vadd.f32 %v1148_v16, %v2363_v44  ;;  %v1152_v44 = vadd.f32 %v1148_v16, %v2387_v54  ;;  %v1183_v16 = vld [vmem:[%s2695_s2 + $0x20] sm:$0xff] }
0x147c   :  { %v1637_v61 = vmul.f32 -1.442695, %v1152_v44 }
0x14ed   :  { %v1242_v49 = vpop.xlane.xlu0 %1241 }
0x14ee   :  { %v1243_v24 = vadd.f32 %v1242_v49, %v1214_v6 }
0x14ef   :  { %v1233_v30 = vpop.xlane.xlu1 %1232 }
0x14f0   :  { %v1234_v51 = vadd.f32 %v1233_v30, %v1205_v3  ;;  %v1185_v3 = vld [vmem:[%s2695_s2 + $0x30] sm:$0xff] }
0x14f1   :  { %v1251_v62 = vpop.permute.xlu0 %1250 }
0x14f3   :  { %v1246_v31 = vpop.permute.xlu1 %1245 }
0x14f4   :  { %v1248_v33 = vadd.f32 %v1246_v31, %v2435_v20 }
0x14f6   :  { %1871 = vtanh.f32 %v1248_v33 }
0x14f7   :  { %1873 = vpow2.f32 %v1637_v61 }
0x1503   :  { %v2555_v4 = vpop.eup %1871 }
0x1504   :  { %v1263_v34 = vmul.f32 %v2555_v4, %v2555_v4  ;;  %v1253_v35 = vsub.f32 %v2555_v4, %v1251_v62  ;;  %v1874_v58 = vpop.eup %1873 }
0x1505   :  { %v1156_v60 = vadd.f32 1.0, %v1874_v58 }
0x1506   :  { %1265 = vrot.lane.b32.xlu0 %v1263_v34, %s1942_s5  ;;  %v1254_v37 = vmul.f32 %v1253_v35, %v1253_v35 }
0x1508   :  { %1256 = vrot.lane.b32.xlu1 %v1254_v37, %s1942_s5 }
0x150c   :  { %1161 = vrot.lane.b32.xlu1 %v1159_v55, %s1941_s4 }
0x1578   :  { %v1266_v20 = vpop.permute.xlu0 %1265 }
0x1579   :  { %v1268_v38 = vsel %vm203_vm1, %v1266_v20, 0.0 }
0x157a   :  { %v1257_v39 = vpop.permute.xlu1 %1256  ;;  %1269 = vadd.xlane.f32.xlu0 %v1268_v38 }
0x157b   :  { %v1259_v40 = vsel %vm203_vm1, %v1257_v39, 0.0 }
0x157c   :  { %1260 = vadd.xlane.f32.xlu1 %v1259_v40 }
0x157e   :  { %v1162_v42 = vpop.permute.xlu1 %1161 }
0x158d   :  { %1273 = vrot.lane.b32.xlu1 %v1182_v41, %s1943_s9 }
0x1590   :  { %1278 = vrot.lane.b32.xlu0 %v2276_v19, %s1943_s9 }
0x1603   :  { %v1270_v45 = vpop.xlane.xlu0 %1269 }
0x1604   :  { %v1271_v52 = vadd.f32 %v1270_v45, %v1243_v24 }
0x1605   :  { %v1261_v48 = vpop.xlane.xlu1 %1260 }
0x1606   :  { %v1262_v43 = vadd.f32 %v1261_v48, %v1234_v51 }
0x1607   :  { %v1279_v19 = vpop.permute.xlu0 %1278 }
0x1609   :  { %v1274_v59 = vpop.permute.xlu1 %1273 }
0x160a   :  { %v1276_v1 = vadd.f32 %v1274_v59, %v2457_v22 }
0x160c   :  { %1875 = vtanh.f32 %v1276_v1 }
0x160d   :  { %1877 = vrcp.f32 %v1156_v60 }
0x1619   :  { %v2574_v63 = vpop.eup %1875 }
0x161a   :  { %v1291_v2 = vmul.f32 %v2574_v63, %v2574_v63  ;;  %v1281_v7 = vsub.f32 %v2574_v63, %v1279_v19  ;;  %v1878_v11 = vpop.eup %1877 }
0x161b   :  { %v1164_v12 = vmul.f32 %v1878_v11, %v1162_v42  ;;  %v1171_v20 = vsub.f32 1.0, %v1878_v11  ;;  %v1177_v40 = vmul.f32 %v1878_v11, %v2513_v57 }
0x161c   :  { %1293 = vrot.lane.b32.xlu0 %v1291_v2, %s1942_s5  ;;  %v1282_v10 = vmul.f32 %v1281_v7, %v1281_v7 }
0x161e   :  { %1284 = vrot.lane.b32.xlu1 %v1282_v10, %s1942_s5 }
0x1620   :  { %1166 = vrot.lane.b32.xlu0 %v1164_v12, %s1941_s4 }
0x168e   :  { %v1294_v22 = vpop.permute.xlu0 %1293 }
0x168f   :  { %v1296_v15 = vsel %vm203_vm1, %v1294_v22, 0.0 }
0x1690   :  { %v1285_v28 = vpop.permute.xlu1 %1284  ;;  %1297 = vadd.xlane.f32.xlu0 %v1296_v15 }
0x1691   :  { %v1287_v8 = vsel %vm203_vm1, %v1285_v28, 0.0 }
0x1692   :  { %1288 = vadd.xlane.f32.xlu1 %v1287_v8 }
0x16a3   :  { %1301 = vrot.lane.b32.xlu1 %v1183_v16, %s1943_s9 }
0x16a6   :  { %1306 = vrot.lane.b32.xlu0 %v2293_v21, %s1943_s9  ;;  %v1167_v21 = vpop.permute.xlu0 %1166 }
0x16a7   :  { %v1169_v53 = vadd.f32 %v1167_v21, %v2387_v54 }
0x16aa   :  { %1329 = vrot.lane.b32.xlu0 %v1184_v17, %s1943_s9 }
0x16ae   :  { %1357 = vrot.lane.b32.xlu0 %v1185_v3, %s1943_s9 }
0x16b2   :  { %1385 = vrot.lane.b32.xlu0 %v1186_v18, %s1943_s9 }
0x16b6   :  { %1334 = vrot.lane.b32.xlu0 %v2320_v36, %s1943_s9 }
0x16ba   :  { %1362 = vrot.lane.b32.xlu0 %v2336_v50, %s1943_s9 }
0x16be   :  { %1390 = vrot.lane.b32.xlu0 %v2352_v25, %s1943_s9 }
0x1719   :  { %v1298_v23 = vpop.xlane.xlu0 %1297 }
0x171a   :  { %v1299_v6 = vadd.f32 %v1298_v23, %v1271_v52 }
0x171b   :  { %v1289_v26 = vpop.xlane.xlu1 %1288 }
0x171c   :  { %v1290_v9 = vadd.f32 %v1289_v26, %v1262_v43 }
0x171d   :  { %v1307_v36 = vpop.permute.xlu0 %1306 }
0x171f   :  { %v1302_v5 = vpop.permute.xlu1 %1301 }
0x1720   :  { %v1304_v14 = vadd.f32 %v1302_v5, %v2478_v13 }
0x1721   :  { %v1330_v13 = vpop.permute.xlu0 %1329 }
0x1722   :  { %1879 = vtanh.f32 %v1304_v14  ;;  %v1332_v33 = vadd.f32 %v1330_v13, %v2499_v32  ;;  %v1187_v13 = vld [vmem:[%s2700_s7] sm:$0xff] }
0x1723   :  { %1881 = vtanh.f32 %v1169_v53 }
0x1724   :  { %1883 = vtanh.f32 %v1332_v33 }
0x1725   :  { %v1358_v29 = vpop.permute.xlu0 %1357 }
0x1726   :  { %v1360_v35 = vadd.f32 %v1358_v29, %v2513_v57 }
0x1728   :  { %1885 = vtanh.f32 %v1360_v35 }
0x1729   :  { %v1386_v54 = vpop.permute.xlu0 %1385 }
0x172d   :  { %v1335_v30 = vpop.permute.xlu0 %1334 }
0x172f   :  { %v2610_v27 = vpop.eup %1879 }
0x1730   :  { %v1319_v50 = vmul.f32 %v2610_v27, %v2610_v27  ;;  %v1309_v25 = vsub.f32 %v2610_v27, %v1307_v36  ;;  %v1882_v46 = vpop.eup %1881 }
0x1731   :  { %v1363_v31 = vpop.permute.xlu0 %1362  ;;  %v1884_v32 = vpop.eup %1883 }
0x1732   :  { %1321 = vrot.lane.b32.xlu0 %v1319_v50, %s1942_s5  ;;  %v1310_v56 = vmul.f32 %v1309_v25, %v1309_v25  ;;  %v1337_v61 = vsub.f32 %v1884_v32, %v1335_v30  ;;  %v1347_v51 = vmul.f32 %v1884_v32, %v1884_v32 }
0x1734   :  { %1312 = vrot.lane.b32.xlu1 %v1310_v56, %s1942_s5  ;;  %v1338_v24 = vmul.f32 %v1337_v61, %v1337_v61 }
0x1735   :  { %v1391_v49 = vpop.permute.xlu0 %1390  ;;  %v1886_v42 = vpop.eup %1885 }
0x1736   :  { %v1365_v45 = vsub.f32 %v1886_v42, %v1363_v31  ;;  %v1375_v48 = vmul.f32 %v1886_v42, %v1886_v42 }
0x1738   :  { %1173 = vrot.lane.b32.xlu1 %v1882_v46, %s1942_s5  ;;  %v1366_v52 = vmul.f32 %v1365_v45, %v1365_v45 }
0x17a4   :  { %v1322_v62 = vpop.permute.xlu0 %1321 }
0x17a5   :  { %v1324_v34 = vsel %vm203_vm1, %v1322_v62, 0.0 }
0x17a6   :  { %v1313_v37 = vpop.permute.xlu1 %1312  ;;  %1325 = vadd.xlane.f32.xlu0 %v1324_v34 }
0x17a7   :  { %v1315_v55 = vsel %vm203_vm1, %v1313_v37, 0.0 }
0x17a8   :  { %1316 = vadd.xlane.f32.xlu1 %v1315_v55 }
0x17aa   :  { %v1174_v38 = vpop.permute.xlu1 %1173 }
0x17ab   :  { %v1176_v39 = vmul.f32 %v1174_v38, %v1171_v20 }
0x17ad   :  { %v1178_v41 = vadd.f32 %v1177_v40, %v1176_v39 }
0x17af   :  { %v1388_v44 = vadd.f32 %v1386_v54, %v1178_v41 }
0x17b1   :  { %1887 = vtanh.f32 %v1388_v44 }
0x17b9   :  { %1340 = vrot.lane.b32.xlu1 %v1338_v24, %s1942_s5 }
0x17bc   :  { %1349 = vrot.lane.b32.xlu0 %v1347_v51, %s1942_s5 }
0x17be   :  { %v1888_v43 = vpop.eup %1887 }
0x17bf   :  { %v1403_v57 = vmul.f32 %v1888_v43, %v1888_v43  ;;  %v1393_v15 = vsub.f32 %v1888_v43, %v1391_v49 }
0x17c0   :  { %1368 = vrot.lane.b32.xlu0 %v1366_v52, %s1942_s5 }
0x17c1   :  { %v1394_v28 = vmul.f32 %v1393_v15, %v1393_v15 }
0x17c4   :  { %1377 = vrot.lane.b32.xlu0 %v1375_v48, %s1942_s5 }
0x17c8   :  { %1405 = vrot.lane.b32.xlu0 %v1403_v57, %s1942_s5 }
0x182f   :  { %v1326_v58 = vpop.xlane.xlu0 %1325 }
0x1830   :  { %v1327_v59 = vadd.f32 %v1326_v58, %v1299_v6 }
0x1831   :  { %v1317_v1 = vpop.xlane.xlu1 %1316 }
0x1832   :  { %v1318_v60 = vadd.f32 %v1317_v1, %v1290_v9 }
0x1833   :  { %v1350_v19 = vpop.permute.xlu0 %1349 }
0x1834   :  { %v1352_v2 = vsel %vm203_vm1, %v1350_v19, 0.0 }
0x1835   :  { %v1341_v7 = vpop.permute.xlu1 %1340  ;;  %1353 = vadd.xlane.f32.xlu0 %v1352_v2 }
0x1836   :  { %v1343_v10 = vsel %vm203_vm1, %v1341_v7, 0.0 }
0x1837   :  { %1344 = vadd.xlane.f32.xlu1 %v1343_v10  ;;  %v1369_v11 = vpop.permute.xlu0 %1368 }
0x1838   :  { %v1371_v8 = vsel %vm203_vm1, %v1369_v11, 0.0 }
0x183b   :  { %v1378_v12 = vpop.permute.xlu0 %1377 }
0x183c   :  { %v1380_v22 = vsel %vm203_vm1, %v1378_v12, 0.0 }
0x183d   :  { %1381 = vadd.xlane.f32.xlu0 %v1380_v22 }
0x183f   :  { %v1406_v16 = vpop.permute.xlu0 %1405 }
0x1840   :  { %v1408_v17 = vsel %vm203_vm1, %v1406_v16, 0.0 }
0x1848   :  { %1396 = vrot.lane.b32.xlu1 %v1394_v28, %s1942_s5 }
0x1853   :  { %1420 = vrot.lane.b32.xlu0 %v2523_v47, %s1942_s5 }
0x1857   :  { %1426 = vrot.lane.b32.xlu0 %v2574_v63, %s1942_s5 }
0x185b   :  { %1430 = vrot.lane.b32.xlu0 %v1884_v32, %s1942_s5 }
0x186c   :  { %1372 = vadd.xlane.f32.xlu1 %v1371_v8 }
0x187a   :  { %1409 = vadd.xlane.f32.xlu0 %v1408_v17 }
0x187d   :  { %1422 = vrot.lane.b32.xlu1 %v2539_v0, %s1942_s5 }
0x1881   :  { %1424 = vrot.lane.b32.xlu1 %v2555_v4, %s1942_s5 }
0x1885   :  { %1428 = vrot.lane.b32.xlu1 %v2610_v27, %s1942_s5 }
0x1889   :  { %1432 = vrot.lane.b32.xlu1 %v1886_v42, %s1942_s5 }
0x18be   :  { %v1354_v3 = vpop.xlane.xlu0 %1353 }
0x18bf   :  { %v1355_v50 = vadd.f32 %v1354_v3, %v1327_v59 }
0x18c0   :  { %v1345_v47 = vpop.xlane.xlu1 %1344 }
0x18c1   :  { %v1346_v63 = vadd.f32 %v1345_v47, %v1318_v60 }
0x18c4   :  { %v1397_v18 = vpop.permute.xlu1 %1396 }
0x18c5   :  { %v1399_v21 = vsel %vm203_vm1, %v1397_v18, 0.0 }
0x18c6   :  { %1400 = vadd.xlane.f32.xlu0 %v1399_v21  ;;  %v1382_v23 = vpop.xlane.xlu0 %1381 }
0x18c7   :  { %v1383_v46 = vadd.f32 %v1382_v23, %v1355_v50 }
0x18ca   :  { %v1421_v6 = vpop.permute.xlu0 %1420 }
0x18cb   :  { %1444 = vst.msk [vmem:[#allocation2] sm:$0xff] %vm203_vm1, %v1421_v6 }
0x18ce   :  { %v1427_v0 = vpop.permute.xlu0 %1426 }
0x18cf   :  { %1447 = vst.msk [vmem:[#allocation2 + $0x18] sm:$0xff] %vm203_vm1, %v1427_v0 }
0x18d2   :  { %v1518_v4 = vld [vmem:[#allocation2] sm:$0xff]  ;;  %v1431_v26 = vpop.permute.xlu0 %1430 }
0x18d3   :  { %1638 = vst [vmem:[%s2701_s8 + $0x40] sm:$0xff] %v1518_v4  ;;  %1449 = vst.msk [vmem:[#allocation2 + $0x28] sm:$0xff] %vm203_vm1, %v1431_v26 }
0x18d6   :  { %v1524_v9 = vld [vmem:[#allocation2 + $0x18] sm:$0xff] }
0x18d7   :  { %1641 = vst [vmem:[%s2701_s8 + $0x58] sm:$0xff] %v1524_v9 }
0x18da   :  { %v1528_v5 = vld [vmem:[#allocation2 + $0x28] sm:$0xff] }
0x18db   :  { %1643 = vst [vmem:[%s2701_s8 + $0x68] sm:$0xff] %v1528_v5 }
0x18dc   :  { %1434 = vrot.lane.b32.xlu0 %v1888_v43, %s1942_s5 }
0x18f5   :  { %v1373_v14 = vpop.xlane.xlu1 %1372 }
0x18f6   :  { %v1374_v53 = vadd.f32 %v1373_v14, %v1346_v63 }
0x18f9   :  { %v1423_v27 = vpop.permute.xlu1 %1422 }
0x18fa   :  { %1445 = vst.msk [vmem:[#allocation2 + $0x8] sm:$0xff] %vm203_vm1, %v1423_v27 }
0x18fd   :  { %v1425_v36 = vpop.permute.xlu1 %1424 }
0x18fe   :  { %1446 = vst.msk [vmem:[#allocation2 + $0x10] sm:$0xff] %vm203_vm1, %v1425_v36 }
0x1901   :  { %v1520_v25 = vld [vmem:[#allocation2 + $0x8] sm:$0xff]  ;;  %v1429_v56 = vpop.permute.xlu1 %1428 }
0x1902   :  { %1639 = vst [vmem:[%s2701_s8 + $0x48] sm:$0xff] %v1520_v25  ;;  %1448 = vst.msk [vmem:[#allocation2 + $0x20] sm:$0xff] %vm203_vm1, %v1429_v56 }
0x1903   :  { %v1410_v29 = vpop.xlane.xlu0 %1409 }
0x1904   :  { %v1411_v54 = vadd.f32 %v1410_v29, %v1383_v46 }
0x1905   :  { %v1522_v30 = vld [vmem:[#allocation2 + $0x10] sm:$0xff]  ;;  %v1433_v31 = vpop.permute.xlu1 %1432 }
0x1906   :  { %1640 = vst [vmem:[%s2701_s8 + $0x50] sm:$0xff] %v1522_v30  ;;  %v1463_v33 = vmul.f32 %v1411_v54, %v1187_v13  ;;  %1450 = vst.msk [vmem:[#allocation2 + $0x30] sm:$0xff] %vm203_vm1, %v1433_v31 }
0x1908   :  { %v1464_v49 = vsel %vm1453_vm2, %v1463_v33, 0.0 }
0x1909   :  { %v1526_v62 = vld [vmem:[#allocation2 + $0x20] sm:$0xff]  ;;  %v1465_v34 = vrot.slane %v1464_v49, 4 }
0x190a   :  { %1642 = vst [vmem:[%s2701_s8 + $0x60] sm:$0xff] %v1526_v62 }
0x190b   :  { %v1466_v35 = vadd.f32 %v1465_v34, %v1464_v49 }
0x190d   :  { %v1467_v37 = vrot.slane %v1466_v35, 2  ;;  %v1530_v55 = vld [vmem:[#allocation2 + $0x30] sm:$0xff] }
0x190e   :  { %1644 = vst [vmem:[%s2701_s8 + $0x70] sm:$0xff] %v1530_v55 }
0x190f   :  { %v1468_v20 = vadd.f32 %v1467_v37, %v1466_v35 }
0x1911   :  { %v1469_v38 = vrot.slane %v1468_v20, 1 }
0x1913   :  { %v1470_v39 = vadd.f32 %v1469_v38, %v1468_v20 }
0x1915   :  { %1471 = vst.msk [vmem:[#allocation5] sm:$0x1] %vm1461_vm3, %v1470_v39 }
0x1916   :  { %1900 = shalt.err (!%p1897_p4)
}
0x1917   :  { %1556 = dma.vmem_to_hbm [thread:$0]  %s1554_s1, 16, %s2704_s11, [#allocation6]  }
0x1918   :  { %s1945_s4 = smov [#allocation3]  }
0x1919   :  { %s1543_s29 = sshll.u32 %s1945_s4, 4  ;;  %s1544_s29 = int_to_ptr.vmem [resolvable:$true] %s1543_s29 }
0x191a   :  { %s1909_s11 = scalar_lea.vmem %s1544_s29, 16  ;;  %s1913_s30 = scalar_lea.vmem %s1544_s29, 32 }
0x191b   :  { %p1910_p5 = scmp.ne.s32.totalorder %s1544_s29, %s1909_s11  ;;  %p1914_p6 = scmp.lt.s32.totalorder %s1544_s29, %s1544_s29 }
0x191c   :  { %p1915_p7 = scmp.lt.s32.totalorder %s1913_s30, %s1909_s11 }
0x191e   :  { %p1916_p8 = por %p1915_p7, %p1914_p6 }
0x1920   :  { %p1917_p9 = pnand %p1916_p8, %p1910_p5 }
0x194f   :  { %v1401_v40 = vpop.xlane.xlu0 %1400 }
0x1950   :  { %v1402_v41 = vadd.f32 %v1401_v40, %v1374_v53 }
0x1952   :  { %v1452_v32 = vmul.f32 %v1402_v41, %v1187_v13 }
0x1953   :  { %v1435_v44 = vpop.permute.xlu0 %1434 }
0x1954   :  { %v1454_v61 = vsel %vm1453_vm2, %v1452_v32, 0.0  ;;  %1451 = vst.msk [vmem:[#allocation2 + $0x38] sm:$0xff] %vm203_vm1, %v1435_v44 }
0x1955   :  { %v1455_v42 = vrot.slane %v1454_v61, 4 }
0x1957   :  { %v1456_v24 = vadd.f32 %v1455_v42, %v1454_v61 }
0x1959   :  { %v1457_v45 = vrot.slane %v1456_v24, 2 }
0x195b   :  { %v1532_v51 = vld [vmem:[#allocation2 + $0x38] sm:$0xff]  ;;  %v1458_v52 = vadd.f32 %v1457_v45, %v1456_v24 }
0x195c   :  { %1645 = vst [vmem:[%s2701_s8 + $0x78] sm:$0xff] %v1532_v51 }
0x195d   :  { %v1459_v48 = vrot.slane %v1458_v52, 1 }
0x195f   :  { %v1460_v43 = vadd.f32 %v1459_v48, %v1458_v52 }
0x1961   :  { %1462 = vst.msk [vmem:[#allocation3] sm:$0x1] %vm1461_vm3, %v1460_v43 }
0x1962   :  { %1920 = shalt.err (!%p1917_p9)
}
0x1963   :  { %1546 = dma.vmem_to_hbm [thread:$0]  %s1544_s29, 16, %s2703_s10, [#allocation4]  }
0x1964   :  { %1929 = dma.done.wait [#allocation4], 16  }
0x1965   :  { %1930 = vsyncadd [#allocation4], 4294967280 }
0x1966   :  { %1931 = dma.done.wait [#allocation6], 16  }
0x1967   :  { %1932 = vsyncadd [#allocation6], 4294967280 }
0x1968   :  { %1567 = vsyncpa [#allocation4], 1 }
0x1969   :  { %1568 = vsyncpa [#allocation6], 1 }

// kernel: neural_network_forward.6
= control target key start
LH: loop header
LB: loop body
LE: loop exit
PB: predicated region body
PF: predicated region fallthrough
CT: control target
= control target key end

     0   :  { %v1245_v0 = vmov 0.0   ;;  %vm41_vm0 = vcmask 64512   ;;  %vm1246_vm1 = vmmov 0   ;;  %s1247_s8 = smov 64   ;;  %vm171_vm2 = vcmask 261120   ;;  %s1525_s2 = inlined_call_operand.vmem [shape: f32[32,96], index: 2, kind: input, shape index: {}]   ;;  %s1526_s1 = inlined_call_operand.vmem [shape: f32[8,96], index: 1, kind: input, shape index: {}]   ;;  %s1527_s0 = inlined_call_operand.vmem [shape: f32[64,8], index: 0, kind: input, shape index: {}]   ;;  %s1528_s4 = inlined_call_operand.vmem [shape: f32[1,32], index: 4, kind: input, shape index: {}]   ;;  %s1529_s3 = inlined_call_operand.vmem [shape: f32[1,96], index: 3, kind: input, shape index: {}]   ;;  %s1530_s5 = inlined_call_operand.vmem [shape: f32[64,32], index: 5, kind: output, shape index: {}]  }
   0x1   :  { %1105 = vmatprep.subr.mxu1 %v1245_v0  ;;  %v1283_v1 = vld [vmem:[%s1525_s2 + $0x18] sm:$0xff]  ;;  %v28_v2 = vld [vmem:[%s1526_s1] sm:$0xff]  ;;  %1113 = vmatprep.mubr.msk.f32.mxu1 %vm1246_vm1, %v1245_v0  ;;  %v1297_v4 = vld [vmem:[%s1525_s2 + $0x10] sm:$0xff] }
   0x2   :  { %v20_v3 = vld [vmem:[%s1527_s0] sm:$0xff]  ;;  %1106 = vmatpush3.msra.mxu1 %v1283_v1  ;;  %1091 = vmatprep.subr.mxu0 %v28_v2  ;;  %v21_v5 = vld [vmem:[%s1527_s0 + $0x8] sm:$0xff]  ;;  %v22_v46 = vld [vmem:[%s1527_s0 + $0x10] sm:$0xff] }
   0x3   :  { %1107 = vmatprep.subr.mxu1 %v1245_v0  ;;  %1092 = vmatpush3.msra.mxu0 %v28_v2  ;;  %v1306_v6 = vld [vmem:[%s1525_s2 + $0x8] sm:$0xff]  ;;  %v1027_v7 = vld [vmem:[%s1528_s4] ss:$0 sm:$0xff]  ;;  %v23_v47 = vld [vmem:[%s1527_s0 + $0x18] sm:$0xff] }
   0x4   :  { %1093 = vmatprep.mubr.msk.f32.mxu0 %vm41_vm0, %v20_v3  ;;  %1108 = vmatpush3.msra.mxu1 %v1297_v4  ;;  %v1318_v8 = vld [vmem:[%s1525_s2] sm:$0xff]  ;;  %v25_v49 = vld [vmem:[%s1527_s0 + $0x28] sm:$0xff]  ;;  %v26_v50 = vld [vmem:[%s1527_s0 + $0x30] sm:$0xff] }
   0x5   :  { %1094 = vmatmul.mubr.msk.f32.vlgmr.msra.gmra.mxu0 %vm41_vm0, %v21_v5  ;;  %1109 = vmatprep.subr.mxu1 %v1245_v0  ;;  %v1352_v14 = vld [vmem:[%s1529_s3] ss:$0 sm:$0xff]  ;;  %s1248_s3 = smov 96   ;;  %v27_v51 = vld [vmem:[%s1527_s0 + $0x38] sm:$0xff] }
   0x6   :  { %1110 = vmatpush3.msra.mxu1 %v1306_v6  ;;  %257 = vrot.lane.b32.xlu0 %v1027_v7, %s1247_s8  ;;  %v24_v48 = vld [vmem:[%s1527_s0 + $0x20] sm:$0xff] }
   0x7   :  { %1111 = vmatprep.subr.mxu1 %v1245_v0  ;;  %1127 = vmatprep.subr.mxu0 %v1245_v0 }
   0x8   :  { %1112 = vmatpush3.msra.mxu1 %v1318_v8  ;;  %1128 = vmatpush3.msra.mxu0 %v1283_v1 }
   0x9   :  { %1114 = vmatmul.mubr.f32.vlgmr.msra.gmra.mxu1 %v1245_v0  ;;  %1116 = vmatprep.subr.mxu1 %v1245_v0 }
   0xa   :  { %1117 = vmatpush3.msra.mxu1 %v1283_v1  ;;  %1124 = vmatprep.mubr.msk.f32.mxu1 %vm1246_vm1, %v1245_v0 }
   0xb   :  { %1118 = vmatprep.subr.mxu1 %v1245_v0  ;;  %1129 = vmatprep.subr.mxu0 %v1245_v0 }
   0xc   :  { %1119 = vmatpush3.msra.mxu1 %v1297_v4  ;;  %1130 = vmatpush3.msra.mxu0 %v1297_v4 }
   0xd   :  { %1120 = vmatprep.subr.mxu1 %v1245_v0  ;;  %1131 = vmatprep.subr.mxu0 %v1245_v0 }
   0xe   :  { %1121 = vmatpush3.msra.mxu1 %v1306_v6  ;;  %1132 = vmatpush3.msra.mxu0 %v1306_v6 }
   0xf   :  { %1122 = vmatprep.subr.mxu1 %v1245_v0  ;;  %1133 = vmatprep.subr.mxu0 %v1245_v0 }
  0x10   :  { %1123 = vmatpush3.msra.mxu1 %v1318_v8  ;;  %1134 = vmatpush3.msra.mxu0 %v1318_v8 }
  0x11   :  { %1138 = vmatprep.subr.mxu1 %v1245_v0  ;;  %1149 = vmatprep.subr.mxu0 %v1245_v0 }
  0x12   :  { %1096 = vmatprep.mubr.msk.f32.mxu0 %vm41_vm0, %v22_v46 }
  0x13   :  { %1097 = vmatmul.mubr.msk.f32.gmra.mxu0 %vm41_vm0, %v23_v47 }
  0x14   :  { %1099 = vmatprep.mubr.msk.f32.mxu0 %vm41_vm0, %v24_v48 }
  0x17   :  { %1100 = vmatmul.mubr.msk.f32.gmra.mxu0 %vm41_vm0, %v25_v49 }
  0x18   :  { %1102 = vmatprep.mubr.msk.f32.mxu0 %vm41_vm0, %v26_v50 }
  0x1b   :  { %1103 = vmatmul.mubr.msk.f32.gmra.mxu0 %vm41_vm0, %v27_v51 }
  0x1c   :  { %1135 = vmatprep.mubr.msk.f32.mxu0 %vm1246_vm1, %v1245_v0 }
  0x78   :  { %v1345_v9 = vpop.permute.xlu0 %257 }
  0xc5   :  { %v1095_v13 = vpop.f32.mrf.mxu0 }
  0xc6   :  { %v138_v36 = vadd.f32 %v1095_v13, %v1352_v14 }
  0xc7   :  { %v132_v15 = vpop.f32.mrf.mxu0 }
  0xc8   :  { %v133_v16 = vadd.f32 %v1352_v14, %v132_v15 }
  0xc9   :  { %v241_v10 = vpop.f32.mrf.mxu1 }
  0xca   :  { %v260_v11 = vadd.f32 %v1345_v9, %v241_v10  ;;  %v245_v17 = vadd.f32 %v241_v10, %v133_v16 }
  0xcb   :  { %v1115_v12 = vpop.f32.mrf.mxu1 }
  0xcc   :  { %262 = vrot.lane.b32.xlu0 %v260_v11, %s1247_s8  ;;  %v1026_v18 = vmul.f32 -1.442695, %v245_v17 }
  0xce   :  { %1197 = vpow2.f32 %v1026_v18 }
  0xd3   :  { %v1098_v59 = vpop.f32.mrf.mxu0 }
  0xd5   :  { %v142_v60 = vpop.f32.mrf.mxu0 }
  0xd6   :  { %v143_v10 = vadd.f32 %v1352_v14, %v142_v60 }
  0xd7   :  { %v1420_v61 = vpop.f32.mrf.mxu0 }
  0xd9   :  { %v1422_v62 = vpop.f32.mrf.mxu0 }
  0xda   :  { %v153_v51 = vadd.f32 %v1352_v14, %v1422_v62 }
  0xdb   :  { %v1198_v19 = vpop.eup %1197  ;;  %v1424_v63 = vpop.f32.mrf.mxu0 }
  0xdc   :  { %v249_v20 = vadd.f32 1.0, %v1198_v19 }
  0xdd   :  { %v1426_v2 = vpop.f32.mrf.mxu0 }
  0xde   :  { %1199 = vrcp.f32 %v249_v20 }
  0xeb   :  { %v1200_v21 = vpop.eup %1199 }
  0xec   :  { %v272_v27 = vsub.f32 1.0, %v1200_v21  ;;  %v278_v29 = vmul.f32 0.0, %v1200_v21 }
 0x13e   :  { %v263_v22 = vpop.permute.xlu0 %262 }
 0x13f   :  { %v265_v23 = vmul.f32 %v1200_v21, %v263_v22 }
 0x141   :  { %267 = vrot.lane.b32.xlu1 %v265_v23, %s1247_s8 }
 0x1b3   :  { %v268_v24 = vpop.permute.xlu1 %267 }
 0x1b4   :  { %v270_v25 = vadd.f32 %v268_v24, %v133_v16 }
 0x1b6   :  { %1201 = vtanh.f32 %v270_v25 }
 0x1c3   :  { %v1202_v26 = vpop.eup %1201 }
 0x1c4   :  { %274 = vrot.lane.b32.xlu1 %v1202_v26, %s1248_s3 }
 0x236   :  { %v275_v28 = vpop.permute.xlu1 %274 }
 0x237   :  { %v277_v30 = vmul.f32 %v275_v28, %v272_v27 }
 0x239   :  { %v279_v31 = vadd.f32 %v278_v29, %v277_v30 }
 0x23b   :  { %281 = vrot.lane.b32.xlu0 %v279_v31, %s1248_s3 }
 0x2ad   :  { %v282_v32 = vpop.permute.xlu0 %281 }
 0x2ae   :  { %1005 = vst.msk [vmem:[%s1530_s5] sm:$0xff] %vm171_vm2, %v282_v32  ;;  %1125 = vmatmul.mubr.msk.f32.vlgmr.msra.gmra.mxu1 %vm171_vm2, %v282_v32 }
 0x2af   :  { %1139 = vmatpush3.msra.mxu1 %v1283_v1  ;;  %1146 = vmatprep.mubr.msk.f32.mxu1 %vm1246_vm1, %v1245_v0 }
 0x2b0   :  { %1140 = vmatprep.subr.mxu1 %v1245_v0 }
 0x2b1   :  { %1141 = vmatpush3.msra.mxu1 %v1297_v4 }
 0x2b2   :  { %1142 = vmatprep.subr.mxu1 %v1245_v0 }
 0x2b3   :  { %1143 = vmatpush3.msra.mxu1 %v1306_v6 }
 0x2b4   :  { %1144 = vmatprep.subr.mxu1 %v1245_v0 }
 0x2b5   :  { %1145 = vmatpush3.msra.mxu1 %v1318_v8 }
 0x2b6   :  { %1160 = vmatprep.subr.mxu1 %v1245_v0 }
 0x36e   :  { %v351_v33 = vpop.f32.mrf.mxu1 }
 0x36f   :  { %v362_v34 = vadd.f32 %v351_v33, %v1345_v9  ;;  %v355_v37 = vadd.f32 %v351_v33, %v138_v36 }
 0x370   :  { %v1126_v35 = vpop.f32.mrf.mxu1 }
 0x371   :  { %364 = vrot.lane.b32.xlu1 %v362_v34, %s1247_s8  ;;  %v1029_v38 = vmul.f32 -1.442695, %v355_v37 }
 0x373   :  { %1203 = vpow2.f32 %v1029_v38 }
 0x380   :  { %v1204_v39 = vpop.eup %1203 }
 0x381   :  { %v359_v40 = vadd.f32 1.0, %v1204_v39 }
 0x383   :  { %1205 = vrcp.f32 %v359_v40 }
 0x390   :  { %v1206_v41 = vpop.eup %1205 }
 0x391   :  { %v374_v53 = vsub.f32 1.0, %v1206_v41  ;;  %v380_v55 = vmul.f32 %v1206_v41, %v279_v31  ;;  %v148_v31 = vadd.f32 %v1098_v59, %v1352_v14 }
 0x3e3   :  { %v365_v42 = vpop.permute.xlu1 %364 }
 0x3e4   :  { %v367_v43 = vmul.f32 %v1206_v41, %v365_v42 }
 0x3e6   :  { %369 = vrot.lane.b32.xlu0 %v367_v43, %s1247_s8 }
 0x458   :  { %v370_v44 = vpop.permute.xlu0 %369 }
 0x459   :  { %v372_v45 = vadd.f32 %v370_v44, %v138_v36 }
 0x45b   :  { %1207 = vtanh.f32 %v372_v45 }
 0x468   :  { %v1208_v52 = vpop.eup %1207 }
 0x469   :  { %376 = vrot.lane.b32.xlu1 %v1208_v52, %s1248_s3 }
 0x4db   :  { %v377_v54 = vpop.permute.xlu1 %376 }
 0x4dc   :  { %v379_v56 = vmul.f32 %v377_v54, %v374_v53 }
 0x4de   :  { %v381_v57 = vadd.f32 %v380_v55, %v379_v56 }
 0x4e0   :  { %383 = vrot.lane.b32.xlu0 %v381_v57, %s1248_s3 }
 0x552   :  { %v384_v58 = vpop.permute.xlu0 %383 }
 0x553   :  { %1006 = vst.msk [vmem:[%s1530_s5 + $0x8] sm:$0xff] %vm171_vm2, %v384_v58  ;;  %1136 = vmatmul.mubr.msk.f32.vlgmr.msra.gmra.mxu0 %vm171_vm2, %v384_v58 }
 0x554   :  { %1150 = vmatpush3.msra.mxu0 %v1283_v1  ;;  %1157 = vmatprep.mubr.msk.f32.mxu0 %vm1246_vm1, %v1245_v0 }
 0x555   :  { %1151 = vmatprep.subr.mxu0 %v1245_v0 }
 0x556   :  { %1152 = vmatpush3.msra.mxu0 %v1297_v4 }
 0x557   :  { %1153 = vmatprep.subr.mxu0 %v1245_v0 }
 0x558   :  { %1154 = vmatpush3.msra.mxu0 %v1306_v6 }
 0x559   :  { %1155 = vmatprep.subr.mxu0 %v1245_v0 }
 0x55a   :  { %1156 = vmatpush3.msra.mxu0 %v1318_v8 }
 0x55b   :  { %1171 = vmatprep.subr.mxu0 %v1245_v0 }
 0x613   :  { %v453_v3 = vpop.f32.mrf.mxu0 }
 0x614   :  { %v464_v5 = vadd.f32 %v453_v3, %v1345_v9  ;;  %v457_v11 = vadd.f32 %v453_v3, %v143_v10 }
 0x615   :  { %v1137_v7 = vpop.f32.mrf.mxu0 }
 0x616   :  { %466 = vrot.lane.b32.xlu1 %v464_v5, %s1247_s8  ;;  %v1031_v12 = vmul.f32 -1.442695, %v457_v11 }
 0x618   :  { %1209 = vpow2.f32 %v1031_v12 }
 0x625   :  { %v1210_v13 = vpop.eup %1209 }
 0x626   :  { %v461_v15 = vadd.f32 1.0, %v1210_v13 }
 0x628   :  { %1211 = vrcp.f32 %v461_v15 }
 0x635   :  { %v1212_v16 = vpop.eup %1211 }
 0x636   :  { %v476_v22 = vsub.f32 1.0, %v1212_v16  ;;  %v482_v24 = vmul.f32 %v1212_v16, %v381_v57 }
 0x688   :  { %v467_v17 = vpop.permute.xlu1 %466 }
 0x689   :  { %v469_v18 = vmul.f32 %v1212_v16, %v467_v17 }
 0x68b   :  { %471 = vrot.lane.b32.xlu0 %v469_v18, %s1247_s8 }
 0x6fd   :  { %v472_v19 = vpop.permute.xlu0 %471 }
 0x6fe   :  { %v474_v20 = vadd.f32 %v472_v19, %v143_v10 }
 0x700   :  { %1213 = vtanh.f32 %v474_v20 }
 0x70d   :  { %v1214_v21 = vpop.eup %1213 }
 0x70e   :  { %478 = vrot.lane.b32.xlu1 %v1214_v21, %s1248_s3 }
 0x780   :  { %v479_v23 = vpop.permute.xlu1 %478 }
 0x781   :  { %v481_v25 = vmul.f32 %v479_v23, %v476_v22 }
 0x783   :  { %v483_v26 = vadd.f32 %v482_v24, %v481_v25 }
 0x785   :  { %485 = vrot.lane.b32.xlu0 %v483_v26, %s1248_s3 }
 0x7f7   :  { %v486_v27 = vpop.permute.xlu0 %485 }
 0x7f8   :  { %1007 = vst.msk [vmem:[%s1530_s5 + $0x10] sm:$0xff] %vm171_vm2, %v486_v27  ;;  %1147 = vmatmul.mubr.msk.f32.vlgmr.msra.gmra.mxu1 %vm171_vm2, %v486_v27 }
 0x7f9   :  { %1161 = vmatpush3.msra.mxu1 %v1283_v1  ;;  %1168 = vmatprep.mubr.msk.f32.mxu1 %vm1246_vm1, %v1245_v0 }
 0x7fa   :  { %1162 = vmatprep.subr.mxu1 %v1245_v0 }
 0x7fb   :  { %1163 = vmatpush3.msra.mxu1 %v1297_v4 }
 0x7fc   :  { %1164 = vmatprep.subr.mxu1 %v1245_v0 }
 0x7fd   :  { %1165 = vmatpush3.msra.mxu1 %v1306_v6 }
 0x7fe   :  { %1166 = vmatprep.subr.mxu1 %v1245_v0 }
 0x7ff   :  { %1167 = vmatpush3.msra.mxu1 %v1318_v8 }
 0x800   :  { %1182 = vmatprep.subr.mxu1 %v1245_v0 }
 0x8b8   :  { %v555_v28 = vpop.f32.mrf.mxu1 }
 0x8b9   :  { %v566_v29 = vadd.f32 %v555_v28, %v1345_v9  ;;  %v559_v32 = vadd.f32 %v555_v28, %v148_v31 }
 0x8ba   :  { %v1148_v30 = vpop.f32.mrf.mxu1 }
 0x8bb   :  { %568 = vrot.lane.b32.xlu1 %v566_v29, %s1247_s8  ;;  %v1033_v33 = vmul.f32 -1.442695, %v559_v32 }
 0x8bd   :  { %1215 = vpow2.f32 %v1033_v33 }
 0x8ca   :  { %v1216_v34 = vpop.eup %1215 }
 0x8cb   :  { %v563_v35 = vadd.f32 1.0, %v1216_v34 }
 0x8cd   :  { %1217 = vrcp.f32 %v563_v35 }
 0x8da   :  { %v1218_v36 = vpop.eup %1217 }
 0x8db   :  { %v578_v42 = vsub.f32 1.0, %v1218_v36  ;;  %v584_v44 = vmul.f32 %v1218_v36, %v483_v26 }
 0x92d   :  { %v569_v37 = vpop.permute.xlu1 %568 }
 0x92e   :  { %v571_v38 = vmul.f32 %v1218_v36, %v569_v37 }
 0x930   :  { %573 = vrot.lane.b32.xlu0 %v571_v38, %s1247_s8 }
 0x9a2   :  { %v574_v39 = vpop.permute.xlu0 %573 }
 0x9a3   :  { %v576_v40 = vadd.f32 %v574_v39, %v148_v31  ;;  %v163_v31 = vadd.f32 %v1352_v14, %v1426_v2 }
 0x9a5   :  { %1219 = vtanh.f32 %v576_v40 }
 0x9b2   :  { %v1220_v41 = vpop.eup %1219 }
 0x9b3   :  { %580 = vrot.lane.b32.xlu1 %v1220_v41, %s1248_s3 }
 0xa25   :  { %v581_v43 = vpop.permute.xlu1 %580 }
 0xa26   :  { %v583_v45 = vmul.f32 %v581_v43, %v578_v42 }
 0xa28   :  { %v585_v46 = vadd.f32 %v584_v44, %v583_v45 }
 0xa2a   :  { %587 = vrot.lane.b32.xlu0 %v585_v46, %s1248_s3 }
 0xa9c   :  { %v588_v47 = vpop.permute.xlu0 %587 }
 0xa9d   :  { %1008 = vst.msk [vmem:[%s1530_s5 + $0x18] sm:$0xff] %vm171_vm2, %v588_v47  ;;  %1158 = vmatmul.mubr.msk.f32.vlgmr.msra.gmra.mxu0 %vm171_vm2, %v588_v47 }
 0xa9e   :  { %1172 = vmatpush3.msra.mxu0 %v1283_v1  ;;  %1179 = vmatprep.mubr.msk.f32.mxu0 %vm1246_vm1, %v1245_v0 }
 0xa9f   :  { %1173 = vmatprep.subr.mxu0 %v1245_v0 }
 0xaa0   :  { %1174 = vmatpush3.msra.mxu0 %v1297_v4 }
 0xaa1   :  { %1175 = vmatprep.subr.mxu0 %v1245_v0 }
 0xaa2   :  { %1176 = vmatpush3.msra.mxu0 %v1306_v6 }
 0xaa3   :  { %1177 = vmatprep.subr.mxu0 %v1245_v0 }
 0xaa4   :  { %1178 = vmatpush3.msra.mxu0 %v1318_v8 }
 0xb5d   :  { %v657_v48 = vpop.f32.mrf.mxu0 }
 0xb5e   :  { %v668_v49 = vadd.f32 %v657_v48, %v1345_v9  ;;  %v661_v52 = vadd.f32 %v657_v48, %v153_v51 }
 0xb5f   :  { %v1159_v50 = vpop.f32.mrf.mxu0 }
 0xb60   :  { %670 = vrot.lane.b32.xlu1 %v668_v49, %s1247_s8  ;;  %v1035_v53 = vmul.f32 -1.442695, %v661_v52  ;;  %v168_v50 = vadd.f32 %v1424_v63, %v1352_v14 }
 0xb62   :  { %1221 = vpow2.f32 %v1035_v53 }
 0xb6f   :  { %v1222_v54 = vpop.eup %1221 }
 0xb70   :  { %v665_v55 = vadd.f32 1.0, %v1222_v54 }
 0xb72   :  { %1223 = vrcp.f32 %v665_v55 }
 0xb7f   :  { %v1224_v56 = vpop.eup %1223 }
 0xb80   :  { %v680_v5 = vsub.f32 1.0, %v1224_v56  ;;  %v686_v62 = vmul.f32 %v1224_v56, %v585_v46 }
 0xbd2   :  { %v671_v57 = vpop.permute.xlu1 %670 }
 0xbd3   :  { %v673_v58 = vmul.f32 %v1224_v56, %v671_v57 }
 0xbd5   :  { %675 = vrot.lane.b32.xlu0 %v673_v58, %s1247_s8 }
 0xc47   :  { %v676_v59 = vpop.permute.xlu0 %675 }
 0xc48   :  { %v678_v60 = vadd.f32 %v676_v59, %v153_v51 }
 0xc4a   :  { %1225 = vtanh.f32 %v678_v60 }
 0xc57   :  { %v1226_v3 = vpop.eup %1225 }
 0xc58   :  { %682 = vrot.lane.b32.xlu1 %v1226_v3, %s1248_s3 }
 0xcca   :  { %v683_v7 = vpop.permute.xlu1 %682 }
 0xccb   :  { %v685_v10 = vmul.f32 %v683_v7, %v680_v5 }
 0xccd   :  { %v687_v11 = vadd.f32 %v686_v62, %v685_v10 }
 0xccf   :  { %689 = vrot.lane.b32.xlu0 %v687_v11, %s1248_s3 }
 0xd41   :  { %v690_v12 = vpop.permute.xlu0 %689 }
 0xd42   :  { %1009 = vst.msk [vmem:[%s1530_s5 + $0x20] sm:$0xff] %vm171_vm2, %v690_v12  ;;  %1169 = vmatmul.mubr.msk.f32.vlgmr.msra.gmra.mxu1 %vm171_vm2, %v690_v12 }
 0xd43   :  { %1183 = vmatpush3.msra.mxu1 %v1283_v1  ;;  %1190 = vmatprep.mubr.msk.f32.mxu1 %vm1246_vm1, %v1245_v0  ;;  %v158_v1 = vadd.f32 %v1420_v61, %v1352_v14 }
 0xd44   :  { %1184 = vmatprep.subr.mxu1 %v1245_v0 }
 0xd45   :  { %1185 = vmatpush3.msra.mxu1 %v1297_v4 }
 0xd46   :  { %1186 = vmatprep.subr.mxu1 %v1245_v0 }
 0xd47   :  { %1187 = vmatpush3.msra.mxu1 %v1306_v6 }
 0xd48   :  { %1188 = vmatprep.subr.mxu1 %v1245_v0 }
 0xd49   :  { %1189 = vmatpush3.msra.mxu1 %v1318_v8 }
 0xe02   :  { %v759_v13 = vpop.f32.mrf.mxu1 }
 0xe03   :  { %v770_v15 = vadd.f32 %v759_v13, %v1345_v9  ;;  %v763_v17 = vadd.f32 %v759_v13, %v158_v1 }
 0xe04   :  { %v1170_v16 = vpop.f32.mrf.mxu1 }
 0xe05   :  { %772 = vrot.lane.b32.xlu1 %v770_v15, %s1247_s8  ;;  %v1037_v18 = vmul.f32 -1.442695, %v763_v17 }
 0xe07   :  { %1227 = vpow2.f32 %v1037_v18 }
 0xe14   :  { %v1228_v4 = vpop.eup %1227 }
 0xe15   :  { %v767_v19 = vadd.f32 1.0, %v1228_v4 }
 0xe17   :  { %1229 = vrcp.f32 %v767_v19 }
 0xe24   :  { %v1230_v6 = vpop.eup %1229 }
 0xe25   :  { %v782_v23 = vsub.f32 1.0, %v1230_v6  ;;  %v788_v61 = vmul.f32 %v1230_v6, %v687_v11 }
 0xe77   :  { %v773_v20 = vpop.permute.xlu1 %772 }
 0xe78   :  { %v775_v0 = vmul.f32 %v1230_v6, %v773_v20 }
 0xe7a   :  { %777 = vrot.lane.b32.xlu0 %v775_v0, %s1247_s8 }
 0xeec   :  { %v778_v8 = vpop.permute.xlu0 %777 }
 0xeed   :  { %v780_v21 = vadd.f32 %v778_v8, %v158_v1 }
 0xeef   :  { %1231 = vtanh.f32 %v780_v21 }
 0xefc   :  { %v1232_v22 = vpop.eup %1231 }
 0xefd   :  { %784 = vrot.lane.b32.xlu1 %v1232_v22, %s1248_s3 }
 0xf6f   :  { %v785_v24 = vpop.permute.xlu1 %784 }
 0xf70   :  { %v787_v25 = vmul.f32 %v785_v24, %v782_v23 }
 0xf72   :  { %v789_v26 = vadd.f32 %v788_v61, %v787_v25 }
 0xf74   :  { %791 = vrot.lane.b32.xlu0 %v789_v26, %s1248_s3 }
 0xfe6   :  { %v792_v27 = vpop.permute.xlu0 %791 }
 0xfe7   :  { %1010 = vst.msk [vmem:[%s1530_s5 + $0x28] sm:$0xff] %vm171_vm2, %v792_v27  ;;  %1180 = vmatmul.mubr.msk.f32.vlgmr.msra.gmra.mxu0 %vm171_vm2, %v792_v27 }
0x10a7   :  { %v861_v28 = vpop.f32.mrf.mxu0 }
0x10a8   :  { %v872_v29 = vadd.f32 %v861_v28, %v1345_v9  ;;  %v865_v32 = vadd.f32 %v861_v28, %v163_v31 }
0x10a9   :  { %v1181_v30 = vpop.f32.mrf.mxu0 }
0x10aa   :  { %874 = vrot.lane.b32.xlu1 %v872_v29, %s1247_s8  ;;  %v1039_v33 = vmul.f32 -1.442695, %v865_v32 }
0x10ac   :  { %1233 = vpow2.f32 %v1039_v33 }
0x10b9   :  { %v1234_v34 = vpop.eup %1233 }
0x10ba   :  { %v869_v35 = vadd.f32 1.0, %v1234_v34 }
0x10bc   :  { %1235 = vrcp.f32 %v869_v35 }
0x10c9   :  { %v1236_v36 = vpop.eup %1235 }
0x10ca   :  { %v884_v42 = vsub.f32 1.0, %v1236_v36  ;;  %v890_v2 = vmul.f32 %v1236_v36, %v789_v26 }
0x111c   :  { %v875_v37 = vpop.permute.xlu1 %874 }
0x111d   :  { %v877_v38 = vmul.f32 %v1236_v36, %v875_v37 }
0x111f   :  { %879 = vrot.lane.b32.xlu0 %v877_v38, %s1247_s8 }
0x1191   :  { %v880_v39 = vpop.permute.xlu0 %879 }
0x1192   :  { %v882_v40 = vadd.f32 %v880_v39, %v163_v31 }
0x1194   :  { %1237 = vtanh.f32 %v882_v40 }
0x11a1   :  { %v1238_v41 = vpop.eup %1237 }
0x11a2   :  { %886 = vrot.lane.b32.xlu1 %v1238_v41, %s1248_s3 }
0x1214   :  { %v887_v43 = vpop.permute.xlu1 %886 }
0x1215   :  { %v889_v44 = vmul.f32 %v887_v43, %v884_v42 }
0x1217   :  { %v891_v45 = vadd.f32 %v890_v2, %v889_v44 }
0x1219   :  { %893 = vrot.lane.b32.xlu0 %v891_v45, %s1248_s3 }
0x128b   :  { %v894_v46 = vpop.permute.xlu0 %893 }
0x128c   :  { %1011 = vst.msk [vmem:[%s1530_s5 + $0x30] sm:$0xff] %vm171_vm2, %v894_v46  ;;  %1191 = vmatmul.mubr.msk.f32.vlgmr.msra.gmra.mxu1 %vm171_vm2, %v894_v46 }
0x134c   :  { %v963_v47 = vpop.f32.mrf.mxu1 }
0x134d   :  { %v974_v48 = vadd.f32 %v963_v47, %v1345_v9  ;;  %v967_v51 = vadd.f32 %v963_v47, %v168_v50 }
0x134e   :  { %v1192_v49 = vpop.f32.mrf.mxu1 }
0x134f   :  { %976 = vrot.lane.b32.xlu1 %v974_v48, %s1247_s8  ;;  %v1041_v52 = vmul.f32 -1.442695, %v967_v51 }
0x1351   :  { %1239 = vpow2.f32 %v1041_v52 }
0x135e   :  { %v1240_v53 = vpop.eup %1239 }
0x135f   :  { %v971_v54 = vadd.f32 1.0, %v1240_v53 }
0x1361   :  { %1241 = vrcp.f32 %v971_v54 }
0x136e   :  { %v1242_v55 = vpop.eup %1241 }
0x136f   :  { %v986_v60 = vsub.f32 1.0, %v1242_v55  ;;  %v992_v14 = vmul.f32 %v1242_v55, %v891_v45 }
0x13c1   :  { %v977_v56 = vpop.permute.xlu1 %976 }
0x13c2   :  { %v979_v57 = vmul.f32 %v1242_v55, %v977_v56 }
0x13c4   :  { %981 = vrot.lane.b32.xlu0 %v979_v57, %s1247_s8 }
0x1436   :  { %v982_v58 = vpop.permute.xlu0 %981 }
0x1437   :  { %v984_v59 = vadd.f32 %v982_v58, %v168_v50 }
0x1439   :  { %1243 = vtanh.f32 %v984_v59 }
0x1446   :  { %v1244_v9 = vpop.eup %1243 }
0x1447   :  { %988 = vrot.lane.b32.xlu1 %v1244_v9, %s1248_s3 }
0x14b9   :  { %v989_v3 = vpop.permute.xlu1 %988 }
0x14ba   :  { %v991_v63 = vmul.f32 %v989_v3, %v986_v60 }
0x14bc   :  { %v993_v5 = vadd.f32 %v992_v14, %v991_v63 }
0x14be   :  { %995 = vrot.lane.b32.xlu0 %v993_v5, %s1248_s3 }
0x1530   :  { %v996_v7 = vpop.permute.xlu0 %995 }
0x1531   :  { %1012 = vst.msk [vmem:[%s1530_s5 + $0x38] sm:$0xff] %vm171_vm2, %v996_v7 }

// kernel: neural_network_forward.9
= control target key start
LH: loop header
LB: loop body
LE: loop exit
PB: predicated region body
PF: predicated region fallthrough
CT: control target
= control target key end

     0   :  { %17 = vsyncpa [#allocation4], 0  ;;  %v1924_v1 = vmov 0   ;;  %v1925_v2 = vmov 2   ;;  %v1926_v5 = vmov 0.0   ;;  %vm1927_vm0 = vmmov 0   ;;  %s2684_s0 = inlined_call_operand.vmem [shape: f32[6,64,32], index: 0, kind: input, shape index: {}, may-alias: {0,8}]   ;;  %s2685_s1 = inlined_call_operand.vmem [shape: f32[8,6], index: 1, kind: input, shape index: {}]   ;;  %s2686_s2 = inlined_call_operand.vmem [shape: f32[64,32], index: 2, kind: input, shape index: {}]   ;;  %s2687_s3 = inlined_call_operand.vmem [shape: f32[32,96], index: 3, kind: input, shape index: {}]   ;;  %s2688_s4 = inlined_call_operand.vmem [shape: f32[32,96], index: 4, kind: input, shape index: {}]   ;;  %s2689_s5 = inlined_call_operand.vmem [shape: f32[1,96], index: 5, kind: input, shape index: {}]   ;;  %s2690_s6 = inlined_call_operand.vmem [shape: f32[1,32], index: 6, kind: input, shape index: {}]   ;;  %s2691_s7 = inlined_call_operand.vmem [shape: f32[8,1], index: 7, kind: input, shape index: {}]   ;;  %s2692_s8 = inlined_call_operand.vmem [shape: f32[6,64,32], index: 8, kind: output, shape index: {0}, may-alias: {0,8}]   ;;  %s2693_s9 = inlined_call_operand.vmem [shape: f32[64,32], index: 9, kind: output, shape index: {1}]   ;;  %s2694_s10 = inlined_call_operand.hbm [shape: f32[1,1], index: 10, kind: output, shape index: {2}]   ;;  %s2695_s11 = inlined_call_operand.hbm [shape: f32[1,1], index: 11, kind: output, shape index: {3}]  }
   0x1   :  { %v35_v0 = vld [vmem:[%s2685_s1] sm:$0xff]  ;;  %1810 = vset.pattern.permute.xlu0 %v1924_v1  ;;  %1812 = vset.pattern.permute.xlu1 %v1925_v2  ;;  %v2003_v3 = vld [vmem:[%s2688_s4 + $0x18] sm:$0xff]  ;;  %v2016_v6 = vld [vmem:[%s2688_s4 + $0x10] sm:$0xff]  ;;  %v1928_v7 = vmov 1   ;;  %v1929_v8 = vmov 3   ;;  %v1930_v12 = vmov 4  }
   0x2   :  { %46 = vperm.xlu0 %1810, %v35_v0   ;;  %96 = vperm.xlu1 %1812, %v35_v0   ;;  %v214_v4 = vld [vmem:[%s2687_s3 + $0x18] sm:$0xff]  ;;  %v2021_v9 = vld [vmem:[%s2688_s4 + $0x8] sm:$0xff]  ;;  %v213_v10 = vld [vmem:[%s2687_s3 + $0x10] sm:$0xff]  ;;  %v1931_v13 = vmov 5  }
   0x3   :  { %1709 = vmatprep.subr.mxu1 %v1926_v5  ;;  %1717 = vmatprep.mubr.msk.f32.mxu1 %vm1927_vm0, %v1926_v5  ;;  %v212_v11 = vld [vmem:[%s2687_s3 + $0x8] sm:$0xff]  ;;  %v2035_v14 = vld [vmem:[%s2688_s4] sm:$0xff]  ;;  %s1932_s4 = smov 64  }
   0x4   :  { %1710 = vmatpush3.msra.mxu1 %v2003_v3  ;;  %1689 = vmatprep.subr.mxu0 %v214_v4  ;;  %v211_v15 = vld [vmem:[%s2687_s3] sm:$0xff] }
   0x5   :  { %1711 = vmatprep.subr.mxu1 %v1926_v5  ;;  %1690 = vmatpush3.msra.mxu0 %v214_v4  ;;  %v1622_v16 = vld [vmem:[%s2690_s6] ss:$0 sm:$0xff] }
   0x6   :  { %1811 = vset.pattern.permute.xlu0 %v1928_v7  ;;  %1813 = vset.pattern.permute.xlu1 %v1929_v8 }
   0x7   :  { %67 = vperm.xlu0 %1811, %v35_v0   ;;  %125 = vperm.xlu1 %1813, %v35_v0  }
   0x8   :  { %1712 = vmatpush3.msra.mxu1 %v2016_v6  ;;  %1691 = vmatprep.subr.mxu0 %v213_v10 }
   0x9   :  { %1713 = vmatprep.subr.mxu1 %v1926_v5  ;;  %1692 = vmatpush3.msra.mxu0 %v213_v10 }
   0xa   :  { %1714 = vmatpush3.msra.mxu1 %v2021_v9  ;;  %1693 = vmatprep.subr.mxu0 %v212_v11 }
   0xb   :  { %1814 = vset.pattern.permute.xlu1 %v1930_v12  ;;  %1815 = vset.pattern.permute.xlu0 %v1931_v13 }
   0xc   :  { %154 = vperm.xlu1 %1814, %v35_v0   ;;  %183 = vperm.xlu0 %1815, %v35_v0  }
   0xd   :  { %1715 = vmatprep.subr.mxu1 %v1926_v5  ;;  %1694 = vmatpush3.msra.mxu0 %v212_v11 }
   0xe   :  { %1716 = vmatpush3.msra.mxu1 %v2035_v14  ;;  %1695 = vmatprep.subr.mxu0 %v211_v15 }
   0xf   :  { %1718 = vmatmul.mubr.f32.vlgmr.msra.gmra.mxu1 %v1926_v5  ;;  %1696 = vmatpush3.msra.mxu0 %v211_v15 }
  0x10   :  { %441 = vrot.lane.b32.xlu1 %v1622_v16, %s1932_s4  ;;  %1720 = vmatprep.subr.mxu1 %v1926_v5 }
  0x11   :  { %1721 = vmatpush3.msra.mxu1 %v2003_v3  ;;  %1728 = vmatprep.mubr.msk.f32.mxu1 %vm1927_vm0, %v1926_v5 }
  0x12   :  { %1722 = vmatprep.subr.mxu1 %v1926_v5  ;;  %1731 = vmatprep.subr.mxu0 %v1926_v5 }
  0x13   :  { %18 = vsyncpa [#allocation6], 0  ;;  %1723 = vmatpush3.msra.mxu1 %v2016_v6  ;;  %v36_v17 = vld [vmem:[%s2684_s0] sm:$0xff]  ;;  %v37_v19 = vld [vmem:[%s2684_s0 + $0x8] sm:$0xff]  ;;  %vm202_vm1 = vcmask 261120   ;;  %vm1452_vm2 = vcmask 7168  }
  0x14   :  { %1724 = vmatprep.subr.mxu1 %v1926_v5  ;;  %v1580_v18 = vld [vmem:[%s2684_s0 + $0x80] sm:$0xff]  ;;  %v1581_v20 = vld [vmem:[%s2684_s0 + $0x88] sm:$0xff]  ;;  %v38_v23 = vld [vmem:[%s2684_s0 + $0x10] sm:$0xff]  ;;  %s1935_s22 = smov [#allocation5]   ;;  %vm1460_vm3 = vcmask 0  }
  0x15   :  { %1725 = vmatpush3.msra.mxu1 %v2021_v9  ;;  %v1582_v24 = vld [vmem:[%s2684_s0 + $0x90] sm:$0xff]  ;;  %v39_v25 = vld [vmem:[%s2684_s0 + $0x18] sm:$0xff]  ;;  %v1572_v26 = vld [vmem:[%s2684_s0 + $0x40] sm:$0xff]  ;;  %s1552_s1 = sshll.u32 %s1935_s22, 4  ;;  %s1553_s1 = int_to_ptr.vmem [resolvable:$true] %s1552_s1 }
  0x16   :  { %1726 = vmatprep.subr.mxu1 %v1926_v5  ;;  %v1588_v27 = vld [vmem:[%s2684_s0 + $0xc0] sm:$0xff]  ;;  %v1583_v28 = vld [vmem:[%s2684_s0 + $0x98] sm:$0xff]  ;;  %v41_v32 = vld [vmem:[%s2684_s0 + $0x28] sm:$0xff]  ;;  %s1880_s23 = scalar_lea.vmem %s1553_s1, 16  ;;  %s1884_s24 = scalar_lea.vmem %s1553_s1, 32 }
  0x17   :  { %1727 = vmatpush3.msra.mxu1 %v2035_v14  ;;  %v40_v29 = vld [vmem:[%s2684_s0 + $0x20] sm:$0xff]  ;;  %v1585_v33 = vld [vmem:[%s2684_s0 + $0xa8] sm:$0xff]  ;;  %v42_v34 = vld [vmem:[%s2684_s0 + $0x30] sm:$0xff]  ;;  %p1881_p0 = scmp.ne.s32.totalorder %s1553_s1, %s1880_s23  ;;  %p1885_p1 = scmp.lt.s32.totalorder %s1553_s1, %s1553_s1 }
  0x18   :  { %1742 = vmatprep.subr.mxu1 %v1926_v5  ;;  %v1584_v30 = vld [vmem:[%s2684_s0 + $0xa0] sm:$0xff]  ;;  %v1573_v37 = vld [vmem:[%s2684_s0 + $0x48] sm:$0xff]  ;;  %v1586_v41 = vld [vmem:[%s2684_s0 + $0xb0] sm:$0xff]  ;;  %p1886_p2 = scmp.lt.s32.totalorder %s1884_s24, %s1880_s23 }
  0x19   :  { %v1589_v39 = vld [vmem:[%s2684_s0 + $0xc8] sm:$0xff]  ;;  %v1574_v42 = vld [vmem:[%s2684_s0 + $0x50] sm:$0xff]  ;;  %v1575_v46 = vld [vmem:[%s2684_s0 + $0x58] sm:$0xff] }
  0x1a   :  { %v1590_v44 = vld [vmem:[%s2684_s0 + $0xd0] sm:$0xff]  ;;  %v1591_v51 = vld [vmem:[%s2684_s0 + $0xd8] sm:$0xff]  ;;  %v1576_v52 = vld [vmem:[%s2684_s0 + $0x60] sm:$0xff]  ;;  %p1887_p3 = por %p1886_p2, %p1885_p1 }
  0x1b   :  { %v1592_v60 = vld [vmem:[%s2684_s0 + $0xe0] sm:$0xff]  ;;  %v1577_v61 = vld [vmem:[%s2684_s0 + $0x68] sm:$0xff]  ;;  %v1578_v7 = vld [vmem:[%s2684_s0 + $0x70] sm:$0xff] }
  0x1c   :  { %v1596_v63 = vld [vmem:[%s2684_s0 + $0x100] sm:$0xff]  ;;  %v1597_v12 = vld [vmem:[%s2684_s0 + $0x108] sm:$0xff]  ;;  %p1888_p4 = pnand %p1887_p3, %p1881_p0 }
  0x1d   :  { %v1604_v10 = vld [vmem:[%s2684_s0 + $0x140] sm:$0xff]  ;;  %v1605_v13 = vld [vmem:[%s2684_s0 + $0x148] sm:$0xff] }
  0x7d   :  { %v2071_v21 = vpop.permute.xlu0 %46  ;;  %v2073_v22 = vpop.permute.xlu1 %96 }
  0x7e   :  { %v49_v31 = vmul.f32 %v2071_v21, %v36_v17  ;;  %v99_v35 = vmul.f32 %v1580_v18, %v2073_v22  ;;  %v50_v36 = vmul.f32 %v2071_v21, %v37_v19  ;;  %v100_v38 = vmul.f32 %v1581_v20, %v2073_v22  ;;  %v1598_v18 = vld [vmem:[%s2684_s0 + $0x110] sm:$0xff] }
  0x7f   :  { %v51_v40 = vmul.f32 %v2071_v21, %v38_v23  ;;  %v101_v43 = vmul.f32 %v1582_v24, %v2073_v22  ;;  %v52_v45 = vmul.f32 %v2071_v21, %v39_v25  ;;  %v102_v47 = vmul.f32 %v1583_v28, %v2073_v22  ;;  %v1606_v28 = vld [vmem:[%s2684_s0 + $0x150] sm:$0xff] }
  0x80   :  { %v53_v48 = vmul.f32 %v2071_v21, %v40_v29  ;;  %v103_v53 = vmul.f32 %v1584_v30, %v2073_v22  ;;  %v54_v54 = vmul.f32 %v2071_v21, %v41_v32  ;;  %v2148_v55 = vmul.f32 %v1585_v33, %v2073_v22  ;;  %v1599_v29 = vld [vmem:[%s2684_s0 + $0x118] sm:$0xff] }
  0x81   :  { %v2151_v56 = vmul.f32 %v2071_v21, %v42_v34  ;;  %v2163_v62 = vmul.f32 %v1586_v41, %v2073_v22  ;;  %v1607_v30 = vld [vmem:[%s2684_s0 + $0x158] sm:$0xff]  ;;  %v1600_v41 = vld [vmem:[%s2684_s0 + $0x120] sm:$0xff] }
  0x82   :  { %v2135_v49 = vpop.permute.xlu0 %67  ;;  %v2137_v50 = vpop.permute.xlu1 %125 }
  0x83   :  { %v70_v57 = vmul.f32 %v1572_v26, %v2135_v49  ;;  %v128_v58 = vmul.f32 %v1588_v27, %v2137_v50  ;;  %v71_v59 = vmul.f32 %v1573_v37, %v2135_v49  ;;  %v129_v0 = vmul.f32 %v1589_v39, %v2137_v50 }
  0x84   :  { %v72_v1 = vmul.f32 %v1574_v42, %v2135_v49  ;;  %v130_v2 = vmul.f32 %v1590_v44, %v2137_v50  ;;  %v73_v4 = vmul.f32 %v1575_v46, %v2135_v49  ;;  %v131_v15 = vmul.f32 %v1591_v51, %v2137_v50  ;;  %v1608_v42 = vld [vmem:[%s2684_s0 + $0x160] sm:$0xff] }
  0x85   :  { %v78_v8 = vadd.f32 %v70_v57, %v49_v31  ;;  %v79_v11 = vadd.f32 %v71_v59, %v50_v36  ;;  %v74_v16 = vmul.f32 %v1576_v52, %v2135_v49  ;;  %v132_v20 = vmul.f32 %v1592_v60, %v2137_v50  ;;  %v1601_v59 = vld [vmem:[%s2684_s0 + $0x128] sm:$0xff] }
  0x86   :  { %v80_v17 = vadd.f32 %v72_v1, %v51_v40  ;;  %v81_v19 = vadd.f32 %v73_v4, %v52_v45  ;;  %v75_v23 = vmul.f32 %v1577_v61, %v2135_v49  ;;  %v76_v32 = vmul.f32 %v1578_v7, %v2135_v49  ;;  %v1609_v7 = vld [vmem:[%s2684_s0 + $0x168] sm:$0xff] }
  0x87   :  { %v2191_v24 = vpop.permute.xlu1 %154  ;;  %v2193_v25 = vpop.permute.xlu0 %183  ;;  %v107_v26 = vadd.f32 %v99_v35, %v78_v8  ;;  %v108_v27 = vadd.f32 %v100_v38, %v79_v11  ;;  %v82_v31 = vadd.f32 %v74_v16, %v53_v48  ;;  %v1594_v8 = vld [vmem:[%s2684_s0 + $0xf0] sm:$0xff] }
  0x88   :  { %v157_v33 = vmul.f32 %v1596_v63, %v2191_v24  ;;  %v186_v34 = vmul.f32 %v1604_v10, %v2193_v25  ;;  %v158_v35 = vmul.f32 %v1597_v12, %v2191_v24  ;;  %v187_v36 = vmul.f32 %v1605_v13, %v2193_v25  ;;  %v1602_v13 = vld [vmem:[%s2684_s0 + $0x130] sm:$0xff] }
  0x89   :  { %v136_v37 = vadd.f32 %v128_v58, %v107_v26  ;;  %v137_v38 = vadd.f32 %v129_v0, %v108_v27  ;;  %v109_v39 = vadd.f32 %v101_v43, %v80_v17  ;;  %v159_v40 = vmul.f32 %v1598_v18, %v2191_v24  ;;  %v1593_v58 = vld [vmem:[%s2684_s0 + $0xe8] sm:$0xff]  ;;  %v43_v0 = vld [vmem:[%s2684_s0 + $0x38] sm:$0xff]  ;;  %v1610_v27 = vld [vmem:[%s2684_s0 + $0x170] sm:$0xff] }
  0x8a   :  { %v188_v44 = vmul.f32 %v1606_v28, %v2193_v25  ;;  %v110_v45 = vadd.f32 %v102_v47, %v81_v19  ;;  %v160_v46 = vmul.f32 %v1599_v29, %v2191_v24  ;;  %v189_v48 = vmul.f32 %v1607_v30, %v2193_v25 }
  0x8b   :  { %v165_v51 = vadd.f32 %v157_v33, %v136_v37  ;;  %v166_v52 = vadd.f32 %v158_v35, %v137_v38  ;;  %v138_v43 = vadd.f32 %v130_v2, %v109_v39  ;;  %v111_v57 = vadd.f32 %v103_v53, %v82_v31  ;;  %v1595_v31 = vld [vmem:[%s2684_s0 + $0xf8] sm:$0xff] }
  0x8c   :  { %v139_v60 = vadd.f32 %v131_v15, %v110_v45  ;;  %v161_v61 = vmul.f32 %v1600_v41, %v2191_v24  ;;  %v190_v47 = vmul.f32 %v1608_v42, %v2193_v25  ;;  %v83_v63 = vadd.f32 %v75_v23, %v54_v54  ;;  %v1579_v15 = vld [vmem:[%s2684_s0 + $0x78] sm:$0xff] }
  0x8d   :  { %v2230_v1 = vadd.f32 %v186_v34, %v165_v51  ;;  %v2232_v53 = vadd.f32 %v187_v36, %v166_v52  ;;  %v167_v2 = vadd.f32 %v159_v40, %v138_v43  ;;  %v140_v4 = vadd.f32 %v132_v20, %v111_v57  ;;  %v1603_v33 = vld [vmem:[%s2684_s0 + $0x138] sm:$0xff]  ;;  %v2361_v51 = vld [vmem:[%s2689_s5] ss:$0 sm:$0xff]  ;;  %s1933_s5 = smov 96  }
  0x8e   :  { %v168_v10 = vadd.f32 %v160_v46, %v139_v60  ;;  %v112_v54 = vadd.f32 %v2148_v55, %v83_v63  ;;  %v133_v11 = vmul.f32 %v1593_v58, %v2137_v50  ;;  %v162_v12 = vmul.f32 %v1601_v59, %v2191_v24  ;;  %v1611_v38 = vld [vmem:[%s2684_s0 + $0x178] sm:$0xff] }
  0x8f   :  { %203 = vst.msk [vmem:[%s2693_s9] sm:$0xff] %vm202_vm1, %v2230_v1  ;;  %1697 = vmatprep.mubr.msk.f32.mxu0 %vm202_vm1, %v2230_v1  ;;  %204 = vst.msk [vmem:[%s2693_s9 + $0x8] sm:$0xff] %vm202_vm1, %v2232_v53  ;;  %v2261_v55 = vadd.f32 %v188_v44, %v167_v2  ;;  %v169_v16 = vadd.f32 %v161_v61, %v140_v4  ;;  %v84_v17 = vadd.f32 %v76_v32, %v2151_v56  ;;  %v1587_v56 = vld [vmem:[%s2684_s0 + $0xb8] sm:$0xff]  ;;  %v2354_v44 = vpop.permute.xlu1 %441 }
  0x90   :  { %v56_v18 = vmul.f32 %v2071_v21, %v43_v0  ;;  %1698 = vmatmul.mubr.msk.f32.vlgmr.msra.gmra.mxu0 %vm202_vm1, %v2232_v53  ;;  %v2267_v19 = vadd.f32 %v189_v48, %v168_v10  ;;  %v141_v20 = vadd.f32 %v133_v11, %v112_v54  ;;  %v191_v23 = vmul.f32 %v1609_v7, %v2193_v25 }
  0x91   :  { %v134_v26 = vmul.f32 %v1594_v8, %v2137_v50  ;;  %205 = vst.msk [vmem:[%s2693_s9 + $0x10] sm:$0xff] %vm202_vm1, %v2261_v55  ;;  %1700 = vmatprep.mubr.msk.f32.mxu0 %vm202_vm1, %v2261_v55  ;;  %v2284_v21 = vadd.f32 %v190_v47, %v169_v16  ;;  %v113_v28 = vadd.f32 %v2163_v62, %v84_v17 }
  0x92   :  { %v163_v29 = vmul.f32 %v1602_v13, %v2191_v24  ;;  %v77_v30 = vmul.f32 %v1579_v15, %v2135_v49  ;;  %206 = vst.msk [vmem:[%s2693_s9 + $0x18] sm:$0xff] %vm202_vm1, %v2267_v19  ;;  %v170_v32 = vadd.f32 %v162_v12, %v141_v20  ;;  %1732 = vmatpush3.msra.mxu0 %v2003_v3 }
  0x93   :  { %207 = vst.msk [vmem:[%s2693_s9 + $0x20] sm:$0xff] %vm202_vm1, %v2284_v21  ;;  %v142_v49 = vadd.f32 %v134_v26, %v113_v28  ;;  %v192_v62 = vmul.f32 %v1610_v27, %v2193_v25  ;;  %v106_v35 = vmul.f32 %v1587_v56, %v2073_v22  ;;  %1733 = vmatprep.subr.mxu0 %v1926_v5 }
  0x94   :  { %v85_v34 = vadd.f32 %v77_v30, %v56_v18  ;;  %1701 = vmatmul.mubr.msk.f32.gmra.mxu0 %vm202_vm1, %v2267_v19  ;;  %v2311_v36 = vadd.f32 %v191_v23, %v170_v32  ;;  %v135_v37 = vmul.f32 %v1595_v31, %v2137_v50  ;;  %v164_v22 = vmul.f32 %v1603_v33, %v2191_v24 }
  0x95   :  { %1703 = vmatprep.mubr.msk.f32.mxu0 %vm202_vm1, %v2284_v21  ;;  %v171_v39 = vadd.f32 %v163_v29, %v142_v49  ;;  %1734 = vmatpush3.msra.mxu0 %v2016_v6  ;;  %v193_v42 = vmul.f32 %v1611_v38, %v2193_v25 }
  0x96   :  { %v114_v40 = vadd.f32 %v106_v35, %v85_v34  ;;  %208 = vst.msk [vmem:[%s2693_s9 + $0x28] sm:$0xff] %vm202_vm1, %v2311_v36  ;;  %1735 = vmatprep.subr.mxu0 %v1926_v5 }
  0x97   :  { %v2327_v50 = vadd.f32 %v192_v62, %v171_v39  ;;  %1736 = vmatpush3.msra.mxu0 %v2021_v9 }
  0x98   :  { %v143_v41 = vadd.f32 %v135_v37, %v114_v40  ;;  %1704 = vmatmul.mubr.msk.f32.gmra.mxu0 %vm202_vm1, %v2311_v36  ;;  %1737 = vmatprep.subr.mxu0 %v1926_v5 }
  0x99   :  { %209 = vst.msk [vmem:[%s2693_s9 + $0x30] sm:$0xff] %vm202_vm1, %v2327_v50  ;;  %1706 = vmatprep.mubr.msk.f32.mxu0 %vm202_vm1, %v2327_v50  ;;  %1738 = vmatpush3.msra.mxu0 %v2035_v14 }
  0x9a   :  { %v172_v24 = vadd.f32 %v164_v22, %v143_v41  ;;  %1753 = vmatprep.subr.mxu0 %v1926_v5 }
  0x9c   :  { %v2343_v25 = vadd.f32 %v193_v42, %v172_v24 }
  0x9e   :  { %210 = vst.msk [vmem:[%s2693_s9 + $0x38] sm:$0xff] %vm202_vm1, %v2343_v25  ;;  %1707 = vmatmul.mubr.msk.f32.gmra.mxu0 %vm202_vm1, %v2343_v25  ;;  %s1934_s9 = smov 32  }
  0x9f   :  { %1739 = vmatprep.mubr.msk.f32.mxu0 %vm1927_vm0, %v1926_v5 }
  0xcf   :  { %v425_v45 = vpop.f32.mrf.mxu1 }
  0xd0   :  { %v444_v46 = vadd.f32 %v2354_v44, %v425_v45 }
  0xd1   :  { %v1719_v48 = vpop.f32.mrf.mxu1 }
  0xd2   :  { %446 = vrot.lane.b32.xlu1 %v444_v46, %s1932_s4 }
 0x144   :  { %v447_v13 = vpop.permute.xlu1 %446 }
 0x150   :  { %v1699_v52 = vpop.f32.mrf.mxu0 }
 0x151   :  { %v323_v43 = vadd.f32 %v1699_v52, %v2361_v51 }
 0x152   :  { %v317_v57 = vpop.f32.mrf.mxu0 }
 0x153   :  { %v318_v58 = vadd.f32 %v2361_v51, %v317_v57 }
 0x154   :  { %v1702_v59 = vpop.f32.mrf.mxu0 }
 0x155   :  { %v429_v60 = vadd.f32 %v425_v45, %v318_v58  ;;  %v2366_v61 = vadd.f32 %v1702_v59, %v2361_v51 }
 0x156   :  { %v327_v47 = vpop.f32.mrf.mxu0 }
 0x157   :  { %v1621_v63 = vmul.f32 -1.442695, %v429_v60  ;;  %v2369_v0 = vadd.f32 %v2361_v51, %v327_v47 }
 0x158   :  { %v1705_v2 = vpop.f32.mrf.mxu0 }
 0x159   :  { %1816 = vpow2.f32 %v1621_v63  ;;  %v2372_v4 = vadd.f32 %v1705_v2, %v2361_v51 }
 0x15a   :  { %v337_v7 = vpop.f32.mrf.mxu0 }
 0x15b   :  { %v2375_v8 = vadd.f32 %v2361_v51, %v337_v7 }
 0x15e   :  { %v1708_v10 = vpop.f32.mrf.mxu0 }
 0x15f   :  { %v2378_v54 = vadd.f32 %v1708_v10, %v2361_v51 }
 0x160   :  { %v2417_v52 = vpop.f32.mrf.mxu0 }
 0x166   :  { %v1817_v11 = vpop.eup %1816 }
 0x167   :  { %v433_v12 = vadd.f32 1.0, %v1817_v11 }
 0x169   :  { %1818 = vrcp.f32 %v433_v12 }
 0x176   :  { %v1819_v15 = vpop.eup %1818 }
 0x177   :  { %v449_v16 = vmul.f32 %v1819_v15, %v447_v13  ;;  %v456_v23 = vsub.f32 1.0, %v1819_v15  ;;  %v462_v27 = vmul.f32 0.0, %v1819_v15 }
 0x179   :  { %451 = vrot.lane.b32.xlu0 %v449_v16, %s1932_s4 }
 0x1eb   :  { %v452_v17 = vpop.permute.xlu0 %451 }
 0x1ec   :  { %v454_v18 = vadd.f32 %v452_v17, %v318_v58 }
 0x1ee   :  { %1820 = vtanh.f32 %v454_v18 }
 0x1fb   :  { %v1821_v20 = vpop.eup %1820 }
 0x1fc   :  { %458 = vrot.lane.b32.xlu1 %v1821_v20, %s1933_s5 }
 0x26e   :  { %v459_v26 = vpop.permute.xlu1 %458 }
 0x26f   :  { %v461_v56 = vmul.f32 %v459_v26, %v456_v23 }
 0x271   :  { %v2382_v28 = vadd.f32 %v462_v27, %v461_v56 }
 0x273   :  { %465 = vrot.lane.b32.xlu0 %v2382_v28, %s1933_s5 }
 0x2e5   :  { %v466_v29 = vpop.permute.xlu0 %465 }
 0x2e6   :  { %1729 = vmatmul.mubr.msk.f32.vlgmr.msra.gmra.mxu1 %vm202_vm1, %v466_v29 }
 0x2e7   :  { %1743 = vmatpush3.msra.mxu1 %v2003_v3  ;;  %1750 = vmatprep.mubr.msk.f32.mxu1 %vm1927_vm0, %v1926_v5 }
 0x2e8   :  { %1744 = vmatprep.subr.mxu1 %v1926_v5 }
 0x2e9   :  { %1745 = vmatpush3.msra.mxu1 %v2016_v6 }
 0x2ea   :  { %1746 = vmatprep.subr.mxu1 %v1926_v5 }
 0x2eb   :  { %1747 = vmatpush3.msra.mxu1 %v2021_v9 }
 0x2ec   :  { %1748 = vmatprep.subr.mxu1 %v1926_v5 }
 0x2ed   :  { %1749 = vmatpush3.msra.mxu1 %v2035_v14 }
 0x2ee   :  { %1764 = vmatprep.subr.mxu1 %v1926_v5 }
 0x3a6   :  { %v535_v30 = vpop.f32.mrf.mxu1 }
 0x3a7   :  { %v546_v31 = vadd.f32 %v535_v30, %v2354_v44  ;;  %v539_v33 = vadd.f32 %v535_v30, %v323_v43 }
 0x3a8   :  { %v1730_v32 = vpop.f32.mrf.mxu1 }
 0x3a9   :  { %548 = vrot.lane.b32.xlu1 %v546_v31, %s1932_s4  ;;  %v1624_v49 = vmul.f32 -1.442695, %v539_v33 }
 0x3ab   :  { %1822 = vpow2.f32 %v1624_v49 }
 0x3b8   :  { %v1823_v62 = vpop.eup %1822 }
 0x3b9   :  { %v543_v34 = vadd.f32 1.0, %v1823_v62 }
 0x3bb   :  { %1824 = vrcp.f32 %v543_v34 }
 0x3c8   :  { %v1825_v35 = vpop.eup %1824 }
 0x3c9   :  { %v558_v41 = vsub.f32 1.0, %v1825_v35  ;;  %v564_v24 = vmul.f32 %v1825_v35, %v2382_v28 }
 0x41b   :  { %v549_v37 = vpop.permute.xlu1 %548 }
 0x41c   :  { %v551_v38 = vmul.f32 %v1825_v35, %v549_v37 }
 0x41e   :  { %553 = vrot.lane.b32.xlu0 %v551_v38, %s1932_s4 }
 0x490   :  { %v554_v39 = vpop.permute.xlu0 %553 }
 0x491   :  { %v556_v40 = vadd.f32 %v554_v39, %v323_v43 }
 0x493   :  { %1826 = vtanh.f32 %v556_v40 }
 0x4a0   :  { %v1827_v22 = vpop.eup %1826 }
 0x4a1   :  { %560 = vrot.lane.b32.xlu1 %v1827_v22, %s1933_s5 }
 0x513   :  { %v561_v42 = vpop.permute.xlu1 %560 }
 0x514   :  { %v563_v45 = vmul.f32 %v561_v42, %v558_v41 }
 0x516   :  { %v2402_v46 = vadd.f32 %v564_v24, %v563_v45 }
 0x518   :  { %567 = vrot.lane.b32.xlu0 %v2402_v46, %s1933_s5 }
 0x58a   :  { %v568_v48 = vpop.permute.xlu0 %567 }
 0x58b   :  { %1740 = vmatmul.mubr.msk.f32.vlgmr.msra.gmra.mxu0 %vm202_vm1, %v568_v48 }
 0x58c   :  { %1754 = vmatpush3.msra.mxu0 %v2003_v3  ;;  %1761 = vmatprep.mubr.msk.f32.mxu0 %vm1927_vm0, %v1926_v5 }
 0x58d   :  { %1755 = vmatprep.subr.mxu0 %v1926_v5 }
 0x58e   :  { %1756 = vmatpush3.msra.mxu0 %v2016_v6 }
 0x58f   :  { %1757 = vmatprep.subr.mxu0 %v1926_v5 }
 0x590   :  { %1758 = vmatpush3.msra.mxu0 %v2021_v9 }
 0x591   :  { %1759 = vmatprep.subr.mxu0 %v1926_v5 }
 0x592   :  { %1760 = vmatpush3.msra.mxu0 %v2035_v14 }
 0x593   :  { %1775 = vmatprep.subr.mxu0 %v1926_v5 }
 0x64b   :  { %v637_v43 = vpop.f32.mrf.mxu0 }
 0x64c   :  { %v648_v57 = vadd.f32 %v637_v43, %v2354_v44  ;;  %v641_v59 = vadd.f32 %v637_v43, %v2369_v0 }
 0x64d   :  { %v1741_v58 = vpop.f32.mrf.mxu0 }
 0x64e   :  { %650 = vrot.lane.b32.xlu1 %v648_v57, %s1932_s4  ;;  %v1626_v60 = vmul.f32 -1.442695, %v641_v59 }
 0x650   :  { %1828 = vpow2.f32 %v1626_v60 }
 0x65d   :  { %v1829_v47 = vpop.eup %1828 }
 0x65e   :  { %v645_v63 = vadd.f32 1.0, %v1829_v47 }
 0x660   :  { %1830 = vrcp.f32 %v645_v63 }
 0x66d   :  { %v1831_v2 = vpop.eup %1830 }
 0x66e   :  { %v660_v15 = vsub.f32 1.0, %v1831_v2  ;;  %v666_v17 = vmul.f32 %v1831_v2, %v2402_v46 }
 0x6c0   :  { %v651_v7 = vpop.permute.xlu1 %650 }
 0x6c1   :  { %v653_v10 = vmul.f32 %v1831_v2, %v651_v7 }
 0x6c3   :  { %655 = vrot.lane.b32.xlu0 %v653_v10, %s1932_s4 }
 0x735   :  { %v656_v11 = vpop.permute.xlu0 %655 }
 0x736   :  { %v658_v12 = vadd.f32 %v656_v11, %v2369_v0 }
 0x738   :  { %1832 = vtanh.f32 %v658_v12 }
 0x745   :  { %v1833_v13 = vpop.eup %1832 }
 0x746   :  { %662 = vrot.lane.b32.xlu1 %v1833_v13, %s1933_s5 }
 0x7b8   :  { %v663_v16 = vpop.permute.xlu1 %662 }
 0x7b9   :  { %v665_v18 = vmul.f32 %v663_v16, %v660_v15 }
 0x7bb   :  { %v2426_v20 = vadd.f32 %v666_v17, %v665_v18 }
 0x7bd   :  { %669 = vrot.lane.b32.xlu0 %v2426_v20, %s1933_s5 }
 0x82f   :  { %v670_v23 = vpop.permute.xlu0 %669 }
 0x830   :  { %1751 = vmatmul.mubr.msk.f32.vlgmr.msra.gmra.mxu1 %vm202_vm1, %v670_v23 }
 0x831   :  { %1765 = vmatpush3.msra.mxu1 %v2003_v3  ;;  %1772 = vmatprep.mubr.msk.f32.mxu1 %vm1927_vm0, %v1926_v5 }
 0x832   :  { %1766 = vmatprep.subr.mxu1 %v1926_v5 }
 0x833   :  { %1767 = vmatpush3.msra.mxu1 %v2016_v6 }
 0x834   :  { %1768 = vmatprep.subr.mxu1 %v1926_v5 }
 0x835   :  { %1769 = vmatpush3.msra.mxu1 %v2021_v9 }
 0x836   :  { %1770 = vmatprep.subr.mxu1 %v1926_v5 }
 0x837   :  { %1771 = vmatpush3.msra.mxu1 %v2035_v14 }
 0x838   :  { %1786 = vmatprep.subr.mxu1 %v1926_v5 }
 0x8f0   :  { %v739_v0 = vpop.f32.mrf.mxu1 }
 0x8f1   :  { %v750_v26 = vadd.f32 %v739_v0, %v2354_v44  ;;  %v743_v56 = vadd.f32 %v739_v0, %v2366_v61 }
 0x8f2   :  { %v1752_v27 = vpop.f32.mrf.mxu1 }
 0x8f3   :  { %752 = vrot.lane.b32.xlu1 %v750_v26, %s1932_s4  ;;  %v1628_v29 = vmul.f32 -1.442695, %v743_v56 }
 0x8f5   :  { %1834 = vpow2.f32 %v1628_v29 }
 0x902   :  { %v1835_v30 = vpop.eup %1834 }
 0x903   :  { %v747_v31 = vadd.f32 1.0, %v1835_v30 }
 0x905   :  { %1836 = vrcp.f32 %v747_v31 }
 0x912   :  { %v1837_v32 = vpop.eup %1836 }
 0x913   :  { %v762_v37 = vsub.f32 1.0, %v1837_v32  ;;  %v768_v39 = vmul.f32 %v1837_v32, %v2426_v20 }
 0x965   :  { %v753_v33 = vpop.permute.xlu1 %752 }
 0x966   :  { %v755_v49 = vmul.f32 %v1837_v32, %v753_v33 }
 0x968   :  { %757 = vrot.lane.b32.xlu0 %v755_v49, %s1932_s4 }
 0x9da   :  { %v758_v62 = vpop.permute.xlu0 %757 }
 0x9db   :  { %v760_v34 = vadd.f32 %v758_v62, %v2366_v61 }
 0x9dd   :  { %1838 = vtanh.f32 %v760_v34  ;;  %v348_v34 = vadd.f32 %v2361_v51, %v2417_v52 }
 0x9ea   :  { %v1839_v35 = vpop.eup %1838 }
 0x9eb   :  { %764 = vrot.lane.b32.xlu1 %v1839_v35, %s1933_s5 }
 0xa5d   :  { %v765_v38 = vpop.permute.xlu1 %764 }
 0xa5e   :  { %v767_v40 = vmul.f32 %v765_v38, %v762_v37 }
 0xa60   :  { %v2448_v22 = vadd.f32 %v768_v39, %v767_v40 }
 0xa62   :  { %771 = vrot.lane.b32.xlu0 %v2448_v22, %s1933_s5 }
 0xad4   :  { %v772_v41 = vpop.permute.xlu0 %771 }
 0xad5   :  { %1762 = vmatmul.mubr.msk.f32.vlgmr.msra.gmra.mxu0 %vm202_vm1, %v772_v41 }
 0xad6   :  { %1776 = vmatpush3.msra.mxu0 %v2003_v3  ;;  %1783 = vmatprep.mubr.msk.f32.mxu0 %vm1927_vm0, %v1926_v5 }
 0xad7   :  { %1777 = vmatprep.subr.mxu0 %v1926_v5 }
 0xad8   :  { %1778 = vmatpush3.msra.mxu0 %v2016_v6 }
 0xad9   :  { %1779 = vmatprep.subr.mxu0 %v1926_v5 }
 0xada   :  { %1780 = vmatpush3.msra.mxu0 %v2021_v9 }
 0xadb   :  { %1781 = vmatprep.subr.mxu0 %v1926_v5 }
 0xadc   :  { %1782 = vmatpush3.msra.mxu0 %v2035_v14 }
 0xb95   :  { %v841_v61 = vpop.f32.mrf.mxu0 }
 0xb96   :  { %v852_v42 = vadd.f32 %v841_v61, %v2354_v44  ;;  %v845_v45 = vadd.f32 %v841_v61, %v2375_v8 }
 0xb97   :  { %v1763_v24 = vpop.f32.mrf.mxu0 }
 0xb98   :  { %854 = vrot.lane.b32.xlu1 %v852_v42, %s1932_s4  ;;  %v1630_v48 = vmul.f32 -1.442695, %v845_v45 }
 0xb9a   :  { %1840 = vpow2.f32 %v1630_v48 }
 0xba7   :  { %v1841_v43 = vpop.eup %1840 }
 0xba8   :  { %v849_v57 = vadd.f32 1.0, %v1841_v43 }
 0xbaa   :  { %1842 = vrcp.f32 %v849_v57 }
 0xbb7   :  { %v1843_v58 = vpop.eup %1842 }
 0xbb8   :  { %v864_v7 = vsub.f32 1.0, %v1843_v58  ;;  %v870_v11 = vmul.f32 %v1843_v58, %v2448_v22 }
 0xc0a   :  { %v855_v59 = vpop.permute.xlu1 %854 }
 0xc0b   :  { %v857_v60 = vmul.f32 %v1843_v58, %v855_v59  ;;  %v1178_v58 = vld [vmem:[%s2686_s2] sm:$0xff] }
 0xc0d   :  { %859 = vrot.lane.b32.xlu0 %v857_v60, %s1932_s4 }
 0xc7f   :  { %v860_v47 = vpop.permute.xlu0 %859 }
 0xc80   :  { %v862_v63 = vadd.f32 %v860_v47, %v2375_v8 }
 0xc82   :  { %1844 = vtanh.f32 %v862_v63 }
 0xc8f   :  { %v1845_v2 = vpop.eup %1844 }
 0xc90   :  { %866 = vrot.lane.b32.xlu1 %v1845_v2, %s1933_s5 }
 0xd02   :  { %v867_v10 = vpop.permute.xlu1 %866 }
 0xd03   :  { %v869_v12 = vmul.f32 %v867_v10, %v864_v7 }
 0xd05   :  { %v2469_v13 = vadd.f32 %v870_v11, %v869_v12 }
 0xd07   :  { %873 = vrot.lane.b32.xlu0 %v2469_v13, %s1933_s5 }
 0xd79   :  { %v874_v15 = vpop.permute.xlu0 %873 }
 0xd7a   :  { %1773 = vmatmul.mubr.msk.f32.vlgmr.msra.gmra.mxu1 %vm202_vm1, %v874_v15 }
 0xd7b   :  { %1787 = vmatpush3.msra.mxu1 %v2003_v3  ;;  %1794 = vmatprep.mubr.msk.f32.mxu1 %vm1927_vm0, %v1926_v5 }
 0xd7c   :  { %1788 = vmatprep.subr.mxu1 %v1926_v5 }
 0xd7d   :  { %1789 = vmatpush3.msra.mxu1 %v2016_v6 }
 0xd7e   :  { %1790 = vmatprep.subr.mxu1 %v1926_v5 }
 0xd7f   :  { %1791 = vmatpush3.msra.mxu1 %v2021_v9 }
 0xd80   :  { %1792 = vmatprep.subr.mxu1 %v1926_v5 }
 0xd81   :  { %1793 = vmatpush3.msra.mxu1 %v2035_v14 }
 0xe3a   :  { %v943_v8 = vpop.f32.mrf.mxu1 }
 0xe3b   :  { %v954_v16 = vadd.f32 %v943_v8, %v2354_v44  ;;  %v947_v3 = vadd.f32 %v943_v8, %v2372_v4  ;;  %v1179_v8 = vld [vmem:[%s2686_s2 + $0x8] sm:$0xff] }
 0xe3c   :  { %v1774_v17 = vpop.f32.mrf.mxu1 }
 0xe3d   :  { %956 = vrot.lane.b32.xlu1 %v954_v16, %s1932_s4  ;;  %v1632_v18 = vmul.f32 -1.442695, %v947_v3 }
 0xe3f   :  { %1846 = vpow2.f32 %v1632_v18 }
 0xe4c   :  { %v1847_v23 = vpop.eup %1846 }
 0xe4d   :  { %v951_v6 = vadd.f32 1.0, %v1847_v23 }
 0xe4f   :  { %1848 = vrcp.f32 %v951_v6 }
 0xe5c   :  { %v1849_v0 = vpop.eup %1848 }
 0xe5d   :  { %v966_v56 = vsub.f32 1.0, %v1849_v0  ;;  %v972_v30 = vmul.f32 %v1849_v0, %v2469_v13 }
 0xeaf   :  { %v957_v26 = vpop.permute.xlu1 %956 }
 0xeb0   :  { %v959_v9 = vmul.f32 %v1849_v0, %v957_v26 }
 0xeb2   :  { %961 = vrot.lane.b32.xlu0 %v959_v9, %s1932_s4 }
 0xf24   :  { %v962_v5 = vpop.permute.xlu0 %961 }
 0xf25   :  { %v964_v14 = vadd.f32 %v962_v5, %v2372_v4 }
 0xf27   :  { %1850 = vtanh.f32 %v964_v14 }
 0xf34   :  { %v1851_v27 = vpop.eup %1850 }
 0xf35   :  { %968 = vrot.lane.b32.xlu1 %v1851_v27, %s1933_s5 }
 0xfa7   :  { %v969_v29 = vpop.permute.xlu1 %968 }
 0xfa8   :  { %v971_v31 = vmul.f32 %v969_v29, %v966_v56  ;;  %v1180_v29 = vld [vmem:[%s2686_s2 + $0x10] sm:$0xff] }
 0xfaa   :  { %v2490_v32 = vadd.f32 %v972_v30, %v971_v31 }
 0xfac   :  { %975 = vrot.lane.b32.xlu0 %v2490_v32, %s1933_s5 }
0x101e   :  { %v976_v33 = vpop.permute.xlu0 %975 }
0x101f   :  { %1784 = vmatmul.mubr.msk.f32.vlgmr.msra.gmra.mxu0 %vm202_vm1, %v976_v33 }
0x10df   :  { %v1045_v49 = vpop.f32.mrf.mxu0 }
0x10e0   :  { %v1056_v4 = vadd.f32 %v1045_v49, %v2354_v44  ;;  %v1049_v35 = vadd.f32 %v1045_v49, %v348_v34 }
0x10e1   :  { %v1785_v62 = vpop.f32.mrf.mxu0 }
0x10e2   :  { %1058 = vrot.lane.b32.xlu1 %v1056_v4, %s1932_s4  ;;  %v1634_v37 = vmul.f32 -1.442695, %v1049_v35 }
0x10e4   :  { %1852 = vpow2.f32 %v1634_v37 }
0x10f1   :  { %v1853_v38 = vpop.eup %1852 }
0x10f2   :  { %v1053_v39 = vadd.f32 1.0, %v1853_v38 }
0x10f4   :  { %1854 = vrcp.f32 %v1053_v39 }
0x1101   :  { %v1855_v40 = vpop.eup %1854 }
0x1102   :  { %v1068_v51 = vsub.f32 1.0, %v1855_v40  ;;  %v1074_v48 = vmul.f32 %v1855_v40, %v2490_v32 }
0x1154   :  { %v1059_v41 = vpop.permute.xlu1 %1058 }
0x1155   :  { %v1061_v61 = vmul.f32 %v1855_v40, %v1059_v41  ;;  %v1181_v41 = vld [vmem:[%s2686_s2 + $0x18] sm:$0xff] }
0x1157   :  { %1063 = vrot.lane.b32.xlu0 %v1061_v61, %s1932_s4 }
0x11c9   :  { %v1064_v42 = vpop.permute.xlu0 %1063 }
0x11ca   :  { %v1066_v24 = vadd.f32 %v1064_v42, %v348_v34 }
0x11cc   :  { %1856 = vtanh.f32 %v1066_v24 }
0x11d9   :  { %v1857_v45 = vpop.eup %1856 }
0x11da   :  { %1070 = vrot.lane.b32.xlu1 %v1857_v45, %s1933_s5 }
0x11de   :  { %1193 = vrot.lane.b32.xlu1 %v2230_v1, %s1934_s9 }
0x124c   :  { %v1071_v52 = vpop.permute.xlu1 %1070 }
0x124d   :  { %v1073_v43 = vmul.f32 %v1071_v52, %v1068_v51 }
0x124f   :  { %v2504_v57 = vadd.f32 %v1074_v48, %v1073_v43 }
0x1250   :  { %v1194_v63 = vpop.permute.xlu1 %1193 }
0x1251   :  { %1077 = vrot.lane.b32.xlu0 %v2504_v57, %s1933_s5 }
0x1255   :  { %1188 = vrot.lane.b32.xlu0 %v1178_v58, %s1934_s9 }
0x12c3   :  { %v1078_v59 = vpop.permute.xlu0 %1077 }
0x12c4   :  { %1795 = vmatmul.mubr.msk.f32.vlgmr.msra.gmra.mxu1 %vm202_vm1, %v1078_v59 }
0x12c7   :  { %v1189_v1 = vpop.permute.xlu0 %1188 }
0x12c8   :  { %v1191_v60 = vadd.f32 %v1189_v1, %v2382_v28 }
0x12ca   :  { %1858 = vtanh.f32 %v1191_v60 }
0x12d7   :  { %v2514_v47 = vpop.eup %1858 }
0x12d8   :  { %v1196_v2 = vsub.f32 %v2514_v47, %v1194_v63  ;;  %v1206_v10 = vmul.f32 %v2514_v47, %v2514_v47 }
0x12da   :  { %v1197_v7 = vmul.f32 %v1196_v2, %v1196_v2 }
0x12dc   :  { %1199 = vrot.lane.b32.xlu0 %v1197_v7, %s1933_s5 }
0x12e0   :  { %1208 = vrot.lane.b32.xlu0 %v1206_v10, %s1933_s5 }
0x134e   :  { %v1200_v11 = vpop.permute.xlu0 %1199 }
0x134f   :  { %v1202_v12 = vsel %vm202_vm1, %v1200_v11, 0.0 }
0x1350   :  { %1203 = vadd.xlane.f32.xlu1 %v1202_v12 }
0x1352   :  { %v1209_v15 = vpop.permute.xlu0 %1208 }
0x1353   :  { %v1211_v28 = vsel %vm202_vm1, %v1209_v15, 0.0 }
0x1354   :  { %1212 = vadd.xlane.f32.xlu0 %v1211_v28 }
0x1361   :  { %1216 = vrot.lane.b32.xlu1 %v1179_v8, %s1934_s9 }
0x136a   :  { %1221 = vrot.lane.b32.xlu0 %v2232_v53, %s1934_s9 }
0x1384   :  { %v1147_v16 = vpop.f32.mrf.mxu1 }
0x1386   :  { %v1796_v17 = vpop.f32.mrf.mxu1 }
0x1387   :  { %v1183_v17 = vld [vmem:[%s2686_s2 + $0x28] sm:$0xff] }
0x13d9   :  { %v1204_v3 = vpop.xlane.xlu1 %1203 }
0x13dd   :  { %v1217_v18 = vpop.permute.xlu1 %1216  ;;  %v1213_v6 = vpop.xlane.xlu0 %1212 }
0x13de   :  { %v1219_v23 = vadd.f32 %v1217_v18, %v2402_v46  ;;  %v1185_v18 = vld [vmem:[%s2686_s2 + $0x38] sm:$0xff] }
0x13e0   :  { %1860 = vtanh.f32 %v1219_v23 }
0x13e1   :  { %v1222_v26 = vpop.permute.xlu0 %1221 }
0x13ed   :  { %v2530_v0 = vpop.eup %1860 }
0x13ee   :  { %v1224_v9 = vsub.f32 %v2530_v0, %v1222_v26  ;;  %v1234_v5 = vmul.f32 %v2530_v0, %v2530_v0 }
0x13f0   :  { %v1225_v14 = vmul.f32 %v1224_v9, %v1224_v9  ;;  %1236 = vrot.lane.b32.xlu0 %v1234_v5, %s1933_s5 }
0x13f2   :  { %1227 = vrot.lane.b32.xlu1 %v1225_v14, %s1933_s5 }
0x1462   :  { %v1237_v53 = vpop.permute.xlu0 %1236 }
0x1463   :  { %v1239_v27 = vsel %vm202_vm1, %v1237_v53, 0.0 }
0x1464   :  { %v1228_v56 = vpop.permute.xlu1 %1227  ;;  %1240 = vadd.xlane.f32.xlu0 %v1239_v27 }
0x1465   :  { %v1230_v46 = vsel %vm202_vm1, %v1228_v56, 0.0 }
0x1466   :  { %1231 = vadd.xlane.f32.xlu1 %v1230_v46 }
0x1477   :  { %1244 = vrot.lane.b32.xlu1 %v1180_v29, %s1934_s9 }
0x147a   :  { %1249 = vrot.lane.b32.xlu0 %v2261_v55, %s1934_s9  ;;  %v1158_v55 = vadd.f32 %v1147_v16, %v2354_v44  ;;  %v1151_v44 = vadd.f32 %v1147_v16, %v2378_v54  ;;  %v1182_v16 = vld [vmem:[%s2686_s2 + $0x20] sm:$0xff] }
0x147c   :  { %v1636_v61 = vmul.f32 -1.442695, %v1151_v44 }
0x14ed   :  { %v1241_v49 = vpop.xlane.xlu0 %1240 }
0x14ee   :  { %v1242_v24 = vadd.f32 %v1241_v49, %v1213_v6 }
0x14ef   :  { %v1232_v30 = vpop.xlane.xlu1 %1231 }
0x14f0   :  { %v1233_v51 = vadd.f32 %v1232_v30, %v1204_v3  ;;  %v1184_v3 = vld [vmem:[%s2686_s2 + $0x30] sm:$0xff] }
0x14f1   :  { %v1250_v62 = vpop.permute.xlu0 %1249 }
0x14f3   :  { %v1245_v31 = vpop.permute.xlu1 %1244 }
0x14f4   :  { %v1247_v33 = vadd.f32 %v1245_v31, %v2426_v20 }
0x14f6   :  { %1862 = vtanh.f32 %v1247_v33 }
0x14f7   :  { %1864 = vpow2.f32 %v1636_v61 }
0x1503   :  { %v2546_v4 = vpop.eup %1862 }
0x1504   :  { %v1262_v34 = vmul.f32 %v2546_v4, %v2546_v4  ;;  %v1252_v35 = vsub.f32 %v2546_v4, %v1250_v62  ;;  %v1865_v58 = vpop.eup %1864 }
0x1505   :  { %v1155_v60 = vadd.f32 1.0, %v1865_v58 }
0x1506   :  { %1264 = vrot.lane.b32.xlu0 %v1262_v34, %s1933_s5  ;;  %v1253_v37 = vmul.f32 %v1252_v35, %v1252_v35 }
0x1508   :  { %1255 = vrot.lane.b32.xlu1 %v1253_v37, %s1933_s5 }
0x150c   :  { %1160 = vrot.lane.b32.xlu1 %v1158_v55, %s1932_s4 }
0x1578   :  { %v1265_v20 = vpop.permute.xlu0 %1264 }
0x1579   :  { %v1267_v38 = vsel %vm202_vm1, %v1265_v20, 0.0 }
0x157a   :  { %v1256_v39 = vpop.permute.xlu1 %1255  ;;  %1268 = vadd.xlane.f32.xlu0 %v1267_v38 }
0x157b   :  { %v1258_v40 = vsel %vm202_vm1, %v1256_v39, 0.0 }
0x157c   :  { %1259 = vadd.xlane.f32.xlu1 %v1258_v40 }
0x157e   :  { %v1161_v42 = vpop.permute.xlu1 %1160 }
0x158d   :  { %1272 = vrot.lane.b32.xlu1 %v1181_v41, %s1934_s9 }
0x1590   :  { %1277 = vrot.lane.b32.xlu0 %v2267_v19, %s1934_s9 }
0x1603   :  { %v1269_v45 = vpop.xlane.xlu0 %1268 }
0x1604   :  { %v1270_v52 = vadd.f32 %v1269_v45, %v1242_v24 }
0x1605   :  { %v1260_v48 = vpop.xlane.xlu1 %1259 }
0x1606   :  { %v1261_v43 = vadd.f32 %v1260_v48, %v1233_v51 }
0x1607   :  { %v1278_v19 = vpop.permute.xlu0 %1277 }
0x1609   :  { %v1273_v59 = vpop.permute.xlu1 %1272 }
0x160a   :  { %v1275_v1 = vadd.f32 %v1273_v59, %v2448_v22 }
0x160c   :  { %1866 = vtanh.f32 %v1275_v1 }
0x160d   :  { %1868 = vrcp.f32 %v1155_v60 }
0x1619   :  { %v2565_v63 = vpop.eup %1866 }
0x161a   :  { %v1290_v2 = vmul.f32 %v2565_v63, %v2565_v63  ;;  %v1280_v7 = vsub.f32 %v2565_v63, %v1278_v19  ;;  %v1869_v11 = vpop.eup %1868 }
0x161b   :  { %v1163_v12 = vmul.f32 %v1869_v11, %v1161_v42  ;;  %v1170_v20 = vsub.f32 1.0, %v1869_v11  ;;  %v1176_v40 = vmul.f32 %v1869_v11, %v2504_v57 }
0x161c   :  { %1292 = vrot.lane.b32.xlu0 %v1290_v2, %s1933_s5  ;;  %v1281_v10 = vmul.f32 %v1280_v7, %v1280_v7 }
0x161e   :  { %1283 = vrot.lane.b32.xlu1 %v1281_v10, %s1933_s5 }
0x1620   :  { %1165 = vrot.lane.b32.xlu0 %v1163_v12, %s1932_s4 }
0x168e   :  { %v1293_v22 = vpop.permute.xlu0 %1292 }
0x168f   :  { %v1295_v15 = vsel %vm202_vm1, %v1293_v22, 0.0 }
0x1690   :  { %v1284_v28 = vpop.permute.xlu1 %1283  ;;  %1296 = vadd.xlane.f32.xlu0 %v1295_v15 }
0x1691   :  { %v1286_v8 = vsel %vm202_vm1, %v1284_v28, 0.0 }
0x1692   :  { %1287 = vadd.xlane.f32.xlu1 %v1286_v8 }
0x16a3   :  { %1300 = vrot.lane.b32.xlu1 %v1182_v16, %s1934_s9 }
0x16a6   :  { %1305 = vrot.lane.b32.xlu0 %v2284_v21, %s1934_s9  ;;  %v1166_v21 = vpop.permute.xlu0 %1165 }
0x16a7   :  { %v1168_v53 = vadd.f32 %v1166_v21, %v2378_v54 }
0x16aa   :  { %1328 = vrot.lane.b32.xlu0 %v1183_v17, %s1934_s9 }
0x16ae   :  { %1356 = vrot.lane.b32.xlu0 %v1184_v3, %s1934_s9 }
0x16b2   :  { %1384 = vrot.lane.b32.xlu0 %v1185_v18, %s1934_s9 }
0x16b6   :  { %1333 = vrot.lane.b32.xlu0 %v2311_v36, %s1934_s9 }
0x16ba   :  { %1361 = vrot.lane.b32.xlu0 %v2327_v50, %s1934_s9 }
0x16be   :  { %1389 = vrot.lane.b32.xlu0 %v2343_v25, %s1934_s9 }
0x1719   :  { %v1297_v23 = vpop.xlane.xlu0 %1296 }
0x171a   :  { %v1298_v6 = vadd.f32 %v1297_v23, %v1270_v52 }
0x171b   :  { %v1288_v26 = vpop.xlane.xlu1 %1287 }
0x171c   :  { %v1289_v9 = vadd.f32 %v1288_v26, %v1261_v43 }
0x171d   :  { %v1306_v36 = vpop.permute.xlu0 %1305 }
0x171f   :  { %v1301_v5 = vpop.permute.xlu1 %1300 }
0x1720   :  { %v1303_v14 = vadd.f32 %v1301_v5, %v2469_v13 }
0x1721   :  { %v1329_v13 = vpop.permute.xlu0 %1328 }
0x1722   :  { %1870 = vtanh.f32 %v1303_v14  ;;  %v1331_v33 = vadd.f32 %v1329_v13, %v2490_v32  ;;  %v1186_v13 = vld [vmem:[%s2691_s7] sm:$0xff] }
0x1723   :  { %1872 = vtanh.f32 %v1168_v53 }
0x1724   :  { %1874 = vtanh.f32 %v1331_v33 }
0x1725   :  { %v1357_v29 = vpop.permute.xlu0 %1356 }
0x1726   :  { %v1359_v35 = vadd.f32 %v1357_v29, %v2504_v57 }
0x1728   :  { %1876 = vtanh.f32 %v1359_v35 }
0x1729   :  { %v1385_v54 = vpop.permute.xlu0 %1384 }
0x172d   :  { %v1334_v30 = vpop.permute.xlu0 %1333 }
0x172f   :  { %v2601_v27 = vpop.eup %1870 }
0x1730   :  { %v1318_v50 = vmul.f32 %v2601_v27, %v2601_v27  ;;  %v1308_v25 = vsub.f32 %v2601_v27, %v1306_v36  ;;  %v1873_v46 = vpop.eup %1872 }
0x1731   :  { %v1362_v31 = vpop.permute.xlu0 %1361  ;;  %v1875_v32 = vpop.eup %1874 }
0x1732   :  { %1320 = vrot.lane.b32.xlu0 %v1318_v50, %s1933_s5  ;;  %v1309_v56 = vmul.f32 %v1308_v25, %v1308_v25  ;;  %v1336_v61 = vsub.f32 %v1875_v32, %v1334_v30  ;;  %v1346_v51 = vmul.f32 %v1875_v32, %v1875_v32 }
0x1734   :  { %1311 = vrot.lane.b32.xlu1 %v1309_v56, %s1933_s5  ;;  %v1337_v24 = vmul.f32 %v1336_v61, %v1336_v61 }
0x1735   :  { %v1390_v49 = vpop.permute.xlu0 %1389  ;;  %v1877_v42 = vpop.eup %1876 }
0x1736   :  { %v1364_v45 = vsub.f32 %v1877_v42, %v1362_v31  ;;  %v1374_v48 = vmul.f32 %v1877_v42, %v1877_v42 }
0x1738   :  { %1172 = vrot.lane.b32.xlu1 %v1873_v46, %s1933_s5  ;;  %v1365_v52 = vmul.f32 %v1364_v45, %v1364_v45 }
0x17a4   :  { %v1321_v62 = vpop.permute.xlu0 %1320 }
0x17a5   :  { %v1323_v34 = vsel %vm202_vm1, %v1321_v62, 0.0 }
0x17a6   :  { %v1312_v37 = vpop.permute.xlu1 %1311  ;;  %1324 = vadd.xlane.f32.xlu0 %v1323_v34 }
0x17a7   :  { %v1314_v55 = vsel %vm202_vm1, %v1312_v37, 0.0 }
0x17a8   :  { %1315 = vadd.xlane.f32.xlu1 %v1314_v55 }
0x17aa   :  { %v1173_v38 = vpop.permute.xlu1 %1172 }
0x17ab   :  { %v1175_v39 = vmul.f32 %v1173_v38, %v1170_v20 }
0x17ad   :  { %v1177_v41 = vadd.f32 %v1176_v40, %v1175_v39 }
0x17af   :  { %v1387_v44 = vadd.f32 %v1385_v54, %v1177_v41 }
0x17b1   :  { %1878 = vtanh.f32 %v1387_v44 }
0x17b9   :  { %1339 = vrot.lane.b32.xlu1 %v1337_v24, %s1933_s5 }
0x17bc   :  { %1348 = vrot.lane.b32.xlu0 %v1346_v51, %s1933_s5 }
0x17be   :  { %v1879_v43 = vpop.eup %1878 }
0x17bf   :  { %v1402_v57 = vmul.f32 %v1879_v43, %v1879_v43  ;;  %v1392_v15 = vsub.f32 %v1879_v43, %v1390_v49 }
0x17c0   :  { %1367 = vrot.lane.b32.xlu0 %v1365_v52, %s1933_s5 }
0x17c1   :  { %v1393_v28 = vmul.f32 %v1392_v15, %v1392_v15 }
0x17c4   :  { %1376 = vrot.lane.b32.xlu0 %v1374_v48, %s1933_s5 }
0x17c8   :  { %1404 = vrot.lane.b32.xlu0 %v1402_v57, %s1933_s5 }
0x182f   :  { %v1325_v58 = vpop.xlane.xlu0 %1324 }
0x1830   :  { %v1326_v59 = vadd.f32 %v1325_v58, %v1298_v6 }
0x1831   :  { %v1316_v1 = vpop.xlane.xlu1 %1315 }
0x1832   :  { %v1317_v60 = vadd.f32 %v1316_v1, %v1289_v9 }
0x1833   :  { %v1349_v19 = vpop.permute.xlu0 %1348 }
0x1834   :  { %v1351_v2 = vsel %vm202_vm1, %v1349_v19, 0.0 }
0x1835   :  { %v1340_v7 = vpop.permute.xlu1 %1339  ;;  %1352 = vadd.xlane.f32.xlu0 %v1351_v2 }
0x1836   :  { %v1342_v10 = vsel %vm202_vm1, %v1340_v7, 0.0 }
0x1837   :  { %1343 = vadd.xlane.f32.xlu1 %v1342_v10  ;;  %v1368_v11 = vpop.permute.xlu0 %1367 }
0x1838   :  { %v1370_v8 = vsel %vm202_vm1, %v1368_v11, 0.0 }
0x183b   :  { %v1377_v12 = vpop.permute.xlu0 %1376 }
0x183c   :  { %v1379_v22 = vsel %vm202_vm1, %v1377_v12, 0.0 }
0x183d   :  { %1380 = vadd.xlane.f32.xlu0 %v1379_v22 }
0x183f   :  { %v1405_v16 = vpop.permute.xlu0 %1404 }
0x1840   :  { %v1407_v17 = vsel %vm202_vm1, %v1405_v16, 0.0 }
0x1848   :  { %1395 = vrot.lane.b32.xlu1 %v1393_v28, %s1933_s5 }
0x1853   :  { %1419 = vrot.lane.b32.xlu0 %v2514_v47, %s1933_s5 }
0x1857   :  { %1425 = vrot.lane.b32.xlu0 %v2565_v63, %s1933_s5 }
0x185b   :  { %1429 = vrot.lane.b32.xlu0 %v1875_v32, %s1933_s5 }
0x186c   :  { %1371 = vadd.xlane.f32.xlu1 %v1370_v8 }
0x187a   :  { %1408 = vadd.xlane.f32.xlu0 %v1407_v17 }
0x187d   :  { %1421 = vrot.lane.b32.xlu1 %v2530_v0, %s1933_s5 }
0x1881   :  { %1423 = vrot.lane.b32.xlu1 %v2546_v4, %s1933_s5 }
0x1885   :  { %1427 = vrot.lane.b32.xlu1 %v2601_v27, %s1933_s5 }
0x1889   :  { %1431 = vrot.lane.b32.xlu1 %v1877_v42, %s1933_s5 }
0x18be   :  { %v1353_v3 = vpop.xlane.xlu0 %1352 }
0x18bf   :  { %v1354_v50 = vadd.f32 %v1353_v3, %v1326_v59 }
0x18c0   :  { %v1344_v47 = vpop.xlane.xlu1 %1343 }
0x18c1   :  { %v1345_v63 = vadd.f32 %v1344_v47, %v1317_v60 }
0x18c4   :  { %v1396_v18 = vpop.permute.xlu1 %1395 }
0x18c5   :  { %v1398_v21 = vsel %vm202_vm1, %v1396_v18, 0.0 }
0x18c6   :  { %1399 = vadd.xlane.f32.xlu0 %v1398_v21  ;;  %v1381_v23 = vpop.xlane.xlu0 %1380 }
0x18c7   :  { %v1382_v46 = vadd.f32 %v1381_v23, %v1354_v50 }
0x18ca   :  { %v1420_v6 = vpop.permute.xlu0 %1419 }
0x18cb   :  { %1443 = vst.msk [vmem:[#allocation2] sm:$0xff] %vm202_vm1, %v1420_v6 }
0x18ce   :  { %v1426_v0 = vpop.permute.xlu0 %1425 }
0x18cf   :  { %1446 = vst.msk [vmem:[#allocation2 + $0x18] sm:$0xff] %vm202_vm1, %v1426_v0 }
0x18d2   :  { %v1517_v4 = vld [vmem:[#allocation2] sm:$0xff]  ;;  %v1430_v26 = vpop.permute.xlu0 %1429 }
0x18d3   :  { %1518 = vst [vmem:[%s2692_s8] sm:$0xff] %v1517_v4  ;;  %1448 = vst.msk [vmem:[#allocation2 + $0x28] sm:$0xff] %vm202_vm1, %v1430_v26 }
0x18d6   :  { %v1523_v9 = vld [vmem:[#allocation2 + $0x18] sm:$0xff] }
0x18d7   :  { %1524 = vst [vmem:[%s2692_s8 + $0x18] sm:$0xff] %v1523_v9 }
0x18da   :  { %v1527_v5 = vld [vmem:[#allocation2 + $0x28] sm:$0xff] }
0x18db   :  { %1528 = vst [vmem:[%s2692_s8 + $0x28] sm:$0xff] %v1527_v5 }
0x18dc   :  { %1433 = vrot.lane.b32.xlu0 %v1879_v43, %s1933_s5 }
0x18f5   :  { %v1372_v14 = vpop.xlane.xlu1 %1371 }
0x18f6   :  { %v1373_v53 = vadd.f32 %v1372_v14, %v1345_v63 }
0x18f9   :  { %v1422_v27 = vpop.permute.xlu1 %1421 }
0x18fa   :  { %1444 = vst.msk [vmem:[#allocation2 + $0x8] sm:$0xff] %vm202_vm1, %v1422_v27 }
0x18fd   :  { %v1424_v36 = vpop.permute.xlu1 %1423 }
0x18fe   :  { %1445 = vst.msk [vmem:[#allocation2 + $0x10] sm:$0xff] %vm202_vm1, %v1424_v36 }
0x1901   :  { %v1519_v25 = vld [vmem:[#allocation2 + $0x8] sm:$0xff]  ;;  %v1428_v56 = vpop.permute.xlu1 %1427 }
0x1902   :  { %1520 = vst [vmem:[%s2692_s8 + $0x8] sm:$0xff] %v1519_v25  ;;  %1447 = vst.msk [vmem:[#allocation2 + $0x20] sm:$0xff] %vm202_vm1, %v1428_v56 }
0x1903   :  { %v1409_v29 = vpop.xlane.xlu0 %1408 }
0x1904   :  { %v1410_v54 = vadd.f32 %v1409_v29, %v1382_v46 }
0x1905   :  { %v1521_v30 = vld [vmem:[#allocation2 + $0x10] sm:$0xff]  ;;  %v1432_v31 = vpop.permute.xlu1 %1431 }
0x1906   :  { %1522 = vst [vmem:[%s2692_s8 + $0x10] sm:$0xff] %v1521_v30  ;;  %v1462_v33 = vmul.f32 %v1410_v54, %v1186_v13  ;;  %1449 = vst.msk [vmem:[#allocation2 + $0x30] sm:$0xff] %vm202_vm1, %v1432_v31 }
0x1908   :  { %v1463_v49 = vsel %vm1452_vm2, %v1462_v33, 0.0 }
0x1909   :  { %v1525_v62 = vld [vmem:[#allocation2 + $0x20] sm:$0xff]  ;;  %v1464_v34 = vrot.slane %v1463_v49, 4 }
0x190a   :  { %1526 = vst [vmem:[%s2692_s8 + $0x20] sm:$0xff] %v1525_v62 }
0x190b   :  { %v1465_v35 = vadd.f32 %v1464_v34, %v1463_v49 }
0x190d   :  { %v1466_v37 = vrot.slane %v1465_v35, 2  ;;  %v1529_v55 = vld [vmem:[#allocation2 + $0x30] sm:$0xff] }
0x190e   :  { %1530 = vst [vmem:[%s2692_s8 + $0x30] sm:$0xff] %v1529_v55 }
0x190f   :  { %v1467_v20 = vadd.f32 %v1466_v37, %v1465_v35 }
0x1911   :  { %v1468_v38 = vrot.slane %v1467_v20, 1 }
0x1913   :  { %v1469_v39 = vadd.f32 %v1468_v38, %v1467_v20 }
0x1915   :  { %1470 = vst.msk [vmem:[#allocation5] sm:$0x1] %vm1460_vm3, %v1469_v39 }
0x1916   :  { %1891 = shalt.err (!%p1888_p4)
}
0x1917   :  { %1555 = dma.vmem_to_hbm [thread:$0]  %s1553_s1, 16, %s2695_s11, [#allocation6]  }
0x1918   :  { %s1936_s4 = smov [#allocation3]  }
0x1919   :  { %s1542_s29 = sshll.u32 %s1936_s4, 4  ;;  %s1543_s29 = int_to_ptr.vmem [resolvable:$true] %s1542_s29 }
0x191a   :  { %s1900_s11 = scalar_lea.vmem %s1543_s29, 16  ;;  %s1904_s30 = scalar_lea.vmem %s1543_s29, 32 }
0x191b   :  { %p1901_p5 = scmp.ne.s32.totalorder %s1543_s29, %s1900_s11  ;;  %p1905_p6 = scmp.lt.s32.totalorder %s1543_s29, %s1543_s29 }
0x191c   :  { %p1906_p7 = scmp.lt.s32.totalorder %s1904_s30, %s1900_s11 }
0x191e   :  { %p1907_p8 = por %p1906_p7, %p1905_p6 }
0x1920   :  { %p1908_p9 = pnand %p1907_p8, %p1901_p5 }
0x194f   :  { %v1400_v40 = vpop.xlane.xlu0 %1399 }
0x1950   :  { %v1401_v41 = vadd.f32 %v1400_v40, %v1373_v53 }
0x1952   :  { %v1451_v32 = vmul.f32 %v1401_v41, %v1186_v13 }
0x1953   :  { %v1434_v44 = vpop.permute.xlu0 %1433 }
0x1954   :  { %v1453_v61 = vsel %vm1452_vm2, %v1451_v32, 0.0  ;;  %1450 = vst.msk [vmem:[#allocation2 + $0x38] sm:$0xff] %vm202_vm1, %v1434_v44 }
0x1955   :  { %v1454_v42 = vrot.slane %v1453_v61, 4 }
0x1957   :  { %v1455_v24 = vadd.f32 %v1454_v42, %v1453_v61 }
0x1959   :  { %v1456_v45 = vrot.slane %v1455_v24, 2 }
0x195b   :  { %v1531_v51 = vld [vmem:[#allocation2 + $0x38] sm:$0xff]  ;;  %v1457_v52 = vadd.f32 %v1456_v45, %v1455_v24 }
0x195c   :  { %1532 = vst [vmem:[%s2692_s8 + $0x38] sm:$0xff] %v1531_v51 }
0x195d   :  { %v1458_v48 = vrot.slane %v1457_v52, 1 }
0x195f   :  { %v1459_v43 = vadd.f32 %v1458_v48, %v1457_v52 }
0x1961   :  { %1461 = vst.msk [vmem:[#allocation3] sm:$0x1] %vm1460_vm3, %v1459_v43 }
0x1962   :  { %1911 = shalt.err (!%p1908_p9)
}
0x1963   :  { %1545 = dma.vmem_to_hbm [thread:$0]  %s1543_s29, 16, %s2694_s10, [#allocation4]  }
0x1964   :  { %1920 = dma.done.wait [#allocation4], 16  }
0x1965   :  { %1921 = vsyncadd [#allocation4], 4294967280 }
0x1966   :  { %1922 = dma.done.wait [#allocation6], 16  }
0x1967   :  { %1923 = vsyncadd [#allocation6], 4294967280 }
0x1968   :  { %1566 = vsyncpa [#allocation4], 1 }
0x1969   :  { %1567 = vsyncpa [#allocation6], 1 }

// kernel: custom-call.39
= control target key start
LH: loop header
LB: loop body
LE: loop exit
PB: predicated region body
PF: predicated region fallthrough
CT: control target
= control target key end

     0   :  { %5 = vsyncpa [#allocation3], 0  ;;  %s869_s0 = inlined_call_operand.vmem [shape: f32[8,7,7], index: 0, kind: input, shape index: {}]   ;;  %s870_s1 = inlined_call_operand.vmem [shape: f32[8,7,7], index: 1, kind: output, shape index: {0}]   ;;  %s871_s2 = inlined_call_operand.hbm [shape: s32[8,7], index: 2, kind: output, shape index: {1}]   ;;  %s872_s3 = inlined_call_operand.vmem [shape: s32[8,7], index: 3, kind: output, shape index: {2}]  }
   0x1   :  { %7 = vsyncpa [#allocation3 + $0x1], 0  ;;  %s697_s12 = smov 0   ;;  %s699_s13 = smov 0  }
   0x2   :  { %s701_s14 = smov 0   ;;  %s703_s15 = smov 0  }
   0x3 LB: > { %s718_s16 = sadd.s32 4294967295, %s669_s15   ;;  %s534_s17 = sadd.s32 4294967294, %s669_s15   ;;  %s669_s15 = sphi %s703_s15, %s878_s15   ;;  %s665_s14 = sphi %s701_s14, %s877_s14   ;;  %s661_s13 = sphi %s699_s13, %s876_s13   ;;  %s657_s12 = sphi %s697_s12, %s875_s12  }
   0x4   : > { %s722_s18 = sadd.s32 1, %s669_s15   ;;  %s17_s19 = sshrl.u32 %s669_s15, 3 }
   0x5   : > { %s18_s20 = sshrl.u32 %s722_s18, 3  ;;  %s22_s21 = sadd.s32 1, %s665_s14 }
   0x6   : > { %s19_s22 = ssub.s32 %s17_s19, %s18_s20  ;;  %p32_p0 = scmp.ne.s32.totalorder %s665_s14, %s661_s13 }
   0x7   : > { %p20_p1 = scmp.eq.s32.totalorder %s19_s22, 0  ;;  %p33_p2 = scmp.eq.s32.totalorder %s718_s16, 7 }
   0x8   : > { %p38_p3 = scmp.ne.s32.totalorder %s661_s13, %s657_s12  ;;  %p39_p4 = scmp.eq.s32.totalorder %s534_s17, 7 }
   0x9   : > { %s733_s23 = scalar_select %p20_p1, %s665_s14, %s22_s21  }
   0xa   : > { %p735_p5 = por %p33_p2, %p32_p0  ;;  %p739_p6 = por %p39_p4, %p38_p3 }
   0xb   : > { %p536_p7 = scmp.ge.s32.totalorder %s669_s15, 8 }
   0xc   : > { %s85_s26 = sand.u32 (!%p536_p7), 1, %s669_s15   ;;  %s538_s27 = sshll.u32 (!%p536_p7), %s669_s15, 3 }
   0xd   : > { %83 = sbr.rel (%p536_p7) target bundleno = 20 (0x14), region = 16  ;;  %s537_s28 = sshll.u32 (!%p536_p7), %s85_s26, 3 }
   0xe   : > { %s89_s4 = scalar_lea.vmem (!%p536_p7), %s869_s0, %s538_s27  ;;  %s87_s5 = scalar_lea.vmem (!%p536_p7), [#allocation0], %s537_s28 }
  0x12   : > { %v118_v0 = vld [vmem:[%s89_s4] sm:$0xff] }
  0x13   : > { %119 = vst [vmem:[%s87_s5] sm:$0xff] %v118_v0 }
  0x14 PF: > { %p539_p8 = scmp.ge.s32.totalorder %s669_s15, 1  ;;  %p124_p9 = scmp.lt.s32.totalorder %s669_s15, 9 }
  0x16   : > { %p125_p10 = pnand %p539_p8, %p124_p9 }
  0x18   : > { %128 = sbr.rel (%p125_p10) target bundleno = 430 (0x1ae), region = 54 }
  0x1d   : > { %s131_s6 = sand.u32 1, %s718_s16   ;;  %s146_s7 = sand.u32 1, %s661_s13   ;;  %v164_v1 = vlaneseq  ;;  %v675_v4 = vmov 0  }
  0x1e   : > { %s540_s8 = sshll.u32 %s131_s6, 3  ;;  %s755_s9 = sshll.u32 %s146_s7, 3 }
  0x1f   : > { %v758_v2 = vshrl.u32 %v164_v1, 7  ;;  %s133_s10 = scalar_lea.vmem [#allocation0], %s540_s8  ;;  %s760_s11 = scalar_lea.vmem [#allocation1], %s540_s8 }
  0x20   : > { %v157_v3 = vld [vmem:[%s133_s10] sm:$0xff]  ;;  %s159_s17 = sand.u32 7, %s718_s16   ;;  %s148_s19 = scalar_lea.vmem [#allocation2], %s755_s9 }
  0x21   : > { %158 = vst [vmem:[%s760_s11] sm:$0xff] %v157_v3  ;;  %168 = vst [vmem:[#allocation5] sm:$0xff] %v758_v2  ;;  %s768_s20 = scalar_lea.vmem %s148_s19, %s159_s17 [#allocation2]  ;;  %s154_s21 = scalar_lea.vmem [#allocation4], %s755_s9 }
  0x22   : > { %s773_s22 = scalar_lea.vmem %s154_s21, %s159_s17 [#allocation4]  ;;  %163 = vst [vmem:[%s768_s20] sm:$0x1] %v675_v4  ;;  %s776_s26 = smov 0  }
  0x23 LB: >> { %vm184_vm0 = vcmp.lt.s32.totalorder %v758_v2, 7  ;;  %v784_v7 = vstv %s673_s26  ;;  %s225_s27 = ssub.s32 128, %s673_s26  ;;  %v231_v37 = vand.u32 127, %v164_v1  ;;  %s237_s28 = scalar_lea.vmem %s760_s11, %s673_s26 [#allocation1]  ;;  %s673_s26 = sphi %s776_s26, %s174_s26  }
  0x24   : >> { %vm183_vm1 = vcmp.ge.s32.totalorder %v758_v2, %v784_v7  ;;  %s243_s30 = scalar_lea.vmem [#allocation5], %s673_s26  ;;  %vm263_vm15 = vcmp.gt.s32.totalorder %v758_v2, %v784_v7  ;;  %s174_s26 = sadd.s32 1, %s673_s26  }
  0x25   : >> { %vm185_vm3 = vmand %vm183_vm1, %vm184_vm0  ;;  %vm255_vm12 = vcmp.gt.s32.totalorder %v231_v37, %v784_v7  ;;  %vm232_vm13 = vcmp.eq.s32.totalorder %v231_v37, %v784_v7  ;;  %p171_p11 = scmp.ge.s32.totalorder %s174_s26, 7  }
  0x26   : >> { %vm267_vm1 = vmand %vm263_vm15, %vm232_vm13  ;;  %s548_s6 = sshll.u32 (%p171_p11), %s718_s16, 3 }
  0x27   : > { %s337_s17 = scalar_lea.vmem (%p171_p11), %s870_s1, %s548_s6 }
  0x28   : >> { %v179_v5 = vld [vmem:[%s760_s11] sm:$0xff]  ;;  %v239_v40 = vld [vmem:[%s237_s28] ss:$0 sm:$0xff] }
  0x29   : >> { %v180_v6 = vand.u32 2147483647, %v179_v5  ;;  %v234_v39 = vld [vmem:[%s768_s20] ss:$0 sm:$0xff] }
  0x2a   : >> { %v245_v41 = vld [vmem:[%s243_s30] ss:$0 sm:$0xff] }
  0x2b   : >> { %vm544_vm2 = vcmp.gt.f32.partialorder %v180_v6, -inf }
  0x2c   : >> { %vm187_vm4 = vmand %vm185_vm3, %vm544_vm2 }
  0x2d   : >> { %v188_v8 = vsel %vm187_vm4, %v758_v2, %v784_v7  ;;  %v189_v9 = vsel %vm187_vm4, %v180_v6, -inf }
  0x2e   : >> { %v190_v10 = vrot.slane %v189_v9, 1  ;;  %v191_v11 = vrot.slane %v188_v8, 1 }
  0x30   : >> { %vm192_vm5 = vcmp.ge.f32.partialorder %v190_v10, %v189_v9  ;;  %v195_v12 = vrot.slane %v190_v10, 1  ;;  %v196_v13 = vrot.slane %v191_v11, 1 }
  0x31   : >> { %v193_v14 = vsel %vm192_vm5, %v190_v10, %v189_v9  ;;  %v194_v15 = vsel %vm192_vm5, %v191_v11, %v188_v8 }
  0x32   : >> { %vm197_vm6 = vcmp.ge.f32.partialorder %v195_v12, %v193_v14  ;;  %v200_v16 = vrot.slane %v195_v12, 1  ;;  %v201_v17 = vrot.slane %v196_v13, 1 }
  0x33   : >> { %v198_v18 = vsel %vm197_vm6, %v195_v12, %v193_v14  ;;  %v199_v19 = vsel %vm197_vm6, %v196_v13, %v194_v15 }
  0x34   : >> { %vm202_vm7 = vcmp.ge.f32.partialorder %v200_v16, %v198_v18  ;;  %v205_v20 = vrot.slane %v200_v16, 1  ;;  %v206_v21 = vrot.slane %v201_v17, 1 }
  0x35   : >> { %v203_v22 = vsel %vm202_vm7, %v200_v16, %v198_v18  ;;  %v204_v23 = vsel %vm202_vm7, %v201_v17, %v199_v19 }
  0x36   : >> { %vm207_vm8 = vcmp.ge.f32.partialorder %v205_v20, %v203_v22  ;;  %v210_v24 = vrot.slane %v205_v20, 1  ;;  %v211_v25 = vrot.slane %v206_v21, 1 }
  0x37   : >> { %v208_v26 = vsel %vm207_vm8, %v205_v20, %v203_v22  ;;  %v209_v27 = vsel %vm207_vm8, %v206_v21, %v204_v23 }
  0x38   : >> { %vm212_vm9 = vcmp.ge.f32.partialorder %v210_v24, %v208_v26  ;;  %v215_v28 = vrot.slane %v210_v24, 1  ;;  %v216_v29 = vrot.slane %v211_v25, 1 }
  0x39   : >> { %v213_v30 = vsel %vm212_vm9, %v210_v24, %v208_v26  ;;  %v214_v31 = vsel %vm212_vm9, %v211_v25, %v209_v27 }
  0x3a   : >> { %vm217_vm10 = vcmp.ge.f32.partialorder %v215_v28, %v213_v30  ;;  %v220_v32 = vrot.slane %v215_v28, 1  ;;  %v221_v33 = vrot.slane %v216_v29, 1 }
  0x3b   : >> { %v218_v34 = vsel %vm217_vm10, %v215_v28, %v213_v30  ;;  %v219_v35 = vsel %vm217_vm10, %v216_v29, %v214_v31 }
  0x3c   : >> { %vm222_vm11 = vcmp.ge.f32.partialorder %v220_v32, %v218_v34 }
  0x3d   : >> { %v224_v36 = vsel %vm222_vm11, %v221_v33, %v219_v35 }
  0x3e   : >> { %226 = vrot.lane.b32.xlu0 %v224_v36, %s225_s27  ;;  %s374_s27 = sshrl.u32 (%p171_p11), %s718_s16, 3 }
  0x3f   : > { %s549_s26 = sshll.u32 (%p171_p11), %s374_s27, 7 }
  0xb0   : >> { %v227_v38 = vpop.permute.xlu0 %226 }
  0xb1   : >> { %553 = vpush %v227_v38 }
  0xe2   : >> { %s554_s29 = spop %553 }
  0xe3   : >> { %v233_v42 = vstv %s554_s29  ;;  %s238_s4 = scalar_lea.vmem %s760_s11, %s554_s29 [#allocation1]  ;;  %s244_s5 = scalar_lea.vmem [#allocation5], %s554_s29 }
  0xe4   : >> { %v240_v43 = vld [vmem:[%s238_s4] ss:$0 sm:$0xff]  ;;  %v235_v45 = vsel %vm232_vm13, %v233_v42, %v234_v39 }
  0xe5   : >> { %v246_v44 = vld [vmem:[%s244_s5] ss:$0 sm:$0xff]  ;;  %241 = vst [vmem:[%s238_s4] sm:$0x1] %v239_v40  ;;  %vm249_vm14 = vcmp.ne.f32.partialorder %v240_v43, 0.0  ;;  %236 = vst [vmem:[%s768_s20] sm:$0x1] %v235_v45  ;;  %v256_v52 = vsel %vm255_vm12, %v240_v43, 0.0 }
  0xe6   : >> { %247 = vst [vmem:[%s244_s5] sm:$0x1] %v245_v41  ;;  %242 = vst [vmem:[%s237_s28] sm:$0x1] %v240_v43  ;;  %s381_s20 = sshll.u32 (%p171_p11), %s148_s19, 4  ;;  %s328_s4 = scalar_lea.sflag (%p171_p11), [#allocation3], %s146_s7  ;;  %s382_s20 = int_to_ptr.vmem [resolvable:$true] %s381_s20 }
  0xe7   : >> { %248 = vst [vmem:[%s243_s30] sm:$0x1] %v246_v44  ;;  %vm250_vm0 = vmand %vm232_vm13, %vm249_vm14  ;;  %s379_s30 = scalar_lea.hbm (%p171_p11), %s871_s2, %s549_s26  ;;  %s605_s5 = scalar_lea.vmem (%p171_p11), %s382_s20, 128 }
  0xe8   : >> { %v251_v46 = vsel %vm250_vm0, %v240_v43, 1.0  ;;  %p606_p12 = scmp.ne.s32.totalorder (%p171_p11), %s382_s20, %s605_s5 }
  0xe9   : >> { %v264_v47 = vsel %vm263_vm15, %v251_v46, 1.0 }
  0xea   : >> { %603 = vrcp.f32 %v264_v47  ;;  %p607_p13 = pnand (%p171_p11), %p606_p12, %p735_p5 }
  0xec   : > { %p608_p0 = pneg (%p171_p11), %p607_p13 }
  0xed   : >> { %v260_v49 = vld [vmem:[%s760_s11] sm:$0xff] }
  0xee   : > { %v274_v56 = vld [vmem:[#allocation5] sm:$0xff] (%p171_p11) }
  0xf7   : >> { %v604_v48 = vpop.eup %603 }
  0xf8   : >> { %v266_v50 = vmul.f32 %v604_v48, %v260_v49 }
  0xfa   : >> { %v268_v51 = vsel %vm267_vm1, %v266_v50, 0.0 }
  0xfb   : >> { %269 = vadd.xlane.f32.xlu0 %v268_v51 }
 0x128   : > { %290 = vxpose.xlu0.b32.start.end [1/1] (short) (narrow) (%p171_p11), %v274_v56, 8 }
 0x184   : >> { %v270_v53 = vpop.xlane.xlu0 %269 }
 0x185   : >> { %v271_v54 = vmul.f32 %v270_v53, %v256_v52  ;;  %173 = sbr.rel (!%p171_p11) target bundleno = 35 (0x23), region = 214 }
 0x187   : >> { %v272_v55 = vsub.f32 %v266_v50, %v271_v54 }
 0x189   : >> { %273 = vst [vmem:[%s760_s11] sm:$0xff] %v272_v55 }
 0x190   : > { %v366_v57 = vld [vmem:[%s760_s11] sm:$0xff]  ;;  %s676_s11 = smov [#allocation2]  }
 0x191   : > { %367 = vst [vmem:[%s337_s17] sm:$0xff] %v366_v57  ;;  %s609_s6 = sshll.u32 %s676_s11, 4  ;;  %s610_s6 = int_to_ptr.vmem [resolvable:$false] %s609_s6 }
 0x192   : > { %s611_s8 = scalar_lea.vmem %s610_s6, 256  ;;  %p612_p1 = scmp.lt.s32.totalorder %s382_s20, %s610_s6 }
 0x193   : > { %p613_p2 = scmp.lt.s32.totalorder %s611_s8, %s605_s5 }
 0x195   : > { %p614_p3 = por %p613_p2, %p612_p1 }
 0x197   : > { %p615_p4 = pnand %p614_p3, %p608_p0 }
 0x199   : > { %618 = shalt.err (!%p615_p4)
}
 0x19a   : > { %s619_s19 = scalar_lea.hbm %s379_s30, 128  ;;  %s623_s17 = scalar_lea.hbm %s871_s2, 128 }
 0x19b   : > { %p620_p7 = scmp.ne.s32.totalorder %s379_s30, %s619_s19  ;;  %p624_p10 = scmp.lt.s32.totalorder %s379_s30, %s871_s2 }
 0x19c   : > { %p625_p11 = scmp.lt.s32.totalorder %s623_s17, %s619_s19 }
 0x19d   : > { %p621_p8 = pnand %p620_p7, %p735_p5 }
 0x19e   : > { %p626_p12 = por %p625_p11, %p624_p10 }
 0x19f   : > { %p622_p9 = pneg %p621_p8 }
 0x1a1   : > { %p627_p13 = pnand %p626_p12, %p622_p9 }
 0x1a3   : > { %630 = shalt.err (!%p627_p13)
}
 0x1a4   : > { %555 = dma.vmem_to_hbm [thread:$0]  (%p735_p5), %s382_s20, 128, %s379_s30, %s328_s4   ;;  %v306_v58 = vpop.trf.xlu0 }
 0x1a5   : > { %322 = vst [vmem:[%s773_s22] sm:$0x1] %v306_v58  ;;  %387 = sbr.rel (!%p735_p5) target bundleno = 430 (0x1ae), region = 104  ;;  %s550_s29 = sshll.u32 (%p735_p5), %s374_s27, 3 }
 0x1a6   : > { %s390_s6 = scalar_lea.vmem (%p735_p5), %s872_s3, %s550_s29 }
 0x1ac   : > { %v419_v59 = vld [vmem:[%s154_s21] sm:$0xff] }
 0x1ad   : > { %420 = vst [vmem:[%s390_s6] sm:$0xff] %v419_v59 }
 0x1ae PF: > { %p561_p0 = scmp.ge.s32.totalorder %s669_s15, 2  ;;  %s436_s22 = sand.u32 1, %s657_s12  }
 0x1af   : > { %s437_s16 = scalar_lea.sflag [#allocation3], %s436_s22 }
 0x1b0   : > { %p558_p5 = pnand %p561_p0, %p739_p6 }
 0x1b2   : > { %p559_p1 = pneg %p558_p5 }
 0x1b4   : > { %652 = dma.done.wait (%p559_p1), %s437_s16, 128  }
 0x1b5   : > { %654 = vsyncadd (%p559_p1), %s437_s16, 4294967168  ;;  %p10_p2 = scmp.ge.s32.totalorder %s722_s18, 10   ;;  %s875_s12 = smov %s661_s13 }
 0x1b6   : > { %s876_s13 = smov %s665_s14  ;;  %s877_s14 = smov %s733_s23 }
 0x1b7   : > { %s878_s15 = smov %s722_s18  ;;  %12 = sbr.rel (!%p10_p2) target bundleno = 3 (0x3), region = 225 }
 0x1bc   :  { %449 = vsyncpa [#allocation3], 1 }
 0x1bd   :  { %451 = vsyncpa [#allocation3 + $0x1], 1 }

// kernel: custom-call.41
= control target key start
LH: loop header
LB: loop body
LE: loop exit
PB: predicated region body
PF: predicated region fallthrough
CT: control target
= control target key end

     0   :  { %s377_s6 = smov 0   ;;  %s379_s7 = smov 0   ;;  %s430_s0 = inlined_call_operand.vmem [shape: f32[8,1,7,7], index: 0, kind: input, shape index: {}]   ;;  %s431_s1 = inlined_call_operand.vmem [shape: f32[8,1,7,7], index: 1, kind: output, shape index: {}]  }
   0x1   :  { %s381_s8 = smov 0  }
   0x2 LB: > { %s303_s9 = sadd.s32 4294967295, %s364_s8   ;;  %s33_s10 = sadd.s32 1, %s360_s7  ;;  %s364_s8 = sphi %s381_s8, %s7_s8   ;;  %s360_s7 = sphi %s379_s7, %s433_s7   ;;  %s356_s6 = sphi %s377_s6, %s432_s6  }
   0x3   : > { %p35_p0 = scmp.ge.s32.totalorder %s33_s10, 8  ;;  %p305_p1 = scmp.ge.s32.totalorder %s364_s8, 8 }
   0x4   : > { %s49_s11 = sand.u32 (!%p305_p1), 1, %s364_s8   ;;  %s307_s12 = sshll.u32 (!%p305_p1), %s360_s7, 3 }
   0x5   : > { %s435_s10 = smov (%p35_p0, %s33_s10), 0  ;;  %47 = sbr.rel (%p305_p1) target bundleno = 12 (0xc), region = 16 }
   0x6   : > { %s306_s13 = sshll.u32 (!%p305_p1), %s49_s11, 3  ;;  %s56_s16 = scalar_lea.vmem (!%p305_p1), %s430_s0, %s307_s12 }
   0x7   : > { %s51_s17 = scalar_lea.vmem (!%p305_p1), [#allocation0], %s306_s13 }
   0xa   : > { %v85_v0 = vld [vmem:[%s56_s16] sm:$0xff] }
   0xb   : > { %86 = vst [vmem:[%s51_s17] sm:$0xff] %v85_v0 }
   0xc PF: > { %p308_p2 = scmp.ge.s32.totalorder %s364_s8, 1  ;;  %p91_p3 = scmp.lt.s32.totalorder %s364_s8, 9 }
   0xe   : > { %p92_p4 = pnand %p308_p2, %p91_p3 }
  0x10   : > { %95 = sbr.rel (%p92_p4) target bundleno = 1041 (0x411), region = 54 }
  0x15   : > { %s98_s18 = sand.u32 1, %s303_s9   ;;  %v109_v1 = vlaneseq  ;;  %v366_v10 = vmov -1.0   ;;  %s312_s21 = sshll.u32 %s356_s6, 3 }
  0x16   : > { %s309_s19 = sshll.u32 %s98_s18, 3  ;;  %s210_s24 = scalar_lea.vmem %s431_s1, %s312_s21 }
  0x17   : > { %v404_v2 = vand.u32 127, %v109_v1  ;;  %v113_v3 = vshrl.u32 %v109_v1, 7  ;;  %s100_s20 = scalar_lea.vmem [#allocation0], %s309_s19 }
  0x18   : > { %v116_v4 = vld [vmem:[%s100_s20] sm:$0xff] }
  0x19   : > { %vm111_vm0 = vcmp.lt.s32.totalorder %v404_v2, 7  ;;  %vm115_vm1 = vcmp.eq.s32.totalorder %v113_v3, %v404_v2  ;;  %vm120_vm2 = vcmp.ge.s32.totalorder %v113_v3, %v404_v2  ;;  %vm134_vm4 = vcmp.eq.s32.totalorder %v404_v2, 0 }
  0x1a   : > { %v117_v5 = vsel %vm115_vm1, %v116_v4, 0.0  ;;  %vm121_vm3 = vmand %vm120_vm2, %vm111_vm0  ;;  %vm131_vm5 = vcmp.eq.s32.totalorder %v404_v2, %v113_v3  ;;  %v135_v11 = vsel %vm134_vm4, 1.0, %v366_v10  ;;  %vm142_vm6 = vcmp.eq.s32.totalorder %v404_v2, 1 }
  0x1b   : > { %v122_v6 = vsel %vm121_vm3, %v116_v4, 0.0  ;;  %118 = vadd.xlane.f32.xlu0 %v117_v5  ;;  %v136_v12 = vsel %vm131_vm5, %v135_v11, 0.0  ;;  %vm152_vm7 = vcmp.eq.s32.totalorder %v404_v2, 2  ;;  %vm162_vm8 = vcmp.eq.s32.totalorder %v404_v2, 3 }
  0x1c   : > { %vm172_vm9 = vcmp.eq.s32.totalorder %v404_v2, 4  ;;  %vm182_vm10 = vcmp.eq.s32.totalorder %v404_v2, 5  ;;  %vm192_vm11 = vcmp.eq.s32.totalorder %v404_v2, 6 }
  0xa4   : > { %v119_v7 = vpop.xlane.xlu0 %118 }
  0xa5   : > { %340 = vrcp.f32 %v119_v7  ;;  %vm199_vm12 = vweird.f32 %v119_v7 }
  0xb2   : > { %v341_v8 = vpop.eup %340 }
  0xb3   : > { %v124_v9 = vmul.f32 %v341_v8, %v122_v6 }
  0xb5   : > { %125 = vst [vmem:[#allocation2] sm:$0xff] %v124_v9 }
  0xbc   : > { %v138_v13 = vld [vmem:[#allocation2 + $0x1] ss:$0 sm:$0xff]  ;;  %v148_v16 = vld [vmem:[#allocation2 + $0x2] ss:$0 sm:$0xff]  ;;  %v158_v21 = vld [vmem:[#allocation2 + $0x3] ss:$0 sm:$0xff] }
  0xbd   : > { %v139_v14 = vxor.u32 2147483648, %v138_v13  ;;  %v149_v18 = vxor.u32 2147483648, %v148_v16  ;;  %v159_v23 = vxor.u32 2147483648, %v158_v21  ;;  %v168_v26 = vld [vmem:[#allocation2 + $0x4] ss:$0 sm:$0xff] }
  0xbe   : > { %v169_v28 = vxor.u32 2147483648, %v168_v26  ;;  %v178_v31 = vld [vmem:[#allocation2 + $0x5] ss:$0 sm:$0xff]  ;;  %v188_v36 = vld [vmem:[#allocation2 + $0x6] ss:$0 sm:$0xff] }
  0xbf   : > { %v143_v15 = vmul.f32 %v139_v14, %v136_v12  ;;  %v179_v33 = vxor.u32 2147483648, %v178_v31  ;;  %v189_v38 = vxor.u32 2147483648, %v188_v36 }
  0xc1   : > { %144 = vadd.xlane.f32.xlu0 %v143_v15 }
 0x14a   : > { %v145_v17 = vpop.xlane.xlu0 %144 }
 0x14b   : > { %v146_v19 = vsel %vm142_vm6, %v145_v17, %v136_v12 }
 0x14c   : > { %v153_v20 = vmul.f32 %v149_v18, %v146_v19 }
 0x14e   : > { %154 = vadd.xlane.f32.xlu1 %v153_v20 }
 0x1d7   : > { %v155_v22 = vpop.xlane.xlu1 %154 }
 0x1d8   : > { %v156_v24 = vsel %vm152_vm7, %v155_v22, %v146_v19 }
 0x1d9   : > { %v163_v25 = vmul.f32 %v159_v23, %v156_v24 }
 0x1db   : > { %164 = vadd.xlane.f32.xlu1 %v163_v25 }
 0x264   : > { %v165_v27 = vpop.xlane.xlu1 %164 }
 0x265   : > { %v166_v29 = vsel %vm162_vm8, %v165_v27, %v156_v24 }
 0x266   : > { %v173_v30 = vmul.f32 %v169_v28, %v166_v29 }
 0x268   : > { %174 = vadd.xlane.f32.xlu0 %v173_v30 }
 0x2f1   : > { %v175_v32 = vpop.xlane.xlu0 %174 }
 0x2f2   : > { %v176_v34 = vsel %vm172_vm9, %v175_v32, %v166_v29 }
 0x2f3   : > { %v183_v35 = vmul.f32 %v179_v33, %v176_v34 }
 0x2f5   : > { %184 = vadd.xlane.f32.xlu1 %v183_v35 }
 0x37e   : > { %v185_v37 = vpop.xlane.xlu1 %184 }
 0x37f   : > { %v186_v39 = vsel %vm182_vm10, %v185_v37, %v176_v34 }
 0x380   : > { %v193_v40 = vmul.f32 %v189_v38, %v186_v39 }
 0x382   : > { %194 = vadd.xlane.f32.xlu0 %v193_v40 }
 0x40b   : > { %v195_v41 = vpop.xlane.xlu0 %194 }
 0x40c   : > { %v196_v42 = vsel %vm192_vm11, %v195_v41, %v186_v39 }
 0x40d   : > { %v198_v43 = vmul.f32 %v341_v8, %v196_v42 }
 0x40f   : > { %v200_v44 = vsel %vm199_vm12, %v196_v42, %v198_v43 }
 0x410   : > { %240 = vst [vmem:[%s210_s24] sm:$0xff] %v200_v44 }
 0x411 PF: > { %s7_s8 = sadd.s32 1, %s364_s8   ;;  %s432_s6 = smov %s360_s7 }
 0x412   : > { %p4_p5 = scmp.ge.s32.totalorder %s7_s8, 10   ;;  %s433_s7 = smov %s435_s10 }
 0x414   :  { %6 = sbr.rel (!%p4_p5) target bundleno = 2 (0x2), region = 124 }

// kernel: custom-call.40
= control target key start
LH: loop header
LB: loop body
LE: loop exit
PB: predicated region body
PF: predicated region fallthrough
CT: control target
= control target key end

     0   :  { %s376_s6 = smov 0   ;;  %s378_s7 = smov 0   ;;  %s429_s0 = inlined_call_operand.vmem [shape: f32[8,1,7,7], index: 0, kind: input, shape index: {}]   ;;  %s430_s1 = inlined_call_operand.vmem [shape: f32[8,1,7,7], index: 1, kind: output, shape index: {}]  }
   0x1   :  { %s380_s8 = smov 0  }
   0x2 LB: > { %s302_s9 = sadd.s32 4294967295, %s363_s8   ;;  %s33_s10 = sadd.s32 1, %s359_s7  ;;  %s363_s8 = sphi %s380_s8, %s7_s8   ;;  %s359_s7 = sphi %s378_s7, %s432_s7   ;;  %s355_s6 = sphi %s376_s6, %s431_s6  }
   0x3   : > { %p35_p0 = scmp.ge.s32.totalorder %s33_s10, 8  ;;  %p304_p1 = scmp.ge.s32.totalorder %s363_s8, 8 }
   0x4   : > { %s49_s11 = sand.u32 (!%p304_p1), 1, %s363_s8   ;;  %s306_s12 = sshll.u32 (!%p304_p1), %s359_s7, 3 }
   0x5   : > { %s434_s10 = smov (%p35_p0, %s33_s10), 0  ;;  %47 = sbr.rel (%p304_p1) target bundleno = 12 (0xc), region = 16 }
   0x6   : > { %s305_s13 = sshll.u32 (!%p304_p1), %s49_s11, 3  ;;  %s56_s16 = scalar_lea.vmem (!%p304_p1), %s429_s0, %s306_s12 }
   0x7   : > { %s51_s17 = scalar_lea.vmem (!%p304_p1), [#allocation0], %s305_s13 }
   0xa   : > { %v85_v0 = vld [vmem:[%s56_s16] sm:$0xff] }
   0xb   : > { %86 = vst [vmem:[%s51_s17] sm:$0xff] %v85_v0 }
   0xc PF: > { %p307_p2 = scmp.ge.s32.totalorder %s363_s8, 1  ;;  %p91_p3 = scmp.lt.s32.totalorder %s363_s8, 9 }
   0xe   : > { %p92_p4 = pnand %p307_p2, %p91_p3 }
  0x10   : > { %95 = sbr.rel (%p92_p4) target bundleno = 1041 (0x411), region = 54 }
  0x15   : > { %s98_s18 = sand.u32 1, %s302_s9   ;;  %v109_v1 = vlaneseq  ;;  %v365_v10 = vmov -1.0   ;;  %s311_s21 = sshll.u32 %s355_s6, 3 }
  0x16   : > { %s308_s19 = sshll.u32 %s98_s18, 3  ;;  %s209_s24 = scalar_lea.vmem %s430_s1, %s311_s21 }
  0x17   : > { %v403_v2 = vand.u32 127, %v109_v1  ;;  %v113_v3 = vshrl.u32 %v109_v1, 7  ;;  %s100_s20 = scalar_lea.vmem [#allocation0], %s308_s19 }
  0x18   : > { %v116_v4 = vld [vmem:[%s100_s20] sm:$0xff] }
  0x19   : > { %vm111_vm0 = vcmp.lt.s32.totalorder %v403_v2, 7  ;;  %vm115_vm1 = vcmp.eq.s32.totalorder %v113_v3, %v403_v2  ;;  %vm120_vm2 = vcmp.le.s32.totalorder %v113_v3, %v403_v2  ;;  %vm134_vm4 = vcmp.eq.s32.totalorder %v403_v2, 6 }
  0x1a   : > { %v117_v5 = vsel %vm115_vm1, %v116_v4, 0.0  ;;  %vm121_vm3 = vmand %vm120_vm2, %vm111_vm0  ;;  %vm131_vm5 = vcmp.eq.s32.totalorder %v403_v2, %v113_v3  ;;  %v135_v11 = vsel %vm134_vm4, 1.0, %v365_v10  ;;  %vm142_vm6 = vcmp.eq.s32.totalorder %v403_v2, 5 }
  0x1b   : > { %v122_v6 = vsel %vm121_vm3, %v116_v4, 0.0  ;;  %118 = vadd.xlane.f32.xlu0 %v117_v5  ;;  %v136_v12 = vsel %vm131_vm5, %v135_v11, 0.0  ;;  %vm152_vm7 = vcmp.eq.s32.totalorder %v403_v2, 4  ;;  %vm162_vm8 = vcmp.eq.s32.totalorder %v403_v2, 3 }
  0x1c   : > { %vm172_vm9 = vcmp.eq.s32.totalorder %v403_v2, 2  ;;  %vm182_vm10 = vcmp.eq.s32.totalorder %v403_v2, 1  ;;  %vm191_vm11 = vcmp.eq.s32.totalorder %v403_v2, 0 }
  0xa4   : > { %v119_v7 = vpop.xlane.xlu0 %118 }
  0xa5   : > { %339 = vrcp.f32 %v119_v7  ;;  %vm198_vm12 = vweird.f32 %v119_v7 }
  0xb2   : > { %v340_v8 = vpop.eup %339 }
  0xb3   : > { %v124_v9 = vmul.f32 %v340_v8, %v122_v6 }
  0xb5   : > { %125 = vst [vmem:[#allocation2] sm:$0xff] %v124_v9 }
  0xbc   : > { %v138_v13 = vld [vmem:[#allocation2 + $0x5] ss:$0 sm:$0xff]  ;;  %v148_v16 = vld [vmem:[#allocation2 + $0x4] ss:$0 sm:$0xff]  ;;  %v158_v21 = vld [vmem:[#allocation2 + $0x3] ss:$0 sm:$0xff] }
  0xbd   : > { %v139_v14 = vxor.u32 2147483648, %v138_v13  ;;  %v149_v18 = vxor.u32 2147483648, %v148_v16  ;;  %v159_v23 = vxor.u32 2147483648, %v158_v21  ;;  %v168_v26 = vld [vmem:[#allocation2 + $0x2] ss:$0 sm:$0xff] }
  0xbe   : > { %v169_v28 = vxor.u32 2147483648, %v168_v26  ;;  %v178_v31 = vld [vmem:[#allocation2 + $0x1] ss:$0 sm:$0xff]  ;;  %v187_v36 = vld [vmem:[#allocation2] ss:$0 sm:$0xff] }
  0xbf   : > { %v143_v15 = vmul.f32 %v139_v14, %v136_v12  ;;  %v179_v33 = vxor.u32 2147483648, %v178_v31  ;;  %v188_v38 = vxor.u32 2147483648, %v187_v36 }
  0xc1   : > { %144 = vadd.xlane.f32.xlu0 %v143_v15 }
 0x14a   : > { %v145_v17 = vpop.xlane.xlu0 %144 }
 0x14b   : > { %v146_v19 = vsel %vm142_vm6, %v145_v17, %v136_v12 }
 0x14c   : > { %v153_v20 = vmul.f32 %v149_v18, %v146_v19 }
 0x14e   : > { %154 = vadd.xlane.f32.xlu1 %v153_v20 }
 0x1d7   : > { %v155_v22 = vpop.xlane.xlu1 %154 }
 0x1d8   : > { %v156_v24 = vsel %vm152_vm7, %v155_v22, %v146_v19 }
 0x1d9   : > { %v163_v25 = vmul.f32 %v159_v23, %v156_v24 }
 0x1db   : > { %164 = vadd.xlane.f32.xlu1 %v163_v25 }
 0x264   : > { %v165_v27 = vpop.xlane.xlu1 %164 }
 0x265   : > { %v166_v29 = vsel %vm162_vm8, %v165_v27, %v156_v24 }
 0x266   : > { %v173_v30 = vmul.f32 %v169_v28, %v166_v29 }
 0x268   : > { %174 = vadd.xlane.f32.xlu0 %v173_v30 }
 0x2f1   : > { %v175_v32 = vpop.xlane.xlu0 %174 }
 0x2f2   : > { %v176_v34 = vsel %vm172_vm9, %v175_v32, %v166_v29 }
 0x2f3   : > { %v183_v35 = vmul.f32 %v179_v33, %v176_v34 }
 0x2f5   : > { %184 = vadd.xlane.f32.xlu1 %v183_v35 }
 0x37e   : > { %v185_v37 = vpop.xlane.xlu1 %184 }
 0x37f   : > { %v186_v39 = vsel %vm182_vm10, %v185_v37, %v176_v34 }
 0x380   : > { %v192_v40 = vmul.f32 %v188_v38, %v186_v39 }
 0x382   : > { %193 = vadd.xlane.f32.xlu0 %v192_v40 }
 0x40b   : > { %v194_v41 = vpop.xlane.xlu0 %193 }
 0x40c   : > { %v195_v42 = vsel %vm191_vm11, %v194_v41, %v186_v39 }
 0x40d   : > { %v197_v43 = vmul.f32 %v340_v8, %v195_v42 }
 0x40f   : > { %v199_v44 = vsel %vm198_vm12, %v195_v42, %v197_v43 }
 0x410   : > { %239 = vst [vmem:[%s209_s24] sm:$0xff] %v199_v44 }
 0x411 PF: > { %s7_s8 = sadd.s32 1, %s363_s8   ;;  %s431_s6 = smov %s359_s7 }
 0x412   : > { %p4_p5 = scmp.ge.s32.totalorder %s7_s8, 10   ;;  %s432_s7 = smov %s434_s10 }
 0x414   :  { %6 = sbr.rel (!%p4_p5) target bundleno = 2 (0x2), region = 123 }

// kernel: body.8
= control target key start
LH: loop header
LB: loop body
LE: loop exit
PB: predicated region body
PF: predicated region fallthrough
CT: control target
= control target key end

     0   :  { %17 = vsyncpa [#allocation3], 0  ;;  %v1859_v1 = vmov 0   ;;  %v1860_v2 = vmov 2   ;;  %v1861_v5 = vmov 0.0   ;;  %vm1862_vm0 = vmmov 0   ;;  %s2619_s0 = inlined_call_operand.vmem [shape: f32[8,6], index: 0, kind: input, shape index: {}]   ;;  %s2620_s1 = inlined_call_operand.vmem [shape: f32[6,64,32], index: 1, kind: input, shape index: {}]   ;;  %s2621_s2 = inlined_call_operand.vmem [shape: f32[64,32], index: 2, kind: input, shape index: {}]   ;;  %s2622_s3 = inlined_call_operand.vmem [shape: f32[32,96], index: 3, kind: input, shape index: {}]   ;;  %s2623_s4 = inlined_call_operand.vmem [shape: f32[32,96], index: 4, kind: input, shape index: {}]   ;;  %s2624_s5 = inlined_call_operand.vmem [shape: f32[1,96], index: 5, kind: input, shape index: {}]   ;;  %s2625_s6 = inlined_call_operand.vmem [shape: f32[1,32], index: 6, kind: input, shape index: {}]   ;;  %s2626_s7 = inlined_call_operand.vmem [shape: f32[8,1], index: 7, kind: input, shape index: {}]   ;;  %s2627_s8 = inlined_call_operand.vmem [shape: f32[64,32], index: 8, kind: output, shape index: {0}]   ;;  %s2628_s9 = inlined_call_operand.vmem [shape: f32[64,32], index: 9, kind: output, shape index: {1}]   ;;  %s2629_s10 = inlined_call_operand.hbm [shape: f32[1,1], index: 10, kind: output, shape index: {2}]   ;;  %s2630_s11 = inlined_call_operand.hbm [shape: f32[1,1], index: 11, kind: output, shape index: {3}]  }
   0x1   :  { %v35_v0 = vld [vmem:[%s2619_s0] sm:$0xff]  ;;  %1745 = vset.pattern.permute.xlu0 %v1859_v1  ;;  %1747 = vset.pattern.permute.xlu1 %v1860_v2  ;;  %v1938_v3 = vld [vmem:[%s2623_s4 + $0x18] sm:$0xff]  ;;  %v1951_v6 = vld [vmem:[%s2623_s4 + $0x10] sm:$0xff]  ;;  %v1863_v7 = vmov 1   ;;  %v1864_v8 = vmov 3   ;;  %v1865_v12 = vmov 4  }
   0x2   :  { %46 = vperm.xlu0 %1745, %v35_v0   ;;  %96 = vperm.xlu1 %1747, %v35_v0   ;;  %v214_v4 = vld [vmem:[%s2622_s3 + $0x18] sm:$0xff]  ;;  %v1956_v9 = vld [vmem:[%s2623_s4 + $0x8] sm:$0xff]  ;;  %v213_v10 = vld [vmem:[%s2622_s3 + $0x10] sm:$0xff]  ;;  %v1866_v13 = vmov 5  }
   0x3   :  { %1644 = vmatprep.subr.mxu1 %v1861_v5  ;;  %1652 = vmatprep.mubr.msk.f32.mxu1 %vm1862_vm0, %v1861_v5  ;;  %v212_v11 = vld [vmem:[%s2622_s3 + $0x8] sm:$0xff]  ;;  %v1970_v14 = vld [vmem:[%s2623_s4] sm:$0xff]  ;;  %s1867_s4 = smov 64  }
   0x4   :  { %1645 = vmatpush3.msra.mxu1 %v1938_v3  ;;  %1624 = vmatprep.subr.mxu0 %v214_v4  ;;  %v211_v15 = vld [vmem:[%s2622_s3] sm:$0xff] }
   0x5   :  { %1646 = vmatprep.subr.mxu1 %v1861_v5  ;;  %1625 = vmatpush3.msra.mxu0 %v214_v4  ;;  %v1557_v16 = vld [vmem:[%s2625_s6] ss:$0 sm:$0xff] }
   0x6   :  { %1746 = vset.pattern.permute.xlu0 %v1863_v7  ;;  %1748 = vset.pattern.permute.xlu1 %v1864_v8 }
   0x7   :  { %67 = vperm.xlu0 %1746, %v35_v0   ;;  %125 = vperm.xlu1 %1748, %v35_v0  }
   0x8   :  { %1647 = vmatpush3.msra.mxu1 %v1951_v6  ;;  %1626 = vmatprep.subr.mxu0 %v213_v10 }
   0x9   :  { %1648 = vmatprep.subr.mxu1 %v1861_v5  ;;  %1627 = vmatpush3.msra.mxu0 %v213_v10 }
   0xa   :  { %1649 = vmatpush3.msra.mxu1 %v1956_v9  ;;  %1628 = vmatprep.subr.mxu0 %v212_v11 }
   0xb   :  { %1749 = vset.pattern.permute.xlu1 %v1865_v12  ;;  %1750 = vset.pattern.permute.xlu0 %v1866_v13 }
   0xc   :  { %154 = vperm.xlu1 %1749, %v35_v0   ;;  %183 = vperm.xlu0 %1750, %v35_v0  }
   0xd   :  { %1650 = vmatprep.subr.mxu1 %v1861_v5  ;;  %1629 = vmatpush3.msra.mxu0 %v212_v11 }
   0xe   :  { %1651 = vmatpush3.msra.mxu1 %v1970_v14  ;;  %1630 = vmatprep.subr.mxu0 %v211_v15 }
   0xf   :  { %1653 = vmatmul.mubr.f32.vlgmr.msra.gmra.mxu1 %v1861_v5  ;;  %1631 = vmatpush3.msra.mxu0 %v211_v15 }
  0x10   :  { %441 = vrot.lane.b32.xlu1 %v1557_v16, %s1867_s4  ;;  %1655 = vmatprep.subr.mxu1 %v1861_v5 }
  0x11   :  { %1656 = vmatpush3.msra.mxu1 %v1938_v3  ;;  %1663 = vmatprep.mubr.msk.f32.mxu1 %vm1862_vm0, %v1861_v5 }
  0x12   :  { %1657 = vmatprep.subr.mxu1 %v1861_v5  ;;  %1666 = vmatprep.subr.mxu0 %v1861_v5 }
  0x13   :  { %18 = vsyncpa [#allocation5], 0  ;;  %1658 = vmatpush3.msra.mxu1 %v1951_v6  ;;  %v36_v17 = vld [vmem:[%s2620_s1] sm:$0xff]  ;;  %v37_v19 = vld [vmem:[%s2620_s1 + $0x8] sm:$0xff]  ;;  %vm202_vm1 = vcmask 261120   ;;  %vm1452_vm2 = vcmask 7168  }
  0x14   :  { %1659 = vmatprep.subr.mxu1 %v1861_v5  ;;  %v1515_v18 = vld [vmem:[%s2620_s1 + $0x80] sm:$0xff]  ;;  %v1516_v20 = vld [vmem:[%s2620_s1 + $0x88] sm:$0xff]  ;;  %v38_v23 = vld [vmem:[%s2620_s1 + $0x10] sm:$0xff]  ;;  %s1870_s0 = smov [#allocation4]   ;;  %vm1460_vm3 = vcmask 0  }
  0x15   :  { %1660 = vmatpush3.msra.mxu1 %v1956_v9  ;;  %v1517_v24 = vld [vmem:[%s2620_s1 + $0x90] sm:$0xff]  ;;  %v39_v25 = vld [vmem:[%s2620_s1 + $0x18] sm:$0xff]  ;;  %v1507_v26 = vld [vmem:[%s2620_s1 + $0x40] sm:$0xff]  ;;  %s1491_s23 = sshll.u32 %s1870_s0, 4  ;;  %s1492_s23 = int_to_ptr.vmem [resolvable:$true] %s1491_s23 }
  0x16   :  { %1661 = vmatprep.subr.mxu1 %v1861_v5  ;;  %v1523_v27 = vld [vmem:[%s2620_s1 + $0xc0] sm:$0xff]  ;;  %v1518_v28 = vld [vmem:[%s2620_s1 + $0x98] sm:$0xff]  ;;  %v41_v32 = vld [vmem:[%s2620_s1 + $0x28] sm:$0xff]  ;;  %s1819_s24 = scalar_lea.vmem %s1492_s23, 32  ;;  %p1820_p1 = scmp.lt.s32.totalorder %s1492_s23, %s1492_s23 }
  0x17   :  { %1662 = vmatpush3.msra.mxu1 %v1970_v14  ;;  %v40_v29 = vld [vmem:[%s2620_s1 + $0x20] sm:$0xff]  ;;  %v1520_v33 = vld [vmem:[%s2620_s1 + $0xa8] sm:$0xff]  ;;  %v42_v34 = vld [vmem:[%s2620_s1 + $0x30] sm:$0xff] }
  0x18   :  { %1677 = vmatprep.subr.mxu1 %v1861_v5  ;;  %v1519_v30 = vld [vmem:[%s2620_s1 + $0xa0] sm:$0xff]  ;;  %v1508_v37 = vld [vmem:[%s2620_s1 + $0x48] sm:$0xff]  ;;  %v1521_v41 = vld [vmem:[%s2620_s1 + $0xb0] sm:$0xff] }
  0x19   :  { %v1524_v39 = vld [vmem:[%s2620_s1 + $0xc8] sm:$0xff]  ;;  %v1509_v42 = vld [vmem:[%s2620_s1 + $0x50] sm:$0xff]  ;;  %v1510_v46 = vld [vmem:[%s2620_s1 + $0x58] sm:$0xff] }
  0x1a   :  { %v1525_v44 = vld [vmem:[%s2620_s1 + $0xd0] sm:$0xff]  ;;  %v1526_v51 = vld [vmem:[%s2620_s1 + $0xd8] sm:$0xff]  ;;  %v1511_v52 = vld [vmem:[%s2620_s1 + $0x60] sm:$0xff] }
  0x1b   :  { %v1527_v60 = vld [vmem:[%s2620_s1 + $0xe0] sm:$0xff]  ;;  %v1512_v61 = vld [vmem:[%s2620_s1 + $0x68] sm:$0xff]  ;;  %v1513_v7 = vld [vmem:[%s2620_s1 + $0x70] sm:$0xff] }
  0x1c   :  { %v1531_v63 = vld [vmem:[%s2620_s1 + $0x100] sm:$0xff]  ;;  %v1532_v12 = vld [vmem:[%s2620_s1 + $0x108] sm:$0xff] }
  0x1d   :  { %v1539_v10 = vld [vmem:[%s2620_s1 + $0x140] sm:$0xff]  ;;  %v1540_v13 = vld [vmem:[%s2620_s1 + $0x148] sm:$0xff] }
  0x7d   :  { %v2006_v21 = vpop.permute.xlu0 %46  ;;  %v2008_v22 = vpop.permute.xlu1 %96 }
  0x7e   :  { %v49_v31 = vmul.f32 %v2006_v21, %v36_v17  ;;  %v99_v35 = vmul.f32 %v1515_v18, %v2008_v22  ;;  %v50_v36 = vmul.f32 %v2006_v21, %v37_v19  ;;  %v100_v38 = vmul.f32 %v1516_v20, %v2008_v22  ;;  %v1533_v18 = vld [vmem:[%s2620_s1 + $0x110] sm:$0xff] }
  0x7f   :  { %v51_v40 = vmul.f32 %v2006_v21, %v38_v23  ;;  %v101_v43 = vmul.f32 %v1517_v24, %v2008_v22  ;;  %v52_v45 = vmul.f32 %v2006_v21, %v39_v25  ;;  %v102_v47 = vmul.f32 %v1518_v28, %v2008_v22  ;;  %v1541_v28 = vld [vmem:[%s2620_s1 + $0x150] sm:$0xff] }
  0x80   :  { %v53_v48 = vmul.f32 %v2006_v21, %v40_v29  ;;  %v103_v53 = vmul.f32 %v1519_v30, %v2008_v22  ;;  %v54_v54 = vmul.f32 %v2006_v21, %v41_v32  ;;  %v2083_v55 = vmul.f32 %v1520_v33, %v2008_v22  ;;  %v1534_v29 = vld [vmem:[%s2620_s1 + $0x118] sm:$0xff] }
  0x81   :  { %v2086_v56 = vmul.f32 %v2006_v21, %v42_v34  ;;  %v2098_v62 = vmul.f32 %v1521_v41, %v2008_v22  ;;  %v1542_v30 = vld [vmem:[%s2620_s1 + $0x158] sm:$0xff]  ;;  %v1535_v41 = vld [vmem:[%s2620_s1 + $0x120] sm:$0xff] }
  0x82   :  { %v2070_v49 = vpop.permute.xlu0 %67  ;;  %v2072_v50 = vpop.permute.xlu1 %125 }
  0x83   :  { %v70_v57 = vmul.f32 %v1507_v26, %v2070_v49  ;;  %v128_v58 = vmul.f32 %v1523_v27, %v2072_v50  ;;  %v71_v59 = vmul.f32 %v1508_v37, %v2070_v49  ;;  %v129_v0 = vmul.f32 %v1524_v39, %v2072_v50 }
  0x84   :  { %v72_v1 = vmul.f32 %v1509_v42, %v2070_v49  ;;  %v130_v2 = vmul.f32 %v1525_v44, %v2072_v50  ;;  %v73_v4 = vmul.f32 %v1510_v46, %v2070_v49  ;;  %v131_v15 = vmul.f32 %v1526_v51, %v2072_v50  ;;  %v1543_v42 = vld [vmem:[%s2620_s1 + $0x160] sm:$0xff] }
  0x85   :  { %v78_v8 = vadd.f32 %v70_v57, %v49_v31  ;;  %v79_v11 = vadd.f32 %v71_v59, %v50_v36  ;;  %v74_v16 = vmul.f32 %v1511_v52, %v2070_v49  ;;  %v132_v20 = vmul.f32 %v1527_v60, %v2072_v50  ;;  %v1536_v59 = vld [vmem:[%s2620_s1 + $0x128] sm:$0xff] }
  0x86   :  { %v80_v17 = vadd.f32 %v72_v1, %v51_v40  ;;  %v81_v19 = vadd.f32 %v73_v4, %v52_v45  ;;  %v75_v23 = vmul.f32 %v1512_v61, %v2070_v49  ;;  %v76_v32 = vmul.f32 %v1513_v7, %v2070_v49  ;;  %v1544_v7 = vld [vmem:[%s2620_s1 + $0x168] sm:$0xff] }
  0x87   :  { %v2126_v24 = vpop.permute.xlu1 %154  ;;  %v2128_v25 = vpop.permute.xlu0 %183  ;;  %v107_v26 = vadd.f32 %v99_v35, %v78_v8  ;;  %v108_v27 = vadd.f32 %v100_v38, %v79_v11  ;;  %v82_v31 = vadd.f32 %v74_v16, %v53_v48  ;;  %v1529_v8 = vld [vmem:[%s2620_s1 + $0xf0] sm:$0xff] }
  0x88   :  { %v157_v33 = vmul.f32 %v1531_v63, %v2126_v24  ;;  %v186_v34 = vmul.f32 %v1539_v10, %v2128_v25  ;;  %v158_v35 = vmul.f32 %v1532_v12, %v2126_v24  ;;  %v187_v36 = vmul.f32 %v1540_v13, %v2128_v25  ;;  %v1537_v13 = vld [vmem:[%s2620_s1 + $0x130] sm:$0xff] }
  0x89   :  { %v136_v37 = vadd.f32 %v128_v58, %v107_v26  ;;  %v137_v38 = vadd.f32 %v129_v0, %v108_v27  ;;  %v109_v39 = vadd.f32 %v101_v43, %v80_v17  ;;  %v159_v40 = vmul.f32 %v1533_v18, %v2126_v24  ;;  %v1528_v58 = vld [vmem:[%s2620_s1 + $0xe8] sm:$0xff]  ;;  %v43_v0 = vld [vmem:[%s2620_s1 + $0x38] sm:$0xff]  ;;  %v1545_v27 = vld [vmem:[%s2620_s1 + $0x170] sm:$0xff] }
  0x8a   :  { %v188_v44 = vmul.f32 %v1541_v28, %v2128_v25  ;;  %v110_v45 = vadd.f32 %v102_v47, %v81_v19  ;;  %v160_v46 = vmul.f32 %v1534_v29, %v2126_v24  ;;  %v189_v48 = vmul.f32 %v1542_v30, %v2128_v25 }
  0x8b   :  { %v165_v51 = vadd.f32 %v157_v33, %v136_v37  ;;  %v166_v52 = vadd.f32 %v158_v35, %v137_v38  ;;  %v138_v43 = vadd.f32 %v130_v2, %v109_v39  ;;  %v111_v57 = vadd.f32 %v103_v53, %v82_v31  ;;  %v1530_v31 = vld [vmem:[%s2620_s1 + $0xf8] sm:$0xff] }
  0x8c   :  { %v139_v60 = vadd.f32 %v131_v15, %v110_v45  ;;  %v161_v61 = vmul.f32 %v1535_v41, %v2126_v24  ;;  %v190_v47 = vmul.f32 %v1543_v42, %v2128_v25  ;;  %v83_v63 = vadd.f32 %v75_v23, %v54_v54  ;;  %v1514_v15 = vld [vmem:[%s2620_s1 + $0x78] sm:$0xff] }
  0x8d   :  { %v2165_v1 = vadd.f32 %v186_v34, %v165_v51  ;;  %v2167_v53 = vadd.f32 %v187_v36, %v166_v52  ;;  %v167_v2 = vadd.f32 %v159_v40, %v138_v43  ;;  %v140_v4 = vadd.f32 %v132_v20, %v111_v57  ;;  %v1538_v33 = vld [vmem:[%s2620_s1 + $0x138] sm:$0xff]  ;;  %v2296_v51 = vld [vmem:[%s2624_s5] ss:$0 sm:$0xff]  ;;  %s1868_s5 = smov 96  }
  0x8e   :  { %v168_v10 = vadd.f32 %v160_v46, %v139_v60  ;;  %v112_v54 = vadd.f32 %v2083_v55, %v83_v63  ;;  %v133_v11 = vmul.f32 %v1528_v58, %v2072_v50  ;;  %v162_v12 = vmul.f32 %v1536_v59, %v2126_v24  ;;  %v1546_v38 = vld [vmem:[%s2620_s1 + $0x178] sm:$0xff] }
  0x8f   :  { %203 = vst.msk [vmem:[%s2627_s8] sm:$0xff] %vm202_vm1, %v2165_v1  ;;  %1632 = vmatprep.mubr.msk.f32.mxu0 %vm202_vm1, %v2165_v1  ;;  %204 = vst.msk [vmem:[%s2627_s8 + $0x8] sm:$0xff] %vm202_vm1, %v2167_v53  ;;  %v2196_v55 = vadd.f32 %v188_v44, %v167_v2  ;;  %v169_v16 = vadd.f32 %v161_v61, %v140_v4  ;;  %v84_v17 = vadd.f32 %v76_v32, %v2086_v56  ;;  %v1522_v56 = vld [vmem:[%s2620_s1 + $0xb8] sm:$0xff]  ;;  %v2289_v44 = vpop.permute.xlu1 %441 }
  0x90   :  { %v56_v18 = vmul.f32 %v2006_v21, %v43_v0  ;;  %1633 = vmatmul.mubr.msk.f32.vlgmr.msra.gmra.mxu0 %vm202_vm1, %v2167_v53  ;;  %v2202_v19 = vadd.f32 %v189_v48, %v168_v10  ;;  %v141_v20 = vadd.f32 %v133_v11, %v112_v54  ;;  %v191_v23 = vmul.f32 %v1544_v7, %v2128_v25 }
  0x91   :  { %v134_v26 = vmul.f32 %v1529_v8, %v2072_v50  ;;  %205 = vst.msk [vmem:[%s2627_s8 + $0x10] sm:$0xff] %vm202_vm1, %v2196_v55  ;;  %1635 = vmatprep.mubr.msk.f32.mxu0 %vm202_vm1, %v2196_v55  ;;  %v2219_v21 = vadd.f32 %v190_v47, %v169_v16  ;;  %v113_v28 = vadd.f32 %v2098_v62, %v84_v17 }
  0x92   :  { %v163_v29 = vmul.f32 %v1537_v13, %v2126_v24  ;;  %v77_v30 = vmul.f32 %v1514_v15, %v2070_v49  ;;  %206 = vst.msk [vmem:[%s2627_s8 + $0x18] sm:$0xff] %vm202_vm1, %v2202_v19  ;;  %v170_v32 = vadd.f32 %v162_v12, %v141_v20  ;;  %1667 = vmatpush3.msra.mxu0 %v1938_v3 }
  0x93   :  { %207 = vst.msk [vmem:[%s2627_s8 + $0x20] sm:$0xff] %vm202_vm1, %v2219_v21  ;;  %v142_v49 = vadd.f32 %v134_v26, %v113_v28  ;;  %v192_v62 = vmul.f32 %v1545_v27, %v2128_v25  ;;  %v106_v35 = vmul.f32 %v1522_v56, %v2008_v22  ;;  %1668 = vmatprep.subr.mxu0 %v1861_v5 }
  0x94   :  { %v85_v34 = vadd.f32 %v77_v30, %v56_v18  ;;  %1636 = vmatmul.mubr.msk.f32.gmra.mxu0 %vm202_vm1, %v2202_v19  ;;  %v2246_v36 = vadd.f32 %v191_v23, %v170_v32  ;;  %v135_v37 = vmul.f32 %v1530_v31, %v2072_v50  ;;  %v164_v22 = vmul.f32 %v1538_v33, %v2126_v24 }
  0x95   :  { %1638 = vmatprep.mubr.msk.f32.mxu0 %vm202_vm1, %v2219_v21  ;;  %v171_v39 = vadd.f32 %v163_v29, %v142_v49  ;;  %1669 = vmatpush3.msra.mxu0 %v1951_v6  ;;  %v193_v42 = vmul.f32 %v1546_v38, %v2128_v25 }
  0x96   :  { %v114_v40 = vadd.f32 %v106_v35, %v85_v34  ;;  %208 = vst.msk [vmem:[%s2627_s8 + $0x28] sm:$0xff] %vm202_vm1, %v2246_v36  ;;  %1670 = vmatprep.subr.mxu0 %v1861_v5 }
  0x97   :  { %v2262_v50 = vadd.f32 %v192_v62, %v171_v39  ;;  %1671 = vmatpush3.msra.mxu0 %v1956_v9 }
  0x98   :  { %v143_v41 = vadd.f32 %v135_v37, %v114_v40  ;;  %1639 = vmatmul.mubr.msk.f32.gmra.mxu0 %vm202_vm1, %v2246_v36  ;;  %1672 = vmatprep.subr.mxu0 %v1861_v5 }
  0x99   :  { %209 = vst.msk [vmem:[%s2627_s8 + $0x30] sm:$0xff] %vm202_vm1, %v2262_v50  ;;  %1641 = vmatprep.mubr.msk.f32.mxu0 %vm202_vm1, %v2262_v50  ;;  %1673 = vmatpush3.msra.mxu0 %v1970_v14 }
  0x9a   :  { %v172_v24 = vadd.f32 %v164_v22, %v143_v41  ;;  %1688 = vmatprep.subr.mxu0 %v1861_v5 }
  0x9c   :  { %v2278_v25 = vadd.f32 %v193_v42, %v172_v24 }
  0x9e   :  { %210 = vst.msk [vmem:[%s2627_s8 + $0x38] sm:$0xff] %vm202_vm1, %v2278_v25  ;;  %1642 = vmatmul.mubr.msk.f32.gmra.mxu0 %vm202_vm1, %v2278_v25  ;;  %s1869_s8 = smov 32  }
  0x9f   :  { %1674 = vmatprep.mubr.msk.f32.mxu0 %vm1862_vm0, %v1861_v5 }
  0xcf   :  { %v425_v45 = vpop.f32.mrf.mxu1 }
  0xd0   :  { %v444_v46 = vadd.f32 %v2289_v44, %v425_v45 }
  0xd1   :  { %v1654_v48 = vpop.f32.mrf.mxu1 }
  0xd2   :  { %446 = vrot.lane.b32.xlu1 %v444_v46, %s1867_s4 }
 0x144   :  { %v447_v13 = vpop.permute.xlu1 %446 }
 0x150   :  { %v1634_v52 = vpop.f32.mrf.mxu0 }
 0x151   :  { %v323_v43 = vadd.f32 %v1634_v52, %v2296_v51 }
 0x152   :  { %v317_v57 = vpop.f32.mrf.mxu0 }
 0x153   :  { %v318_v58 = vadd.f32 %v2296_v51, %v317_v57 }
 0x154   :  { %v1637_v59 = vpop.f32.mrf.mxu0 }
 0x155   :  { %v429_v60 = vadd.f32 %v425_v45, %v318_v58  ;;  %v2301_v61 = vadd.f32 %v1637_v59, %v2296_v51 }
 0x156   :  { %v327_v47 = vpop.f32.mrf.mxu0 }
 0x157   :  { %v1556_v63 = vmul.f32 -1.442695, %v429_v60  ;;  %v2304_v0 = vadd.f32 %v2296_v51, %v327_v47 }
 0x158   :  { %v1640_v2 = vpop.f32.mrf.mxu0 }
 0x159   :  { %1751 = vpow2.f32 %v1556_v63  ;;  %v2307_v4 = vadd.f32 %v1640_v2, %v2296_v51 }
 0x15a   :  { %v337_v7 = vpop.f32.mrf.mxu0 }
 0x15b   :  { %v2310_v8 = vadd.f32 %v2296_v51, %v337_v7 }
 0x15e   :  { %v1643_v10 = vpop.f32.mrf.mxu0 }
 0x15f   :  { %v2313_v54 = vadd.f32 %v1643_v10, %v2296_v51 }
 0x160   :  { %v2352_v52 = vpop.f32.mrf.mxu0 }
 0x166   :  { %v1752_v11 = vpop.eup %1751 }
 0x167   :  { %v433_v12 = vadd.f32 1.0, %v1752_v11 }
 0x169   :  { %1753 = vrcp.f32 %v433_v12 }
 0x176   :  { %v1754_v15 = vpop.eup %1753 }
 0x177   :  { %v449_v16 = vmul.f32 %v1754_v15, %v447_v13  ;;  %v456_v23 = vsub.f32 1.0, %v1754_v15  ;;  %v462_v27 = vmul.f32 0.0, %v1754_v15 }
 0x179   :  { %451 = vrot.lane.b32.xlu0 %v449_v16, %s1867_s4 }
 0x1eb   :  { %v452_v17 = vpop.permute.xlu0 %451 }
 0x1ec   :  { %v454_v18 = vadd.f32 %v452_v17, %v318_v58 }
 0x1ee   :  { %1755 = vtanh.f32 %v454_v18 }
 0x1fb   :  { %v1756_v20 = vpop.eup %1755 }
 0x1fc   :  { %458 = vrot.lane.b32.xlu1 %v1756_v20, %s1868_s5 }
 0x26e   :  { %v459_v26 = vpop.permute.xlu1 %458 }
 0x26f   :  { %v461_v56 = vmul.f32 %v459_v26, %v456_v23 }
 0x271   :  { %v2317_v28 = vadd.f32 %v462_v27, %v461_v56 }
 0x273   :  { %465 = vrot.lane.b32.xlu0 %v2317_v28, %s1868_s5 }
 0x2e5   :  { %v466_v29 = vpop.permute.xlu0 %465 }
 0x2e6   :  { %1664 = vmatmul.mubr.msk.f32.vlgmr.msra.gmra.mxu1 %vm202_vm1, %v466_v29 }
 0x2e7   :  { %1678 = vmatpush3.msra.mxu1 %v1938_v3  ;;  %1685 = vmatprep.mubr.msk.f32.mxu1 %vm1862_vm0, %v1861_v5 }
 0x2e8   :  { %1679 = vmatprep.subr.mxu1 %v1861_v5 }
 0x2e9   :  { %1680 = vmatpush3.msra.mxu1 %v1951_v6 }
 0x2ea   :  { %1681 = vmatprep.subr.mxu1 %v1861_v5 }
 0x2eb   :  { %1682 = vmatpush3.msra.mxu1 %v1956_v9 }
 0x2ec   :  { %1683 = vmatprep.subr.mxu1 %v1861_v5 }
 0x2ed   :  { %1684 = vmatpush3.msra.mxu1 %v1970_v14 }
 0x2ee   :  { %1699 = vmatprep.subr.mxu1 %v1861_v5 }
 0x3a6   :  { %v535_v30 = vpop.f32.mrf.mxu1 }
 0x3a7   :  { %v546_v31 = vadd.f32 %v535_v30, %v2289_v44  ;;  %v539_v33 = vadd.f32 %v535_v30, %v323_v43 }
 0x3a8   :  { %v1665_v32 = vpop.f32.mrf.mxu1 }
 0x3a9   :  { %548 = vrot.lane.b32.xlu1 %v546_v31, %s1867_s4  ;;  %v1559_v49 = vmul.f32 -1.442695, %v539_v33 }
 0x3ab   :  { %1757 = vpow2.f32 %v1559_v49 }
 0x3b8   :  { %v1758_v62 = vpop.eup %1757 }
 0x3b9   :  { %v543_v34 = vadd.f32 1.0, %v1758_v62 }
 0x3bb   :  { %1759 = vrcp.f32 %v543_v34 }
 0x3c8   :  { %v1760_v35 = vpop.eup %1759 }
 0x3c9   :  { %v558_v41 = vsub.f32 1.0, %v1760_v35  ;;  %v564_v24 = vmul.f32 %v1760_v35, %v2317_v28 }
 0x41b   :  { %v549_v37 = vpop.permute.xlu1 %548 }
 0x41c   :  { %v551_v38 = vmul.f32 %v1760_v35, %v549_v37 }
 0x41e   :  { %553 = vrot.lane.b32.xlu0 %v551_v38, %s1867_s4 }
 0x490   :  { %v554_v39 = vpop.permute.xlu0 %553 }
 0x491   :  { %v556_v40 = vadd.f32 %v554_v39, %v323_v43 }
 0x493   :  { %1761 = vtanh.f32 %v556_v40 }
 0x4a0   :  { %v1762_v22 = vpop.eup %1761 }
 0x4a1   :  { %560 = vrot.lane.b32.xlu1 %v1762_v22, %s1868_s5 }
 0x513   :  { %v561_v42 = vpop.permute.xlu1 %560 }
 0x514   :  { %v563_v45 = vmul.f32 %v561_v42, %v558_v41 }
 0x516   :  { %v2337_v46 = vadd.f32 %v564_v24, %v563_v45 }
 0x518   :  { %567 = vrot.lane.b32.xlu0 %v2337_v46, %s1868_s5 }
 0x58a   :  { %v568_v48 = vpop.permute.xlu0 %567 }
 0x58b   :  { %1675 = vmatmul.mubr.msk.f32.vlgmr.msra.gmra.mxu0 %vm202_vm1, %v568_v48 }
 0x58c   :  { %1689 = vmatpush3.msra.mxu0 %v1938_v3  ;;  %1696 = vmatprep.mubr.msk.f32.mxu0 %vm1862_vm0, %v1861_v5 }
 0x58d   :  { %1690 = vmatprep.subr.mxu0 %v1861_v5 }
 0x58e   :  { %1691 = vmatpush3.msra.mxu0 %v1951_v6 }
 0x58f   :  { %1692 = vmatprep.subr.mxu0 %v1861_v5 }
 0x590   :  { %1693 = vmatpush3.msra.mxu0 %v1956_v9 }
 0x591   :  { %1694 = vmatprep.subr.mxu0 %v1861_v5 }
 0x592   :  { %1695 = vmatpush3.msra.mxu0 %v1970_v14 }
 0x593   :  { %1710 = vmatprep.subr.mxu0 %v1861_v5 }
 0x64b   :  { %v637_v43 = vpop.f32.mrf.mxu0 }
 0x64c   :  { %v648_v57 = vadd.f32 %v637_v43, %v2289_v44  ;;  %v641_v59 = vadd.f32 %v637_v43, %v2304_v0 }
 0x64d   :  { %v1676_v58 = vpop.f32.mrf.mxu0 }
 0x64e   :  { %650 = vrot.lane.b32.xlu1 %v648_v57, %s1867_s4  ;;  %v1561_v60 = vmul.f32 -1.442695, %v641_v59 }
 0x650   :  { %1763 = vpow2.f32 %v1561_v60 }
 0x65d   :  { %v1764_v47 = vpop.eup %1763 }
 0x65e   :  { %v645_v63 = vadd.f32 1.0, %v1764_v47 }
 0x660   :  { %1765 = vrcp.f32 %v645_v63 }
 0x66d   :  { %v1766_v2 = vpop.eup %1765 }
 0x66e   :  { %v660_v15 = vsub.f32 1.0, %v1766_v2  ;;  %v666_v17 = vmul.f32 %v1766_v2, %v2337_v46 }
 0x6c0   :  { %v651_v7 = vpop.permute.xlu1 %650 }
 0x6c1   :  { %v653_v10 = vmul.f32 %v1766_v2, %v651_v7 }
 0x6c3   :  { %655 = vrot.lane.b32.xlu0 %v653_v10, %s1867_s4 }
 0x735   :  { %v656_v11 = vpop.permute.xlu0 %655 }
 0x736   :  { %v658_v12 = vadd.f32 %v656_v11, %v2304_v0 }
 0x738   :  { %1767 = vtanh.f32 %v658_v12 }
 0x745   :  { %v1768_v13 = vpop.eup %1767 }
 0x746   :  { %662 = vrot.lane.b32.xlu1 %v1768_v13, %s1868_s5 }
 0x7b8   :  { %v663_v16 = vpop.permute.xlu1 %662 }
 0x7b9   :  { %v665_v18 = vmul.f32 %v663_v16, %v660_v15 }
 0x7bb   :  { %v2361_v20 = vadd.f32 %v666_v17, %v665_v18 }
 0x7bd   :  { %669 = vrot.lane.b32.xlu0 %v2361_v20, %s1868_s5 }
 0x82f   :  { %v670_v23 = vpop.permute.xlu0 %669 }
 0x830   :  { %1686 = vmatmul.mubr.msk.f32.vlgmr.msra.gmra.mxu1 %vm202_vm1, %v670_v23 }
 0x831   :  { %1700 = vmatpush3.msra.mxu1 %v1938_v3  ;;  %1707 = vmatprep.mubr.msk.f32.mxu1 %vm1862_vm0, %v1861_v5 }
 0x832   :  { %1701 = vmatprep.subr.mxu1 %v1861_v5 }
 0x833   :  { %1702 = vmatpush3.msra.mxu1 %v1951_v6 }
 0x834   :  { %1703 = vmatprep.subr.mxu1 %v1861_v5 }
 0x835   :  { %1704 = vmatpush3.msra.mxu1 %v1956_v9 }
 0x836   :  { %1705 = vmatprep.subr.mxu1 %v1861_v5 }
 0x837   :  { %1706 = vmatpush3.msra.mxu1 %v1970_v14 }
 0x838   :  { %1721 = vmatprep.subr.mxu1 %v1861_v5 }
 0x8f0   :  { %v739_v0 = vpop.f32.mrf.mxu1 }
 0x8f1   :  { %v750_v26 = vadd.f32 %v739_v0, %v2289_v44  ;;  %v743_v56 = vadd.f32 %v739_v0, %v2301_v61 }
 0x8f2   :  { %v1687_v27 = vpop.f32.mrf.mxu1 }
 0x8f3   :  { %752 = vrot.lane.b32.xlu1 %v750_v26, %s1867_s4  ;;  %v1563_v29 = vmul.f32 -1.442695, %v743_v56 }
 0x8f5   :  { %1769 = vpow2.f32 %v1563_v29 }
 0x902   :  { %v1770_v30 = vpop.eup %1769 }
 0x903   :  { %v747_v31 = vadd.f32 1.0, %v1770_v30 }
 0x905   :  { %1771 = vrcp.f32 %v747_v31 }
 0x912   :  { %v1772_v32 = vpop.eup %1771 }
 0x913   :  { %v762_v37 = vsub.f32 1.0, %v1772_v32  ;;  %v768_v39 = vmul.f32 %v1772_v32, %v2361_v20 }
 0x965   :  { %v753_v33 = vpop.permute.xlu1 %752 }
 0x966   :  { %v755_v49 = vmul.f32 %v1772_v32, %v753_v33 }
 0x968   :  { %757 = vrot.lane.b32.xlu0 %v755_v49, %s1867_s4 }
 0x9da   :  { %v758_v62 = vpop.permute.xlu0 %757 }
 0x9db   :  { %v760_v34 = vadd.f32 %v758_v62, %v2301_v61 }
 0x9dd   :  { %1773 = vtanh.f32 %v760_v34  ;;  %v348_v34 = vadd.f32 %v2296_v51, %v2352_v52 }
 0x9ea   :  { %v1774_v35 = vpop.eup %1773 }
 0x9eb   :  { %764 = vrot.lane.b32.xlu1 %v1774_v35, %s1868_s5 }
 0xa5d   :  { %v765_v38 = vpop.permute.xlu1 %764 }
 0xa5e   :  { %v767_v40 = vmul.f32 %v765_v38, %v762_v37 }
 0xa60   :  { %v2383_v22 = vadd.f32 %v768_v39, %v767_v40 }
 0xa62   :  { %771 = vrot.lane.b32.xlu0 %v2383_v22, %s1868_s5 }
 0xad4   :  { %v772_v41 = vpop.permute.xlu0 %771 }
 0xad5   :  { %1697 = vmatmul.mubr.msk.f32.vlgmr.msra.gmra.mxu0 %vm202_vm1, %v772_v41 }
 0xad6   :  { %1711 = vmatpush3.msra.mxu0 %v1938_v3  ;;  %1718 = vmatprep.mubr.msk.f32.mxu0 %vm1862_vm0, %v1861_v5 }
 0xad7   :  { %1712 = vmatprep.subr.mxu0 %v1861_v5 }
 0xad8   :  { %1713 = vmatpush3.msra.mxu0 %v1951_v6 }
 0xad9   :  { %1714 = vmatprep.subr.mxu0 %v1861_v5 }
 0xada   :  { %1715 = vmatpush3.msra.mxu0 %v1956_v9 }
 0xadb   :  { %1716 = vmatprep.subr.mxu0 %v1861_v5 }
 0xadc   :  { %1717 = vmatpush3.msra.mxu0 %v1970_v14 }
 0xb95   :  { %v841_v61 = vpop.f32.mrf.mxu0 }
 0xb96   :  { %v852_v42 = vadd.f32 %v841_v61, %v2289_v44  ;;  %v845_v45 = vadd.f32 %v841_v61, %v2310_v8 }
 0xb97   :  { %v1698_v24 = vpop.f32.mrf.mxu0 }
 0xb98   :  { %854 = vrot.lane.b32.xlu1 %v852_v42, %s1867_s4  ;;  %v1565_v48 = vmul.f32 -1.442695, %v845_v45 }
 0xb9a   :  { %1775 = vpow2.f32 %v1565_v48 }
 0xba7   :  { %v1776_v43 = vpop.eup %1775 }
 0xba8   :  { %v849_v57 = vadd.f32 1.0, %v1776_v43 }
 0xbaa   :  { %1777 = vrcp.f32 %v849_v57 }
 0xbb7   :  { %v1778_v58 = vpop.eup %1777 }
 0xbb8   :  { %v864_v7 = vsub.f32 1.0, %v1778_v58  ;;  %v870_v11 = vmul.f32 %v1778_v58, %v2383_v22 }
 0xc0a   :  { %v855_v59 = vpop.permute.xlu1 %854 }
 0xc0b   :  { %v857_v60 = vmul.f32 %v1778_v58, %v855_v59  ;;  %v1178_v58 = vld [vmem:[%s2621_s2] sm:$0xff] }
 0xc0d   :  { %859 = vrot.lane.b32.xlu0 %v857_v60, %s1867_s4 }
 0xc7f   :  { %v860_v47 = vpop.permute.xlu0 %859 }
 0xc80   :  { %v862_v63 = vadd.f32 %v860_v47, %v2310_v8 }
 0xc82   :  { %1779 = vtanh.f32 %v862_v63 }
 0xc8f   :  { %v1780_v2 = vpop.eup %1779 }
 0xc90   :  { %866 = vrot.lane.b32.xlu1 %v1780_v2, %s1868_s5 }
 0xd02   :  { %v867_v10 = vpop.permute.xlu1 %866 }
 0xd03   :  { %v869_v12 = vmul.f32 %v867_v10, %v864_v7 }
 0xd05   :  { %v2404_v13 = vadd.f32 %v870_v11, %v869_v12 }
 0xd07   :  { %873 = vrot.lane.b32.xlu0 %v2404_v13, %s1868_s5 }
 0xd79   :  { %v874_v15 = vpop.permute.xlu0 %873 }
 0xd7a   :  { %1708 = vmatmul.mubr.msk.f32.vlgmr.msra.gmra.mxu1 %vm202_vm1, %v874_v15 }
 0xd7b   :  { %1722 = vmatpush3.msra.mxu1 %v1938_v3  ;;  %1729 = vmatprep.mubr.msk.f32.mxu1 %vm1862_vm0, %v1861_v5 }
 0xd7c   :  { %1723 = vmatprep.subr.mxu1 %v1861_v5 }
 0xd7d   :  { %1724 = vmatpush3.msra.mxu1 %v1951_v6 }
 0xd7e   :  { %1725 = vmatprep.subr.mxu1 %v1861_v5 }
 0xd7f   :  { %1726 = vmatpush3.msra.mxu1 %v1956_v9 }
 0xd80   :  { %1727 = vmatprep.subr.mxu1 %v1861_v5 }
 0xd81   :  { %1728 = vmatpush3.msra.mxu1 %v1970_v14 }
 0xe3a   :  { %v943_v8 = vpop.f32.mrf.mxu1 }
 0xe3b   :  { %v954_v16 = vadd.f32 %v943_v8, %v2289_v44  ;;  %v947_v3 = vadd.f32 %v943_v8, %v2307_v4  ;;  %v1179_v8 = vld [vmem:[%s2621_s2 + $0x8] sm:$0xff] }
 0xe3c   :  { %v1709_v17 = vpop.f32.mrf.mxu1 }
 0xe3d   :  { %956 = vrot.lane.b32.xlu1 %v954_v16, %s1867_s4  ;;  %v1567_v18 = vmul.f32 -1.442695, %v947_v3 }
 0xe3f   :  { %1781 = vpow2.f32 %v1567_v18 }
 0xe4c   :  { %v1782_v23 = vpop.eup %1781 }
 0xe4d   :  { %v951_v6 = vadd.f32 1.0, %v1782_v23 }
 0xe4f   :  { %1783 = vrcp.f32 %v951_v6 }
 0xe5c   :  { %v1784_v0 = vpop.eup %1783 }
 0xe5d   :  { %v966_v56 = vsub.f32 1.0, %v1784_v0  ;;  %v972_v30 = vmul.f32 %v1784_v0, %v2404_v13 }
 0xeaf   :  { %v957_v26 = vpop.permute.xlu1 %956 }
 0xeb0   :  { %v959_v9 = vmul.f32 %v1784_v0, %v957_v26 }
 0xeb2   :  { %961 = vrot.lane.b32.xlu0 %v959_v9, %s1867_s4 }
 0xf24   :  { %v962_v5 = vpop.permute.xlu0 %961 }
 0xf25   :  { %v964_v14 = vadd.f32 %v962_v5, %v2307_v4 }
 0xf27   :  { %1785 = vtanh.f32 %v964_v14 }
 0xf34   :  { %v1786_v27 = vpop.eup %1785 }
 0xf35   :  { %968 = vrot.lane.b32.xlu1 %v1786_v27, %s1868_s5 }
 0xfa7   :  { %v969_v29 = vpop.permute.xlu1 %968 }
 0xfa8   :  { %v971_v31 = vmul.f32 %v969_v29, %v966_v56  ;;  %v1180_v29 = vld [vmem:[%s2621_s2 + $0x10] sm:$0xff] }
 0xfaa   :  { %v2425_v32 = vadd.f32 %v972_v30, %v971_v31 }
 0xfac   :  { %975 = vrot.lane.b32.xlu0 %v2425_v32, %s1868_s5 }
0x101e   :  { %v976_v33 = vpop.permute.xlu0 %975 }
0x101f   :  { %1719 = vmatmul.mubr.msk.f32.vlgmr.msra.gmra.mxu0 %vm202_vm1, %v976_v33 }
0x10df   :  { %v1045_v49 = vpop.f32.mrf.mxu0 }
0x10e0   :  { %v1056_v4 = vadd.f32 %v1045_v49, %v2289_v44  ;;  %v1049_v35 = vadd.f32 %v1045_v49, %v348_v34 }
0x10e1   :  { %v1720_v62 = vpop.f32.mrf.mxu0 }
0x10e2   :  { %1058 = vrot.lane.b32.xlu1 %v1056_v4, %s1867_s4  ;;  %v1569_v37 = vmul.f32 -1.442695, %v1049_v35 }
0x10e4   :  { %1787 = vpow2.f32 %v1569_v37 }
0x10f1   :  { %v1788_v38 = vpop.eup %1787 }
0x10f2   :  { %v1053_v39 = vadd.f32 1.0, %v1788_v38 }
0x10f4   :  { %1789 = vrcp.f32 %v1053_v39 }
0x1101   :  { %v1790_v40 = vpop.eup %1789 }
0x1102   :  { %v1068_v51 = vsub.f32 1.0, %v1790_v40  ;;  %v1074_v48 = vmul.f32 %v1790_v40, %v2425_v32 }
0x1154   :  { %v1059_v41 = vpop.permute.xlu1 %1058 }
0x1155   :  { %v1061_v61 = vmul.f32 %v1790_v40, %v1059_v41  ;;  %v1181_v41 = vld [vmem:[%s2621_s2 + $0x18] sm:$0xff] }
0x1157   :  { %1063 = vrot.lane.b32.xlu0 %v1061_v61, %s1867_s4 }
0x11c9   :  { %v1064_v42 = vpop.permute.xlu0 %1063 }
0x11ca   :  { %v1066_v24 = vadd.f32 %v1064_v42, %v348_v34 }
0x11cc   :  { %1791 = vtanh.f32 %v1066_v24 }
0x11d9   :  { %v1792_v45 = vpop.eup %1791 }
0x11da   :  { %1070 = vrot.lane.b32.xlu1 %v1792_v45, %s1868_s5 }
0x11de   :  { %1193 = vrot.lane.b32.xlu1 %v2165_v1, %s1869_s8 }
0x124c   :  { %v1071_v52 = vpop.permute.xlu1 %1070 }
0x124d   :  { %v1073_v43 = vmul.f32 %v1071_v52, %v1068_v51 }
0x124f   :  { %v2439_v57 = vadd.f32 %v1074_v48, %v1073_v43 }
0x1250   :  { %v1194_v63 = vpop.permute.xlu1 %1193 }
0x1251   :  { %1077 = vrot.lane.b32.xlu0 %v2439_v57, %s1868_s5 }
0x1255   :  { %1188 = vrot.lane.b32.xlu0 %v1178_v58, %s1869_s8 }
0x12c3   :  { %v1078_v59 = vpop.permute.xlu0 %1077 }
0x12c4   :  { %1730 = vmatmul.mubr.msk.f32.vlgmr.msra.gmra.mxu1 %vm202_vm1, %v1078_v59 }
0x12c7   :  { %v1189_v1 = vpop.permute.xlu0 %1188 }
0x12c8   :  { %v1191_v60 = vadd.f32 %v1189_v1, %v2317_v28 }
0x12ca   :  { %1793 = vtanh.f32 %v1191_v60 }
0x12d7   :  { %v2449_v47 = vpop.eup %1793 }
0x12d8   :  { %v1196_v2 = vsub.f32 %v2449_v47, %v1194_v63  ;;  %v1206_v10 = vmul.f32 %v2449_v47, %v2449_v47 }
0x12da   :  { %v1197_v7 = vmul.f32 %v1196_v2, %v1196_v2 }
0x12dc   :  { %1199 = vrot.lane.b32.xlu0 %v1197_v7, %s1868_s5 }
0x12e0   :  { %1208 = vrot.lane.b32.xlu0 %v1206_v10, %s1868_s5 }
0x134e   :  { %v1200_v11 = vpop.permute.xlu0 %1199 }
0x134f   :  { %v1202_v12 = vsel %vm202_vm1, %v1200_v11, 0.0 }
0x1350   :  { %1203 = vadd.xlane.f32.xlu1 %v1202_v12 }
0x1352   :  { %v1209_v15 = vpop.permute.xlu0 %1208 }
0x1353   :  { %v1211_v28 = vsel %vm202_vm1, %v1209_v15, 0.0 }
0x1354   :  { %1212 = vadd.xlane.f32.xlu0 %v1211_v28 }
0x1361   :  { %1216 = vrot.lane.b32.xlu1 %v1179_v8, %s1869_s8 }
0x136a   :  { %1221 = vrot.lane.b32.xlu0 %v2167_v53, %s1869_s8 }
0x1384   :  { %v1147_v16 = vpop.f32.mrf.mxu1 }
0x1386   :  { %v1731_v17 = vpop.f32.mrf.mxu1 }
0x1387   :  { %v1183_v17 = vld [vmem:[%s2621_s2 + $0x28] sm:$0xff] }
0x13d9   :  { %v1204_v3 = vpop.xlane.xlu1 %1203 }
0x13dd   :  { %v1217_v18 = vpop.permute.xlu1 %1216  ;;  %v1213_v6 = vpop.xlane.xlu0 %1212 }
0x13de   :  { %v1219_v23 = vadd.f32 %v1217_v18, %v2337_v46  ;;  %v1185_v18 = vld [vmem:[%s2621_s2 + $0x38] sm:$0xff] }
0x13e0   :  { %1795 = vtanh.f32 %v1219_v23 }
0x13e1   :  { %v1222_v26 = vpop.permute.xlu0 %1221 }
0x13ed   :  { %v2465_v0 = vpop.eup %1795 }
0x13ee   :  { %v1224_v9 = vsub.f32 %v2465_v0, %v1222_v26  ;;  %v1234_v5 = vmul.f32 %v2465_v0, %v2465_v0 }
0x13f0   :  { %v1225_v14 = vmul.f32 %v1224_v9, %v1224_v9  ;;  %1236 = vrot.lane.b32.xlu0 %v1234_v5, %s1868_s5 }
0x13f2   :  { %1227 = vrot.lane.b32.xlu1 %v1225_v14, %s1868_s5 }
0x1462   :  { %v1237_v53 = vpop.permute.xlu0 %1236 }
0x1463   :  { %v1239_v27 = vsel %vm202_vm1, %v1237_v53, 0.0 }
0x1464   :  { %v1228_v56 = vpop.permute.xlu1 %1227  ;;  %1240 = vadd.xlane.f32.xlu0 %v1239_v27 }
0x1465   :  { %v1230_v46 = vsel %vm202_vm1, %v1228_v56, 0.0 }
0x1466   :  { %1231 = vadd.xlane.f32.xlu1 %v1230_v46 }
0x1477   :  { %1244 = vrot.lane.b32.xlu1 %v1180_v29, %s1869_s8 }
0x147a   :  { %1249 = vrot.lane.b32.xlu0 %v2196_v55, %s1869_s8  ;;  %v1158_v55 = vadd.f32 %v1147_v16, %v2289_v44  ;;  %v1151_v44 = vadd.f32 %v1147_v16, %v2313_v54  ;;  %v1182_v16 = vld [vmem:[%s2621_s2 + $0x20] sm:$0xff] }
0x147c   :  { %v1571_v61 = vmul.f32 -1.442695, %v1151_v44 }
0x14ed   :  { %v1241_v49 = vpop.xlane.xlu0 %1240 }
0x14ee   :  { %v1242_v24 = vadd.f32 %v1241_v49, %v1213_v6 }
0x14ef   :  { %v1232_v30 = vpop.xlane.xlu1 %1231 }
0x14f0   :  { %v1233_v51 = vadd.f32 %v1232_v30, %v1204_v3  ;;  %v1184_v3 = vld [vmem:[%s2621_s2 + $0x30] sm:$0xff] }
0x14f1   :  { %v1250_v62 = vpop.permute.xlu0 %1249 }
0x14f3   :  { %v1245_v31 = vpop.permute.xlu1 %1244 }
0x14f4   :  { %v1247_v33 = vadd.f32 %v1245_v31, %v2361_v20 }
0x14f6   :  { %1797 = vtanh.f32 %v1247_v33 }
0x14f7   :  { %1799 = vpow2.f32 %v1571_v61 }
0x1503   :  { %v2481_v4 = vpop.eup %1797 }
0x1504   :  { %v1262_v34 = vmul.f32 %v2481_v4, %v2481_v4  ;;  %v1252_v35 = vsub.f32 %v2481_v4, %v1250_v62  ;;  %v1800_v58 = vpop.eup %1799 }
0x1505   :  { %v1155_v60 = vadd.f32 1.0, %v1800_v58 }
0x1506   :  { %1264 = vrot.lane.b32.xlu0 %v1262_v34, %s1868_s5  ;;  %v1253_v37 = vmul.f32 %v1252_v35, %v1252_v35 }
0x1508   :  { %1255 = vrot.lane.b32.xlu1 %v1253_v37, %s1868_s5 }
0x150c   :  { %1160 = vrot.lane.b32.xlu1 %v1158_v55, %s1867_s4 }
0x1578   :  { %v1265_v20 = vpop.permute.xlu0 %1264 }
0x1579   :  { %v1267_v38 = vsel %vm202_vm1, %v1265_v20, 0.0 }
0x157a   :  { %v1256_v39 = vpop.permute.xlu1 %1255  ;;  %1268 = vadd.xlane.f32.xlu0 %v1267_v38 }
0x157b   :  { %v1258_v40 = vsel %vm202_vm1, %v1256_v39, 0.0 }
0x157c   :  { %1259 = vadd.xlane.f32.xlu1 %v1258_v40 }
0x157e   :  { %v1161_v42 = vpop.permute.xlu1 %1160 }
0x158d   :  { %1272 = vrot.lane.b32.xlu1 %v1181_v41, %s1869_s8 }
0x1590   :  { %1277 = vrot.lane.b32.xlu0 %v2202_v19, %s1869_s8 }
0x1603   :  { %v1269_v45 = vpop.xlane.xlu0 %1268 }
0x1604   :  { %v1270_v52 = vadd.f32 %v1269_v45, %v1242_v24 }
0x1605   :  { %v1260_v48 = vpop.xlane.xlu1 %1259 }
0x1606   :  { %v1261_v43 = vadd.f32 %v1260_v48, %v1233_v51 }
0x1607   :  { %v1278_v19 = vpop.permute.xlu0 %1277 }
0x1609   :  { %v1273_v59 = vpop.permute.xlu1 %1272 }
0x160a   :  { %v1275_v1 = vadd.f32 %v1273_v59, %v2383_v22 }
0x160c   :  { %1801 = vtanh.f32 %v1275_v1 }
0x160d   :  { %1803 = vrcp.f32 %v1155_v60 }
0x1619   :  { %v2500_v63 = vpop.eup %1801 }
0x161a   :  { %v1290_v2 = vmul.f32 %v2500_v63, %v2500_v63  ;;  %v1280_v7 = vsub.f32 %v2500_v63, %v1278_v19  ;;  %v1804_v11 = vpop.eup %1803 }
0x161b   :  { %v1163_v12 = vmul.f32 %v1804_v11, %v1161_v42  ;;  %v1170_v20 = vsub.f32 1.0, %v1804_v11  ;;  %v1176_v40 = vmul.f32 %v1804_v11, %v2439_v57 }
0x161c   :  { %1292 = vrot.lane.b32.xlu0 %v1290_v2, %s1868_s5  ;;  %v1281_v10 = vmul.f32 %v1280_v7, %v1280_v7 }
0x161e   :  { %1283 = vrot.lane.b32.xlu1 %v1281_v10, %s1868_s5 }
0x1620   :  { %1165 = vrot.lane.b32.xlu0 %v1163_v12, %s1867_s4 }
0x168e   :  { %v1293_v22 = vpop.permute.xlu0 %1292 }
0x168f   :  { %v1295_v15 = vsel %vm202_vm1, %v1293_v22, 0.0 }
0x1690   :  { %v1284_v28 = vpop.permute.xlu1 %1283  ;;  %1296 = vadd.xlane.f32.xlu0 %v1295_v15 }
0x1691   :  { %v1286_v8 = vsel %vm202_vm1, %v1284_v28, 0.0 }
0x1692   :  { %1287 = vadd.xlane.f32.xlu1 %v1286_v8 }
0x16a3   :  { %1300 = vrot.lane.b32.xlu1 %v1182_v16, %s1869_s8 }
0x16a6   :  { %1305 = vrot.lane.b32.xlu0 %v2219_v21, %s1869_s8  ;;  %v1166_v21 = vpop.permute.xlu0 %1165 }
0x16a7   :  { %v1168_v53 = vadd.f32 %v1166_v21, %v2313_v54 }
0x16aa   :  { %1328 = vrot.lane.b32.xlu0 %v1183_v17, %s1869_s8 }
0x16ae   :  { %1356 = vrot.lane.b32.xlu0 %v1184_v3, %s1869_s8 }
0x16b2   :  { %1384 = vrot.lane.b32.xlu0 %v1185_v18, %s1869_s8 }
0x16b6   :  { %1333 = vrot.lane.b32.xlu0 %v2246_v36, %s1869_s8 }
0x16ba   :  { %1361 = vrot.lane.b32.xlu0 %v2262_v50, %s1869_s8 }
0x16be   :  { %1389 = vrot.lane.b32.xlu0 %v2278_v25, %s1869_s8 }
0x1719   :  { %v1297_v23 = vpop.xlane.xlu0 %1296 }
0x171a   :  { %v1298_v6 = vadd.f32 %v1297_v23, %v1270_v52 }
0x171b   :  { %v1288_v26 = vpop.xlane.xlu1 %1287 }
0x171c   :  { %v1289_v9 = vadd.f32 %v1288_v26, %v1261_v43 }
0x171d   :  { %v1306_v36 = vpop.permute.xlu0 %1305 }
0x171f   :  { %v1301_v5 = vpop.permute.xlu1 %1300 }
0x1720   :  { %v1303_v14 = vadd.f32 %v1301_v5, %v2404_v13 }
0x1721   :  { %v1329_v13 = vpop.permute.xlu0 %1328 }
0x1722   :  { %1805 = vtanh.f32 %v1303_v14  ;;  %v1331_v33 = vadd.f32 %v1329_v13, %v2425_v32 }
0x1723   :  { %1807 = vtanh.f32 %v1168_v53 }
0x1724   :  { %1809 = vtanh.f32 %v1331_v33 }
0x1725   :  { %v1357_v29 = vpop.permute.xlu0 %1356 }
0x1726   :  { %v1359_v35 = vadd.f32 %v1357_v29, %v2439_v57 }
0x1728   :  { %1811 = vtanh.f32 %v1359_v35 }
0x1729   :  { %v1385_v54 = vpop.permute.xlu0 %1384 }
0x172d   :  { %v1334_v30 = vpop.permute.xlu0 %1333 }
0x172f   :  { %v2536_v27 = vpop.eup %1805 }
0x1730   :  { %v1318_v50 = vmul.f32 %v2536_v27, %v2536_v27  ;;  %v1308_v25 = vsub.f32 %v2536_v27, %v1306_v36  ;;  %v1808_v46 = vpop.eup %1807 }
0x1731   :  { %v1362_v31 = vpop.permute.xlu0 %1361  ;;  %v1810_v32 = vpop.eup %1809 }
0x1732   :  { %1320 = vrot.lane.b32.xlu0 %v1318_v50, %s1868_s5  ;;  %v1309_v56 = vmul.f32 %v1308_v25, %v1308_v25  ;;  %v1336_v61 = vsub.f32 %v1810_v32, %v1334_v30  ;;  %v1346_v51 = vmul.f32 %v1810_v32, %v1810_v32  ;;  %v1186_v50 = vld [vmem:[%s2626_s7] sm:$0xff]  ;;  %s1815_s7 = scalar_lea.vmem %s1492_s23, 16 }
0x1733   :  { %p1816_p0 = scmp.ne.s32.totalorder %s1492_s23, %s1815_s7  ;;  %p1821_p2 = scmp.lt.s32.totalorder %s1819_s24, %s1815_s7 }
0x1734   :  { %1311 = vrot.lane.b32.xlu1 %v1309_v56, %s1868_s5  ;;  %v1337_v24 = vmul.f32 %v1336_v61, %v1336_v61 }
0x1735   :  { %v1390_v49 = vpop.permute.xlu0 %1389  ;;  %v1812_v42 = vpop.eup %1811  ;;  %p1822_p3 = por %p1821_p2, %p1820_p1 }
0x1736   :  { %v1364_v45 = vsub.f32 %v1812_v42, %v1362_v31  ;;  %v1374_v48 = vmul.f32 %v1812_v42, %v1812_v42 }
0x1737   :  { %p1823_p4 = pnand %p1822_p3, %p1816_p0 }
0x1738   :  { %1172 = vrot.lane.b32.xlu1 %v1808_v46, %s1868_s5  ;;  %v1365_v52 = vmul.f32 %v1364_v45, %v1364_v45 }
0x17a4   :  { %v1321_v62 = vpop.permute.xlu0 %1320 }
0x17a5   :  { %v1323_v34 = vsel %vm202_vm1, %v1321_v62, 0.0 }
0x17a6   :  { %v1312_v37 = vpop.permute.xlu1 %1311  ;;  %1324 = vadd.xlane.f32.xlu0 %v1323_v34 }
0x17a7   :  { %v1314_v55 = vsel %vm202_vm1, %v1312_v37, 0.0 }
0x17a8   :  { %1315 = vadd.xlane.f32.xlu1 %v1314_v55 }
0x17aa   :  { %v1173_v38 = vpop.permute.xlu1 %1172 }
0x17ab   :  { %v1175_v39 = vmul.f32 %v1173_v38, %v1170_v20 }
0x17ad   :  { %v1177_v41 = vadd.f32 %v1176_v40, %v1175_v39 }
0x17af   :  { %v1387_v44 = vadd.f32 %v1385_v54, %v1177_v41 }
0x17b1   :  { %1813 = vtanh.f32 %v1387_v44 }
0x17b9   :  { %1339 = vrot.lane.b32.xlu1 %v1337_v24, %s1868_s5 }
0x17bc   :  { %1348 = vrot.lane.b32.xlu0 %v1346_v51, %s1868_s5 }
0x17be   :  { %v1814_v43 = vpop.eup %1813 }
0x17bf   :  { %v1402_v57 = vmul.f32 %v1814_v43, %v1814_v43  ;;  %v1392_v15 = vsub.f32 %v1814_v43, %v1390_v49 }
0x17c0   :  { %1367 = vrot.lane.b32.xlu0 %v1365_v52, %s1868_s5 }
0x17c1   :  { %v1393_v28 = vmul.f32 %v1392_v15, %v1392_v15 }
0x17c4   :  { %1376 = vrot.lane.b32.xlu0 %v1374_v48, %s1868_s5 }
0x17c8   :  { %1404 = vrot.lane.b32.xlu0 %v1402_v57, %s1868_s5 }
0x182f   :  { %v1325_v58 = vpop.xlane.xlu0 %1324 }
0x1830   :  { %v1326_v59 = vadd.f32 %v1325_v58, %v1298_v6 }
0x1831   :  { %v1316_v1 = vpop.xlane.xlu1 %1315 }
0x1832   :  { %v1317_v60 = vadd.f32 %v1316_v1, %v1289_v9 }
0x1833   :  { %v1349_v19 = vpop.permute.xlu0 %1348 }
0x1834   :  { %v1351_v2 = vsel %vm202_vm1, %v1349_v19, 0.0 }
0x1835   :  { %v1340_v7 = vpop.permute.xlu1 %1339  ;;  %1352 = vadd.xlane.f32.xlu0 %v1351_v2 }
0x1836   :  { %v1342_v10 = vsel %vm202_vm1, %v1340_v7, 0.0 }
0x1837   :  { %1343 = vadd.xlane.f32.xlu1 %v1342_v10  ;;  %v1368_v11 = vpop.permute.xlu0 %1367 }
0x1838   :  { %v1370_v8 = vsel %vm202_vm1, %v1368_v11, 0.0 }
0x183b   :  { %v1377_v12 = vpop.permute.xlu0 %1376 }
0x183c   :  { %v1379_v22 = vsel %vm202_vm1, %v1377_v12, 0.0 }
0x183d   :  { %1380 = vadd.xlane.f32.xlu0 %v1379_v22 }
0x183f   :  { %v1405_v16 = vpop.permute.xlu0 %1404 }
0x1840   :  { %v1407_v17 = vsel %vm202_vm1, %v1405_v16, 0.0 }
0x1848   :  { %1395 = vrot.lane.b32.xlu1 %v1393_v28, %s1868_s5 }
0x1853   :  { %1419 = vrot.lane.b32.xlu0 %v2449_v47, %s1868_s5 }
0x1857   :  { %1425 = vrot.lane.b32.xlu0 %v2500_v63, %s1868_s5 }
0x185b   :  { %1429 = vrot.lane.b32.xlu0 %v1810_v32, %s1868_s5 }
0x186c   :  { %1371 = vadd.xlane.f32.xlu1 %v1370_v8 }
0x187a   :  { %1408 = vadd.xlane.f32.xlu0 %v1407_v17 }
0x187d   :  { %1421 = vrot.lane.b32.xlu1 %v2465_v0, %s1868_s5 }
0x1881   :  { %1423 = vrot.lane.b32.xlu1 %v2481_v4, %s1868_s5 }
0x1885   :  { %1427 = vrot.lane.b32.xlu1 %v2536_v27, %s1868_s5 }
0x1889   :  { %1431 = vrot.lane.b32.xlu1 %v1812_v42, %s1868_s5 }
0x18be   :  { %v1353_v3 = vpop.xlane.xlu0 %1352 }
0x18bf   :  { %v1354_v53 = vadd.f32 %v1353_v3, %v1326_v59 }
0x18c0   :  { %v1344_v47 = vpop.xlane.xlu1 %1343 }
0x18c1   :  { %v1345_v63 = vadd.f32 %v1344_v47, %v1317_v60 }
0x18c4   :  { %v1396_v18 = vpop.permute.xlu1 %1395 }
0x18c5   :  { %v1398_v21 = vsel %vm202_vm1, %v1396_v18, 0.0 }
0x18c6   :  { %1399 = vadd.xlane.f32.xlu0 %v1398_v21  ;;  %v1381_v23 = vpop.xlane.xlu0 %1380 }
0x18c7   :  { %v1382_v36 = vadd.f32 %v1381_v23, %v1354_v53 }
0x18ca   :  { %v1420_v6 = vpop.permute.xlu0 %1419 }
0x18cb   :  { %1443 = vst.msk [vmem:[%s2628_s9] sm:$0xff] %vm202_vm1, %v1420_v6 }
0x18ce   :  { %v1426_v0 = vpop.permute.xlu0 %1425 }
0x18cf   :  { %1446 = vst.msk [vmem:[%s2628_s9 + $0x18] sm:$0xff] %vm202_vm1, %v1426_v0 }
0x18d2   :  { %v1430_v4 = vpop.permute.xlu0 %1429 }
0x18d3   :  { %1448 = vst.msk [vmem:[%s2628_s9 + $0x28] sm:$0xff] %vm202_vm1, %v1430_v4 }
0x18dc   :  { %1433 = vrot.lane.b32.xlu0 %v1814_v43, %s1868_s5 }
0x18f5   :  { %v1372_v26 = vpop.xlane.xlu1 %1371 }
0x18f6   :  { %v1373_v9 = vadd.f32 %v1372_v26, %v1345_v63 }
0x18f9   :  { %v1422_v5 = vpop.permute.xlu1 %1421 }
0x18fa   :  { %1444 = vst.msk [vmem:[%s2628_s9 + $0x8] sm:$0xff] %vm202_vm1, %v1422_v5 }
0x18fd   :  { %v1424_v14 = vpop.permute.xlu1 %1423 }
0x18fe   :  { %1445 = vst.msk [vmem:[%s2628_s9 + $0x10] sm:$0xff] %vm202_vm1, %v1424_v14 }
0x1901   :  { %v1428_v27 = vpop.permute.xlu1 %1427 }
0x1902   :  { %1447 = vst.msk [vmem:[%s2628_s9 + $0x20] sm:$0xff] %vm202_vm1, %v1428_v27 }
0x1903   :  { %v1409_v25 = vpop.xlane.xlu0 %1408 }
0x1904   :  { %v1410_v56 = vadd.f32 %v1409_v25, %v1382_v36 }
0x1905   :  { %v1432_v46 = vpop.permute.xlu1 %1431 }
0x1906   :  { %v1462_v13 = vmul.f32 %v1410_v56, %v1186_v50  ;;  %1449 = vst.msk [vmem:[%s2628_s9 + $0x30] sm:$0xff] %vm202_vm1, %v1432_v46 }
0x1908   :  { %v1463_v29 = vsel %vm1452_vm2, %v1462_v13, 0.0 }
0x1909   :  { %v1464_v54 = vrot.slane %v1463_v29, 4 }
0x190b   :  { %v1465_v30 = vadd.f32 %v1464_v54, %v1463_v29 }
0x190d   :  { %v1466_v31 = vrot.slane %v1465_v30, 2 }
0x190f   :  { %v1467_v33 = vadd.f32 %v1466_v31, %v1465_v30 }
0x1911   :  { %v1468_v49 = vrot.slane %v1467_v33, 1 }
0x1913   :  { %v1469_v62 = vadd.f32 %v1468_v49, %v1467_v33 }
0x1915   :  { %1470 = vst.msk [vmem:[#allocation4] sm:$0x1] %vm1460_vm3, %v1469_v62 }
0x1916   :  { %1826 = shalt.err (!%p1823_p4)
}
0x1917   :  { %1494 = dma.vmem_to_hbm [thread:$0]  %s1492_s23, 16, %s2630_s11, [#allocation5]  }
0x1918   :  { %s1871_s4 = smov [#allocation2]  }
0x1919   :  { %s1481_s29 = sshll.u32 %s1871_s4, 4  ;;  %s1482_s29 = int_to_ptr.vmem [resolvable:$true] %s1481_s29 }
0x191a   :  { %s1835_s11 = scalar_lea.vmem %s1482_s29, 16  ;;  %s1839_s30 = scalar_lea.vmem %s1482_s29, 32 }
0x191b   :  { %p1836_p5 = scmp.ne.s32.totalorder %s1482_s29, %s1835_s11  ;;  %p1840_p6 = scmp.lt.s32.totalorder %s1482_s29, %s1482_s29 }
0x191c   :  { %p1841_p7 = scmp.lt.s32.totalorder %s1839_s30, %s1835_s11 }
0x191e   :  { %p1842_p8 = por %p1841_p7, %p1840_p6 }
0x1920   :  { %p1843_p9 = pnand %p1842_p8, %p1836_p5 }
0x194f   :  { %v1400_v34 = vpop.xlane.xlu0 %1399 }
0x1950   :  { %v1401_v35 = vadd.f32 %v1400_v34, %v1373_v9 }
0x1952   :  { %v1451_v37 = vmul.f32 %v1401_v35, %v1186_v50 }
0x1953   :  { %v1434_v55 = vpop.permute.xlu0 %1433 }
0x1954   :  { %v1453_v20 = vsel %vm1452_vm2, %v1451_v37, 0.0  ;;  %1450 = vst.msk [vmem:[%s2628_s9 + $0x38] sm:$0xff] %vm202_vm1, %v1434_v55 }
0x1955   :  { %v1454_v38 = vrot.slane %v1453_v20, 4 }
0x1957   :  { %v1455_v39 = vadd.f32 %v1454_v38, %v1453_v20 }
0x1959   :  { %v1456_v40 = vrot.slane %v1455_v39, 2 }
0x195b   :  { %v1457_v41 = vadd.f32 %v1456_v40, %v1455_v39 }
0x195d   :  { %v1458_v32 = vrot.slane %v1457_v41, 1 }
0x195f   :  { %v1459_v44 = vadd.f32 %v1458_v32, %v1457_v41 }
0x1961   :  { %1461 = vst.msk [vmem:[#allocation2] sm:$0x1] %vm1460_vm3, %v1459_v44 }
0x1962   :  { %1846 = shalt.err (!%p1843_p9)
}
0x1963   :  { %1484 = dma.vmem_to_hbm [thread:$0]  %s1482_s29, 16, %s2629_s10, [#allocation3]  }
0x1964   :  { %1855 = dma.done.wait [#allocation3], 16  }
0x1965   :  { %1856 = vsyncadd [#allocation3], 4294967280 }
0x1966   :  { %1857 = dma.done.wait [#allocation5], 16  }
0x1967   :  { %1858 = vsyncadd [#allocation5], 4294967280 }
0x1968   :  { %1505 = vsyncpa [#allocation3], 1 }
0x1969   :  { %1506 = vsyncpa [#allocation5], 1 }

// kernel: neural_network_forward.7
= control target key start
LH: loop header
LB: loop body
LE: loop exit
PB: predicated region body
PF: predicated region fallthrough
CT: control target
= control target key end

     0   :  { %vm55_vm0 = vcmask 261120   ;;  %v1515_v2 = vmov 0.0   ;;  %vm1516_vm1 = vmmov 0   ;;  %s1519_s18 = smov 32   ;;  %vm1088_vm2 = vcmask 523264   ;;  %s1972_s2 = inlined_call_operand.vmem [shape: f32[32,96], index: 2, kind: input, shape index: {}]   ;;  %s1973_s0 = inlined_call_operand.vmem [shape: f32[64,32], index: 0, kind: input, shape index: {}]   ;;  %s1974_s3 = inlined_call_operand.vmem [shape: f32[32,96], index: 3, kind: input, shape index: {}]   ;;  %s1975_s5 = inlined_call_operand.vmem [shape: f32[1,32], index: 5, kind: input, shape index: {}]   ;;  %s1976_s4 = inlined_call_operand.vmem [shape: f32[1,96], index: 4, kind: input, shape index: {}]   ;;  %s1977_s1 = inlined_call_operand.vmem [shape: f32[64,32], index: 1, kind: input, shape index: {}]   ;;  %s1978_s6 = inlined_call_operand.vmem [shape: f32[256,1], index: 6, kind: input, shape index: {}]   ;;  %s1979_s7 = inlined_call_operand.<no memory space> [shape: f32[1,1], index: 7, kind: input, shape index: {}]   ;;  %s1980_s8 = inlined_call_operand.vmem [shape: f32[8,1], index: 8, kind: output, shape index: {}]  }
   0x1   :  { %v42_v0 = vld [vmem:[%s1972_s2 + $0x18] sm:$0xff]  ;;  %v41_v1 = vld [vmem:[%s1972_s2 + $0x10] sm:$0xff]  ;;  %1365 = vmatprep.subr.mxu0 %v1515_v2  ;;  %1373 = vmatprep.mubr.msk.f32.mxu0 %vm1516_vm1, %v1515_v2  ;;  %v31_v3 = vld [vmem:[%s1973_s0] sm:$0xff]  ;;  %vm1090_vm3 = vcmask 785408   ;;  %vm1204_vm4 = vcmask 7168  }
   0x2   :  { %1323 = vmatprep.subr.mxu1 %v42_v0  ;;  %v40_v4 = vld [vmem:[%s1972_s2 + $0x8] sm:$0xff]  ;;  %1331 = vmatprep.mubr.msk.f32.mxu1 %vm55_vm0, %v31_v3  ;;  %v1584_v5 = vld [vmem:[%s1974_s3 + $0x18] sm:$0xff]  ;;  %v39_v6 = vld [vmem:[%s1972_s2] sm:$0xff]  ;;  %s1517_s2 = smov 64  }
   0x3   :  { %1324 = vmatpush3.msra.mxu1 %v42_v0  ;;  %1366 = vmatpush3.msra.mxu0 %v1584_v5  ;;  %v1593_v7 = vld [vmem:[%s1974_s3 + $0x10] sm:$0xff]  ;;  %v1220_v8 = vld [vmem:[%s1975_s5] ss:$0 sm:$0xff]  ;;  %v32_v9 = vld [vmem:[%s1973_s0 + $0x8] sm:$0xff] }
   0x4   :  { %1325 = vmatprep.subr.mxu1 %v41_v1  ;;  %1367 = vmatprep.subr.mxu0 %v1515_v2  ;;  %v33_v10 = vld [vmem:[%s1973_s0 + $0x10] sm:$0xff]  ;;  %v1610_v11 = vld [vmem:[%s1974_s3 + $0x8] sm:$0xff]  ;;  %v34_v12 = vld [vmem:[%s1973_s0 + $0x18] sm:$0xff] }
   0x5   :  { %1326 = vmatpush3.msra.mxu1 %v41_v1  ;;  %1368 = vmatpush3.msra.mxu0 %v1593_v7  ;;  %v35_v13 = vld [vmem:[%s1973_s0 + $0x20] sm:$0xff]  ;;  %v36_v15 = vld [vmem:[%s1973_s0 + $0x28] sm:$0xff]  ;;  %v37_v16 = vld [vmem:[%s1973_s0 + $0x30] sm:$0xff] }
   0x6   :  { %1327 = vmatprep.subr.mxu1 %v40_v4  ;;  %270 = vrot.lane.b32.xlu0 %v1220_v8, %s1517_s2  ;;  %v1628_v14 = vld [vmem:[%s1974_s3] sm:$0xff]  ;;  %v38_v17 = vld [vmem:[%s1973_s0 + $0x38] sm:$0xff] }
   0x7   :  { %1328 = vmatpush3.msra.mxu1 %v40_v4  ;;  %1369 = vmatprep.subr.mxu0 %v1515_v2  ;;  %v1210_v18 = vld [vmem:[%s1976_s4] ss:$0 sm:$0xff]  ;;  %s1518_s4 = smov 96  }
   0x8   :  { %1329 = vmatprep.subr.mxu1 %v39_v6  ;;  %1370 = vmatpush3.msra.mxu0 %v1610_v11 }
   0x9   :  { %1330 = vmatpush3.msra.mxu1 %v39_v6  ;;  %1371 = vmatprep.subr.mxu0 %v1515_v2 }
   0xa   :  { %1332 = vmatmul.mubr.msk.f32.vlgmr.msra.gmra.mxu1 %vm55_vm0, %v32_v9  ;;  %1343 = vmatprep.subr.mxu1 %v1515_v2 }
   0xb   :  { %1344 = vmatpush3.msra.mxu1 %v1584_v5  ;;  %1334 = vmatprep.mubr.msk.f32.mxu1 %vm55_vm0, %v33_v10 }
   0xc   :  { %1345 = vmatprep.subr.mxu1 %v1515_v2  ;;  %1372 = vmatpush3.msra.mxu0 %v1628_v14 }
   0xd   :  { %1346 = vmatpush3.msra.mxu1 %v1593_v7  ;;  %1387 = vmatprep.subr.mxu0 %v1515_v2 }
   0xe   :  { %1335 = vmatmul.mubr.msk.f32.gmra.mxu1 %vm55_vm0, %v34_v12  ;;  %1347 = vmatprep.subr.mxu1 %v1515_v2 }
   0xf   :  { %1337 = vmatprep.mubr.msk.f32.mxu1 %vm55_vm0, %v35_v13  ;;  %1348 = vmatpush3.msra.mxu1 %v1610_v11 }
  0x10   :  { %1349 = vmatprep.subr.mxu1 %v1515_v2 }
  0x11   :  { %1350 = vmatpush3.msra.mxu1 %v1628_v14 }
  0x12   :  { %1338 = vmatmul.mubr.msk.f32.gmra.mxu1 %vm55_vm0, %v36_v15  ;;  %1354 = vmatprep.subr.mxu1 %v1515_v2 }
  0x13   :  { %1340 = vmatprep.mubr.msk.f32.mxu1 %vm55_vm0, %v37_v16 }
  0x16   :  { %1341 = vmatmul.mubr.msk.f32.gmra.mxu1 %vm55_vm0, %v38_v17 }
  0x17   :  { %1351 = vmatprep.mubr.msk.f32.mxu1 %vm1516_vm1, %v1515_v2 }
  0x1a   :  { %1352 = vmatmul.mubr.f32.vlgmr.msra.gmra.mxu1 %v1515_v2 }
  0x1b   :  { %1355 = vmatpush3.msra.mxu1 %v1584_v5  ;;  %1362 = vmatprep.mubr.msk.f32.mxu1 %vm1516_vm1, %v1515_v2 }
  0x1c   :  { %1356 = vmatprep.subr.mxu1 %v1515_v2 }
  0x1d   :  { %1357 = vmatpush3.msra.mxu1 %v1593_v7 }
  0x1e   :  { %1358 = vmatprep.subr.mxu1 %v1515_v2 }
  0x1f   :  { %1359 = vmatpush3.msra.mxu1 %v1610_v11 }
  0x20   :  { %1360 = vmatprep.subr.mxu1 %v1515_v2 }
  0x21   :  { %1361 = vmatpush3.msra.mxu1 %v1628_v14 }
  0x22   :  { %1376 = vmatprep.subr.mxu1 %v1515_v2 }
  0x78   :  { %v1681_v33 = vpop.permute.xlu0 %270 }
  0xca   :  { %v1333_v19 = vpop.f32.mrf.mxu1 }
  0xcb   :  { %v1669_v20 = vadd.f32 %v1333_v19, %v1210_v18 }
  0xcc   :  { %v146_v21 = vpop.f32.mrf.mxu1 }
  0xcd   :  { %v147_v38 = vadd.f32 %v1210_v18, %v146_v21 }
  0xce   :  { %v1336_v22 = vpop.f32.mrf.mxu1 }
  0xcf   :  { %v1671_v23 = vadd.f32 %v1336_v22, %v1210_v18 }
  0xd0   :  { %v156_v24 = vpop.f32.mrf.mxu1 }
  0xd1   :  { %v1673_v25 = vadd.f32 %v1210_v18, %v156_v24 }
  0xd2   :  { %v1339_v26 = vpop.f32.mrf.mxu1 }
  0xd3   :  { %v1675_v27 = vadd.f32 %v1339_v26, %v1210_v18 }
  0xd4   :  { %v166_v28 = vpop.f32.mrf.mxu1 }
  0xd5   :  { %v1677_v29 = vadd.f32 %v1210_v18, %v166_v28 }
  0xd6   :  { %v1342_v30 = vpop.f32.mrf.mxu1 }
  0xd7   :  { %v1679_v31 = vadd.f32 %v1342_v30, %v1210_v18 }
  0xd8   :  { %v176_v32 = vpop.f32.mrf.mxu1 }
  0xd9   :  { %v1683_v34 = vadd.f32 %v1210_v18, %v176_v32 }
  0xda   :  { %v254_v35 = vpop.f32.mrf.mxu1 }
  0xdb   :  { %v273_v36 = vadd.f32 %v1681_v33, %v254_v35  ;;  %v258_v39 = vadd.f32 %v254_v35, %v147_v38 }
  0xdc   :  { %v1353_v37 = vpop.f32.mrf.mxu1 }
  0xdd   :  { %275 = vrot.lane.b32.xlu0 %v273_v36, %s1517_s2  ;;  %v1219_v40 = vmul.f32 -1.442695, %v258_v39 }
  0xdf   :  { %1451 = vpow2.f32 %v1219_v40 }
  0xec   :  { %v1452_v41 = vpop.eup %1451 }
  0xed   :  { %v262_v42 = vadd.f32 1.0, %v1452_v41 }
  0xef   :  { %1453 = vrcp.f32 %v262_v42 }
  0xfc   :  { %v1454_v43 = vpop.eup %1453 }
  0xfd   :  { %v285_v49 = vsub.f32 1.0, %v1454_v43  ;;  %v291_v51 = vmul.f32 0.0, %v1454_v43 }
 0x14f   :  { %v276_v44 = vpop.permute.xlu0 %275 }
 0x150   :  { %v278_v45 = vmul.f32 %v1454_v43, %v276_v44 }
 0x152   :  { %280 = vrot.lane.b32.xlu1 %v278_v45, %s1517_s2 }
 0x1c4   :  { %v281_v46 = vpop.permute.xlu1 %280 }
 0x1c5   :  { %v283_v47 = vadd.f32 %v281_v46, %v147_v38 }
 0x1c7   :  { %1455 = vtanh.f32 %v283_v47 }
 0x1d4   :  { %v1456_v48 = vpop.eup %1455 }
 0x1d5   :  { %287 = vrot.lane.b32.xlu1 %v1456_v48, %s1518_s4 }
 0x247   :  { %v288_v50 = vpop.permute.xlu1 %287 }
 0x248   :  { %v290_v52 = vmul.f32 %v288_v50, %v285_v49 }
 0x24a   :  { %v1689_v53 = vadd.f32 %v291_v51, %v290_v52 }
 0x24c   :  { %294 = vrot.lane.b32.xlu0 %v1689_v53, %s1518_s4 }
 0x2be   :  { %v295_v54 = vpop.permute.xlu0 %294 }
 0x2bf   :  { %1363 = vmatmul.mubr.msk.f32.vlgmr.msra.gmra.mxu1 %vm55_vm0, %v295_v54 }
 0x2c0   :  { %1377 = vmatpush3.msra.mxu1 %v1584_v5  ;;  %1384 = vmatprep.mubr.msk.f32.mxu1 %vm1516_vm1, %v1515_v2 }
 0x2c1   :  { %1378 = vmatprep.subr.mxu1 %v1515_v2 }
 0x2c2   :  { %1379 = vmatpush3.msra.mxu1 %v1593_v7 }
 0x2c3   :  { %1380 = vmatprep.subr.mxu1 %v1515_v2 }
 0x2c4   :  { %1381 = vmatpush3.msra.mxu1 %v1610_v11 }
 0x2c5   :  { %1382 = vmatprep.subr.mxu1 %v1515_v2 }
 0x2c6   :  { %1383 = vmatpush3.msra.mxu1 %v1628_v14 }
 0x2c7   :  { %1398 = vmatprep.subr.mxu1 %v1515_v2 }
 0x37f   :  { %v364_v55 = vpop.f32.mrf.mxu1 }
 0x380   :  { %v375_v56 = vadd.f32 %v364_v55, %v1681_v33  ;;  %v368_v58 = vadd.f32 %v364_v55, %v1669_v20 }
 0x381   :  { %v1364_v57 = vpop.f32.mrf.mxu1 }
 0x382   :  { %377 = vrot.lane.b32.xlu1 %v375_v56, %s1517_s2  ;;  %v1222_v59 = vmul.f32 -1.442695, %v368_v58 }
 0x384   :  { %1457 = vpow2.f32 %v1222_v59 }
 0x391   :  { %v1458_v60 = vpop.eup %1457 }
 0x392   :  { %v372_v61 = vadd.f32 1.0, %v1458_v60 }
 0x394   :  { %1459 = vrcp.f32 %v372_v61 }
 0x3a1   :  { %v1460_v62 = vpop.eup %1459 }
 0x3a2   :  { %v387_v6 = vsub.f32 1.0, %v1460_v62  ;;  %v393_v9 = vmul.f32 %v1460_v62, %v1689_v53 }
 0x3f4   :  { %v378_v63 = vpop.permute.xlu1 %377 }
 0x3f5   :  { %v380_v0 = vmul.f32 %v1460_v62, %v378_v63 }
 0x3f7   :  { %382 = vrot.lane.b32.xlu0 %v380_v0, %s1517_s2 }
 0x469   :  { %v383_v1 = vpop.permute.xlu0 %382 }
 0x46a   :  { %v385_v3 = vadd.f32 %v383_v1, %v1669_v20 }
 0x46c   :  { %1461 = vtanh.f32 %v385_v3 }
 0x479   :  { %v1462_v4 = vpop.eup %1461 }
 0x47a   :  { %389 = vrot.lane.b32.xlu1 %v1462_v4, %s1518_s4 }
 0x4ec   :  { %v390_v8 = vpop.permute.xlu1 %389 }
 0x4ed   :  { %v392_v10 = vmul.f32 %v390_v8, %v387_v6 }
 0x4ef   :  { %v1711_v12 = vadd.f32 %v393_v9, %v392_v10 }
 0x4f1   :  { %396 = vrot.lane.b32.xlu0 %v1711_v12, %s1518_s4 }
 0x563   :  { %v397_v13 = vpop.permute.xlu0 %396 }
 0x564   :  { %1374 = vmatmul.mubr.msk.f32.vlgmr.msra.gmra.mxu0 %vm55_vm0, %v397_v13 }
 0x565   :  { %1388 = vmatpush3.msra.mxu0 %v1584_v5  ;;  %1395 = vmatprep.mubr.msk.f32.mxu0 %vm1516_vm1, %v1515_v2 }
 0x566   :  { %1389 = vmatprep.subr.mxu0 %v1515_v2 }
 0x567   :  { %1390 = vmatpush3.msra.mxu0 %v1593_v7 }
 0x568   :  { %1391 = vmatprep.subr.mxu0 %v1515_v2 }
 0x569   :  { %1392 = vmatpush3.msra.mxu0 %v1610_v11 }
 0x56a   :  { %1393 = vmatprep.subr.mxu0 %v1515_v2 }
 0x56b   :  { %1394 = vmatpush3.msra.mxu0 %v1628_v14 }
 0x56c   :  { %1409 = vmatprep.subr.mxu0 %v1515_v2 }
 0x624   :  { %v466_v15 = vpop.f32.mrf.mxu0 }
 0x625   :  { %v477_v16 = vadd.f32 %v466_v15, %v1681_v33  ;;  %v470_v18 = vadd.f32 %v466_v15, %v1673_v25 }
 0x626   :  { %v1375_v17 = vpop.f32.mrf.mxu0 }
 0x627   :  { %479 = vrot.lane.b32.xlu1 %v477_v16, %s1517_s2  ;;  %v1224_v19 = vmul.f32 -1.442695, %v470_v18 }
 0x629   :  { %1463 = vpow2.f32 %v1224_v19 }
 0x636   :  { %v1464_v20 = vpop.eup %1463 }
 0x637   :  { %v474_v21 = vadd.f32 1.0, %v1464_v20 }
 0x639   :  { %1465 = vrcp.f32 %v474_v21 }
 0x646   :  { %v1466_v22 = vpop.eup %1465 }
 0x647   :  { %v489_v35 = vsub.f32 1.0, %v1466_v22  ;;  %v495_v37 = vmul.f32 %v1466_v22, %v1711_v12 }
 0x699   :  { %v480_v24 = vpop.permute.xlu1 %479 }
 0x69a   :  { %v482_v26 = vmul.f32 %v1466_v22, %v480_v24 }
 0x69c   :  { %484 = vrot.lane.b32.xlu0 %v482_v26, %s1517_s2 }
 0x70e   :  { %v485_v28 = vpop.permute.xlu0 %484 }
 0x70f   :  { %v487_v30 = vadd.f32 %v485_v28, %v1673_v25 }
 0x711   :  { %1467 = vtanh.f32 %v487_v30 }
 0x71e   :  { %v1468_v32 = vpop.eup %1467 }
 0x71f   :  { %491 = vrot.lane.b32.xlu1 %v1468_v32, %s1518_s4 }
 0x791   :  { %v492_v36 = vpop.permute.xlu1 %491 }
 0x792   :  { %v494_v38 = vmul.f32 %v492_v36, %v489_v35 }
 0x794   :  { %v1733_v39 = vadd.f32 %v495_v37, %v494_v38 }
 0x796   :  { %498 = vrot.lane.b32.xlu0 %v1733_v39, %s1518_s4 }
 0x808   :  { %v499_v40 = vpop.permute.xlu0 %498 }
 0x809   :  { %1385 = vmatmul.mubr.msk.f32.vlgmr.msra.gmra.mxu1 %vm55_vm0, %v499_v40 }
 0x80a   :  { %1399 = vmatpush3.msra.mxu1 %v1584_v5  ;;  %1406 = vmatprep.mubr.msk.f32.mxu1 %vm1516_vm1, %v1515_v2 }
 0x80b   :  { %1400 = vmatprep.subr.mxu1 %v1515_v2 }
 0x80c   :  { %1401 = vmatpush3.msra.mxu1 %v1593_v7 }
 0x80d   :  { %1402 = vmatprep.subr.mxu1 %v1515_v2 }
 0x80e   :  { %1403 = vmatpush3.msra.mxu1 %v1610_v11 }
 0x80f   :  { %1404 = vmatprep.subr.mxu1 %v1515_v2 }
 0x810   :  { %1405 = vmatpush3.msra.mxu1 %v1628_v14 }
 0x811   :  { %1420 = vmatprep.subr.mxu1 %v1515_v2 }
 0x8c9   :  { %v568_v25 = vpop.f32.mrf.mxu1 }
 0x8ca   :  { %v579_v41 = vadd.f32 %v568_v25, %v1681_v33  ;;  %v572_v43 = vadd.f32 %v568_v25, %v1671_v23 }
 0x8cb   :  { %v1386_v42 = vpop.f32.mrf.mxu1 }
 0x8cc   :  { %581 = vrot.lane.b32.xlu1 %v579_v41, %s1517_s2  ;;  %v1226_v44 = vmul.f32 -1.442695, %v572_v43 }
 0x8ce   :  { %1469 = vpow2.f32 %v1226_v44 }
 0x8db   :  { %v1470_v45 = vpop.eup %1469 }
 0x8dc   :  { %v576_v46 = vadd.f32 1.0, %v1470_v45 }
 0x8de   :  { %1471 = vrcp.f32 %v576_v46 }
 0x8eb   :  { %v1472_v47 = vpop.eup %1471 }
 0x8ec   :  { %v591_v54 = vsub.f32 1.0, %v1472_v47  ;;  %v597_v56 = vmul.f32 %v1472_v47, %v1733_v39 }
 0x93e   :  { %v582_v48 = vpop.permute.xlu1 %581 }
 0x93f   :  { %v584_v49 = vmul.f32 %v1472_v47, %v582_v48 }
 0x941   :  { %586 = vrot.lane.b32.xlu0 %v584_v49, %s1517_s2 }
 0x9b3   :  { %v587_v50 = vpop.permute.xlu0 %586 }
 0x9b4   :  { %v589_v51 = vadd.f32 %v587_v50, %v1671_v23 }
 0x9b6   :  { %1473 = vtanh.f32 %v589_v51 }
 0x9c3   :  { %v1474_v52 = vpop.eup %1473 }
 0x9c4   :  { %593 = vrot.lane.b32.xlu1 %v1474_v52, %s1518_s4 }
 0xa36   :  { %v594_v55 = vpop.permute.xlu1 %593 }
 0xa37   :  { %v596_v57 = vmul.f32 %v594_v55, %v591_v54 }
 0xa39   :  { %v1755_v58 = vadd.f32 %v597_v56, %v596_v57 }
 0xa3b   :  { %600 = vrot.lane.b32.xlu0 %v1755_v58, %s1518_s4 }
 0xaad   :  { %v601_v59 = vpop.permute.xlu0 %600 }
 0xaae   :  { %1396 = vmatmul.mubr.msk.f32.vlgmr.msra.gmra.mxu0 %vm55_vm0, %v601_v59 }
 0xaaf   :  { %1410 = vmatpush3.msra.mxu0 %v1584_v5  ;;  %1417 = vmatprep.mubr.msk.f32.mxu0 %vm1516_vm1, %v1515_v2 }
 0xab0   :  { %1411 = vmatprep.subr.mxu0 %v1515_v2 }
 0xab1   :  { %1412 = vmatpush3.msra.mxu0 %v1593_v7 }
 0xab2   :  { %1413 = vmatprep.subr.mxu0 %v1515_v2 }
 0xab3   :  { %1414 = vmatpush3.msra.mxu0 %v1610_v11 }
 0xab4   :  { %1415 = vmatprep.subr.mxu0 %v1515_v2 }
 0xab5   :  { %1416 = vmatpush3.msra.mxu0 %v1628_v14 }
 0xb6e   :  { %v670_v23 = vpop.f32.mrf.mxu0 }
 0xb6f   :  { %v681_v60 = vadd.f32 %v670_v23, %v1681_v33  ;;  %v674_v62 = vadd.f32 %v670_v23, %v1677_v29 }
 0xb70   :  { %v1397_v61 = vpop.f32.mrf.mxu0 }
 0xb71   :  { %683 = vrot.lane.b32.xlu1 %v681_v60, %s1517_s2  ;;  %v1228_v63 = vmul.f32 -1.442695, %v674_v62  ;;  %v1007_v61 = vld [vmem:[%s1977_s1] sm:$0xff] }
 0xb73   :  { %1475 = vpow2.f32 %v1228_v63 }
 0xb80   :  { %v1476_v0 = vpop.eup %1475 }
 0xb81   :  { %v678_v1 = vadd.f32 1.0, %v1476_v0 }
 0xb83   :  { %1477 = vrcp.f32 %v678_v1 }
 0xb90   :  { %v1478_v3 = vpop.eup %1477 }
 0xb91   :  { %v693_v13 = vsub.f32 1.0, %v1478_v3  ;;  %v699_v16 = vmul.f32 %v1478_v3, %v1755_v58 }
 0xbe3   :  { %v684_v4 = vpop.permute.xlu1 %683 }
 0xbe4   :  { %v686_v6 = vmul.f32 %v1478_v3, %v684_v4 }
 0xbe6   :  { %688 = vrot.lane.b32.xlu0 %v686_v6, %s1517_s2  ;;  %v1011_v6 = vld [vmem:[%s1977_s1 + $0x20] sm:$0xff] }
 0xc58   :  { %v689_v8 = vpop.permute.xlu0 %688 }
 0xc59   :  { %v691_v9 = vadd.f32 %v689_v8, %v1677_v29  ;;  %v1013_v8 = vld [vmem:[%s1977_s1 + $0x30] sm:$0xff] }
 0xc5b   :  { %1479 = vtanh.f32 %v691_v9  ;;  %v1014_v9 = vld [vmem:[%s1977_s1 + $0x38] sm:$0xff] }
 0xc68   :  { %v1480_v10 = vpop.eup %1479 }
 0xc69   :  { %695 = vrot.lane.b32.xlu1 %v1480_v10, %s1518_s4  ;;  %v1012_v10 = vld [vmem:[%s1977_s1 + $0x28] sm:$0xff] }
 0xcdb   :  { %v696_v15 = vpop.permute.xlu1 %695 }
 0xcdc   :  { %v698_v17 = vmul.f32 %v696_v15, %v693_v13 }
 0xcde   :  { %v1776_v18 = vadd.f32 %v699_v16, %v698_v17 }
 0xce0   :  { %702 = vrot.lane.b32.xlu0 %v1776_v18, %s1518_s4 }
 0xd52   :  { %v703_v19 = vpop.permute.xlu0 %702 }
 0xd53   :  { %1407 = vmatmul.mubr.msk.f32.vlgmr.msra.gmra.mxu1 %vm55_vm0, %v703_v19 }
 0xd54   :  { %1421 = vmatpush3.msra.mxu1 %v1584_v5  ;;  %1428 = vmatprep.mubr.msk.f32.mxu1 %vm1516_vm1, %v1515_v2 }
 0xd55   :  { %1422 = vmatprep.subr.mxu1 %v1515_v2 }
 0xd56   :  { %1423 = vmatpush3.msra.mxu1 %v1593_v7 }
 0xd57   :  { %1424 = vmatprep.subr.mxu1 %v1515_v2 }
 0xd58   :  { %1425 = vmatpush3.msra.mxu1 %v1610_v11 }
 0xd59   :  { %1426 = vmatprep.subr.mxu1 %v1515_v2 }
 0xd5a   :  { %1427 = vmatpush3.msra.mxu1 %v1628_v14 }
 0xe13   :  { %v772_v29 = vpop.f32.mrf.mxu1 }
 0xe14   :  { %v783_v20 = vadd.f32 %v772_v29, %v1681_v33  ;;  %v776_v5 = vadd.f32 %v772_v29, %v1675_v27 }
 0xe15   :  { %v1408_v21 = vpop.f32.mrf.mxu1 }
 0xe16   :  { %785 = vrot.lane.b32.xlu1 %v783_v20, %s1517_s2  ;;  %v1230_v22 = vmul.f32 -1.442695, %v776_v5  ;;  %v1009_v21 = vld [vmem:[%s1977_s1 + $0x10] sm:$0xff] }
 0xe18   :  { %1481 = vpow2.f32 %v1230_v22 }
 0xe25   :  { %v1482_v24 = vpop.eup %1481 }
 0xe26   :  { %v780_v7 = vadd.f32 1.0, %v1482_v24  ;;  %v1126_v24 = vld [vmem:[%s1978_s6 + $0xf8] sm:$0xff] }
 0xe27   :  { %1288 = vmatprep.subr.mxu0 %v1126_v24 }
 0xe28   :  { %1483 = vrcp.f32 %v780_v7  ;;  %v1110_v7 = vld [vmem:[%s1978_s6 + $0x78] sm:$0xff] }
 0xe35   :  { %v1484_v26 = vpop.eup %1483 }
 0xe36   :  { %v795_v32 = vsub.f32 1.0, %v1484_v26  ;;  %v801_v36 = vmul.f32 %v1484_v26, %v1776_v18 }
 0xe88   :  { %v786_v28 = vpop.permute.xlu1 %785 }
 0xe89   :  { %v788_v11 = vmul.f32 %v1484_v26, %v786_v28  ;;  %v1125_v26 = vld [vmem:[%s1978_s6 + $0xf0] sm:$0xff] }
 0xe8a   :  { %v1109_v28 = vld [vmem:[%s1978_s6 + $0x70] sm:$0xff] }
 0xe8b   :  { %790 = vrot.lane.b32.xlu0 %v788_v11, %s1517_s2  ;;  %v1124_v11 = vld [vmem:[%s1978_s6 + $0xe8] sm:$0xff] }
 0xefd   :  { %v791_v2 = vpop.permute.xlu0 %790 }
 0xefe   :  { %v793_v14 = vadd.f32 %v791_v2, %v1675_v27  ;;  %v1108_v2 = vld [vmem:[%s1978_s6 + $0x68] sm:$0xff] }
 0xf00   :  { %1485 = vtanh.f32 %v793_v14  ;;  %v1123_v14 = vld [vmem:[%s1978_s6 + $0xe0] sm:$0xff] }
 0xf0d   :  { %v1486_v30 = vpop.eup %1485 }
 0xf0e   :  { %797 = vrot.lane.b32.xlu1 %v1486_v30, %s1518_s4  ;;  %v1107_v30 = vld [vmem:[%s1978_s6 + $0x60] sm:$0xff] }
 0xf80   :  { %v798_v35 = vpop.permute.xlu1 %797 }
 0xf81   :  { %v800_v37 = vmul.f32 %v798_v35, %v795_v32  ;;  %v1122_v32 = vld [vmem:[%s1978_s6 + $0xd8] sm:$0xff] }
 0xf82   :  { %v1106_v35 = vld [vmem:[%s1978_s6 + $0x58] sm:$0xff] }
 0xf83   :  { %v1797_v38 = vadd.f32 %v801_v36, %v800_v37  ;;  %v1121_v36 = vld [vmem:[%s1978_s6 + $0xd0] sm:$0xff] }
 0xf84   :  { %v1105_v37 = vld [vmem:[%s1978_s6 + $0x50] sm:$0xff] }
 0xf85   :  { %804 = vrot.lane.b32.xlu0 %v1797_v38, %s1518_s4 }
 0xff7   :  { %v805_v40 = vpop.permute.xlu0 %804 }
 0xff8   :  { %1418 = vmatmul.mubr.msk.f32.vlgmr.msra.gmra.mxu0 %vm55_vm0, %v805_v40  ;;  %v1120_v40 = vld [vmem:[%s1978_s6 + $0xc8] sm:$0xff] }
 0xff9   :  { %1289 = vmatpush3.msra.mxu0 %v1110_v7 }
 0xffa   :  { %1290 = vmatprep.subr.mxu0 %v1125_v26 }
 0xffb   :  { %1291 = vmatpush3.msra.mxu0 %v1109_v28 }
 0xffc   :  { %1292 = vmatprep.subr.mxu0 %v1124_v11 }
 0xffd   :  { %1293 = vmatpush3.msra.mxu0 %v1108_v2 }
 0xffe   :  { %1294 = vmatprep.subr.mxu0 %v1123_v14 }
 0xfff   :  { %1295 = vmatpush3.msra.mxu0 %v1107_v30 }
0x1000   :  { %1296 = vmatprep.subr.mxu0 %v1122_v32  ;;  %v13_v32 = vstv %s1979_s7 }
0x1001   :  { %1297 = vmatpush3.msra.mxu0 %v1106_v35  ;;  %14 = vst [vmem:[#allocation2] sm:$0x1] %v13_v32 }
0x1002   :  { %1298 = vmatprep.subr.mxu0 %v1121_v36 }
0x1003   :  { %1299 = vmatpush3.msra.mxu0 %v1105_v37 }
0x1004   :  { %1300 = vmatprep.subr.mxu0 %v1120_v40 }
0x1008   :  { %v1235_v36 = vld [vmem:[#allocation2] ss:$0 sm:$0xff] }
0x10b8   :  { %v874_v25 = vpop.f32.mrf.mxu0 }
0x10b9   :  { %v885_v27 = vadd.f32 %v874_v25, %v1681_v33  ;;  %v878_v42 = vadd.f32 %v874_v25, %v1683_v34  ;;  %v1104_v25 = vld [vmem:[%s1978_s6 + $0x48] sm:$0xff] }
0x10ba   :  { %v1419_v41 = vpop.f32.mrf.mxu0  ;;  %1301 = vmatpush3.msra.mxu0 %v1104_v25 }
0x10bb   :  { %887 = vrot.lane.b32.xlu1 %v885_v27, %s1517_s2  ;;  %v1232_v43 = vmul.f32 -1.442695, %v878_v42  ;;  %v1119_v27 = vld [vmem:[%s1978_s6 + $0xc0] sm:$0xff]  ;;  %v1118_v42 = vld [vmem:[%s1978_s6 + $0xb8] sm:$0xff] }
0x10bc   :  { %v1103_v41 = vld [vmem:[%s1978_s6 + $0x40] sm:$0xff]  ;;  %1302 = vmatprep.subr.mxu0 %v1119_v27 }
0x10bd   :  { %1487 = vpow2.f32 %v1232_v43  ;;  %v1102_v43 = vld [vmem:[%s1978_s6 + $0x38] sm:$0xff]  ;;  %1303 = vmatpush3.msra.mxu0 %v1103_v41 }
0x10be   :  { %1304 = vmatprep.subr.mxu0 %v1118_v42 }
0x10bf   :  { %1305 = vmatpush3.msra.mxu0 %v1102_v43 }
0x10ca   :  { %v1488_v44 = vpop.eup %1487 }
0x10cb   :  { %v882_v45 = vadd.f32 1.0, %v1488_v44  ;;  %v1117_v44 = vld [vmem:[%s1978_s6 + $0xb0] sm:$0xff] }
0x10cc   :  { %1306 = vmatprep.subr.mxu0 %v1117_v44 }
0x10cd   :  { %1489 = vrcp.f32 %v882_v45  ;;  %v1101_v45 = vld [vmem:[%s1978_s6 + $0x30] sm:$0xff] }
0x10ce   :  { %1307 = vmatpush3.msra.mxu0 %v1101_v45 }
0x10da   :  { %v1490_v46 = vpop.eup %1489 }
0x10db   :  { %v897_v52 = vsub.f32 1.0, %v1490_v46  ;;  %v903_v55 = vmul.f32 %v1490_v46, %v1797_v38 }
0x112d   :  { %v888_v47 = vpop.permute.xlu1 %887 }
0x112e   :  { %v890_v48 = vmul.f32 %v1490_v46, %v888_v47  ;;  %v1116_v46 = vld [vmem:[%s1978_s6 + $0xa8] sm:$0xff] }
0x112f   :  { %v1100_v47 = vld [vmem:[%s1978_s6 + $0x28] sm:$0xff]  ;;  %1308 = vmatprep.subr.mxu0 %v1116_v46 }
0x1130   :  { %892 = vrot.lane.b32.xlu0 %v890_v48, %s1517_s2  ;;  %v1115_v48 = vld [vmem:[%s1978_s6 + $0xa0] sm:$0xff]  ;;  %1309 = vmatpush3.msra.mxu0 %v1100_v47 }
0x1131   :  { %1310 = vmatprep.subr.mxu0 %v1115_v48 }
0x11a2   :  { %v893_v49 = vpop.permute.xlu0 %892 }
0x11a3   :  { %v895_v50 = vadd.f32 %v893_v49, %v1683_v34  ;;  %v1099_v49 = vld [vmem:[%s1978_s6 + $0x20] sm:$0xff] }
0x11a4   :  { %1311 = vmatpush3.msra.mxu0 %v1099_v49 }
0x11a5   :  { %1491 = vtanh.f32 %v895_v50 }
0x11b2   :  { %v1492_v51 = vpop.eup %1491 }
0x11b3   :  { %899 = vrot.lane.b32.xlu1 %v1492_v51, %s1518_s4 }
0x1225   :  { %v900_v54 = vpop.permute.xlu1 %899 }
0x1226   :  { %v902_v56 = vmul.f32 %v900_v54, %v897_v52 }
0x1228   :  { %v1809_v57 = vadd.f32 %v903_v55, %v902_v56 }
0x122a   :  { %906 = vrot.lane.b32.xlu0 %v1809_v57, %s1518_s4 }
0x129c   :  { %v907_v59 = vpop.permute.xlu0 %906 }
0x129d   :  { %1429 = vmatmul.mubr.msk.f32.vlgmr.msra.gmra.mxu1 %vm55_vm0, %v907_v59 }
0x135d   :  { %v976_v23 = vpop.f32.mrf.mxu1 }
0x135e   :  { %v987_v34 = vadd.f32 %v976_v23, %v1681_v33  ;;  %v980_v62 = vadd.f32 %v976_v23, %v1679_v31 }
0x135f   :  { %v1430_v60 = vpop.f32.mrf.mxu1 }
0x1360   :  { %989 = vrot.lane.b32.xlu1 %v987_v34, %s1517_s2  ;;  %v1234_v63 = vmul.f32 -1.442695, %v980_v62 }
0x1362   :  { %1493 = vpow2.f32 %v1234_v63 }
0x1364   :  { %1016 = vrot.lane.b32.xlu1 %v1007_v61, %s1519_s18 }
0x136f   :  { %v1494_v0 = vpop.eup %1493 }
0x1370   :  { %v984_v1 = vadd.f32 1.0, %v1494_v0  ;;  %v1114_v0 = vld [vmem:[%s1978_s6 + $0x98] sm:$0xff] }
0x1371   :  { %1312 = vmatprep.subr.mxu0 %v1114_v0 }
0x1372   :  { %1495 = vrcp.f32 %v984_v1  ;;  %v1112_v1 = vld [vmem:[%s1978_s6 + $0x88] sm:$0xff] }
0x137f   :  { %v1821_v3 = vpop.eup %1495 }
0x1380   :  { %v999_v51 = vsub.f32 1.0, %v1821_v3  ;;  %v1005_v54 = vmul.f32 %v1821_v3, %v1809_v57 }
0x13d2   :  { %v990_v33 = vpop.permute.xlu1 %989 }
0x13d3   :  { %v992_v4 = vmul.f32 %v1821_v3, %v990_v33  ;;  %v1096_v3 = vld [vmem:[%s1978_s6 + $0x8] sm:$0xff]  ;;  %v1111_v33 = vld [vmem:[%s1978_s6 + $0x80] sm:$0xff] }
0x13d5   :  { %994 = vrot.lane.b32.xlu0 %v992_v4, %s1517_s2  ;;  %v1095_v4 = vld [vmem:[%s1978_s6] sm:$0xff] }
0x13d6   :  { %v1017_v13 = vpop.permute.xlu1 %1016 }
0x13d7   :  { %v1019_v17 = vadd.f32 %v1017_v13, %v1689_v53  ;;  %v1010_v53 = vld [vmem:[%s1977_s1 + $0x18] sm:$0xff] }
0x13d9   :  { %1040 = vrot.lane.b32.xlu0 %v1011_v6, %s1519_s18 }
0x13dd   :  { %1052 = vrot.lane.b32.xlu0 %v1013_v8, %s1519_s18 }
0x13e1   :  { %1058 = vrot.lane.b32.xlu0 %v1014_v9, %s1519_s18 }
0x13e5   :  { %1046 = vrot.lane.b32.xlu0 %v1012_v10, %s1519_s18 }
0x1447   :  { %v995_v15 = vpop.permute.xlu0 %994 }
0x1448   :  { %v997_v16 = vadd.f32 %v995_v15, %v1679_v31 }
0x144a   :  { %1497 = vtanh.f32 %v997_v16 }
0x144b   :  { %v1041_v19 = vpop.permute.xlu0 %1040  ;;  %1499 = vtanh.f32 %v1019_v17 }
0x144c   :  { %v1043_v29 = vadd.f32 %v1041_v19, %v1776_v18  ;;  %v1008_v18 = vld [vmem:[%s1977_s1 + $0x8] sm:$0xff] }
0x144e   :  { %1501 = vtanh.f32 %v1043_v29 }
0x144f   :  { %v1053_v50 = vpop.permute.xlu0 %1052 }
0x1450   :  { %v1055_v56 = vadd.f32 %v1053_v50, %v1809_v57  ;;  %v1098_v57 = vld [vmem:[%s1978_s6 + $0x18] sm:$0xff] }
0x1451   :  { %1313 = vmatpush3.msra.mxu0 %v1098_v57 }
0x1452   :  { %1503 = vtanh.f32 %v1055_v56 }
0x1453   :  { %v1059_v34 = vpop.permute.xlu0 %1058 }
0x1457   :  { %v1498_v20 = vpop.eup %1497  ;;  %v1047_v17 = vpop.permute.xlu0 %1046 }
0x1458   :  { %1001 = vrot.lane.b32.xlu1 %v1498_v20, %s1518_s4  ;;  %v1500_v5 = vpop.eup %1499  ;;  %v1049_v29 = vadd.f32 %v1047_v17, %v1797_v38 }
0x145b   :  { %v1502_v22 = vpop.eup %1501 }
0x145c   :  { %1028 = vrot.lane.b32.xlu1 %v1009_v21, %s1519_s18  ;;  %v1436_v31 = vpack.i.bf16 %v1500_v5, %v1502_v22 }
0x145e   :  { %1437 = vrot.lane.b32.xlu0 %v1436_v31, %s1518_s4 }
0x145f   :  { %v1504_v6 = vpop.eup %1503 }
0x1460   :  { %1034 = vrot.lane.b32.xlu1 %v1010_v53, %s1519_s18 }
0x1464   :  { %1022 = vrot.lane.b32.xlu1 %v1008_v18, %s1519_s18 }
0x14ca   :  { %v1002_v52 = vpop.permute.xlu1 %1001 }
0x14cb   :  { %v1004_v55 = vmul.f32 %v1002_v52, %v999_v51 }
0x14cd   :  { %v1006_v59 = vadd.f32 %v1005_v54, %v1004_v55 }
0x14ce   :  { %v1029_v23 = vpop.permute.xlu1 %1028 }
0x14cf   :  { %v1031_v60 = vadd.f32 %v1029_v23, %v1733_v39  ;;  %v1061_v61 = vadd.f32 %v1059_v34, %v1006_v59  ;;  %v1113_v39 = vld [vmem:[%s1978_s6 + $0x90] sm:$0xff] }
0x14d0   :  { %1314 = vmatprep.subr.mxu0 %v1113_v39  ;;  %v1438_v20 = vpop.permute.xlu0 %1437 }
0x14d1   :  { %1505 = vtanh.f32 %v1031_v60  ;;  %v1439_v21 = vunpack.i.l.bf16 %v1438_v20  ;;  %v1440_v18 = vunpack.i.h.bf16 %v1438_v20 }
0x14d2   :  { %v1035_v62 = vpop.permute.xlu1 %1034  ;;  %1507 = vtanh.f32 %v1061_v61 }
0x14d3   :  { %v1037_v63 = vadd.f32 %v1035_v62, %v1755_v58  ;;  %v1097_v58 = vld [vmem:[%s1978_s6 + $0x10] sm:$0xff] }
0x14d4   :  { %1315 = vmatpush3.msra.mxu0 %v1097_v58 }
0x14d5   :  { %1509 = vtanh.f32 %v1037_v63  ;;  %1316 = vmatprep.subr.mxu0 %v1112_v1 }
0x14d6   :  { %1317 = vmatpush3.msra.mxu0 %v1096_v3  ;;  %v1023_v16 = vpop.permute.xlu1 %1022 }
0x14d7   :  { %1318 = vmatprep.subr.mxu0 %v1111_v33  ;;  %v1025_v19 = vadd.f32 %v1023_v16, %v1711_v12 }
0x14d8   :  { %1319 = vmatpush3.msra.mxu0 %v1095_v4 }
0x14d9   :  { %1511 = vtanh.f32 %v1025_v19 }
0x14da   :  { %1513 = vtanh.f32 %v1049_v29 }
0x14de   :  { %v1506_v8 = vpop.eup %1505 }
0x14df   :  { %v1441_v9 = vpack.i.bf16 %v1506_v8, %v1504_v6  ;;  %v1508_v10 = vpop.eup %1507 }
0x14e1   :  { %1442 = vrot.lane.b32.xlu1 %v1441_v9, %s1519_s18 }
0x14e2   :  { %v1510_v13 = vpop.eup %1509 }
0x14e3   :  { %v1446_v15 = vpack.i.bf16 %v1510_v13, %v1508_v10 }
0x14e5   :  { %1447 = vrot.lane.b32.xlu0 %v1446_v15, %s1517_s2 }
0x14e6   :  { %v1512_v22 = vpop.eup %1511 }
0x14e7   :  { %v1514_v24 = vpop.eup %1513  ;;  %v1087_v26 = vsel %vm55_vm0, %v1440_v18, %v1512_v22 }
0x14e8   :  { %v1092_v12 = vsel %vm55_vm0, %v1439_v21, %v1514_v24 }
0x1553   :  { %v1443_v5 = vpop.permute.xlu1 %1442 }
0x1554   :  { %v1445_v31 = vunpack.i.h.bf16 %v1443_v5  ;;  %v1444_v53 = vunpack.i.l.bf16 %v1443_v5 }
0x1556   :  { %v1089_v38 = vsel %vm1088_vm2, %v1087_v26, %v1445_v31  ;;  %v1093_v2 = vsel %vm1088_vm2, %v1092_v12, %v1444_v53 }
0x1557   :  { %v1448_v7 = vpop.permute.xlu0 %1447 }
0x1558   :  { %v1450_v28 = vunpack.i.h.bf16 %v1448_v7  ;;  %v1449_v11 = vunpack.i.l.bf16 %v1448_v7 }
0x155a   :  { %v1094_v14 = vsel %vm1090_vm3, %v1093_v2, %v1449_v11  ;;  %v1091_v30 = vsel %vm1090_vm3, %v1089_v38, %v1450_v28 }
0x155b   :  { %1198 = vmatprep.mubr.f32.mxu0 %v1094_v14 }
0x155c   :  { %1199 = vmatmul.mubr.f32.vlgmr.msra.gmra.mxu0 %v1091_v30 }
0x161c   :  { %v1320_v35 = vpop.f32.mrf.mxu0 }
0x161e   :  { %v1321_v37 = vpop.f32.mrf.mxu0 }
0x161f   :  { %v1322_v40 = vadd.f32 %v1321_v37, %v1320_v35 }
0x1621   :  { %v1201_v25 = vadd.f32 %v1322_v40, %v1235_v36 }
0x1623   :  { %1205 = vst.msk [vmem:[%s1980_s8] sm:$0xff] %vm1204_vm4, %v1201_v25 }

</bundles_post_ra>
